<compile_context>
chip_gen: v5e
topology: v5e:2x2
jax: 0.10.0
libtpu: 0.0.40
codegen_flags: <defaults>
</compile_context>

<pallas_src>
import functools

import jax
import jax.numpy as jnp
from jax import lax
from jax.experimental import pallas as pl
from jax.experimental.pallas import tpu as pltpu

INPUT_SIZE = 10          # len(features)
HIDDEN_LAYER_SIZE = 150
OUTPUT_SIZE = 1
LANE = 128
SUBLANE = 8
MAX_T_CHUNK = 32         # time steps per grid iteration (bounded unroll inside)
MAX_B_BLOCK = 128        # batch rows per (parallel) grid block


def _round_up(x, m):
    return ((x + m - 1) // m) * m


def _reorder_and_pad_gates(mat, H, Hp, axis=0):
    """Torch gate order [i,f,g,o] -> [i,f,o,g]; pad each gate block H -> Hp."""
    blocks = [lax.slice_in_dim(mat, k * H, (k + 1) * H, axis=axis)
              for k in (0, 1, 3, 2)]          # i, f, o, g
    pad = [(0, 0)] * mat.ndim
    pad[axis] = (0, Hp - H)
    return jnp.concatenate([jnp.pad(b, pad) for b in blocks], axis=axis)


@functools.partial(jax.jit, static_argnames=("recurrent_dtype",))
def lstm_model_forward(x_btf, w_ih, w_hh, b_ih, b_hh, w_lin, b_lin,
                       recurrent_dtype=jnp.bfloat16):
    """x_btf: (B, T, F) float32, batch_first like the PyTorch module."""
    B, T, F = x_btf.shape
    H = w_hh.shape[1]                          # w_hh: (4H, H)
    Hp = _round_up(H, LANE)                    # 150 -> 256 (lane-aligned gates)
    G = 4 * Hp
    Fp = _round_up(F, SUBLANE)                 # 10 -> 16
    Bp = _round_up(B, SUBLANE)                 # batch padded to sublane
    Bb = min(Bp, MAX_B_BLOCK)                  # batch rows per grid block
    Bp = _round_up(Bp, Bb)
    nb = Bp // Bb
    chunk = T if T <= MAX_T_CHUNK else MAX_T_CHUNK
    T_pad = _round_up(T, chunk)
    nt = T_pad // chunk
    unroll_n = chunk if chunk <= 8 else 8

    # ---- pack / pad weights (gate order [i, f, o, g], each block Hp wide) ----
    wih = _reorder_and_pad_gates(w_ih, H, Hp, axis=0).T                 # (F, 4Hp)
    wih_p = jnp.zeros((Fp, G), jnp.float32).at[:F, :].set(wih)          # (Fp, 4Hp)
    whh = _reorder_and_pad_gates(w_hh, H, Hp, axis=0).T                 # (H, 4Hp)
    whh_p = jnp.zeros((Hp, G), jnp.float32).at[:H, :].set(whh)          # (Hp, 4Hp)
    whh_p = whh_p.astype(recurrent_dtype)                               # bf16 on MXU
    bias_p = _reorder_and_pad_gates(b_ih + b_hh, H, Hp, axis=0).reshape(1, G)
    wl_row = jnp.zeros((1, Hp), jnp.float32).at[:, :H].set(w_lin)       # (1, Hp)
    bl = b_lin.reshape(1, OUTPUT_SIZE).astype(jnp.float32)              # (1, 1)

    # ---- input: (B,T,F) -> time-major, zero-padded (T_pad, Bp, Fp) ----
    xt = jnp.transpose(x_btf, (1, 0, 2)).astype(jnp.float32)
    x_p = jnp.zeros((T_pad, Bp, Fp), jnp.float32).at[:T, :B, :F].set(xt)

    def kernel(x_ref, wih_ref, bias_ref, whh_ref, wl_ref, bl_ref, out_ref,
               pg_ref, h_ref, c_ref):
        t_blk = pl.program_id(1)

        @pl.when(t_blk == 0)
        def _():
            h_ref[...] = jnp.zeros_like(h_ref)
            c_ref[...] = jnp.zeros_like(c_ref)

        # Fused input projection for the whole chunk: one small-K matmul into
        # VMEM scratch (no HBM pre-gates tensor).  Bias folded in once.
        x_flat = x_ref[...].reshape(chunk * Bb, Fp)
        pg_ref[...] = (jnp.dot(x_flat, wih_ref[...],
                               preferred_element_type=jnp.float32)
                       + bias_ref[...])

        t0 = t_blk * chunk

        def step(i, carry):
            h, c = carry
            row = pl.multiple_of(i * Bb, Bb)
            pg = pg_ref[pl.ds(row, Bb), :]
            # Single per-step MXU matmul, bf16 operands, f32 accumulation.
            gates = pg + jnp.dot(h.astype(recurrent_dtype), whh_ref[...],
                                 preferred_element_type=jnp.float32)
            # Gate layout [i, f, o, g]: lane-aligned free views; one contiguous
            # sigmoid region for i/f/o, one tanh for g.
            sig = jax.nn.sigmoid(gates[:, 0:3 * Hp])
            i_g = sig[:, 0 * Hp:1 * Hp]
            f_g = sig[:, 1 * Hp:2 * Hp]
            o_g = sig[:, 2 * Hp:3 * Hp]
            g_g = jnp.tanh(gates[:, 3 * Hp:4 * Hp])
            c_new = f_g * c + i_g * g_g
            h_new = o_g * jnp.tanh(c_new)
            if T_pad != T:          # mask padded trailing time steps (static check)
                valid = (t0 + i) < T
                h_new = jnp.where(valid, h_new, h)
                c_new = jnp.where(valid, c_new, c)
            return (h_new, c_new)

        h, c = lax.fori_loop(0, chunk, step, (h_ref[...], c_ref[...]),
                             unroll=unroll_n)
        h_ref[...] = h
        c_ref[...] = c

        @pl.when(t_blk == pl.num_programs(1) - 1)
        def _():
            # Final Linear (OUTPUT_SIZE=1): VPU multiply + row reduce.  Padded
            # columns of wl are zero, so they drop out.
            out_ref[...] = (jnp.sum(h * wl_ref[...], axis=-1, keepdims=True)
                            + bl_ref[...]).astype(out_ref.dtype)

    out_p = pl.pallas_call(
        kernel,
        out_shape=jax.ShapeDtypeStruct((Bp, OUTPUT_SIZE), jnp.float32),
        grid_spec=pltpu.PrefetchScalarGridSpec(
            num_scalar_prefetch=0,
            grid=(nb, nt),
            in_specs=[
                pl.BlockSpec((chunk, Bb, Fp), lambda b, t: (t, b, 0)),   # x chunk
                pl.BlockSpec((Fp, G), lambda b, t: (0, 0)),              # W_ih^T
                pl.BlockSpec((1, G), lambda b, t: (0, 0)),               # bias
                pl.BlockSpec((Hp, G), lambda b, t: (0, 0)),              # W_hh^T (bf16)
                pl.BlockSpec((1, Hp), lambda b, t: (0, 0)),              # linear w
                pl.BlockSpec((1, OUTPUT_SIZE), lambda b, t: (0, 0)),     # linear b
            ],
            out_specs=pl.BlockSpec((Bb, OUTPUT_SIZE), lambda b, t: (b, 0)),
            scratch_shapes=[
                pltpu.VMEM((chunk * Bb, G), jnp.float32),   # chunk pre-gates
                pltpu.VMEM((Bb, Hp), jnp.float32),          # h (persistent)
                pltpu.VMEM((Bb, Hp), jnp.float32),          # c (persistent)
            ]),
        compiler_params=pltpu.CompilerParams(
            dimension_semantics=("parallel", "arbitrary"),
            vmem_limit_bytes=32 * 1024 * 1024),
    )(x_p, wih_p, bias_p, whh_p, wl_row, bl)

    return out_p[:B]


def _reference_forward(x_btf, w_ih, w_hh, b_ih, b_hh, w_lin, b_lin):
    """Pure-JAX reference replicating torch.nn.LSTM (gate order i,f,g,o), f32."""
    B, T, F = x_btf.shape
    H = w_hh.shape[1]
    hi = lax.Precision.HIGHEST
    h = jnp.zeros((B, H), jnp.float32)
    c = jnp.zeros((B, H), jnp.float32)

    def step(carry, x_t):
        h, c = carry
        gates = (jnp.dot(x_t, w_ih.T, precision=hi)
                 + jnp.dot(h, w_hh.T, precision=hi) + b_ih + b_hh)
        i = jax.nn.sigmoid(gates[:, 0 * H:1 * H])
        f = jax.nn.sigmoid(gates[:, 1 * H:2 * H])
        g = jnp.tanh(gates[:, 2 * H:3 * H])
        o = jax.nn.sigmoid(gates[:, 3 * H:4 * H])
        c = f * c + i * g
        h = o * jnp.tanh(c)
        return (h, c), None

    (h, c), _ = jax.lax.scan(step, (h, c), jnp.transpose(x_btf, (1, 0, 2)))
    return jnp.dot(h, w_lin.T, precision=hi) + b_lin


def _init_params(key, input_size=INPUT_SIZE, hidden=HIDDEN_LAYER_SIZE,
                 out_size=OUTPUT_SIZE):
    """Deterministic init matching PyTorch shapes (uniform(-1/sqrt(H), 1/sqrt(H)))."""
    ks = jax.random.split(key, 6)
    bound = 1.0 / jnp.sqrt(jnp.float32(hidden))
    u = lambda k, shape: jax.random.uniform(k, shape, jnp.float32, -bound, bound)
    w_ih = u(ks[0], (4 * hidden, input_size))
    w_hh = u(ks[1], (4 * hidden, hidden))
    b_ih = u(ks[2], (4 * hidden,))
    b_hh = u(ks[3], (4 * hidden,))
    w_lin = u(ks[4], (out_size, hidden))
    b_lin = u(ks[5], (out_size,))
    return w_ih, w_hh, b_ih, b_hh, w_lin, b_lin


if __name__ == "__main__":
    key = jax.random.PRNGKey(0)
    k_x, k_p = jax.random.split(key)

    B, T, F = 2, 8, INPUT_SIZE
    x = jax.random.normal(k_x, (B, T, F), jnp.float32)
    params = _init_params(k_p)

    ref = _reference_forward(x, *params)

    # f32 recurrence: bit-accuracy validation of the kernel structure.
    out_f32 = jax.block_until_ready(
        lstm_model_forward(x, *params, recurrent_dtype=jnp.float32))
    assert out_f32.shape == (B, OUTPUT_SIZE), out_f32.shape
    assert jnp.allclose(out_f32, ref, atol=1e-4, rtol=1e-4), (out_f32, ref)

    # bf16 recurrent matmul (performance default): looser tolerance due to the
    # bf16 rounding of h / W_hh accumulated over the T recurrent steps.
    out_bf16 = jax.block_until_ready(lstm_model_forward(x, *params))
    assert out_bf16.shape == (B, OUTPUT_SIZE), out_bf16.shape
    assert jnp.allclose(out_bf16, ref, atol=1e-2, rtol=1e-2), (out_bf16, ref)

    print("KERNEL_OK")
</pallas_src>

<mosaic_0001>
module attributes {stable_mosaic.version = 11 : i64} {
  func.func @kernel(%arg0: i32, %arg1: i32, %arg2: memref<8x8x16xf32, #tpu.memory_space<vmem>>, %arg3: memref<16x1024xf32, #tpu.memory_space<vmem>>, %arg4: memref<1x1024xf32, #tpu.memory_space<vmem>>, %arg5: memref<256x1024xf32, #tpu.memory_space<vmem>>, %arg6: memref<1x256xf32, #tpu.memory_space<vmem>>, %arg7: memref<1x1xf32, #tpu.memory_space<vmem>>, %arg8: memref<8x1xf32, #tpu.memory_space<vmem>>, %arg9: memref<64x1024xf32, #tpu.memory_space<vmem>>, %arg10: memref<8x256xf32, #tpu.memory_space<vmem>>, %arg11: memref<8x256xf32, #tpu.memory_space<vmem>>) attributes {dimension_semantics = [#tpu.dimension_semantics<parallel>, #tpu.dimension_semantics<arbitrary>], iteration_bounds = array<i64: 1, 1>, scalar_prefetch = 0 : i64, scratch_operands = 3 : i64, tpu.core_type = #tpu.core_type<tc>, window_params = [{transform_indices = @transform_0, window_bounds = array<i64: 8, 8, 16>}, {pipeline_mode = #tpu.pipeline_mode<synchronous>, transform_indices = @transform_1, window_bounds = array<i64: 16, 1024>}, {pipeline_mode = #tpu.pipeline_mode<synchronous>, transform_indices = @transform_2, window_bounds = array<i64: 1, 1024>}, {pipeline_mode = #tpu.pipeline_mode<synchronous>, transform_indices = @transform_3, window_bounds = array<i64: 256, 1024>}, {pipeline_mode = #tpu.pipeline_mode<synchronous>, transform_indices = @transform_4, window_bounds = array<i64: 1, 256>}, {pipeline_mode = #tpu.pipeline_mode<synchronous>, transform_indices = @transform_5, window_bounds = array<i64: 1, 1>}, {transform_indices = @transform_6, window_bounds = array<i64: 8, 1>}]} {
    %c0_i32 = arith.constant 0 : i32
    %0 = arith.cmpi eq, %arg1, %c0_i32 : i32
    %1 = arith.extui %0 : i1 to i32
    %c0_i32_0 = arith.constant 0 : i32
    %2 = arith.cmpi ne, %1, %c0_i32_0 : i32
    scf.if %2 {
      %cst_68 = arith.constant 0.000000e+00 : f32
      %202 = vector.broadcast %cst_68 : f32 to vector<8x256xf32>
      %c0_69 = arith.constant 0 : index
      %c0_70 = arith.constant 0 : index
      %203 = vector.load %arg10[%c0_69, %c0_70] : memref<8x256xf32, #tpu.memory_space<vmem>>, vector<8x256xf32>
      tpu.vector_store %arg10[%c0_69, %c0_70], %202 {strides = array<i32>} : memref<8x256xf32, #tpu.memory_space<vmem>>, vector<8x256xf32>,
      %cst_71 = arith.constant 0.000000e+00 : f32
      %204 = vector.broadcast %cst_71 : f32 to vector<8x256xf32>
      %c0_72 = arith.constant 0 : index
      %c0_73 = arith.constant 0 : index
      %205 = vector.load %arg11[%c0_72, %c0_73] : memref<8x256xf32, #tpu.memory_space<vmem>>, vector<8x256xf32>
      tpu.vector_store %arg11[%c0_72, %c0_73], %204 {strides = array<i32>} : memref<8x256xf32, #tpu.memory_space<vmem>>, vector<8x256xf32>,
    } else {
    }
    %c0 = arith.constant 0 : index
    %c0_1 = arith.constant 0 : index
    %c0_2 = arith.constant 0 : index
    %3 = vector.load %arg2[%c0, %c0_1, %c0_2] : memref<8x8x16xf32, #tpu.memory_space<vmem>>, vector<8x8x16xf32>
    %4 = vector.shape_cast %3 : vector<8x8x16xf32> to vector<64x16xf32>
    %c0_3 = arith.constant 0 : index
    %c0_4 = arith.constant 0 : index
    %5 = vector.load %arg3[%c0_3, %c0_4] : memref<16x1024xf32, #tpu.memory_space<vmem>>, vector<16x1024xf32>
    %cst = arith.constant dense<0.000000e+00> : vector<64x1024xf32>
    %6 = tpu.matmul %4, %5, %cst {dimension_numbers = #tpu.dot_dimension_numbers<[1], [0], [0], [1], [0, 0, 1, 1], [], []>} : vector<64x16xf32>, vector<16x1024xf32>, vector<64x1024xf32> -> vector<64x1024xf32>
    %c0_5 = arith.constant 0 : index
    %c0_6 = arith.constant 0 : index
    %7 = vector.load %arg4[%c0_5, %c0_6] : memref<1x1024xf32, #tpu.memory_space<vmem>>, vector<1x1024xf32>
    %8 = vector.broadcast %7 : vector<1x1024xf32> to vector<64x1024xf32>
    %9 = arith.addf %6, %8 : vector<64x1024xf32>
    %c0_7 = arith.constant 0 : index
    %c0_8 = arith.constant 0 : index
    %10 = vector.load %arg9[%c0_7, %c0_8] : memref<64x1024xf32, #tpu.memory_space<vmem>>, vector<64x1024xf32>
    tpu.vector_store %arg9[%c0_7, %c0_8], %9 {strides = array<i32>} : memref<64x1024xf32, #tpu.memory_space<vmem>>, vector<64x1024xf32>,
    %c0_9 = arith.constant 0 : index
    %c0_10 = arith.constant 0 : index
    %11 = vector.load %arg10[%c0_9, %c0_10] : memref<8x256xf32, #tpu.memory_space<vmem>>, vector<8x256xf32>
    %c0_11 = arith.constant 0 : index
    %c0_12 = arith.constant 0 : index
    %12 = vector.load %arg11[%c0_11, %c0_12] : memref<8x256xf32, #tpu.memory_space<vmem>>, vector<8x256xf32>
    %c0_i32_13 = arith.constant 0 : i32
    %c8_i32 = arith.constant 8 : i32
    %13 = arith.muli %c0_i32_13, %c8_i32 : i32
    %14 = tpu.assume_multiple %13, 8 : i32
    %15 = arith.index_cast %14 : i32 to index
    %c0_14 = arith.constant 0 : index
    %16 = vector.load %arg9[%15, %c0_14] : memref<64x1024xf32, #tpu.memory_space<vmem>>, vector<8x1024xf32>
    %c0_15 = arith.constant 0 : index
    %c0_16 = arith.constant 0 : index
    %17 = vector.load %arg5[%c0_15, %c0_16] : memref<256x1024xf32, #tpu.memory_space<vmem>>, vector<256x1024xf32>
    %cst_17 = arith.constant dense<0.000000e+00> : vector<8x1024xf32>
    %18 = tpu.matmul %11, %17, %cst_17 {dimension_numbers = #tpu.dot_dimension_numbers<[1], [0], [0], [1], [0, 0, 1, 1], [], []>} : vector<8x256xf32>, vector<256x1024xf32>, vector<8x1024xf32> -> vector<8x1024xf32>
    %19 = arith.addf %16, %18 : vector<8x1024xf32>
    %20 = vector.extract_strided_slice %19 {offsets = [0, 0], sizes = [8, 768], strides = [1, 1]} : vector<8x1024xf32> to vector<8x768xf32>
    %21 = arith.negf %20 : vector<8x768xf32>
    %22 = math.exp %21 : vector<8x768xf32>
    %cst_18 = arith.constant 1.000000e+00 : f32
    %23 = vector.broadcast %cst_18 : f32 to vector<8x768xf32>
    %24 = arith.addf %23, %22 : vector<8x768xf32>
    %25 = arith.divf %23, %24 : vector<8x768xf32>
    %26 = vector.extract_strided_slice %25 {offsets = [0, 0], sizes = [8, 256], strides = [1, 1]} : vector<8x768xf32> to vector<8x256xf32>
    %27 = vector.extract_strided_slice %25 {offsets = [0, 256], sizes = [8, 256], strides = [1, 1]} : vector<8x768xf32> to vector<8x256xf32>
    %28 = vector.extract_strided_slice %25 {offsets = [0, 512], sizes = [8, 256], strides = [1, 1]} : vector<8x768xf32> to vector<8x256xf32>
    %29 = vector.extract_strided_slice %19 {offsets = [0, 768], sizes = [8, 256], strides = [1, 1]} : vector<8x1024xf32> to vector<8x256xf32>
    %30 = math.tanh %29 : vector<8x256xf32>
    %31 = arith.mulf %27, %12 : vector<8x256xf32>
    %32 = arith.mulf %26, %30 : vector<8x256xf32>
    %33 = arith.addf %31, %32 : vector<8x256xf32>
    %34 = math.tanh %33 : vector<8x256xf32>
    %35 = arith.mulf %28, %34 : vector<8x256xf32>
    %c1_i32 = arith.constant 1 : i32
    %c8_i32_19 = arith.constant 8 : i32
    %36 = arith.muli %c1_i32, %c8_i32_19 : i32
    %37 = tpu.assume_multiple %36, 8 : i32
    %38 = arith.index_cast %37 : i32 to index
    %c0_20 = arith.constant 0 : index
    %39 = vector.load %arg9[%38, %c0_20] : memref<64x1024xf32, #tpu.memory_space<vmem>>, vector<8x1024xf32>
    %c0_21 = arith.constant 0 : index
    %c0_22 = arith.constant 0 : index
    %40 = vector.load %arg5[%c0_21, %c0_22] : memref<256x1024xf32, #tpu.memory_space<vmem>>, vector<256x1024xf32>
    %cst_23 = arith.constant dense<0.000000e+00> : vector<8x1024xf32>
    %41 = tpu.matmul %35, %40, %cst_23 {dimension_numbers = #tpu.dot_dimension_numbers<[1], [0], [0], [1], [0, 0, 1, 1], [], []>} : vector<8x256xf32>, vector<256x1024xf32>, vector<8x1024xf32> -> vector<8x1024xf32>
    %42 = arith.addf %39, %41 : vector<8x1024xf32>
    %43 = vector.extract_strided_slice %42 {offsets = [0, 0], sizes = [8, 768], strides = [1, 1]} : vector<8x1024xf32> to vector<8x768xf32>
    %44 = arith.negf %43 : vector<8x768xf32>
    %45 = math.exp %44 : vector<8x768xf32>
    %cst_24 = arith.constant 1.000000e+00 : f32
    %46 = vector.broadcast %cst_24 : f32 to vector<8x768xf32>
    %47 = arith.addf %46, %45 : vector<8x768xf32>
    %48 = arith.divf %46, %47 : vector<8x768xf32>
    %49 = vector.extract_strided_slice %48 {offsets = [0, 0], sizes = [8, 256], strides = [1, 1]} : vector<8x768xf32> to vector<8x256xf32>
    %50 = vector.extract_strided_slice %48 {offsets = [0, 256], sizes = [8, 256], strides = [1, 1]} : vector<8x768xf32> to vector<8x256xf32>
    %51 = vector.extract_strided_slice %48 {offsets = [0, 512], sizes = [8, 256], strides = [1, 1]} : vector<8x768xf32> to vector<8x256xf32>
    %52 = vector.extract_strided_slice %42 {offsets = [0, 768], sizes = [8, 256], strides = [1, 1]} : vector<8x1024xf32> to vector<8x256xf32>
    %53 = math.tanh %52 : vector<8x256xf32>
    %54 = arith.mulf %50, %33 : vector<8x256xf32>
    %55 = arith.mulf %49, %53 : vector<8x256xf32>
    %56 = arith.addf %54, %55 : vector<8x256xf32>
    %57 = math.tanh %56 : vector<8x256xf32>
    %58 = arith.mulf %51, %57 : vector<8x256xf32>
    %c2_i32 = arith.constant 2 : i32
    %c8_i32_25 = arith.constant 8 : i32
    %59 = arith.muli %c2_i32, %c8_i32_25 : i32
    %60 = tpu.assume_multiple %59, 8 : i32
    %61 = arith.index_cast %60 : i32 to index
    %c0_26 = arith.constant 0 : index
    %62 = vector.load %arg9[%61, %c0_26] : memref<64x1024xf32, #tpu.memory_space<vmem>>, vector<8x1024xf32>
    %c0_27 = arith.constant 0 : index
    %c0_28 = arith.constant 0 : index
    %63 = vector.load %arg5[%c0_27, %c0_28] : memref<256x1024xf32, #tpu.memory_space<vmem>>, vector<256x1024xf32>
    %cst_29 = arith.constant dense<0.000000e+00> : vector<8x1024xf32>
    %64 = tpu.matmul %58, %63, %cst_29 {dimension_numbers = #tpu.dot_dimension_numbers<[1], [0], [0], [1], [0, 0, 1, 1], [], []>} : vector<8x256xf32>, vector<256x1024xf32>, vector<8x1024xf32> -> vector<8x1024xf32>
    %65 = arith.addf %62, %64 : vector<8x1024xf32>
    %66 = vector.extract_strided_slice %65 {offsets = [0, 0], sizes = [8, 768], strides = [1, 1]} : vector<8x1024xf32> to vector<8x768xf32>
    %67 = arith.negf %66 : vector<8x768xf32>
    %68 = math.exp %67 : vector<8x768xf32>
    %cst_30 = arith.constant 1.000000e+00 : f32
    %69 = vector.broadcast %cst_30 : f32 to vector<8x768xf32>
    %70 = arith.addf %69, %68 : vector<8x768xf32>
    %71 = arith.divf %69, %70 : vector<8x768xf32>
    %72 = vector.extract_strided_slice %71 {offsets = [0, 0], sizes = [8, 256], strides = [1, 1]} : vector<8x768xf32> to vector<8x256xf32>
    %73 = vector.extract_strided_slice %71 {offsets = [0, 256], sizes = [8, 256], strides = [1, 1]} : vector<8x768xf32> to vector<8x256xf32>
    %74 = vector.extract_strided_slice %71 {offsets = [0, 512], sizes = [8, 256], strides = [1, 1]} : vector<8x768xf32> to vector<8x256xf32>
    %75 = vector.extract_strided_slice %65 {offsets = [0, 768], sizes = [8, 256], strides = [1, 1]} : vector<8x1024xf32> to vector<8x256xf32>
    %76 = math.tanh %75 : vector<8x256xf32>
    %77 = arith.mulf %73, %56 : vector<8x256xf32>
    %78 = arith.mulf %72, %76 : vector<8x256xf32>
    %79 = arith.addf %77, %78 : vector<8x256xf32>
    %80 = math.tanh %79 : vector<8x256xf32>
    %81 = arith.mulf %74, %80 : vector<8x256xf32>
    %c3_i32 = arith.constant 3 : i32
    %c8_i32_31 = arith.constant 8 : i32
    %82 = arith.muli %c3_i32, %c8_i32_31 : i32
    %83 = tpu.assume_multiple %82, 8 : i32
    %84 = arith.index_cast %83 : i32 to index
    %c0_32 = arith.constant 0 : index
    %85 = vector.load %arg9[%84, %c0_32] : memref<64x1024xf32, #tpu.memory_space<vmem>>, vector<8x1024xf32>
    %c0_33 = arith.constant 0 : index
    %c0_34 = arith.constant 0 : index
    %86 = vector.load %arg5[%c0_33, %c0_34] : memref<256x1024xf32, #tpu.memory_space<vmem>>, vector<256x1024xf32>
    %cst_35 = arith.constant dense<0.000000e+00> : vector<8x1024xf32>
    %87 = tpu.matmul %81, %86, %cst_35 {dimension_numbers = #tpu.dot_dimension_numbers<[1], [0], [0], [1], [0, 0, 1, 1], [], []>} : vector<8x256xf32>, vector<256x1024xf32>, vector<8x1024xf32> -> vector<8x1024xf32>
    %88 = arith.addf %85, %87 : vector<8x1024xf32>
    %89 = vector.extract_strided_slice %88 {offsets = [0, 0], sizes = [8, 768], strides = [1, 1]} : vector<8x1024xf32> to vector<8x768xf32>
    %90 = arith.negf %89 : vector<8x768xf32>
    %91 = math.exp %90 : vector<8x768xf32>
    %cst_36 = arith.constant 1.000000e+00 : f32
    %92 = vector.broadcast %cst_36 : f32 to vector<8x768xf32>
    %93 = arith.addf %92, %91 : vector<8x768xf32>
    %94 = arith.divf %92, %93 : vector<8x768xf32>
    %95 = vector.extract_strided_slice %94 {offsets = [0, 0], sizes = [8, 256], strides = [1, 1]} : vector<8x768xf32> to vector<8x256xf32>
    %96 = vector.extract_strided_slice %94 {offsets = [0, 256], sizes = [8, 256], strides = [1, 1]} : vector<8x768xf32> to vector<8x256xf32>
    %97 = vector.extract_strided_slice %94 {offsets = [0, 512], sizes = [8, 256], strides = [1, 1]} : vector<8x768xf32> to vector<8x256xf32>
    %98 = vector.extract_strided_slice %88 {offsets = [0, 768], sizes = [8, 256], strides = [1, 1]} : vector<8x1024xf32> to vector<8x256xf32>
    %99 = math.tanh %98 : vector<8x256xf32>
    %100 = arith.mulf %96, %79 : vector<8x256xf32>
    %101 = arith.mulf %95, %99 : vector<8x256xf32>
    %102 = arith.addf %100, %101 : vector<8x256xf32>
    %103 = math.tanh %102 : vector<8x256xf32>
    %104 = arith.mulf %97, %103 : vector<8x256xf32>
    %c4_i32 = arith.constant 4 : i32
    %c8_i32_37 = arith.constant 8 : i32
    %105 = arith.muli %c4_i32, %c8_i32_37 : i32
    %106 = tpu.assume_multiple %105, 8 : i32
    %107 = arith.index_cast %106 : i32 to index
    %c0_38 = arith.constant 0 : index
    %108 = vector.load %arg9[%107, %c0_38] : memref<64x1024xf32, #tpu.memory_space<vmem>>, vector<8x1024xf32>
    %c0_39 = arith.constant 0 : index
    %c0_40 = arith.constant 0 : index
    %109 = vector.load %arg5[%c0_39, %c0_40] : memref<256x1024xf32, #tpu.memory_space<vmem>>, vector<256x1024xf32>
    %cst_41 = arith.constant dense<0.000000e+00> : vector<8x1024xf32>
    %110 = tpu.matmul %104, %109, %cst_41 {dimension_numbers = #tpu.dot_dimension_numbers<[1], [0], [0], [1], [0, 0, 1, 1], [], []>} : vector<8x256xf32>, vector<256x1024xf32>, vector<8x1024xf32> -> vector<8x1024xf32>
    %111 = arith.addf %108, %110 : vector<8x1024xf32>
    %112 = vector.extract_strided_slice %111 {offsets = [0, 0], sizes = [8, 768], strides = [1, 1]} : vector<8x1024xf32> to vector<8x768xf32>
    %113 = arith.negf %112 : vector<8x768xf32>
    %114 = math.exp %113 : vector<8x768xf32>
    %cst_42 = arith.constant 1.000000e+00 : f32
    %115 = vector.broadcast %cst_42 : f32 to vector<8x768xf32>
    %116 = arith.addf %115, %114 : vector<8x768xf32>
    %117 = arith.divf %115, %116 : vector<8x768xf32>
    %118 = vector.extract_strided_slice %117 {offsets = [0, 0], sizes = [8, 256], strides = [1, 1]} : vector<8x768xf32> to vector<8x256xf32>
    %119 = vector.extract_strided_slice %117 {offsets = [0, 256], sizes = [8, 256], strides = [1, 1]} : vector<8x768xf32> to vector<8x256xf32>
    %120 = vector.extract_strided_slice %117 {offsets = [0, 512], sizes = [8, 256], strides = [1, 1]} : vector<8x768xf32> to vector<8x256xf32>
    %121 = vector.extract_strided_slice %111 {offsets = [0, 768], sizes = [8, 256], strides = [1, 1]} : vector<8x1024xf32> to vector<8x256xf32>
    %122 = math.tanh %121 : vector<8x256xf32>
    %123 = arith.mulf %119, %102 : vector<8x256xf32>
    %124 = arith.mulf %118, %122 : vector<8x256xf32>
    %125 = arith.addf %123, %124 : vector<8x256xf32>
    %126 = math.tanh %125 : vector<8x256xf32>
    %127 = arith.mulf %120, %126 : vector<8x256xf32>
    %c5_i32 = arith.constant 5 : i32
    %c8_i32_43 = arith.constant 8 : i32
    %128 = arith.muli %c5_i32, %c8_i32_43 : i32
    %129 = tpu.assume_multiple %128, 8 : i32
    %130 = arith.index_cast %129 : i32 to index
    %c0_44 = arith.constant 0 : index
    %131 = vector.load %arg9[%130, %c0_44] : memref<64x1024xf32, #tpu.memory_space<vmem>>, vector<8x1024xf32>
    %c0_45 = arith.constant 0 : index
    %c0_46 = arith.constant 0 : index
    %132 = vector.load %arg5[%c0_45, %c0_46] : memref<256x1024xf32, #tpu.memory_space<vmem>>, vector<256x1024xf32>
    %cst_47 = arith.constant dense<0.000000e+00> : vector<8x1024xf32>
    %133 = tpu.matmul %127, %132, %cst_47 {dimension_numbers = #tpu.dot_dimension_numbers<[1], [0], [0], [1], [0, 0, 1, 1], [], []>} : vector<8x256xf32>, vector<256x1024xf32>, vector<8x1024xf32> -> vector<8x1024xf32>
    %134 = arith.addf %131, %133 : vector<8x1024xf32>
    %135 = vector.extract_strided_slice %134 {offsets = [0, 0], sizes = [8, 768], strides = [1, 1]} : vector<8x1024xf32> to vector<8x768xf32>
    %136 = arith.negf %135 : vector<8x768xf32>
    %137 = math.exp %136 : vector<8x768xf32>
    %cst_48 = arith.constant 1.000000e+00 : f32
    %138 = vector.broadcast %cst_48 : f32 to vector<8x768xf32>
    %139 = arith.addf %138, %137 : vector<8x768xf32>
    %140 = arith.divf %138, %139 : vector<8x768xf32>
    %141 = vector.extract_strided_slice %140 {offsets = [0, 0], sizes = [8, 256], strides = [1, 1]} : vector<8x768xf32> to vector<8x256xf32>
    %142 = vector.extract_strided_slice %140 {offsets = [0, 256], sizes = [8, 256], strides = [1, 1]} : vector<8x768xf32> to vector<8x256xf32>
    %143 = vector.extract_strided_slice %140 {offsets = [0, 512], sizes = [8, 256], strides = [1, 1]} : vector<8x768xf32> to vector<8x256xf32>
    %144 = vector.extract_strided_slice %134 {offsets = [0, 768], sizes = [8, 256], strides = [1, 1]} : vector<8x1024xf32> to vector<8x256xf32>
    %145 = math.tanh %144 : vector<8x256xf32>
    %146 = arith.mulf %142, %125 : vector<8x256xf32>
    %147 = arith.mulf %141, %145 : vector<8x256xf32>
    %148 = arith.addf %146, %147 : vector<8x256xf32>
    %149 = math.tanh %148 : vector<8x256xf32>
    %150 = arith.mulf %143, %149 : vector<8x256xf32>
    %c6_i32 = arith.constant 6 : i32
    %c8_i32_49 = arith.constant 8 : i32
    %151 = arith.muli %c6_i32, %c8_i32_49 : i32
    %152 = tpu.assume_multiple %151, 8 : i32
    %153 = arith.index_cast %152 : i32 to index
    %c0_50 = arith.constant 0 : index
    %154 = vector.load %arg9[%153, %c0_50] : memref<64x1024xf32, #tpu.memory_space<vmem>>, vector<8x1024xf32>
    %c0_51 = arith.constant 0 : index
    %c0_52 = arith.constant 0 : index
    %155 = vector.load %arg5[%c0_51, %c0_52] : memref<256x1024xf32, #tpu.memory_space<vmem>>, vector<256x1024xf32>
    %cst_53 = arith.constant dense<0.000000e+00> : vector<8x1024xf32>
    %156 = tpu.matmul %150, %155, %cst_53 {dimension_numbers = #tpu.dot_dimension_numbers<[1], [0], [0], [1], [0, 0, 1, 1], [], []>} : vector<8x256xf32>, vector<256x1024xf32>, vector<8x1024xf32> -> vector<8x1024xf32>
    %157 = arith.addf %154, %156 : vector<8x1024xf32>
    %158 = vector.extract_strided_slice %157 {offsets = [0, 0], sizes = [8, 768], strides = [1, 1]} : vector<8x1024xf32> to vector<8x768xf32>
    %159 = arith.negf %158 : vector<8x768xf32>
    %160 = math.exp %159 : vector<8x768xf32>
    %cst_54 = arith.constant 1.000000e+00 : f32
    %161 = vector.broadcast %cst_54 : f32 to vector<8x768xf32>
    %162 = arith.addf %161, %160 : vector<8x768xf32>
    %163 = arith.divf %161, %162 : vector<8x768xf32>
    %164 = vector.extract_strided_slice %163 {offsets = [0, 0], sizes = [8, 256], strides = [1, 1]} : vector<8x768xf32> to vector<8x256xf32>
    %165 = vector.extract_strided_slice %163 {offsets = [0, 256], sizes = [8, 256], strides = [1, 1]} : vector<8x768xf32> to vector<8x256xf32>
    %166 = vector.extract_strided_slice %163 {offsets = [0, 512], sizes = [8, 256], strides = [1, 1]} : vector<8x768xf32> to vector<8x256xf32>
    %167 = vector.extract_strided_slice %157 {offsets = [0, 768], sizes = [8, 256], strides = [1, 1]} : vector<8x1024xf32> to vector<8x256xf32>
    %168 = math.tanh %167 : vector<8x256xf32>
    %169 = arith.mulf %165, %148 : vector<8x256xf32>
    %170 = arith.mulf %164, %168 : vector<8x256xf32>
    %171 = arith.addf %169, %170 : vector<8x256xf32>
    %172 = math.tanh %171 : vector<8x256xf32>
    %173 = arith.mulf %166, %172 : vector<8x256xf32>
    %c7_i32 = arith.constant 7 : i32
    %c8_i32_55 = arith.constant 8 : i32
    %174 = arith.muli %c7_i32, %c8_i32_55 : i32
    %175 = tpu.assume_multiple %174, 8 : i32
    %176 = arith.index_cast %175 : i32 to index
    %c0_56 = arith.constant 0 : index
    %177 = vector.load %arg9[%176, %c0_56] : memref<64x1024xf32, #tpu.memory_space<vmem>>, vector<8x1024xf32>
    %c0_57 = arith.constant 0 : index
    %c0_58 = arith.constant 0 : index
    %178 = vector.load %arg5[%c0_57, %c0_58] : memref<256x1024xf32, #tpu.memory_space<vmem>>, vector<256x1024xf32>
    %cst_59 = arith.constant dense<0.000000e+00> : vector<8x1024xf32>
    %179 = tpu.matmul %173, %178, %cst_59 {dimension_numbers = #tpu.dot_dimension_numbers<[1], [0], [0], [1], [0, 0, 1, 1], [], []>} : vector<8x256xf32>, vector<256x1024xf32>, vector<8x1024xf32> -> vector<8x1024xf32>
    %180 = arith.addf %177, %179 : vector<8x1024xf32>
    %181 = vector.extract_strided_slice %180 {offsets = [0, 0], sizes = [8, 768], strides = [1, 1]} : vector<8x1024xf32> to vector<8x768xf32>
    %182 = arith.negf %181 : vector<8x768xf32>
    %183 = math.exp %182 : vector<8x768xf32>
    %cst_60 = arith.constant 1.000000e+00 : f32
    %184 = vector.broadcast %cst_60 : f32 to vector<8x768xf32>
    %185 = arith.addf %184, %183 : vector<8x768xf32>
    %186 = arith.divf %184, %185 : vector<8x768xf32>
    %187 = vector.extract_strided_slice %186 {offsets = [0, 0], sizes = [8, 256], strides = [1, 1]} : vector<8x768xf32> to vector<8x256xf32>
    %188 = vector.extract_strided_slice %186 {offsets = [0, 256], sizes = [8, 256], strides = [1, 1]} : vector<8x768xf32> to vector<8x256xf32>
    %189 = vector.extract_strided_slice %186 {offsets = [0, 512], sizes = [8, 256], strides = [1, 1]} : vector<8x768xf32> to vector<8x256xf32>
    %190 = vector.extract_strided_slice %180 {offsets = [0, 768], sizes = [8, 256], strides = [1, 1]} : vector<8x1024xf32> to vector<8x256xf32>
    %191 = math.tanh %190 : vector<8x256xf32>
    %192 = arith.mulf %188, %171 : vector<8x256xf32>
    %193 = arith.mulf %187, %191 : vector<8x256xf32>
    %194 = arith.addf %192, %193 : vector<8x256xf32>
    %195 = math.tanh %194 : vector<8x256xf32>
    %196 = arith.mulf %189, %195 : vector<8x256xf32>
    %c8_i32_61 = arith.constant 8 : i32
    %c0_62 = arith.constant 0 : index
    %c0_63 = arith.constant 0 : index
    %197 = vector.load %arg10[%c0_62, %c0_63] : memref<8x256xf32, #tpu.memory_space<vmem>>, vector<8x256xf32>
    tpu.vector_store %arg10[%c0_62, %c0_63], %196 {strides = array<i32>} : memref<8x256xf32, #tpu.memory_space<vmem>>, vector<8x256xf32>,
    %c0_64 = arith.constant 0 : index
    %c0_65 = arith.constant 0 : index
    %198 = vector.load %arg11[%c0_64, %c0_65] : memref<8x256xf32, #tpu.memory_space<vmem>>, vector<8x256xf32>
    tpu.vector_store %arg11[%c0_64, %c0_65], %194 {strides = array<i32>} : memref<8x256xf32, #tpu.memory_space<vmem>>, vector<8x256xf32>,
    %c0_i32_66 = arith.constant 0 : i32
    %199 = arith.cmpi eq, %arg1, %c0_i32_66 : i32
    %200 = arith.extui %199 : i1 to i32
    %c0_i32_67 = arith.constant 0 : i32
    %201 = arith.cmpi ne, %200, %c0_i32_67 : i32
    scf.if %201 {
      %c0_68 = arith.constant 0 : index
      %c0_69 = arith.constant 0 : index
      %202 = vector.load %arg6[%c0_68, %c0_69] : memref<1x256xf32, #tpu.memory_space<vmem>>, vector<1x256xf32>
      %203 = vector.broadcast %202 : vector<1x256xf32> to vector<8x256xf32>
      %204 = arith.mulf %196, %203 : vector<8x256xf32>
      %cst_70 = arith.constant dense<0.000000e+00> : vector<8xf32>
      %205 = vector.multi_reduction <add>, %204, %cst_70 [1] : vector<8x256xf32> to vector<8xf32>
      %206 = vector.shape_cast %205 : vector<8xf32> to vector<8x1xf32>
      %c0_71 = arith.constant 0 : index
      %c0_72 = arith.constant 0 : index
      %207 = vector.load %arg7[%c0_71, %c0_72] : memref<1x1xf32, #tpu.memory_space<vmem>>, vector<1x1xf32>
      %208 = vector.broadcast %207 : vector<1x1xf32> to vector<8x1xf32>
      %209 = arith.addf %206, %208 : vector<8x1xf32>
      %c0_73 = arith.constant 0 : index
      %c0_74 = arith.constant 0 : index
      %210 = vector.load %arg8[%c0_73, %c0_74] : memref<8x1xf32, #tpu.memory_space<vmem>>, vector<8x1xf32>
      tpu.vector_store %arg8[%c0_73, %c0_74], %209 {strides = array<i32>} : memref<8x1xf32, #tpu.memory_space<vmem>>, vector<8x1xf32>,
    } else {
    }
    return
  }
  func.func @transform_0(%arg0: i32, %arg1: i32) -> (i32, i32, i32) {
    %c0_i32 = arith.constant 0 : i32
    %c0_i32_0 = arith.constant 0 : i32
    return %arg1, %arg0, %c0_i32 : i32, i32, i32
  }
  func.func @transform_1(%arg0: i32, %arg1: i32) -> (i32, i32) {
    %c0_i32 = arith.constant 0 : i32
    %c0_i32_0 = arith.constant 0 : i32
    %c0_i32_1 = arith.constant 0 : i32
    return %c0_i32, %c0_i32_0 : i32, i32
  }
  func.func @transform_2(%arg0: i32, %arg1: i32) -> (i32, i32) {
    %c0_i32 = arith.constant 0 : i32
    %c0_i32_0 = arith.constant 0 : i32
    %c0_i32_1 = arith.constant 0 : i32
    return %c0_i32, %c0_i32_0 : i32, i32
  }
  func.func @transform_3(%arg0: i32, %arg1: i32) -> (i32, i32) {
    %c0_i32 = arith.constant 0 : i32
    %c0_i32_0 = arith.constant 0 : i32
    %c0_i32_1 = arith.constant 0 : i32
    return %c0_i32, %c0_i32_0 : i32, i32
  }
  func.func @transform_4(%arg0: i32, %arg1: i32) -> (i32, i32) {
    %c0_i32 = arith.constant 0 : i32
    %c0_i32_0 = arith.constant 0 : i32
    %c0_i32_1 = arith.constant 0 : i32
    return %c0_i32, %c0_i32_0 : i32, i32
  }
  func.func @transform_5(%arg0: i32, %arg1: i32) -> (i32, i32) {
    %c0_i32 = arith.constant 0 : i32
    %c0_i32_0 = arith.constant 0 : i32
    %c0_i32_1 = arith.constant 0 : i32
    return %c0_i32, %c0_i32_0 : i32, i32
  }
  func.func @transform_6(%arg0: i32, %arg1: i32) -> (i32, i32) {
    %c0_i32 = arith.constant 0 : i32
    %c0_i32_0 = arith.constant 0 : i32
    return %arg0, %c0_i32 : i32, i32
  }
}

</mosaic_0001>

<bundles_post_ra>
// kernel: lstm_model_forward.1
= control target key start
LH: loop header
LB: loop body
LE: loop exit
PB: predicated region body
PF: predicated region fallthrough
CT: control target
= control target key end

     0   :  { %vm75_vm0 = vcmask 130048   ;;  %s14461_s1 = inlined_call_operand.vmem [shape: f32[16,1024], index: 1, kind: input, shape index: {}]   ;;  %s14462_s0 = inlined_call_operand.vmem [shape: f32[8,8,16], index: 0, kind: input, shape index: {}]   ;;  %s14463_s3 = inlined_call_operand.vmem [shape: f32[256,1024], index: 3, kind: input, shape index: {}]   ;;  %s14464_s2 = inlined_call_operand.vmem [shape: f32[1,1024], index: 2, kind: input, shape index: {}]   ;;  %s14465_s5 = inlined_call_operand.<no memory space> [shape: f32[1,1], index: 5, kind: input, shape index: {}]   ;;  %s14466_s4 = inlined_call_operand.vmem [shape: f32[1,256], index: 4, kind: input, shape index: {}]   ;;  %s14467_s6 = inlined_call_operand.vmem [shape: f32[8,1], index: 6, kind: output, shape index: {}]  }
   0x1   :  { %v49_v0 = vld [vmem:[%s14461_s1 + $0x40] sm:$0xff]  ;;  %v50_v1 = vld [vmem:[%s14461_s1 + $0x48] sm:$0xff]  ;;  %v51_v2 = vld [vmem:[%s14461_s1 + $0x50] sm:$0xff] }
   0x2   :  { %114 = vmatpush.msra.mxu0 %v49_v0  ;;  %155 = vmatpush.msra.mxu1 %v50_v1  ;;  %v52_v3 = vld [vmem:[%s14461_s1 + $0x58] sm:$0xff]  ;;  %v41_v4 = vld [vmem:[%s14461_s1] sm:$0xff]  ;;  %v42_v5 = vld [vmem:[%s14461_s1 + $0x8] sm:$0xff] }
   0x3   :  { %196 = vmatpush.msra.mxu2 %v51_v2  ;;  %237 = vmatpush.msra.mxu3 %v52_v3  ;;  %v43_v6 = vld [vmem:[%s14461_s1 + $0x10] sm:$0xff]  ;;  %v44_v7 = vld [vmem:[%s14461_s1 + $0x18] sm:$0xff]  ;;  %v5912_v8 = vld [vmem:[%s14462_s0] sm:$0xff] }
   0x4   :  { %115 = vmatpush.msra.mxu0 %v41_v4  ;;  %156 = vmatpush.msra.mxu1 %v42_v5  ;;  %v5925_v9 = vld [vmem:[%s14462_s0 + $0x8] sm:$0xff]  ;;  %v5938_v10 = vld [vmem:[%s14462_s0 + $0x10] sm:$0xff]  ;;  %v5951_v11 = vld [vmem:[%s14462_s0 + $0x18] sm:$0xff] }
   0x5   :  { %197 = vmatpush.msra.mxu2 %v43_v6  ;;  %238 = vmatpush.msra.mxu3 %v44_v7  ;;  %v53_v12 = vld [vmem:[%s14461_s1 + $0x60] sm:$0xff]  ;;  %v54_v13 = vld [vmem:[%s14461_s1 + $0x68] sm:$0xff]  ;;  %v55_v14 = vld [vmem:[%s14461_s1 + $0x70] sm:$0xff] }
   0x6   :  { %4508 = vmatmul.msk.f32.vlgmr.msra.gmra.mxu0 %vm75_vm0, %v5912_v8  ;;  %4516 = vmatmul.msk.f32.vlgmr.msra.gmra.mxu1 %vm75_vm0, %v5912_v8  ;;  %v56_v15 = vld [vmem:[%s14461_s1 + $0x78] sm:$0xff]  ;;  %v45_v16 = vld [vmem:[%s14461_s1 + $0x20] sm:$0xff]  ;;  %v46_v17 = vld [vmem:[%s14461_s1 + $0x28] sm:$0xff] }
   0x7   :  { %4524 = vmatmul.msk.f32.vlgmr.msra.gmra.mxu2 %vm75_vm0, %v5912_v8  ;;  %4532 = vmatmul.msk.f32.vlgmr.msra.gmra.mxu3 %vm75_vm0, %v5912_v8  ;;  %v47_v18 = vld [vmem:[%s14461_s1 + $0x30] sm:$0xff]  ;;  %v48_v19 = vld [vmem:[%s14461_s1 + $0x38] sm:$0xff]  ;;  %v5988_v20 = vld [vmem:[%s14462_s0 + $0x20] sm:$0xff] }
   0x8   :  { %278 = vmatpush.msrb.mxu0 %v53_v12  ;;  %319 = vmatpush.msrb.mxu1 %v54_v13  ;;  %v627_v21 = vld [vmem:[%s14463_s3 + $0x3c0] sm:$0xff]  ;;  %v628_v23 = vld [vmem:[%s14463_s3 + $0x3c8] sm:$0xff]  ;;  %v6086_v46 = vld [vmem:[%s14462_s0 + $0x30] sm:$0xff] }
   0x9   :  { %360 = vmatpush.msrb.mxu2 %v55_v14  ;;  %401 = vmatpush.msrb.mxu3 %v56_v15  ;;  %v755_v22 = vld [vmem:[%s14463_s3 + $0x7c0] sm:$0xff]  ;;  %v756_v24 = vld [vmem:[%s14463_s3 + $0x7c8] sm:$0xff]  ;;  %v6135_v59 = vld [vmem:[%s14462_s0 + $0x38] sm:$0xff] }
   0xa   :  { %279 = vmatpush.msrb.mxu0 %v45_v16  ;;  %320 = vmatpush.msrb.mxu1 %v46_v17  ;;  %v619_v25 = vld [vmem:[%s14463_s3 + $0x380] sm:$0xff]  ;;  %v620_v27 = vld [vmem:[%s14463_s3 + $0x388] sm:$0xff] }
   0xb   :  { %361 = vmatpush.msrb.mxu2 %v47_v18  ;;  %402 = vmatpush.msrb.mxu3 %v48_v19  ;;  %v747_v26 = vld [vmem:[%s14463_s3 + $0x780] sm:$0xff]  ;;  %v748_v28 = vld [vmem:[%s14463_s3 + $0x788] sm:$0xff] }
   0xc   :  { %763 = vmatpush.msra.mxu0 %v627_v21  ;;  %783 = vmatpush.msra.mxu1 %v755_v22  ;;  %v611_v29 = vld [vmem:[%s14463_s3 + $0x340] sm:$0xff]  ;;  %v612_v31 = vld [vmem:[%s14463_s3 + $0x348] sm:$0xff] }
   0xd   :  { %803 = vmatpush.msra.mxu2 %v628_v23  ;;  %823 = vmatpush.msra.mxu3 %v756_v24  ;;  %v739_v30 = vld [vmem:[%s14463_s3 + $0x740] sm:$0xff]  ;;  %v740_v32 = vld [vmem:[%s14463_s3 + $0x748] sm:$0xff] }
   0xe   :  { %4509 = vmatmul.msk.f32.gmra.mxu0 %vm75_vm0, %v5925_v9  ;;  %4517 = vmatmul.msk.f32.gmra.mxu1 %vm75_vm0, %v5925_v9  ;;  %v6037_v33 = vld [vmem:[%s14462_s0 + $0x28] sm:$0xff]  ;;  %v603_v34 = vld [vmem:[%s14463_s3 + $0x300] sm:$0xff] }
   0xf   :  { %4525 = vmatmul.msk.f32.gmra.mxu2 %vm75_vm0, %v5925_v9  ;;  %4533 = vmatmul.msk.f32.gmra.mxu3 %vm75_vm0, %v5925_v9  ;;  %v731_v35 = vld [vmem:[%s14463_s3 + $0x700] sm:$0xff]  ;;  %v604_v36 = vld [vmem:[%s14463_s3 + $0x308] sm:$0xff] }
  0x10   :  { %764 = vmatpush.msra.mxu0 %v619_v25  ;;  %784 = vmatpush.msra.mxu1 %v747_v26  ;;  %v732_v37 = vld [vmem:[%s14463_s3 + $0x708] sm:$0xff]  ;;  %v595_v38 = vld [vmem:[%s14463_s3 + $0x2c0] sm:$0xff] }
  0x11   :  { %804 = vmatpush.msra.mxu2 %v620_v27  ;;  %824 = vmatpush.msra.mxu3 %v748_v28  ;;  %v723_v39 = vld [vmem:[%s14463_s3 + $0x6c0] sm:$0xff]  ;;  %v596_v40 = vld [vmem:[%s14463_s3 + $0x2c8] sm:$0xff]  ;;  %v629_v28 = vld [vmem:[%s14463_s3 + $0x3d0] sm:$0xff] }
  0x12   :  { %765 = vmatpush.msra.mxu0 %v611_v29  ;;  %785 = vmatpush.msra.mxu1 %v739_v30  ;;  %v724_v41 = vld [vmem:[%s14463_s3 + $0x6c8] sm:$0xff]  ;;  %v587_v42 = vld [vmem:[%s14463_s3 + $0x280] sm:$0xff]  ;;  %v757_v29 = vld [vmem:[%s14463_s3 + $0x7d0] sm:$0xff] }
  0x13   :  { %805 = vmatpush.msra.mxu2 %v612_v31  ;;  %825 = vmatpush.msra.mxu3 %v740_v32  ;;  %v715_v43 = vld [vmem:[%s14463_s3 + $0x680] sm:$0xff]  ;;  %v588_v44 = vld [vmem:[%s14463_s3 + $0x288] sm:$0xff]  ;;  %v630_v30 = vld [vmem:[%s14463_s3 + $0x3d8] sm:$0xff] }
  0x14   :  { %766 = vmatpush.msra.mxu0 %v603_v34  ;;  %786 = vmatpush.msra.mxu1 %v731_v35  ;;  %v716_v45 = vld [vmem:[%s14463_s3 + $0x688] sm:$0xff]  ;;  %v579_v47 = vld [vmem:[%s14463_s3 + $0x240] sm:$0xff]  ;;  %v758_v31 = vld [vmem:[%s14463_s3 + $0x7d8] sm:$0xff] }
  0x15   :  { %806 = vmatpush.msra.mxu2 %v604_v36  ;;  %826 = vmatpush.msra.mxu3 %v732_v37  ;;  %v707_v48 = vld [vmem:[%s14463_s3 + $0x640] sm:$0xff]  ;;  %v580_v49 = vld [vmem:[%s14463_s3 + $0x248] sm:$0xff]  ;;  %v749_v32 = vld [vmem:[%s14463_s3 + $0x790] sm:$0xff] }
  0x16   :  { %4510 = vmatmul.msk.f32.gmra.mxu0 %vm75_vm0, %v5938_v10  ;;  %4518 = vmatmul.msk.f32.gmra.mxu1 %vm75_vm0, %v5938_v10  ;;  %v708_v50 = vld [vmem:[%s14463_s3 + $0x648] sm:$0xff]  ;;  %v571_v51 = vld [vmem:[%s14463_s3 + $0x200] sm:$0xff]  ;;  %v622_v34 = vld [vmem:[%s14463_s3 + $0x398] sm:$0xff] }
  0x17   :  { %4526 = vmatmul.msk.f32.gmra.mxu2 %vm75_vm0, %v5938_v10  ;;  %4534 = vmatmul.msk.f32.gmra.mxu3 %vm75_vm0, %v5938_v10  ;;  %v699_v52 = vld [vmem:[%s14463_s3 + $0x600] sm:$0xff]  ;;  %v572_v53 = vld [vmem:[%s14463_s3 + $0x208] sm:$0xff]  ;;  %v750_v35 = vld [vmem:[%s14463_s3 + $0x798] sm:$0xff] }
  0x18   :  { %767 = vmatpush.msra.mxu0 %v595_v38  ;;  %787 = vmatpush.msra.mxu1 %v723_v39  ;;  %v700_v54 = vld [vmem:[%s14463_s3 + $0x608] sm:$0xff]  ;;  %v563_v55 = vld [vmem:[%s14463_s3 + $0x1c0] sm:$0xff]  ;;  %v613_v36 = vld [vmem:[%s14463_s3 + $0x350] sm:$0xff] }
  0x19   :  { %807 = vmatpush.msra.mxu2 %v596_v40  ;;  %827 = vmatpush.msra.mxu3 %v724_v41  ;;  %v691_v56 = vld [vmem:[%s14463_s3 + $0x5c0] sm:$0xff]  ;;  %v564_v57 = vld [vmem:[%s14463_s3 + $0x1c8] sm:$0xff]  ;;  %v741_v37 = vld [vmem:[%s14463_s3 + $0x750] sm:$0xff] }
  0x1a   :  { %768 = vmatpush.msra.mxu0 %v587_v42  ;;  %788 = vmatpush.msra.mxu1 %v715_v43  ;;  %v692_v58 = vld [vmem:[%s14463_s3 + $0x5c8] sm:$0xff]  ;;  %v555_v60 = vld [vmem:[%s14463_s3 + $0x180] sm:$0xff]  ;;  %v614_v38 = vld [vmem:[%s14463_s3 + $0x358] sm:$0xff] }
  0x1b   :  { %808 = vmatpush.msra.mxu2 %v588_v44  ;;  %828 = vmatpush.msra.mxu3 %v716_v45  ;;  %v683_v61 = vld [vmem:[%s14463_s3 + $0x580] sm:$0xff]  ;;  %v556_v62 = vld [vmem:[%s14463_s3 + $0x188] sm:$0xff]  ;;  %v742_v39 = vld [vmem:[%s14463_s3 + $0x758] sm:$0xff] }
  0x1c   :  { %769 = vmatpush.msra.mxu0 %v579_v47  ;;  %789 = vmatpush.msra.mxu1 %v707_v48  ;;  %v684_v63 = vld [vmem:[%s14463_s3 + $0x588] sm:$0xff]  ;;  %v547_v0 = vld [vmem:[%s14463_s3 + $0x140] sm:$0xff]  ;;  %v605_v40 = vld [vmem:[%s14463_s3 + $0x310] sm:$0xff] }
  0x1d   :  { %809 = vmatpush.msra.mxu2 %v580_v49  ;;  %829 = vmatpush.msra.mxu3 %v708_v50  ;;  %v675_v1 = vld [vmem:[%s14463_s3 + $0x540] sm:$0xff]  ;;  %v548_v2 = vld [vmem:[%s14463_s3 + $0x148] sm:$0xff]  ;;  %v733_v41 = vld [vmem:[%s14463_s3 + $0x710] sm:$0xff] }
  0x1e   :  { %4511 = vmatmul.msk.f32.gmra.mxu0 %vm75_vm0, %v5951_v11  ;;  %4519 = vmatmul.msk.f32.gmra.mxu1 %vm75_vm0, %v5951_v11  ;;  %v676_v3 = vld [vmem:[%s14463_s3 + $0x548] sm:$0xff]  ;;  %v539_v4 = vld [vmem:[%s14463_s3 + $0x100] sm:$0xff]  ;;  %v606_v42 = vld [vmem:[%s14463_s3 + $0x318] sm:$0xff] }
  0x1f   :  { %4527 = vmatmul.msk.f32.gmra.mxu2 %vm75_vm0, %v5951_v11  ;;  %4535 = vmatmul.msk.f32.gmra.mxu3 %vm75_vm0, %v5951_v11  ;;  %v667_v5 = vld [vmem:[%s14463_s3 + $0x500] sm:$0xff]  ;;  %v540_v6 = vld [vmem:[%s14463_s3 + $0x108] sm:$0xff]  ;;  %v734_v43 = vld [vmem:[%s14463_s3 + $0x718] sm:$0xff] }
  0x20   :  { %770 = vmatpush.msra.mxu0 %v571_v51  ;;  %790 = vmatpush.msra.mxu1 %v699_v52  ;;  %v668_v7 = vld [vmem:[%s14463_s3 + $0x508] sm:$0xff]  ;;  %v531_v12 = vld [vmem:[%s14463_s3 + $0xc0] sm:$0xff]  ;;  %v725_v44 = vld [vmem:[%s14463_s3 + $0x6d0] sm:$0xff] }
  0x21   :  { %810 = vmatpush.msra.mxu2 %v572_v53  ;;  %830 = vmatpush.msra.mxu3 %v700_v54  ;;  %v659_v13 = vld [vmem:[%s14463_s3 + $0x4c0] sm:$0xff]  ;;  %v532_v14 = vld [vmem:[%s14463_s3 + $0xc8] sm:$0xff]  ;;  %v598_v45 = vld [vmem:[%s14463_s3 + $0x2d8] sm:$0xff] }
  0x22   :  { %771 = vmatpush.msra.mxu0 %v563_v55  ;;  %791 = vmatpush.msra.mxu1 %v691_v56  ;;  %v660_v15 = vld [vmem:[%s14463_s3 + $0x4c8] sm:$0xff]  ;;  %v523_v16 = vld [vmem:[%s14463_s3 + $0x80] sm:$0xff]  ;;  %v726_v47 = vld [vmem:[%s14463_s3 + $0x6d8] sm:$0xff] }
  0x23   :  { %811 = vmatpush.msra.mxu2 %v564_v57  ;;  %831 = vmatpush.msra.mxu3 %v692_v58  ;;  %v651_v17 = vld [vmem:[%s14463_s3 + $0x480] sm:$0xff]  ;;  %v524_v18 = vld [vmem:[%s14463_s3 + $0x88] sm:$0xff]  ;;  %v589_v48 = vld [vmem:[%s14463_s3 + $0x290] sm:$0xff] }
  0x24   :  { %772 = vmatpush.msra.mxu0 %v555_v60  ;;  %792 = vmatpush.msra.mxu1 %v683_v61  ;;  %v652_v19 = vld [vmem:[%s14463_s3 + $0x488] sm:$0xff]  ;;  %v643_v21 = vld [vmem:[%s14463_s3 + $0x440] sm:$0xff]  ;;  %v717_v49 = vld [vmem:[%s14463_s3 + $0x690] sm:$0xff] }
  0x25   :  { %812 = vmatpush.msra.mxu2 %v556_v62  ;;  %832 = vmatpush.msra.mxu3 %v684_v63  ;;  %v516_v22 = vld [vmem:[%s14463_s3 + $0x48] sm:$0xff]  ;;  %v507_v24 = vld [vmem:[%s14463_s3] sm:$0xff]  ;;  %v590_v50 = vld [vmem:[%s14463_s3 + $0x298] sm:$0xff] }
  0x26   :  { %4512 = vmatmul.msk.f32.gmra.mxu0 %vm75_vm0, %v5988_v20  ;;  %4520 = vmatmul.msk.f32.gmra.mxu1 %vm75_vm0, %v5988_v20  ;;  %v644_v23 = vld [vmem:[%s14463_s3 + $0x448] sm:$0xff]  ;;  %v635_v25 = vld [vmem:[%s14463_s3 + $0x400] sm:$0xff]  ;;  %v718_v51 = vld [vmem:[%s14463_s3 + $0x698] sm:$0xff] }
  0x27   :  { %4528 = vmatmul.msk.f32.gmra.mxu2 %vm75_vm0, %v5988_v20  ;;  %4536 = vmatmul.msk.f32.gmra.mxu3 %vm75_vm0, %v5988_v20  ;;  %v508_v26 = vld [vmem:[%s14463_s3 + $0x8] sm:$0xff]  ;;  %v581_v52 = vld [vmem:[%s14463_s3 + $0x250] sm:$0xff]  ;;  %v582_v54 = vld [vmem:[%s14463_s3 + $0x258] sm:$0xff] }
  0x28   :  { %773 = vmatpush.msra.mxu0 %v547_v0  ;;  %793 = vmatpush.msra.mxu1 %v675_v1  ;;  %v636_v27 = vld [vmem:[%s14463_s3 + $0x408] sm:$0xff]  ;;  %v709_v53 = vld [vmem:[%s14463_s3 + $0x650] sm:$0xff]  ;;  %v710_v55 = vld [vmem:[%s14463_s3 + $0x658] sm:$0xff] }
  0x29   :  { %813 = vmatpush.msra.mxu2 %v548_v2  ;;  %833 = vmatpush.msra.mxu3 %v676_v3  ;;  %v701_v56 = vld [vmem:[%s14463_s3 + $0x610] sm:$0xff]  ;;  %v6354_v57 = vld [vmem:[%s14463_s3 + $0x218] sm:$0xff] }
  0x2a   :  { %774 = vmatpush.msra.mxu0 %v539_v4  ;;  %794 = vmatpush.msra.mxu1 %v667_v5  ;;  %v702_v58 = vld [vmem:[%s14463_s3 + $0x618] sm:$0xff]  ;;  %v6363_v60 = vld [vmem:[%s14463_s3 + $0x1d0] sm:$0xff] }
  0x2b   :  { %814 = vmatpush.msra.mxu2 %v540_v6  ;;  %834 = vmatpush.msra.mxu3 %v668_v7  ;;  %v6368_v61 = vld [vmem:[%s14463_s3 + $0x5d0] sm:$0xff]  ;;  %v6377_v62 = vld [vmem:[%s14463_s3 + $0x1d8] sm:$0xff] }
  0x2c   :  { %775 = vmatpush.msra.mxu0 %v531_v12  ;;  %795 = vmatpush.msra.mxu1 %v659_v13  ;;  %v6382_v63 = vld [vmem:[%s14463_s3 + $0x5d8] sm:$0xff]  ;;  %v6391_v0 = vld [vmem:[%s14463_s3 + $0x190] sm:$0xff] }
  0x2d   :  { %815 = vmatpush.msra.mxu2 %v532_v14  ;;  %835 = vmatpush.msra.mxu3 %v660_v15  ;;  %v6396_v1 = vld [vmem:[%s14463_s3 + $0x590] sm:$0xff]  ;;  %v6403_v2 = vld [vmem:[%s14463_s3 + $0x198] sm:$0xff] }
  0x2e   :  { %4513 = vmatmul.msk.f32.gmra.mxu0 %vm75_vm0, %v6037_v33  ;;  %4521 = vmatmul.msk.f32.gmra.mxu1 %vm75_vm0, %v6037_v33  ;;  %v6415_v3 = vld [vmem:[%s14463_s3 + $0x150] sm:$0xff]  ;;  %v6427_v5 = vld [vmem:[%s14463_s3 + $0x158] sm:$0xff] }
  0x2f   :  { %4529 = vmatmul.msk.f32.gmra.mxu2 %vm75_vm0, %v6037_v33  ;;  %4537 = vmatmul.msk.f32.gmra.mxu3 %vm75_vm0, %v6037_v33  ;;  %v6420_v4 = vld [vmem:[%s14463_s3 + $0x550] sm:$0xff]  ;;  %v6432_v6 = vld [vmem:[%s14463_s3 + $0x558] sm:$0xff] }
  0x30   :  { %776 = vmatpush.msra.mxu0 %v523_v16  ;;  %796 = vmatpush.msra.mxu1 %v651_v17  ;;  %v6443_v7 = vld [vmem:[%s14463_s3 + $0x110] sm:$0xff]  ;;  %v6457_v13 = vld [vmem:[%s14463_s3 + $0x118] sm:$0xff] }
  0x31   :  { %816 = vmatpush.msra.mxu2 %v524_v18  ;;  %836 = vmatpush.msra.mxu3 %v652_v19  ;;  %v6448_v12 = vld [vmem:[%s14463_s3 + $0x510] sm:$0xff]  ;;  %v6462_v14 = vld [vmem:[%s14463_s3 + $0x518] sm:$0xff] }
  0x32   :  { %797 = vmatpush.msra.mxu1 %v643_v21  ;;  %v6471_v15 = vld [vmem:[%s14463_s3 + $0xd0] sm:$0xff]  ;;  %v6483_v17 = vld [vmem:[%s14463_s3 + $0xd8] sm:$0xff] }
  0x33   :  { %817 = vmatpush.msra.mxu2 %v516_v22  ;;  %837 = vmatpush.msra.mxu3 %v644_v23  ;;  %v6476_v16 = vld [vmem:[%s14463_s3 + $0x4d0] sm:$0xff]  ;;  %v6512_v21 = vld [vmem:[%s14463_s3 + $0x498] sm:$0xff] }
  0x34   :  { %798 = vmatpush.msra.mxu1 %v635_v25  ;;  %v6495_v18 = vld [vmem:[%s14463_s3 + $0x90] sm:$0xff]  ;;  %v6542_v25 = vld [vmem:[%s14463_s3 + $0x458] sm:$0xff] }
  0x35   :  { %818 = vmatpush.msra.mxu2 %v508_v26  ;;  %838 = vmatpush.msra.mxu3 %v636_v27  ;;  %v6500_v19 = vld [vmem:[%s14463_s3 + $0x490] sm:$0xff] }
  0x36   :  { %4514 = vmatmul.msk.f32.gmra.mxu0 %vm75_vm0, %v6086_v46  ;;  %4522 = vmatmul.msk.f32.gmra.mxu1 %vm75_vm0, %v6086_v46  ;;  %v6523_v22 = vld [vmem:[%s14463_s3 + $0x50] sm:$0xff] }
  0x37   :  { %4530 = vmatmul.msk.f32.gmra.mxu2 %vm75_vm0, %v6086_v46  ;;  %4538 = vmatmul.msk.f32.gmra.mxu3 %vm75_vm0, %v6086_v46  ;;  %v6528_v23 = vld [vmem:[%s14463_s3 + $0x450] sm:$0xff] }
  0x38   :  { %v6551_v26 = vld [vmem:[%s14463_s3 + $0x10] sm:$0xff] }
  0x39   :  { %v6556_v27 = vld [vmem:[%s14463_s3 + $0x410] sm:$0xff] }
  0x3e   :  { %4515 = vmatmul.msk.f32.gmra.mxu0 %vm75_vm0, %v6135_v59  ;;  %4523 = vmatmul.msk.f32.gmra.mxu1 %vm75_vm0, %v6135_v59 }
  0x3f   :  { %4531 = vmatmul.msk.f32.gmra.mxu2 %vm75_vm0, %v6135_v59  ;;  %4539 = vmatmul.msk.f32.gmra.mxu3 %vm75_vm0, %v6135_v59 }
  0x46   :  { %4540 = vmatmul.msk.f32.vlgmr.msrb.gmra.mxu0 %vm75_vm0, %v5912_v8  ;;  %4548 = vmatmul.msk.f32.vlgmr.msrb.gmra.mxu1 %vm75_vm0, %v5912_v8 }
  0x47   :  { %4556 = vmatmul.msk.f32.vlgmr.msrb.gmra.mxu2 %vm75_vm0, %v5912_v8  ;;  %4564 = vmatmul.msk.f32.vlgmr.msrb.gmra.mxu3 %vm75_vm0, %v5912_v8  ;;  %v515_v8 = vld [vmem:[%s14463_s3 + $0x40] sm:$0xff] }
  0x48   :  { %777 = vmatpush.msra.mxu0 %v515_v8  ;;  %863 = vmatpush.msrb.mxu1 %v757_v29  ;;  %v6507_v8 = vld [vmem:[%s14463_s3 + $0x98] sm:$0xff] }
  0x49   :  { %883 = vmatpush.msrb.mxu2 %v630_v30  ;;  %903 = vmatpush.msrb.mxu3 %v758_v31  ;;  %v631_v31 = vld [vmem:[%s14463_s3 + $0x3e0] sm:$0xff] }
  0x4a   :  { %778 = vmatpush.msra.mxu0 %v507_v24  ;;  %864 = vmatpush.msrb.mxu1 %v749_v32  ;;  %v6537_v24 = vld [vmem:[%s14463_s3 + $0x58] sm:$0xff]  ;;  %v14468_v32 = vmov 0.0  }
  0x4b   :  { %884 = vmatpush.msrb.mxu2 %v622_v34  ;;  %904 = vmatpush.msrb.mxu3 %v750_v35  ;;  %v760_v34 = vld [vmem:[%s14463_s3 + $0x7e8] sm:$0xff]  ;;  %v623_v35 = vld [vmem:[%s14463_s3 + $0x3a0] sm:$0xff] }
  0x4c   :  { %843 = vmatpush.msrb.mxu0 %v629_v28  ;;  %865 = vmatpush.msrb.mxu1 %v741_v37  ;;  %v6563_v28 = vld [vmem:[%s14463_s3 + $0x18] sm:$0xff]  ;;  %v624_v37 = vld [vmem:[%s14463_s3 + $0x3a8] sm:$0xff] }
  0x4d   :  { %885 = vmatpush.msrb.mxu2 %v614_v38  ;;  %905 = vmatpush.msrb.mxu3 %v742_v39  ;;  %v752_v38 = vld [vmem:[%s14463_s3 + $0x7a8] sm:$0xff]  ;;  %v615_v39 = vld [vmem:[%s14463_s3 + $0x360] sm:$0xff] }
  0x4e   :  { %4541 = vmatmul.msk.f32.gmra.mxu0 %vm75_vm0, %v5925_v9  ;;  %4549 = vmatmul.msk.f32.gmra.mxu1 %vm75_vm0, %v5925_v9 }
  0x4f   :  { %4557 = vmatmul.msk.f32.gmra.mxu2 %vm75_vm0, %v5925_v9  ;;  %4565 = vmatmul.msk.f32.gmra.mxu3 %vm75_vm0, %v5925_v9  ;;  %v621_v9 = vld [vmem:[%s14463_s3 + $0x390] sm:$0xff] }
  0x50   :  { %844 = vmatpush.msrb.mxu0 %v621_v9  ;;  %866 = vmatpush.msrb.mxu1 %v733_v41  ;;  %v759_v9 = vld [vmem:[%s14463_s3 + $0x7e0] sm:$0xff] }
  0x51   :  { %886 = vmatpush.msrb.mxu2 %v606_v42  ;;  %906 = vmatpush.msrb.mxu3 %v734_v43  ;;  %v616_v43 = vld [vmem:[%s14463_s3 + $0x368] sm:$0xff] }
  0x52   :  { %845 = vmatpush.msrb.mxu0 %v613_v36  ;;  %867 = vmatpush.msrb.mxu1 %v725_v44  ;;  %v751_v36 = vld [vmem:[%s14463_s3 + $0x7a0] sm:$0xff] }
  0x53   :  { %887 = vmatpush.msrb.mxu2 %v598_v45  ;;  %907 = vmatpush.msrb.mxu3 %v726_v47  ;;  %v607_v47 = vld [vmem:[%s14463_s3 + $0x320] sm:$0xff] }
  0x54   :  { %846 = vmatpush.msrb.mxu0 %v605_v40  ;;  %868 = vmatpush.msrb.mxu1 %v717_v49  ;;  %v743_v40 = vld [vmem:[%s14463_s3 + $0x760] sm:$0xff]  ;;  %v608_v49 = vld [vmem:[%s14463_s3 + $0x328] sm:$0xff] }
  0x55   :  { %888 = vmatpush.msrb.mxu2 %v590_v50  ;;  %908 = vmatpush.msrb.mxu3 %v718_v51  ;;  %v736_v50 = vld [vmem:[%s14463_s3 + $0x728] sm:$0xff]  ;;  %v599_v51 = vld [vmem:[%s14463_s3 + $0x2e0] sm:$0xff] }
  0x56   :  { %4542 = vmatmul.msk.f32.gmra.mxu0 %vm75_vm0, %v5938_v10  ;;  %4550 = vmatmul.msk.f32.gmra.mxu1 %vm75_vm0, %v5938_v10 }
  0x57   :  { %4558 = vmatmul.msk.f32.gmra.mxu2 %vm75_vm0, %v5938_v10  ;;  %4566 = vmatmul.msk.f32.gmra.mxu3 %vm75_vm0, %v5938_v10  ;;  %v597_v10 = vld [vmem:[%s14463_s3 + $0x2d0] sm:$0xff] }
  0x58   :  { %847 = vmatpush.msrb.mxu0 %v597_v10  ;;  %869 = vmatpush.msrb.mxu1 %v709_v53  ;;  %v744_v10 = vld [vmem:[%s14463_s3 + $0x768] sm:$0xff] }
  0x59   :  { %889 = vmatpush.msrb.mxu2 %v582_v54  ;;  %909 = vmatpush.msrb.mxu3 %v710_v55  ;;  %v600_v53 = vld [vmem:[%s14463_s3 + $0x2e8] sm:$0xff]  ;;  %v591_v55 = vld [vmem:[%s14463_s3 + $0x2a0] sm:$0xff] }
  0x5a   :  { %848 = vmatpush.msrb.mxu0 %v589_v48  ;;  %870 = vmatpush.msrb.mxu1 %v701_v56  ;;  %v735_v48 = vld [vmem:[%s14463_s3 + $0x720] sm:$0xff]  ;;  %v728_v54 = vld [vmem:[%s14463_s3 + $0x6e8] sm:$0xff] }
  0x5b   :  { %890 = vmatpush.msrb.mxu2 %v6354_v57  ;;  %910 = vmatpush.msrb.mxu3 %v702_v58  ;;  %v592_v56 = vld [vmem:[%s14463_s3 + $0x2a8] sm:$0xff] }
  0x5c   :  { %849 = vmatpush.msrb.mxu0 %v581_v52  ;;  %871 = vmatpush.msrb.mxu1 %v6368_v61  ;;  %v727_v52 = vld [vmem:[%s14463_s3 + $0x6e0] sm:$0xff]  ;;  %v720_v58 = vld [vmem:[%s14463_s3 + $0x6a8] sm:$0xff] }
  0x5d   :  { %891 = vmatpush.msrb.mxu2 %v6377_v62  ;;  %911 = vmatpush.msrb.mxu3 %v6382_v63 }
  0x5e   :  { %4543 = vmatmul.msk.f32.gmra.mxu0 %vm75_vm0, %v5951_v11  ;;  %4551 = vmatmul.msk.f32.gmra.mxu1 %vm75_vm0, %v5951_v11 }
  0x5f   :  { %4559 = vmatmul.msk.f32.gmra.mxu2 %vm75_vm0, %v5951_v11  ;;  %4567 = vmatmul.msk.f32.gmra.mxu3 %vm75_vm0, %v5951_v11  ;;  %v573_v11 = vld [vmem:[%s14463_s3 + $0x210] sm:$0xff] }
  0x60   :  { %850 = vmatpush.msrb.mxu0 %v573_v11  ;;  %872 = vmatpush.msrb.mxu1 %v6396_v1  ;;  %v719_v11 = vld [vmem:[%s14463_s3 + $0x6a0] sm:$0xff] }
  0x61   :  { %892 = vmatpush.msrb.mxu2 %v6403_v2 }
  0x62   :  { %851 = vmatpush.msrb.mxu0 %v6363_v60  ;;  %873 = vmatpush.msrb.mxu1 %v6420_v4 }
  0x63   :  { %893 = vmatpush.msrb.mxu2 %v6427_v5 }
  0x64   :  { %852 = vmatpush.msrb.mxu0 %v6391_v0  ;;  %874 = vmatpush.msrb.mxu1 %v6448_v12 }
  0x65   :  { %894 = vmatpush.msrb.mxu2 %v6457_v13 }
  0x66   :  { %4544 = vmatmul.msk.f32.gmra.mxu0 %vm75_vm0, %v5988_v20  ;;  %4552 = vmatmul.msk.f32.gmra.mxu1 %vm75_vm0, %v5988_v20 }
  0x67   :  { %4560 = vmatmul.msk.f32.gmra.mxu2 %vm75_vm0, %v5988_v20  ;;  %4568 = vmatmul.msk.f32.gmra.mxu3 %vm75_vm0, %v5988_v20  ;;  %v6408_v20 = vld [vmem:[%s14463_s3 + $0x598] sm:$0xff] }
  0x68   :  { %912 = vmatpush.msrb.mxu3 %v6408_v20  ;;  %853 = vmatpush.msrb.mxu0 %v6415_v3 }
  0x69   :  { %875 = vmatpush.msrb.mxu1 %v6476_v16  ;;  %895 = vmatpush.msrb.mxu2 %v6483_v17 }
  0x6a   :  { %913 = vmatpush.msrb.mxu3 %v6432_v6  ;;  %854 = vmatpush.msrb.mxu0 %v6443_v7 }
  0x6b   :  { %876 = vmatpush.msrb.mxu1 %v6500_v19  ;;  %896 = vmatpush.msrb.mxu2 %v6507_v8 }
  0x6c   :  { %914 = vmatpush.msrb.mxu3 %v6462_v14  ;;  %855 = vmatpush.msrb.mxu0 %v6471_v15 }
  0x6d   :  { %877 = vmatpush.msrb.mxu1 %v6528_v23  ;;  %897 = vmatpush.msrb.mxu2 %v6537_v24 }
  0x6e   :  { %4545 = vmatmul.msk.f32.gmra.mxu0 %vm75_vm0, %v6037_v33  ;;  %4553 = vmatmul.msk.f32.gmra.mxu1 %vm75_vm0, %v6037_v33 }
  0x6f   :  { %4561 = vmatmul.msk.f32.gmra.mxu2 %vm75_vm0, %v6037_v33  ;;  %4569 = vmatmul.msk.f32.gmra.mxu3 %vm75_vm0, %v6037_v33  ;;  %v6488_v33 = vld [vmem:[%s14463_s3 + $0x4d8] sm:$0xff] }
  0x70   :  { %915 = vmatpush.msrb.mxu3 %v6488_v33  ;;  %856 = vmatpush.msrb.mxu0 %v6495_v18 }
  0x71   :  { %878 = vmatpush.msrb.mxu1 %v6556_v27  ;;  %898 = vmatpush.msrb.mxu2 %v6563_v28 }
  0x72   :  { %916 = vmatpush.msrb.mxu3 %v6512_v21  ;;  %857 = vmatpush.msrb.mxu0 %v6523_v22 }
  0x74   :  { %917 = vmatpush.msrb.mxu3 %v6542_v25  ;;  %858 = vmatpush.msrb.mxu0 %v6551_v26 }
  0x76   :  { %4546 = vmatmul.msk.f32.gmra.mxu0 %vm75_vm0, %v6086_v46  ;;  %4554 = vmatmul.msk.f32.gmra.mxu1 %vm75_vm0, %v6086_v46 }
  0x77   :  { %4562 = vmatmul.msk.f32.gmra.mxu2 %vm75_vm0, %v6086_v46  ;;  %4570 = vmatmul.msk.f32.gmra.mxu3 %vm75_vm0, %v6086_v46  ;;  %v6568_v46 = vld [vmem:[%s14463_s3 + $0x418] sm:$0xff] }
  0x78   :  { %918 = vmatpush.msrb.mxu3 %v6568_v46 }
  0x7e   :  { %4547 = vmatmul.msk.f32.gmra.mxu0 %vm75_vm0, %v6135_v59  ;;  %4555 = vmatmul.msk.f32.gmra.mxu1 %vm75_vm0, %v6135_v59 }
  0x7f   :  { %4563 = vmatmul.msk.f32.gmra.mxu2 %vm75_vm0, %v6135_v59  ;;  %4571 = vmatmul.msk.f32.gmra.mxu3 %vm75_vm0, %v6135_v59  ;;  %v632_v59 = vld [vmem:[%s14463_s3 + $0x3e8] sm:$0xff] }
  0x83   :  { %v6584_v29 = vpop.f32.mrf.mxu0  ;;  %v6586_v30 = vpop.f32.mrf.mxu1 }
  0x86   :  { %779 = vmatmul.f32.vlgmr.msra.gmra.mxu0 %v14468_v32  ;;  %799 = vmatmul.f32.vlgmr.msra.gmra.mxu1 %v14468_v32 }
  0x87   :  { %819 = vmatmul.f32.vlgmr.msra.gmra.mxu2 %v14468_v32  ;;  %839 = vmatmul.f32.vlgmr.msra.gmra.mxu3 %v14468_v32 }
  0x88   :  { %923 = vmatpush.msra.mxu0 %v631_v31  ;;  %943 = vmatpush.msra.mxu1 %v759_v9 }
  0x89   :  { %963 = vmatpush.msra.mxu2 %v632_v59  ;;  %983 = vmatpush.msra.mxu3 %v760_v34  ;;  %v583_v59 = vld [vmem:[%s14463_s3 + $0x260] sm:$0xff] }
  0x8a   :  { %924 = vmatpush.msra.mxu0 %v623_v35  ;;  %944 = vmatpush.msra.mxu1 %v751_v36  ;;  %v6622_v41 = vpop.f32.mrf.mxu2  ;;  %v6624_v42 = vpop.f32.mrf.mxu3  ;;  %v711_v34 = vld [vmem:[%s14463_s3 + $0x660] sm:$0xff] }
  0x8b   :  { %964 = vmatpush.msra.mxu2 %v624_v37  ;;  %984 = vmatpush.msra.mxu3 %v752_v38  ;;  %v6632_v44 = vpop.f32.mrf.mxu0  ;;  %v6634_v45 = vpop.f32.mrf.mxu1  ;;  %v584_v37 = vld [vmem:[%s14463_s3 + $0x268] sm:$0xff] }
  0x8c   :  { %15075 = vst [vmem:[#allocation6_spill] sm:$0xff] %v6632_v44  ;;  %925 = vmatpush.msra.mxu0 %v615_v39  ;;  %945 = vmatpush.msra.mxu1 %v743_v40  ;;  %v712_v38 = vld [vmem:[%s14463_s3 + $0x668] sm:$0xff]  ;;  %v575_v39 = vld [vmem:[%s14463_s3 + $0x220] sm:$0xff] }
  0x8d   :  { %15076 = vst [vmem:[#allocation7_spill] sm:$0xff] %v6634_v45  ;;  %965 = vmatpush.msra.mxu2 %v616_v43  ;;  %985 = vmatpush.msra.mxu3 %v744_v10  ;;  %v703_v40 = vld [vmem:[%s14463_s3 + $0x620] sm:$0xff]  ;;  %v576_v43 = vld [vmem:[%s14463_s3 + $0x228] sm:$0xff] }
  0x8e   :  { %926 = vmatpush.msra.mxu0 %v607_v47  ;;  %946 = vmatpush.msra.mxu1 %v735_v48  ;;  %v704_v10 = vld [vmem:[%s14463_s3 + $0x628] sm:$0xff]  ;;  %v567_v47 = vld [vmem:[%s14463_s3 + $0x1e0] sm:$0xff] }
  0x8f   :  { %966 = vmatpush.msra.mxu2 %v608_v49  ;;  %986 = vmatpush.msra.mxu3 %v736_v50  ;;  %v695_v48 = vld [vmem:[%s14463_s3 + $0x5e0] sm:$0xff]  ;;  %v568_v49 = vld [vmem:[%s14463_s3 + $0x1e8] sm:$0xff] }
  0x90   :  { %859 = vmatmul.f32.vlgmr.msrb.gmra.mxu0 %v14468_v32  ;;  %879 = vmatmul.f32.vlgmr.msrb.gmra.mxu1 %v14468_v32  ;;  %v696_v50 = vld [vmem:[%s14463_s3 + $0x5e8] sm:$0xff] }
  0x91   :  { %899 = vmatmul.f32.vlgmr.msrb.gmra.mxu2 %v14468_v32  ;;  %919 = vmatmul.f32.vlgmr.msrb.gmra.mxu3 %v14468_v32 }
  0x92   :  { %927 = vmatpush.msra.mxu0 %v599_v51  ;;  %947 = vmatpush.msra.mxu1 %v727_v52  ;;  %v6676_v31 = vpop.f32.mrf.mxu2  ;;  %v6678_v9 = vpop.f32.mrf.mxu3  ;;  %v559_v51 = vld [vmem:[%s14463_s3 + $0x1a0] sm:$0xff] }
  0x93   :  { %15077 = vst [vmem:[#allocation8_spill] sm:$0xff] %v6676_v31  ;;  %967 = vmatpush.msra.mxu2 %v600_v53  ;;  %987 = vmatpush.msra.mxu3 %v728_v54  ;;  %v6686_v35 = vpop.f32.mrf.mxu0  ;;  %v6688_v36 = vpop.f32.mrf.mxu1  ;;  %v687_v52 = vld [vmem:[%s14463_s3 + $0x5a0] sm:$0xff]  ;;  %v560_v53 = vld [vmem:[%s14463_s3 + $0x1a8] sm:$0xff]  ;;  %v15109_v31 = vmov 0.0  }
  0x94   :  { %15078 = vst [vmem:[#allocation9_spill] sm:$0xff] %v6678_v9  ;;  %928 = vmatpush.msra.mxu0 %v591_v55  ;;  %948 = vmatpush.msra.mxu1 %v719_v11  ;;  %v688_v54 = vld [vmem:[%s14463_s3 + $0x5a8] sm:$0xff] }
  0x95   :  { %15079 = vst [vmem:[#allocation10_spill] sm:$0xff] %v6686_v35  ;;  %968 = vmatpush.msra.mxu2 %v592_v56  ;;  %988 = vmatpush.msra.mxu3 %v720_v58  ;;  %v551_v56 = vld [vmem:[%s14463_s3 + $0x160] sm:$0xff]  ;;  %v7100_v35 = vld [vmem:[%s14463_s3 + $0x438] sm:$0xff] }
  0x96   :  { %15080 = vst [vmem:[#allocation11_spill] sm:$0xff] %v6688_v36  ;;  %929 = vmatpush.msra.mxu0 %v583_v59  ;;  %949 = vmatpush.msra.mxu1 %v711_v34  ;;  %v679_v58 = vld [vmem:[%s14463_s3 + $0x560] sm:$0xff]  ;;  %v7088_v36 = vld [vmem:[%s14463_s3 + $0x430] sm:$0xff] }
  0x97   :  { %969 = vmatpush.msra.mxu2 %v584_v37  ;;  %989 = vmatpush.msra.mxu3 %v712_v38  ;;  %v552_v37 = vld [vmem:[%s14463_s3 + $0x168] sm:$0xff]  ;;  %15105 = vst [vmem:[#allocation36_spill] sm:$0xff] %v7088_v36 }
  0x98   :  { %930 = vmatpush.msra.mxu0 %v575_v39  ;;  %950 = vmatpush.msra.mxu1 %v703_v40  ;;  %v680_v38 = vld [vmem:[%s14463_s3 + $0x568] sm:$0xff]  ;;  %v543_v39 = vld [vmem:[%s14463_s3 + $0x120] sm:$0xff]  ;;  %15106 = vst [vmem:[#allocation37_spill] sm:$0xff] %v7100_v35 }
  0x99   :  { %970 = vmatpush.msra.mxu2 %v576_v43  ;;  %990 = vmatpush.msra.mxu3 %v704_v10  ;;  %v671_v40 = vld [vmem:[%s14463_s3 + $0x520] sm:$0xff]  ;;  %v544_v43 = vld [vmem:[%s14463_s3 + $0x128] sm:$0xff] }
  0x9a   :  { %931 = vmatpush.msra.mxu0 %v567_v47  ;;  %951 = vmatpush.msra.mxu1 %v695_v48  ;;  %v6732_v55 = vpop.f32.mrf.mxu2  ;;  %v6734_v11 = vpop.f32.mrf.mxu3  ;;  %v672_v10 = vld [vmem:[%s14463_s3 + $0x528] sm:$0xff]  ;;  %v535_v47 = vld [vmem:[%s14463_s3 + $0xe0] sm:$0xff] }
  0x9b   :  { %15081 = vst [vmem:[#allocation12_spill] sm:$0xff] %v6732_v55  ;;  %971 = vmatpush.msra.mxu2 %v568_v49  ;;  %991 = vmatpush.msra.mxu3 %v696_v50  ;;  %v6742_v59 = vpop.f32.mrf.mxu0  ;;  %v6744_v34 = vpop.f32.mrf.mxu1  ;;  %v663_v48 = vld [vmem:[%s14463_s3 + $0x4e0] sm:$0xff]  ;;  %v536_v49 = vld [vmem:[%s14463_s3 + $0xe8] sm:$0xff] }
  0x9c   :  { %15082 = vst [vmem:[#allocation13_spill] sm:$0xff] %v6734_v11  ;;  %932 = vmatpush.msra.mxu0 %v559_v51  ;;  %952 = vmatpush.msra.mxu1 %v687_v52  ;;  %v664_v50 = vld [vmem:[%s14463_s3 + $0x4e8] sm:$0xff]  ;;  %v527_v51 = vld [vmem:[%s14463_s3 + $0xa0] sm:$0xff]  ;;  %v7095_v11 = vld [vmem:[%s14463_s3 + $0x38] sm:$0xff] }
  0x9d   :  { %15083 = vst [vmem:[#allocation14_spill] sm:$0xff] %v6742_v59  ;;  %972 = vmatpush.msra.mxu2 %v560_v53  ;;  %992 = vmatpush.msra.mxu3 %v688_v54  ;;  %v655_v52 = vld [vmem:[%s14463_s3 + $0x4a0] sm:$0xff]  ;;  %v528_v53 = vld [vmem:[%s14463_s3 + $0xa8] sm:$0xff]  ;;  %v7076_v59 = vld [vmem:[%s14463_s3 + $0x478] sm:$0xff] }
  0x9e   :  { %15084 = vst [vmem:[#allocation15_spill] sm:$0xff] %v6744_v34  ;;  %933 = vmatpush.msra.mxu0 %v551_v56  ;;  %953 = vmatpush.msra.mxu1 %v679_v58  ;;  %v656_v54 = vld [vmem:[%s14463_s3 + $0x4a8] sm:$0xff] }
  0x9f   :  { %973 = vmatpush.msra.mxu2 %v552_v37  ;;  %993 = vmatpush.msra.mxu3 %v680_v38  ;;  %v519_v37 = vld [vmem:[%s14463_s3 + $0x60] sm:$0xff]  ;;  %15104 = vst [vmem:[#allocation35_spill] sm:$0xff] %v7076_v59 }
  0xa0   :  { %934 = vmatpush.msra.mxu0 %v543_v39  ;;  %954 = vmatpush.msra.mxu1 %v671_v40  ;;  %v647_v38 = vld [vmem:[%s14463_s3 + $0x460] sm:$0xff] }
  0xa1   :  { %974 = vmatpush.msra.mxu2 %v544_v43  ;;  %994 = vmatpush.msra.mxu3 %v672_v10  ;;  %v520_v43 = vld [vmem:[%s14463_s3 + $0x68] sm:$0xff] }
  0xa2   :  { %935 = vmatpush.msra.mxu0 %v535_v47  ;;  %955 = vmatpush.msra.mxu1 %v663_v48  ;;  %v6788_v56 = vpop.f32.mrf.mxu2  ;;  %v6790_v58 = vpop.f32.mrf.mxu3  ;;  %v648_v10 = vld [vmem:[%s14463_s3 + $0x468] sm:$0xff]  ;;  %v511_v47 = vld [vmem:[%s14463_s3 + $0x20] sm:$0xff] }
  0xa3   :  { %15085 = vst [vmem:[#allocation16_spill] sm:$0xff] %v6788_v56  ;;  %975 = vmatpush.msra.mxu2 %v536_v49  ;;  %995 = vmatpush.msra.mxu3 %v664_v50  ;;  %v6798_v39 = vpop.f32.mrf.mxu0  ;;  %v6800_v40 = vpop.f32.mrf.mxu1  ;;  %v639_v48 = vld [vmem:[%s14463_s3 + $0x420] sm:$0xff]  ;;  %v512_v49 = vld [vmem:[%s14463_s3 + $0x28] sm:$0xff]  ;;  %v7083_v56 = vld [vmem:[%s14463_s3 + $0x30] sm:$0xff] }
  0xa4   :  { %15086 = vst [vmem:[#allocation17_spill] sm:$0xff] %v6790_v58  ;;  %936 = vmatpush.msra.mxu0 %v527_v51  ;;  %956 = vmatpush.msra.mxu1 %v655_v52  ;;  %v640_v50 = vld [vmem:[%s14463_s3 + $0x428] sm:$0xff]  ;;  %v633_v51 = vld [vmem:[%s14463_s3 + $0x3f0] sm:$0xff]  ;;  %v7071_v58 = vld [vmem:[%s14463_s3 + $0x78] sm:$0xff] }
  0xa5   :  { %15087 = vst [vmem:[#allocation18_spill] sm:$0xff] %v6798_v39  ;;  %976 = vmatpush.msra.mxu2 %v528_v53  ;;  %996 = vmatpush.msra.mxu3 %v656_v54  ;;  %v761_v52 = vld [vmem:[%s14463_s3 + $0x7f0] sm:$0xff]  ;;  %v634_v53 = vld [vmem:[%s14463_s3 + $0x3f8] sm:$0xff] }
  0xa6   :  { %15088 = vst [vmem:[#allocation19_spill] sm:$0xff] %v6800_v40  ;;  %937 = vmatpush.msra.mxu0 %v519_v37  ;;  %957 = vmatpush.msra.mxu1 %v647_v38  ;;  %v762_v54 = vld [vmem:[%s14463_s3 + $0x7f8] sm:$0xff]  ;;  %v7037_v39 = vld [vmem:[%s14463_s3 + $0x4b0] sm:$0xff] }
  0xa7   :  { %977 = vmatpush.msra.mxu2 %v520_v43  ;;  %997 = vmatpush.msra.mxu3 %v648_v10  ;;  %v625_v43 = vld [vmem:[%s14463_s3 + $0x3b0] sm:$0xff] }
  0xa8   :  { %938 = vmatpush.msra.mxu0 %v511_v47  ;;  %958 = vmatpush.msra.mxu1 %v639_v48  ;;  %v753_v10 = vld [vmem:[%s14463_s3 + $0x7b0] sm:$0xff] }
  0xa9   :  { %978 = vmatpush.msra.mxu2 %v512_v49  ;;  %998 = vmatpush.msra.mxu3 %v640_v50  ;;  %v626_v49 = vld [vmem:[%s14463_s3 + $0x3b8] sm:$0xff] }
  0xaa   :  { %939 = vmatmul.f32.vlgmr.msra.gmra.mxu0 %v14468_v32  ;;  %959 = vmatmul.f32.vlgmr.msra.gmra.mxu1 %v14468_v32  ;;  %v6834_v37 = vpop.f32.mrf.mxu2  ;;  %v6836_v38 = vpop.f32.mrf.mxu3  ;;  %v754_v50 = vld [vmem:[%s14463_s3 + $0x7b8] sm:$0xff] }
  0xab   :  { %15089 = vst [vmem:[#allocation20_spill] sm:$0xff] %v6834_v37  ;;  %979 = vmatmul.f32.vlgmr.msra.gmra.mxu2 %v14468_v32  ;;  %999 = vmatmul.f32.vlgmr.msra.gmra.mxu3 %v14468_v32  ;;  %v6846_v47 = vpop.f32.mrf.mxu0  ;;  %v6848_v48 = vpop.f32.mrf.mxu1  ;;  %v617_v32 = vld [vmem:[%s14463_s3 + $0x370] sm:$0xff] }
  0xac   :  { %15090 = vst [vmem:[#allocation21_spill] sm:$0xff] %v6836_v38  ;;  %1003 = vmatpush.msrb.mxu0 %v633_v51  ;;  %1023 = vmatpush.msrb.mxu1 %v761_v52  ;;  %v618_v51 = vld [vmem:[%s14463_s3 + $0x378] sm:$0xff] }
  0xad   :  { %15091 = vst [vmem:[#allocation22_spill] sm:$0xff] %v6846_v47  ;;  %1043 = vmatpush.msrb.mxu2 %v634_v53  ;;  %1063 = vmatpush.msrb.mxu3 %v762_v54  ;;  %v746_v52 = vld [vmem:[%s14463_s3 + $0x778] sm:$0xff]  ;;  %v609_v53 = vld [vmem:[%s14463_s3 + $0x330] sm:$0xff] }
  0xae   :  { %15092 = vst [vmem:[#allocation23_spill] sm:$0xff] %v6848_v48  ;;  %v745_v48 = vld [vmem:[%s14463_s3 + $0x770] sm:$0xff]  ;;  %1004 = vmatpush.msrb.mxu0 %v625_v43  ;;  %1024 = vmatpush.msrb.mxu1 %v753_v10  ;;  %v610_v43 = vld [vmem:[%s14463_s3 + $0x338] sm:$0xff] }
  0xaf   :  { %1044 = vmatpush.msrb.mxu2 %v626_v49  ;;  %1064 = vmatpush.msrb.mxu3 %v754_v50  ;;  %v737_v54 = vld [vmem:[%s14463_s3 + $0x730] sm:$0xff]  ;;  %v738_v10 = vld [vmem:[%s14463_s3 + $0x738] sm:$0xff] }
  0xb0   :  { %1005 = vmatpush.msrb.mxu0 %v617_v32  ;;  %1025 = vmatpush.msrb.mxu1 %v745_v48  ;;  %v601_v49 = vld [vmem:[%s14463_s3 + $0x2f0] sm:$0xff]  ;;  %v602_v32 = vld [vmem:[%s14463_s3 + $0x2f8] sm:$0xff] }
  0xb1   :  { %1045 = vmatpush.msrb.mxu2 %v618_v51  ;;  %1065 = vmatpush.msrb.mxu3 %v746_v52  ;;  %v729_v50 = vld [vmem:[%s14463_s3 + $0x6f0] sm:$0xff]  ;;  %v730_v48 = vld [vmem:[%s14463_s3 + $0x6f8] sm:$0xff] }
  0xb2   :  { %1006 = vmatpush.msrb.mxu0 %v609_v53  ;;  %1026 = vmatpush.msrb.mxu1 %v737_v54  ;;  %v6892_v51 = vpop.f32.mrf.mxu2  ;;  %v6894_v52 = vpop.f32.mrf.mxu3  ;;  %v593_v47 = vld [vmem:[%s14463_s3 + $0x2b0] sm:$0xff] }
  0xb3   :  { %15093 = vst [vmem:[#allocation24_spill] sm:$0xff] %v6892_v51  ;;  %1046 = vmatpush.msrb.mxu2 %v610_v43  ;;  %1066 = vmatpush.msrb.mxu3 %v738_v10  ;;  %v721_v53 = vld [vmem:[%s14463_s3 + $0x6b0] sm:$0xff]  ;;  %v6902_v54 = vpop.f32.mrf.mxu0  ;;  %v6904_v40 = vpop.f32.mrf.mxu1  ;;  %v722_v43 = vld [vmem:[%s14463_s3 + $0x6b8] sm:$0xff] }
  0xb4   :  { %15094 = vst [vmem:[#allocation25_spill] sm:$0xff] %v6894_v52  ;;  %1007 = vmatpush.msrb.mxu0 %v601_v49  ;;  %1027 = vmatpush.msrb.mxu1 %v729_v50  ;;  %v594_v52 = vld [vmem:[%s14463_s3 + $0x2b8] sm:$0xff]  ;;  %v585_v10 = vld [vmem:[%s14463_s3 + $0x270] sm:$0xff] }
  0xb5   :  { %15095 = vst [vmem:[#allocation26_spill] sm:$0xff] %v6902_v54  ;;  %1047 = vmatpush.msrb.mxu2 %v602_v32  ;;  %1067 = vmatpush.msrb.mxu3 %v730_v48  ;;  %v586_v49 = vld [vmem:[%s14463_s3 + $0x278] sm:$0xff]  ;;  %v577_v32 = vld [vmem:[%s14463_s3 + $0x230] sm:$0xff] }
  0xb6   :  { %15096 = vst [vmem:[#allocation27_spill] sm:$0xff] %v6904_v40  ;;  %v713_v40 = vld [vmem:[%s14463_s3 + $0x670] sm:$0xff]  ;;  %1008 = vmatpush.msrb.mxu0 %v593_v47  ;;  %1028 = vmatpush.msrb.mxu1 %v721_v53  ;;  %v714_v50 = vld [vmem:[%s14463_s3 + $0x678] sm:$0xff] }
  0xb7   :  { %1048 = vmatpush.msrb.mxu2 %v594_v52  ;;  %1068 = vmatpush.msrb.mxu3 %v722_v43  ;;  %v705_v48 = vld [vmem:[%s14463_s3 + $0x630] sm:$0xff]  ;;  %v578_v47 = vld [vmem:[%s14463_s3 + $0x238] sm:$0xff] }
  0xb8   :  { %1009 = vmatpush.msrb.mxu0 %v585_v10  ;;  %1029 = vmatpush.msrb.mxu1 %v713_v40  ;;  %v706_v53 = vld [vmem:[%s14463_s3 + $0x638] sm:$0xff]  ;;  %v569_v52 = vld [vmem:[%s14463_s3 + $0x1f0] sm:$0xff] }
  0xb9   :  { %1049 = vmatpush.msrb.mxu2 %v586_v49  ;;  %1069 = vmatpush.msrb.mxu3 %v714_v50  ;;  %v697_v43 = vld [vmem:[%s14463_s3 + $0x5f0] sm:$0xff]  ;;  %v570_v40 = vld [vmem:[%s14463_s3 + $0x1f8] sm:$0xff] }
  0xba   :  { %1010 = vmatpush.msrb.mxu0 %v577_v32  ;;  %1030 = vmatpush.msrb.mxu1 %v705_v48  ;;  %v698_v10 = vld [vmem:[%s14463_s3 + $0x5f8] sm:$0xff]  ;;  %v6948_v49 = vpop.f32.mrf.mxu2  ;;  %v6950_v50 = vpop.f32.mrf.mxu3  ;;  %v561_v54 = vld [vmem:[%s14463_s3 + $0x1b0] sm:$0xff] }
  0xbb   :  { %15097 = vst [vmem:[#allocation28_spill] sm:$0xff] %v6948_v49  ;;  %1050 = vmatpush.msrb.mxu2 %v578_v47  ;;  %1070 = vmatpush.msrb.mxu3 %v706_v53  ;;  %v689_v32 = vld [vmem:[%s14463_s3 + $0x5b0] sm:$0xff]  ;;  %v6958_v48 = vpop.f32.mrf.mxu0  ;;  %v6960_v51 = vpop.f32.mrf.mxu1  ;;  %v690_v47 = vld [vmem:[%s14463_s3 + $0x5b8] sm:$0xff] }
  0xbc   :  { %15098 = vst [vmem:[#allocation29_spill] sm:$0xff] %v6950_v50  ;;  %1011 = vmatpush.msrb.mxu0 %v569_v52  ;;  %1031 = vmatpush.msrb.mxu1 %v697_v43  ;;  %v6965_v50 = vld [vmem:[%s14463_s3 + $0x1b8] sm:$0xff]  ;;  %v6973_v53 = vld [vmem:[%s14463_s3 + $0x170] sm:$0xff] }
  0xbd   :  { %15099 = vst [vmem:[#allocation30_spill] sm:$0xff] %v6958_v48  ;;  %1051 = vmatpush.msrb.mxu2 %v570_v40  ;;  %1071 = vmatpush.msrb.mxu3 %v698_v10  ;;  %v681_v52 = vld [vmem:[%s14463_s3 + $0x570] sm:$0xff]  ;;  %v6981_v43 = vld [vmem:[%s14463_s3 + $0x178] sm:$0xff] }
  0xbe   :  { %15100 = vst [vmem:[#allocation31_spill] sm:$0xff] %v6960_v51  ;;  %1012 = vmatpush.msrb.mxu0 %v561_v54  ;;  %1032 = vmatpush.msrb.mxu1 %v689_v32  ;;  %v682_v40 = vld [vmem:[%s14463_s3 + $0x578] sm:$0xff]  ;;  %v6990_v10 = vld [vmem:[%s14463_s3 + $0x130] sm:$0xff] }
  0xbf   :  { %1052 = vmatpush.msrb.mxu2 %v6965_v50  ;;  %1072 = vmatpush.msrb.mxu3 %v690_v47  ;;  %v673_v54 = vld [vmem:[%s14463_s3 + $0x530] sm:$0xff]  ;;  %v6999_v32 = vld [vmem:[%s14463_s3 + $0x138] sm:$0xff] }
  0xc0   :  { %1013 = vmatpush.msrb.mxu0 %v6973_v53  ;;  %1033 = vmatpush.msrb.mxu1 %v681_v52  ;;  %v674_v47 = vld [vmem:[%s14463_s3 + $0x538] sm:$0xff]  ;;  %v7008_v51 = vld [vmem:[%s14463_s3 + $0xf0] sm:$0xff] }
  0xc1   :  { %1053 = vmatpush.msrb.mxu2 %v6981_v43  ;;  %1073 = vmatpush.msrb.mxu3 %v682_v40  ;;  %v665_v52 = vld [vmem:[%s14463_s3 + $0x4f0] sm:$0xff]  ;;  %v7017_v48 = vld [vmem:[%s14463_s3 + $0xf8] sm:$0xff] }
  0xc2   :  { %1014 = vmatpush.msrb.mxu0 %v6990_v10  ;;  %1034 = vmatpush.msrb.mxu1 %v673_v54  ;;  %v7022_v40 = vld [vmem:[%s14463_s3 + $0x4f8] sm:$0xff]  ;;  %v7024_v49 = vpop.f32.mrf.mxu2  ;;  %v7026_v38 = vpop.f32.mrf.mxu3  ;;  %v7032_v54 = vld [vmem:[%s14463_s3 + $0xb0] sm:$0xff] }
  0xc3   :  { %15101 = vst [vmem:[#allocation32_spill] sm:$0xff] %v7024_v49  ;;  %1054 = vmatpush.msrb.mxu2 %v6999_v32  ;;  %1074 = vmatpush.msrb.mxu3 %v674_v47  ;;  %v7039_v37 = vpop.f32.mrf.mxu0  ;;  %v7041_v34 = vpop.f32.mrf.mxu1  ;;  %v7047_v47 = vld [vmem:[%s14463_s3 + $0xb8] sm:$0xff]  ;;  %v7059_v49 = vld [vmem:[%s14463_s3 + $0x70] sm:$0xff] }
  0xc4   :  { %15102 = vst [vmem:[#allocation33_spill] sm:$0xff] %v7026_v38  ;;  %1015 = vmatpush.msrb.mxu0 %v7008_v51  ;;  %1035 = vmatpush.msrb.mxu1 %v665_v52  ;;  %v7052_v38 = vld [vmem:[%s14463_s3 + $0x4b8] sm:$0xff]  ;;  %v7064_v52 = vld [vmem:[%s14463_s3 + $0x470] sm:$0xff] }
  0xc5   :  { %1055 = vmatpush.msrb.mxu2 %v7017_v48  ;;  %1075 = vmatpush.msrb.mxu3 %v7022_v40  ;;  %15103 = vst [vmem:[#allocation34_spill] sm:$0xff] %v7064_v52 }
  0xc6   :  { %1016 = vmatpush.msrb.mxu0 %v7032_v54  ;;  %1036 = vmatpush.msrb.mxu1 %v7037_v39 }
  0xc7   :  { %1056 = vmatpush.msrb.mxu2 %v7047_v47  ;;  %1076 = vmatpush.msrb.mxu3 %v7052_v38 }
  0xc8   :  { %1017 = vmatpush.msrb.mxu0 %v7059_v49  ;;  %1037 = vmatpush.msrb.mxu1 %v7064_v52 }
  0xc9   :  { %1057 = vmatpush.msrb.mxu2 %v7071_v58  ;;  %1077 = vmatpush.msrb.mxu3 %v7076_v59  ;;  %v7153_v59 = vld [vmem:[%s14463_s3 + $0x388] sm:$0xff] }
  0xca   :  { %1018 = vmatpush.msrb.mxu0 %v7083_v56  ;;  %1038 = vmatpush.msrb.mxu1 %v7088_v36  ;;  %v7106_v55 = vpop.f32.mrf.mxu2  ;;  %v7108_v45 = vpop.f32.mrf.mxu3  ;;  %v7123_v36 = vld [vmem:[%s14463_s3 + $0x3c0] sm:$0xff]  ;;  %15114 = vst [vmem:[#allocation44_spill] sm:$0xff] %v7153_v59 }
  0xcb   :  { %1058 = vmatpush.msrb.mxu2 %v7095_v11  ;;  %1078 = vmatpush.msrb.mxu3 %v7100_v35  ;;  %v7112_v9 = vpop.f32.mrf.mxu0  ;;  %v7114_v44 = vpop.f32.mrf.mxu1  ;;  %v7147_v35 = vld [vmem:[%s14463_s3 + $0x380] sm:$0xff] }
  0xcc   :  { %15107 = vst [vmem:[#allocation38_spill] sm:$0xff] %v7112_v9  ;;  %1019 = vmatmul.f32.vlgmr.msrb.gmra.mxu0 %v15109_v31  ;;  %1039 = vmatmul.f32.vlgmr.msrb.gmra.mxu1 %v15109_v31  ;;  %v7129_v9 = vld [vmem:[%s14463_s3 + $0x3c8] sm:$0xff] }
  0xcd   :  { %15108 = vst [vmem:[#allocation39_spill] sm:$0xff] %v7114_v44  ;;  %1059 = vmatmul.f32.vlgmr.msrb.gmra.mxu2 %v15109_v31  ;;  %1079 = vmatmul.f32.vlgmr.msrb.gmra.mxu3 %v15109_v31  ;;  %v7135_v44 = vld [vmem:[%s14463_s3 + $0x7c0] sm:$0xff]  ;;  %v7141_v31 = vld [vmem:[%s14463_s3 + $0x7c8] sm:$0xff] }
  0xce   :  { %1228 = vmatpush.msra.mxu0 %v7123_v36  ;;  %15110 = vst [vmem:[#allocation40_spill] sm:$0xff] %v7129_v9  ;;  %1268 = vmatpush.msra.mxu2 %v7129_v9 }
  0xcf   :  { %15111 = vst [vmem:[#allocation41_spill] sm:$0xff] %v7135_v44  ;;  %1248 = vmatpush.msra.mxu1 %v7135_v44  ;;  %1288 = vmatpush.msra.mxu3 %v7141_v31  ;;  %v7159_v44 = vld [vmem:[%s14463_s3 + $0x780] sm:$0xff] }
  0xd0   :  { %15112 = vst [vmem:[#allocation42_spill] sm:$0xff] %v7141_v31  ;;  %1229 = vmatpush.msra.mxu0 %v7147_v35  ;;  %1269 = vmatpush.msra.mxu2 %v7153_v59  ;;  %v7165_v31 = vld [vmem:[%s14463_s3 + $0x788] sm:$0xff]  ;;  %v7175_v59 = vld [vmem:[%s14463_s3 + $0x340] sm:$0xff] }
  0xd1   :  { %15113 = vst [vmem:[#allocation43_spill] sm:$0xff] %v7147_v35  ;;  %1249 = vmatpush.msra.mxu1 %v7159_v44  ;;  %1289 = vmatpush.msra.mxu3 %v7165_v31 }
  0xd2   :  { %15115 = vst [vmem:[#allocation45_spill] sm:$0xff] %v7159_v44  ;;  %v7168_v35 = vpop.f32.mrf.mxu2  ;;  %v7170_v52 = vpop.f32.mrf.mxu3  ;;  %1230 = vmatpush.msra.mxu0 %v7175_v59  ;;  %v7181_v44 = vld [vmem:[%s14463_s3 + $0x348] sm:$0xff] }
  0xd3   :  { %15116 = vst [vmem:[#allocation46_spill] sm:$0xff] %v7165_v31  ;;  %1270 = vmatpush.msra.mxu2 %v7181_v44  ;;  %v7184_v9 = vpop.f32.mrf.mxu0  ;;  %v7186_v31 = vpop.f32.mrf.mxu1 }
  0xd4   :  { %15117 = vst [vmem:[#allocation47_spill] sm:$0xff] %v7168_v35  ;;  %v7197_v35 = vld [vmem:[%s14463_s3 + $0x748] sm:$0xff] }
  0xd5   :  { %15118 = vst [vmem:[#allocation48_spill] sm:$0xff] %v7170_v52  ;;  %v7191_v52 = vld [vmem:[%s14463_s3 + $0x740] sm:$0xff]  ;;  %1290 = vmatpush.msra.mxu3 %v7197_v35 }
  0xd6   :  { %15119 = vst [vmem:[#allocation49_spill] sm:$0xff] %v7181_v44  ;;  %1250 = vmatpush.msra.mxu1 %v7191_v52 }
  0xd7   :  { %15120 = vst [vmem:[#allocation50_spill] sm:$0xff] %v7184_v9  ;;  %v7203_v9 = vld [vmem:[%s14463_s3 + $0x300] sm:$0xff] }
  0xd8   :  { %15121 = vst [vmem:[#allocation51_spill] sm:$0xff] %v7186_v31  ;;  %1231 = vmatpush.msra.mxu0 %v7203_v9  ;;  %v7209_v31 = vld [vmem:[%s14463_s3 + $0x308] sm:$0xff] }
  0xd9   :  { %15122 = vst [vmem:[#allocation52_spill] sm:$0xff] %v7191_v52  ;;  %1271 = vmatpush.msra.mxu2 %v7209_v31  ;;  %v7215_v52 = vld [vmem:[%s14463_s3 + $0x700] sm:$0xff] }
  0xda   :  { %15123 = vst [vmem:[#allocation53_spill] sm:$0xff] %v7197_v35  ;;  %1251 = vmatpush.msra.mxu1 %v7215_v52  ;;  %v7221_v35 = vld [vmem:[%s14463_s3 + $0x708] sm:$0xff]  ;;  %v7274_v44 = vpop.f32.mrf.mxu3 }
  0xdb   :  { %15124 = vst [vmem:[#allocation54_spill] sm:$0xff] %v7203_v9  ;;  %1291 = vmatpush.msra.mxu3 %v7221_v35  ;;  %v7227_v9 = vld [vmem:[%s14463_s3 + $0x2c0] sm:$0xff] }
  0xdc   :  { %15125 = vst [vmem:[#allocation55_spill] sm:$0xff] %v7209_v31  ;;  %1232 = vmatpush.msra.mxu0 %v7227_v9  ;;  %v7233_v31 = vld [vmem:[%s14463_s3 + $0x2c8] sm:$0xff] }
  0xdd   :  { %15126 = vst [vmem:[#allocation56_spill] sm:$0xff] %v7215_v52  ;;  %1272 = vmatpush.msra.mxu2 %v7233_v31  ;;  %v7239_v52 = vld [vmem:[%s14463_s3 + $0x6c0] sm:$0xff] }
  0xde   :  { %15127 = vst [vmem:[#allocation57_spill] sm:$0xff] %v7221_v35  ;;  %1252 = vmatpush.msra.mxu1 %v7239_v52  ;;  %v7245_v35 = vld [vmem:[%s14463_s3 + $0x6c8] sm:$0xff] }
  0xdf   :  { %15128 = vst [vmem:[#allocation58_spill] sm:$0xff] %v7227_v9  ;;  %1292 = vmatpush.msra.mxu3 %v7245_v35  ;;  %v7251_v9 = vld [vmem:[%s14463_s3 + $0x280] sm:$0xff] }
  0xe0   :  { %15129 = vst [vmem:[#allocation59_spill] sm:$0xff] %v7233_v31  ;;  %1233 = vmatpush.msra.mxu0 %v7251_v9  ;;  %v7257_v31 = vld [vmem:[%s14463_s3 + $0x288] sm:$0xff] }
  0xe1   :  { %15130 = vst [vmem:[#allocation60_spill] sm:$0xff] %v7239_v52  ;;  %1273 = vmatpush.msra.mxu2 %v7257_v31  ;;  %v7263_v52 = vld [vmem:[%s14463_s3 + $0x680] sm:$0xff] }
  0xe2   :  { %15131 = vst [vmem:[#allocation61_spill] sm:$0xff] %v7245_v35  ;;  %1253 = vmatpush.msra.mxu1 %v7263_v52  ;;  %v7269_v35 = vld [vmem:[%s14463_s3 + $0x688] sm:$0xff] }
  0xe3   :  { %15132 = vst [vmem:[#allocation62_spill] sm:$0xff] %v7251_v9  ;;  %1293 = vmatpush.msra.mxu3 %v7269_v35  ;;  %v7272_v9 = vpop.f32.mrf.mxu2 }
  0xe4   :  { %15133 = vst [vmem:[#allocation63_spill] sm:$0xff] %v7257_v31  ;;  %v7279_v31 = vld [vmem:[%s14463_s3 + $0x240] sm:$0xff] }
  0xe5   :  { %15134 = vst [vmem:[#allocation64_spill] sm:$0xff] %v7263_v52  ;;  %1234 = vmatpush.msra.mxu0 %v7279_v31  ;;  %v7285_v52 = vld [vmem:[%s14463_s3 + $0x248] sm:$0xff] }
  0xe6   :  { %15135 = vst [vmem:[#allocation65_spill] sm:$0xff] %v7269_v35  ;;  %1274 = vmatpush.msra.mxu2 %v7285_v52  ;;  %v7303_v35 = vld [vmem:[%s14463_s3 + $0x200] sm:$0xff] }
  0xe7   :  { %15136 = vst [vmem:[#allocation66_spill] sm:$0xff] %v7272_v9  ;;  %v7291_v9 = vld [vmem:[%s14463_s3 + $0x640] sm:$0xff]  ;;  %1235 = vmatpush.msra.mxu0 %v7303_v35 }
  0xe8   :  { %15137 = vst [vmem:[#allocation67_spill] sm:$0xff] %v7274_v44  ;;  %1254 = vmatpush.msra.mxu1 %v7291_v9  ;;  %v7297_v44 = vld [vmem:[%s14463_s3 + $0x648] sm:$0xff] }
  0xe9   :  { %15138 = vst [vmem:[#allocation68_spill] sm:$0xff] %v7279_v31  ;;  %1294 = vmatpush.msra.mxu3 %v7297_v44  ;;  %v7314_v31 = vpop.f32.mrf.mxu1 }
  0xea   :  { %15139 = vst [vmem:[#allocation69_spill] sm:$0xff] %v7285_v52  ;;  %v7309_v52 = vld [vmem:[%s14463_s3 + $0x208] sm:$0xff] }
  0xeb   :  { %15140 = vst [vmem:[#allocation70_spill] sm:$0xff] %v7291_v9  ;;  %1275 = vmatpush.msra.mxu2 %v7309_v52  ;;  %v7312_v9 = vpop.f32.mrf.mxu0 }
  0xec   :  { %15141 = vst [vmem:[#allocation71_spill] sm:$0xff] %v7297_v44  ;;  %v7319_v44 = vld [vmem:[%s14463_s3 + $0x600] sm:$0xff] }
  0xed   :  { %15142 = vst [vmem:[#allocation72_spill] sm:$0xff] %v7303_v35  ;;  %1255 = vmatpush.msra.mxu1 %v7319_v44  ;;  %v7325_v35 = vld [vmem:[%s14463_s3 + $0x608] sm:$0xff] }
  0xee   :  { %15143 = vst [vmem:[#allocation73_spill] sm:$0xff] %v7309_v52  ;;  %1295 = vmatpush.msra.mxu3 %v7325_v35  ;;  %v7402_v52 = vpop.f32.mrf.mxu3 }
  0xef   :  { %15144 = vst [vmem:[#allocation74_spill] sm:$0xff] %v7312_v9  ;;  %v7331_v9 = vld [vmem:[%s14463_s3 + $0x1c0] sm:$0xff] }
  0xf0   :  { %15145 = vst [vmem:[#allocation75_spill] sm:$0xff] %v7314_v31  ;;  %1236 = vmatpush.msra.mxu0 %v7331_v9  ;;  %v7337_v31 = vld [vmem:[%s14463_s3 + $0x1c8] sm:$0xff] }
  0xf1   :  { %15146 = vst [vmem:[#allocation76_spill] sm:$0xff] %v7319_v44  ;;  %1276 = vmatpush.msra.mxu2 %v7337_v31  ;;  %v7343_v44 = vld [vmem:[%s14463_s3 + $0x5c0] sm:$0xff] }
  0xf2   :  { %15147 = vst [vmem:[#allocation77_spill] sm:$0xff] %v7325_v35  ;;  %1256 = vmatpush.msra.mxu1 %v7343_v44  ;;  %v7349_v35 = vld [vmem:[%s14463_s3 + $0x5c8] sm:$0xff] }
  0xf3   :  { %15148 = vst [vmem:[#allocation78_spill] sm:$0xff] %v7331_v9  ;;  %1296 = vmatpush.msra.mxu3 %v7349_v35  ;;  %v7355_v9 = vld [vmem:[%s14463_s3 + $0x180] sm:$0xff] }
  0xf4   :  { %15149 = vst [vmem:[#allocation79_spill] sm:$0xff] %v7337_v31  ;;  %1237 = vmatpush.msra.mxu0 %v7355_v9  ;;  %v7361_v31 = vld [vmem:[%s14463_s3 + $0x188] sm:$0xff] }
  0xf5   :  { %15150 = vst [vmem:[#allocation80_spill] sm:$0xff] %v7343_v44  ;;  %1277 = vmatpush.msra.mxu2 %v7361_v31  ;;  %v7367_v44 = vld [vmem:[%s14463_s3 + $0x580] sm:$0xff] }
  0xf6   :  { %15151 = vst [vmem:[#allocation81_spill] sm:$0xff] %v7349_v35  ;;  %1257 = vmatpush.msra.mxu1 %v7367_v44  ;;  %v7373_v35 = vld [vmem:[%s14463_s3 + $0x588] sm:$0xff] }
  0xf7   :  { %15152 = vst [vmem:[#allocation82_spill] sm:$0xff] %v7355_v9  ;;  %1297 = vmatpush.msra.mxu3 %v7373_v35  ;;  %v7379_v9 = vld [vmem:[%s14463_s3 + $0x140] sm:$0xff] }
  0xf8   :  { %15153 = vst [vmem:[#allocation83_spill] sm:$0xff] %v7361_v31  ;;  %1238 = vmatpush.msra.mxu0 %v7379_v9  ;;  %v7385_v31 = vld [vmem:[%s14463_s3 + $0x148] sm:$0xff] }
  0xf9   :  { %15154 = vst [vmem:[#allocation84_spill] sm:$0xff] %v7367_v44  ;;  %1278 = vmatpush.msra.mxu2 %v7385_v31  ;;  %v7391_v44 = vld [vmem:[%s14463_s3 + $0x540] sm:$0xff] }
  0xfa   :  { %15155 = vst [vmem:[#allocation85_spill] sm:$0xff] %v7373_v35  ;;  %1258 = vmatpush.msra.mxu1 %v7391_v44  ;;  %v7397_v35 = vld [vmem:[%s14463_s3 + $0x548] sm:$0xff] }
  0xfb   :  { %15156 = vst [vmem:[#allocation86_spill] sm:$0xff] %v7379_v9  ;;  %1298 = vmatpush.msra.mxu3 %v7397_v35  ;;  %v7400_v9 = vpop.f32.mrf.mxu2 }
  0xfc   :  { %15157 = vst [vmem:[#allocation87_spill] sm:$0xff] %v7385_v31  ;;  %v7407_v31 = vld [vmem:[%s14463_s3 + $0x100] sm:$0xff] }
  0xfd   :  { %15158 = vst [vmem:[#allocation88_spill] sm:$0xff] %v7391_v44  ;;  %1239 = vmatpush.msra.mxu0 %v7407_v31  ;;  %v7413_v44 = vld [vmem:[%s14463_s3 + $0x108] sm:$0xff] }
  0xfe   :  { %15159 = vst [vmem:[#allocation89_spill] sm:$0xff] %v7397_v35  ;;  %1279 = vmatpush.msra.mxu2 %v7413_v44  ;;  %v7431_v35 = vld [vmem:[%s14463_s3 + $0xc0] sm:$0xff] }
  0xff   :  { %15160 = vst [vmem:[#allocation90_spill] sm:$0xff] %v7400_v9  ;;  %v7419_v9 = vld [vmem:[%s14463_s3 + $0x500] sm:$0xff]  ;;  %1240 = vmatpush.msra.mxu0 %v7431_v35 }
 0x100   :  { %15161 = vst [vmem:[#allocation91_spill] sm:$0xff] %v7402_v52  ;;  %1259 = vmatpush.msra.mxu1 %v7419_v9  ;;  %v7425_v52 = vld [vmem:[%s14463_s3 + $0x508] sm:$0xff] }
 0x101   :  { %15162 = vst [vmem:[#allocation92_spill] sm:$0xff] %v7407_v31  ;;  %1299 = vmatpush.msra.mxu3 %v7425_v52  ;;  %v7442_v31 = vpop.f32.mrf.mxu1 }
 0x102   :  { %15163 = vst [vmem:[#allocation93_spill] sm:$0xff] %v7413_v44  ;;  %v7437_v44 = vld [vmem:[%s14463_s3 + $0xc8] sm:$0xff] }
 0x103   :  { %15164 = vst [vmem:[#allocation94_spill] sm:$0xff] %v7419_v9  ;;  %1280 = vmatpush.msra.mxu2 %v7437_v44  ;;  %v7440_v9 = vpop.f32.mrf.mxu0 }
 0x104   :  { %15165 = vst [vmem:[#allocation95_spill] sm:$0xff] %v7425_v52  ;;  %v7447_v52 = vld [vmem:[%s14463_s3 + $0x4c0] sm:$0xff] }
 0x105   :  { %15166 = vst [vmem:[#allocation96_spill] sm:$0xff] %v7431_v35  ;;  %1260 = vmatpush.msra.mxu1 %v7447_v52  ;;  %v7453_v35 = vld [vmem:[%s14463_s3 + $0x4c8] sm:$0xff] }
 0x106   :  { %15167 = vst [vmem:[#allocation97_spill] sm:$0xff] %v7437_v44  ;;  %1300 = vmatpush.msra.mxu3 %v7453_v35  ;;  %v7530_v44 = vpop.f32.mrf.mxu3 }
 0x107   :  { %15168 = vst [vmem:[#allocation98_spill] sm:$0xff] %v7440_v9  ;;  %v7459_v9 = vld [vmem:[%s14463_s3 + $0x80] sm:$0xff] }
 0x108   :  { %15169 = vst [vmem:[#allocation99_spill] sm:$0xff] %v7442_v31  ;;  %1241 = vmatpush.msra.mxu0 %v7459_v9  ;;  %v7465_v31 = vld [vmem:[%s14463_s3 + $0x88] sm:$0xff] }
 0x109   :  { %15170 = vst [vmem:[#allocation100_spill] sm:$0xff] %v7447_v52  ;;  %1281 = vmatpush.msra.mxu2 %v7465_v31  ;;  %v7471_v52 = vld [vmem:[%s14463_s3 + $0x480] sm:$0xff] }
 0x10a   :  { %15171 = vst [vmem:[#allocation101_spill] sm:$0xff] %v7453_v35  ;;  %1261 = vmatpush.msra.mxu1 %v7471_v52  ;;  %v7477_v35 = vld [vmem:[%s14463_s3 + $0x488] sm:$0xff] }
 0x10b   :  { %15172 = vst [vmem:[#allocation102_spill] sm:$0xff] %v7459_v9  ;;  %1301 = vmatpush.msra.mxu3 %v7477_v35  ;;  %v7483_v9 = vld [vmem:[%s14463_s3 + $0x40] sm:$0xff] }
 0x10c   :  { %15173 = vst [vmem:[#allocation103_spill] sm:$0xff] %v7465_v31  ;;  %1242 = vmatpush.msra.mxu0 %v7483_v9  ;;  %v7489_v31 = vld [vmem:[%s14463_s3 + $0x48] sm:$0xff] }
 0x10d   :  { %15174 = vst [vmem:[#allocation104_spill] sm:$0xff] %v7471_v52  ;;  %1282 = vmatpush.msra.mxu2 %v7489_v31  ;;  %v7495_v52 = vld [vmem:[%s14463_s3 + $0x440] sm:$0xff] }
 0x10e   :  { %15175 = vst [vmem:[#allocation105_spill] sm:$0xff] %v7477_v35  ;;  %1262 = vmatpush.msra.mxu1 %v7495_v52  ;;  %v7501_v35 = vld [vmem:[%s14463_s3 + $0x448] sm:$0xff] }
 0x10f   :  { %15176 = vst [vmem:[#allocation106_spill] sm:$0xff] %v7483_v9  ;;  %1302 = vmatpush.msra.mxu3 %v7501_v35  ;;  %v7507_v9 = vld [vmem:[%s14463_s3] sm:$0xff] }
 0x110   :  { %15177 = vst [vmem:[#allocation107_spill] sm:$0xff] %v7489_v31  ;;  %1243 = vmatpush.msra.mxu0 %v7507_v9  ;;  %v7513_v31 = vld [vmem:[%s14463_s3 + $0x8] sm:$0xff] }
 0x111   :  { %15178 = vst [vmem:[#allocation108_spill] sm:$0xff] %v7495_v52  ;;  %1283 = vmatpush.msra.mxu2 %v7513_v31  ;;  %v7519_v52 = vld [vmem:[%s14463_s3 + $0x3d0] sm:$0xff] }
 0x112   :  { %15179 = vst [vmem:[#allocation109_spill] sm:$0xff] %v7501_v35  ;;  %1308 = vmatpush.msrb.mxu0 %v7519_v52  ;;  %v7525_v35 = vld [vmem:[%s14463_s3 + $0x3d8] sm:$0xff] }
 0x113   :  { %15180 = vst [vmem:[#allocation110_spill] sm:$0xff] %v7507_v9  ;;  %1348 = vmatpush.msrb.mxu2 %v7525_v35  ;;  %v7528_v9 = vpop.f32.mrf.mxu2 }
 0x114   :  { %15181 = vst [vmem:[#allocation111_spill] sm:$0xff] %v7513_v31  ;;  %v7535_v31 = vld [vmem:[%s14463_s3 + $0x400] sm:$0xff] }
 0x115   :  { %15182 = vst [vmem:[#allocation112_spill] sm:$0xff] %v7519_v52  ;;  %1263 = vmatpush.msra.mxu1 %v7535_v31  ;;  %v7541_v52 = vld [vmem:[%s14463_s3 + $0x408] sm:$0xff] }
 0x116   :  { %15183 = vst [vmem:[#allocation113_spill] sm:$0xff] %v7525_v35  ;;  %1303 = vmatpush.msra.mxu3 %v7541_v52  ;;  %v7570_v35 = vpop.f32.mrf.mxu1 }
 0x117   :  { %15184 = vst [vmem:[#allocation114_spill] sm:$0xff] %v7528_v9  ;;  %v7547_v9 = vld [vmem:[%s14463_s3 + $0x390] sm:$0xff] }
 0x118   :  { %15185 = vst [vmem:[#allocation115_spill] sm:$0xff] %v7530_v44  ;;  %1309 = vmatpush.msrb.mxu0 %v7547_v9  ;;  %v7553_v44 = vld [vmem:[%s14463_s3 + $0x398] sm:$0xff] }
 0x119   :  { %15186 = vst [vmem:[#allocation116_spill] sm:$0xff] %v7535_v31  ;;  %1349 = vmatpush.msrb.mxu2 %v7553_v44  ;;  %v7559_v31 = vld [vmem:[%s14463_s3 + $0x7d0] sm:$0xff] }
 0x11a   :  { %15187 = vst [vmem:[#allocation117_spill] sm:$0xff] %v7541_v52  ;;  %1328 = vmatpush.msrb.mxu1 %v7559_v31  ;;  %v7565_v52 = vld [vmem:[%s14463_s3 + $0x7d8] sm:$0xff] }
 0x11b   :  { %15188 = vst [vmem:[#allocation118_spill] sm:$0xff] %v7547_v9  ;;  %1368 = vmatpush.msrb.mxu3 %v7565_v52  ;;  %v7568_v9 = vpop.f32.mrf.mxu0 }
 0x11c   :  { %15189 = vst [vmem:[#allocation119_spill] sm:$0xff] %v7553_v44  ;;  %v7575_v44 = vld [vmem:[%s14463_s3 + $0x350] sm:$0xff] }
 0x11d   :  { %15190 = vst [vmem:[#allocation120_spill] sm:$0xff] %v7559_v31  ;;  %1310 = vmatpush.msrb.mxu0 %v7575_v44  ;;  %v7581_v31 = vld [vmem:[%s14463_s3 + $0x358] sm:$0xff] }
 0x11e   :  { %15191 = vst [vmem:[#allocation121_spill] sm:$0xff] %v7565_v52  ;;  %1350 = vmatpush.msrb.mxu2 %v7581_v31  ;;  %v7599_v52 = vld [vmem:[%s14463_s3 + $0x310] sm:$0xff] }
 0x11f   :  { %15192 = vst [vmem:[#allocation122_spill] sm:$0xff] %v7568_v9  ;;  %v7587_v9 = vld [vmem:[%s14463_s3 + $0x790] sm:$0xff]  ;;  %1311 = vmatpush.msrb.mxu0 %v7599_v52 }
 0x120   :  { %15193 = vst [vmem:[#allocation123_spill] sm:$0xff] %v7570_v35  ;;  %1329 = vmatpush.msrb.mxu1 %v7587_v9  ;;  %v7593_v35 = vld [vmem:[%s14463_s3 + $0x798] sm:$0xff] }
 0x121   :  { %15194 = vst [vmem:[#allocation124_spill] sm:$0xff] %v7575_v44  ;;  %1369 = vmatpush.msrb.mxu3 %v7593_v35  ;;  %v7658_v44 = vpop.f32.mrf.mxu3 }
 0x122   :  { %15195 = vst [vmem:[#allocation125_spill] sm:$0xff] %v7581_v31  ;;  %v7605_v31 = vld [vmem:[%s14463_s3 + $0x318] sm:$0xff] }
 0x123   :  { %15196 = vst [vmem:[#allocation126_spill] sm:$0xff] %v7587_v9  ;;  %1351 = vmatpush.msrb.mxu2 %v7605_v31  ;;  %v7611_v9 = vld [vmem:[%s14463_s3 + $0x750] sm:$0xff] }
 0x124   :  { %15197 = vst [vmem:[#allocation127_spill] sm:$0xff] %v7593_v35  ;;  %1330 = vmatpush.msrb.mxu1 %v7611_v9  ;;  %v7617_v35 = vld [vmem:[%s14463_s3 + $0x758] sm:$0xff] }
 0x125   :  { %15198 = vst [vmem:[#allocation128_spill] sm:$0xff] %v7599_v52  ;;  %1370 = vmatpush.msrb.mxu3 %v7617_v35  ;;  %v7623_v52 = vld [vmem:[%s14463_s3 + $0x2d0] sm:$0xff] }
 0x126   :  { %15199 = vst [vmem:[#allocation129_spill] sm:$0xff] %v7605_v31  ;;  %1312 = vmatpush.msrb.mxu0 %v7623_v52  ;;  %v7629_v31 = vld [vmem:[%s14463_s3 + $0x2d8] sm:$0xff] }
 0x127   :  { %15200 = vst [vmem:[#allocation130_spill] sm:$0xff] %v7611_v9  ;;  %1352 = vmatpush.msrb.mxu2 %v7629_v31  ;;  %v7635_v9 = vld [vmem:[%s14463_s3 + $0x710] sm:$0xff] }
 0x128   :  { %15201 = vst [vmem:[#allocation131_spill] sm:$0xff] %v7617_v35  ;;  %1331 = vmatpush.msrb.mxu1 %v7635_v9  ;;  %v7641_v35 = vld [vmem:[%s14463_s3 + $0x718] sm:$0xff] }
 0x129   :  { %15202 = vst [vmem:[#allocation132_spill] sm:$0xff] %v7623_v52  ;;  %1371 = vmatpush.msrb.mxu3 %v7641_v35  ;;  %v7647_v52 = vld [vmem:[%s14463_s3 + $0x290] sm:$0xff] }
 0x12a   :  { %15203 = vst [vmem:[#allocation133_spill] sm:$0xff] %v7629_v31  ;;  %1313 = vmatpush.msrb.mxu0 %v7647_v52  ;;  %v7653_v31 = vld [vmem:[%s14463_s3 + $0x298] sm:$0xff] }
 0x12b   :  { %15204 = vst [vmem:[#allocation134_spill] sm:$0xff] %v7635_v9  ;;  %1353 = vmatpush.msrb.mxu2 %v7653_v31  ;;  %v7656_v9 = vpop.f32.mrf.mxu2 }
 0x12c   :  { %15205 = vst [vmem:[#allocation135_spill] sm:$0xff] %v7641_v35  ;;  %v7663_v35 = vld [vmem:[%s14463_s3 + $0x6d0] sm:$0xff] }
 0x12d   :  { %15206 = vst [vmem:[#allocation136_spill] sm:$0xff] %v7647_v52  ;;  %1332 = vmatpush.msrb.mxu1 %v7663_v35  ;;  %v7669_v52 = vld [vmem:[%s14463_s3 + $0x6d8] sm:$0xff] }
 0x12e   :  { %15207 = vst [vmem:[#allocation137_spill] sm:$0xff] %v7653_v31  ;;  %1372 = vmatpush.msrb.mxu3 %v7669_v52  ;;  %v7698_v31 = vpop.f32.mrf.mxu1 }
 0x12f   :  { %15208 = vst [vmem:[#allocation138_spill] sm:$0xff] %v7656_v9  ;;  %v7675_v9 = vld [vmem:[%s14463_s3 + $0x250] sm:$0xff] }
 0x130   :  { %15209 = vst [vmem:[#allocation139_spill] sm:$0xff] %v7658_v44  ;;  %1314 = vmatpush.msrb.mxu0 %v7675_v9  ;;  %v7681_v44 = vld [vmem:[%s14463_s3 + $0x258] sm:$0xff] }
 0x131   :  { %15210 = vst [vmem:[#allocation140_spill] sm:$0xff] %v7663_v35  ;;  %1354 = vmatpush.msrb.mxu2 %v7681_v44  ;;  %v7687_v35 = vld [vmem:[%s14463_s3 + $0x690] sm:$0xff] }
 0x132   :  { %15211 = vst [vmem:[#allocation141_spill] sm:$0xff] %v7669_v52  ;;  %1333 = vmatpush.msrb.mxu1 %v7687_v35  ;;  %v7693_v52 = vld [vmem:[%s14463_s3 + $0x698] sm:$0xff] }
 0x133   :  { %15212 = vst [vmem:[#allocation142_spill] sm:$0xff] %v7675_v9  ;;  %1373 = vmatpush.msrb.mxu3 %v7693_v52  ;;  %v7696_v9 = vpop.f32.mrf.mxu0  ;;  %1355 = vmatpush.msrb.mxu2 %v6354_v57  ;;  %v7724_v57 = vld [vmem:[%s14463_s3 + $0x610] sm:$0xff] }
 0x134   :  { %15213 = vst [vmem:[#allocation143_spill] sm:$0xff] %v7681_v44  ;;  %v7703_v44 = vld [vmem:[%s14463_s3 + $0x210] sm:$0xff] }
 0x135   :  { %15214 = vst [vmem:[#allocation144_spill] sm:$0xff] %v7687_v35  ;;  %1315 = vmatpush.msrb.mxu0 %v7703_v44  ;;  %v7710_v35 = vld [vmem:[%s14463_s3 + $0x650] sm:$0xff]  ;;  %1356 = vmatpush.msrb.mxu2 %v6377_v62  ;;  %v7741_v62 = vpop.f32.mrf.mxu3 }
 0x136   :  { %15215 = vst [vmem:[#allocation145_spill] sm:$0xff] %v7696_v9  ;;  %1334 = vmatpush.msrb.mxu1 %v7710_v35  ;;  %v7730_v9 = vld [vmem:[%s14463_s3 + $0x618] sm:$0xff] }
 0x137   :  { %15216 = vst [vmem:[#allocation146_spill] sm:$0xff] %v7698_v31  ;;  %v7716_v31 = vld [vmem:[%s14463_s3 + $0x658] sm:$0xff]  ;;  %1316 = vmatpush.msrb.mxu0 %v6363_v60  ;;  %1357 = vmatpush.msrb.mxu2 %v6403_v2  ;;  %v7739_v60 = vpop.f32.mrf.mxu2 }
 0x138   :  { %1374 = vmatpush.msrb.mxu3 %v7716_v31  ;;  %1335 = vmatpush.msrb.mxu1 %v7724_v57  ;;  %15217 = vst [vmem:[#allocation147_spill] sm:$0xff] %v7739_v60 }
 0x139   :  { %1317 = vmatpush.msrb.mxu0 %v6391_v0  ;;  %1358 = vmatpush.msrb.mxu2 %v6427_v5  ;;  %15218 = vst [vmem:[#allocation148_spill] sm:$0xff] %v7741_v62  ;;  %v7778_v5 = vld [vmem:[%s14464_s2] sm:$0xff] }
 0x13a   :  { %1375 = vmatpush.msrb.mxu3 %v7730_v9  ;;  %1336 = vmatpush.msrb.mxu1 %v6368_v61 }
 0x13b   :  { %1318 = vmatpush.msrb.mxu0 %v6415_v3  ;;  %1359 = vmatpush.msrb.mxu2 %v6457_v13  ;;  %v7749_v61 = vpop.f32.mrf.mxu0  ;;  %v7784_v13 = vperm.slane %v7778_v5, 0 }
 0x13c   :  { %1376 = vmatpush.msrb.mxu3 %v6382_v63  ;;  %1337 = vmatpush.msrb.mxu1 %v6396_v1  ;;  %15219 = vst [vmem:[#allocation149_spill] sm:$0xff] %v7749_v61  ;;  %v7751_v63 = vpop.f32.mrf.mxu1 }
 0x13d   :  { %1319 = vmatpush.msrb.mxu0 %v6443_v7  ;;  %15220 = vst [vmem:[#allocation150_spill] sm:$0xff] %v7751_v63  ;;  %1360 = vmatpush.msrb.mxu2 %v6483_v17  ;;  %v7769_v1 = vpop.f32.mrf.mxu3  ;;  %v118_v17 = vadd.f32 %v6584_v29, %v7784_v13 }
 0x13e   :  { %1377 = vmatpush.msrb.mxu3 %v6408_v20  ;;  %1338 = vmatpush.msrb.mxu1 %v6420_v4  ;;  %15222 = vst [vmem:[#allocation152_spill] sm:$0xff] %v7769_v1 }
 0x13f   :  { %1320 = vmatpush.msrb.mxu0 %v6471_v15  ;;  %1361 = vmatpush.msrb.mxu2 %v6507_v8  ;;  %v7767_v0 = vpop.f32.mrf.mxu2  ;;  %15224 = vst [vmem:[#allocation154_spill] sm:$0xff] %v7784_v13  ;;  %v7791_v8 = vperm.slane %v7778_v5, 3 }
 0x140   :  { %1378 = vmatpush.msrb.mxu3 %v6432_v6  ;;  %1339 = vmatpush.msrb.mxu1 %v6448_v12  ;;  %15221 = vst [vmem:[#allocation151_spill] sm:$0xff] %v7767_v0  ;;  %v7781_v12 = vperm.slane %v7778_v5, 2 }
 0x141   :  { %1321 = vmatpush.msrb.mxu0 %v6495_v18  ;;  %1362 = vmatpush.msrb.mxu2 %v6537_v24  ;;  %15225 = vst [vmem:[#allocation155_spill] sm:$0xff] %v7791_v8 }
 0x142   :  { %1379 = vmatpush.msrb.mxu3 %v6462_v14  ;;  %1340 = vmatpush.msrb.mxu1 %v6476_v16  ;;  %15223 = vst [vmem:[#allocation153_spill] sm:$0xff] %v7781_v12  ;;  %v200_v15 = vadd.f32 %v6622_v41, %v7781_v12 }
 0x143   :  { %1322 = vmatpush.msrb.mxu0 %v6523_v22  ;;  %1363 = vmatpush.msrb.mxu2 %v6563_v28  ;;  %v780_v2 = vpop.f32.mrf.mxu0 }
 0x144   :  { %1380 = vmatpush.msrb.mxu3 %v6488_v33  ;;  %1341 = vmatpush.msrb.mxu1 %v6500_v19  ;;  %v800_v20 = vpop.f32.mrf.mxu1 }
 0x145   :  { %1323 = vmatpush.msrb.mxu0 %v6551_v26  ;;  %v840_v4 = vpop.f32.mrf.mxu3  ;;  %v801_v16 = vadd.f32 %v800_v20, %v780_v2  ;;  %v7801_v2 = vperm.slane %v7778_v5, 4 }
 0x146   :  { %1381 = vmatpush.msrb.mxu3 %v6512_v21  ;;  %1342 = vmatpush.msrb.mxu1 %v6528_v23  ;;  %v7794_v23 = vperm.slane %v7778_v5, 1 }
 0x147   :  { %v820_v3 = vpop.f32.mrf.mxu2  ;;  %v1083_v21 = vadd.f32 %v801_v16, %v118_v17  ;;  %15227 = vst [vmem:[#allocation157_spill] sm:$0xff] %v7801_v2  ;;  %v7806_v17 = vperm.slane %v7778_v5, 5 }
 0x148   :  { %1382 = vmatpush.msrb.mxu3 %v6542_v25  ;;  %1343 = vmatpush.msrb.mxu1 %v6556_v27  ;;  %15226 = vst [vmem:[#allocation156_spill] sm:$0xff] %v7794_v23  ;;  %v241_v25 = vadd.f32 %v6624_v42, %v7791_v8  ;;  %v841_v27 = vadd.f32 %v840_v4, %v820_v3 }
 0x149   :  { %v4572_v26 = vmul.f32 -1.442695, %v1083_v21  ;;  %v159_v41 = vadd.f32 %v6586_v30, %v7794_v23  ;;  %15228 = vst [vmem:[#allocation158_spill] sm:$0xff] %v7806_v17  ;;  %v323_v21 = vadd.f32 %v7041_v34, %v7806_v17 }
 0x14a   :  { %1383 = vmatpush.msrb.mxu3 %v6568_v46 }
 0x14b   :  { %v860_v6 = vpop.f32.mrf.mxu0  ;;  %v1084_v20 = vadd.f32 %v841_v27, %v159_v41 }
 0x14c   :  { %v880_v7 = vpop.f32.mrf.mxu1 }
 0x14d   :  { %v881_v14 = vadd.f32 %v880_v7, %v860_v6  ;;  %v920_v19 = vpop.f32.mrf.mxu3 }
 0x14f   :  { %v1085_v33 = vadd.f32 %v881_v14, %v200_v15  ;;  %v900_v18 = vpop.f32.mrf.mxu2  ;;  %v282_v14 = vadd.f32 %v7039_v37, %v7801_v2  ;;  %v4573_v15 = vmul.f32 -1.442695, %v1084_v20 }
 0x150   :  { %v921_v22 = vadd.f32 %v920_v19, %v900_v18 }
 0x151   :  { %v4574_v24 = vmul.f32 -1.442695, %v1085_v33 }
 0x152   :  { %v1086_v28 = vadd.f32 %v921_v22, %v241_v25 }
 0x153   :  { %v940_v46 = vpop.f32.mrf.mxu0  ;;  %4622 = vpow2.f32 %v4574_v24 }
 0x154   :  { %v960_v29 = vpop.f32.mrf.mxu1  ;;  %4624 = vpow2.f32 %v4572_v26  ;;  %v4575_v7 = vmul.f32 -1.442695, %v1086_v28 }
 0x155   :  { %v961_v6 = vadd.f32 %v960_v29, %v940_v46  ;;  %v1000_v16 = vpop.f32.mrf.mxu3 }
 0x156   :  { %4626 = vpow2.f32 %v4575_v7 }
 0x157   :  { %v1087_v3 = vadd.f32 %v961_v6, %v282_v14  ;;  %v980_v4 = vpop.f32.mrf.mxu2  ;;  %4628 = vpow2.f32 %v4573_v15 }
 0x158   :  { %v1001_v18 = vadd.f32 %v1000_v16, %v980_v4  ;;  %v7835_v4 = vperm.slane %v7778_v5, 6 }
 0x159   :  { %v4623_v42 = vpop.eup %4622  ;;  %v4576_v19 = vmul.f32 -1.442695, %v1087_v3 }
 0x15a   :  { %v4625_v30 = vpop.eup %4624  ;;  %v7808_v33 = vadd.f32 1.0, %v4623_v42  ;;  %v1088_v24 = vadd.f32 %v1001_v18, %v323_v21  ;;  %15229 = vst [vmem:[#allocation159_spill] sm:$0xff] %v7835_v4 }
 0x15b   :  { %v7812_v22 = vadd.f32 1.0, %v4625_v30 }
 0x15c   :  { %v4627_v37 = vpop.eup %4626  ;;  %4630 = vrcp.f32 %v7808_v33  ;;  %v4577_v27 = vmul.f32 -1.442695, %v1088_v24  ;;  %v7847_v24 = vperm.slane %v7778_v5, 7  ;;  %vm1150_vm3 = vweird.f32 %v7808_v33 }
 0x15d   :  { %4632 = vpow2.f32 %v4576_v19  ;;  %v4629_v25 = vpop.eup %4628  ;;  %v7816_v26 = vadd.f32 1.0, %v4627_v37  ;;  %vm1120_vm4 = vweird.f32 %v7812_v22  ;;  %v1080_v63 = vpop.f32.mrf.mxu3 }
 0x15e   :  { %4634 = vrcp.f32 %v7812_v22  ;;  %v7818_v46 = vadd.f32 1.0, %v4629_v25  ;;  %15230 = vst [vmem:[#allocation160_spill] sm:$0xff] %v7847_v24  ;;  %v1020_v25 = vpop.f32.mrf.mxu0 }
 0x15f   :  { %4636 = vrcp.f32 %v7816_v26  ;;  %vm1165_vm11 = vweird.f32 %v7816_v26 }
 0x160   :  { %4638 = vpow2.f32 %v4577_v27  ;;  %v1040_v27 = vpop.f32.mrf.mxu1  ;;  %vm1135_vm13 = vweird.f32 %v7818_v46 }
 0x161   :  { %4640 = vrcp.f32 %v7818_v46 }
 0x162   :  { %v4631_v28 = vpop.eup %4630 }
 0x163   :  { %v4633_v29 = vpop.eup %4632  ;;  %v1146_v41 = vmul.f32 %v4631_v28, %v7808_v33  ;;  %vm1151_vm2 = vweird.f32 %v4631_v28 }
 0x164   :  { %v7821_v34 = vpop.eup %4634  ;;  %v7825_v20 = vadd.f32 1.0, %v4633_v29  ;;  %v364_v29 = vadd.f32 %v7106_v55, %v7835_v4  ;;  %v1124_v55 = vand.u32 2147483647, %v7812_v22  ;;  %vm7863_vm5 = vmor %vm1150_vm3, %vm1151_vm2 }
 0x165   :  { %v1116_v6 = vmul.f32 %v7821_v34, %v7812_v22  ;;  %v7829_v7 = vpop.eup %4636  ;;  %v1147_v42 = vsub.f32 1.0, %v1146_v41  ;;  %vm1121_vm1 = vweird.f32 %v7821_v34 }
 0x166   :  { %v4639_v14 = vpop.eup %4638  ;;  %4642 = vrcp.f32 %v7825_v20  ;;  %v1161_v16 = vmul.f32 %v7829_v7, %v7816_v26  ;;  %vm7871_vm6 = vmor %vm1120_vm4, %vm1121_vm1  ;;  %vm1125_vm7 = vcmp.eq.f32.partialorder %v1124_v55, 8.507059e+37  ;;  %vm1166_vm10 = vweird.f32 %v7829_v7 }
 0x167   :  { %v1117_v15 = vsub.f32 1.0, %v1116_v6  ;;  %v7832_v3 = vpop.eup %4640  ;;  %v7839_v30 = vadd.f32 1.0, %v4639_v14  ;;  %v1148_v18 = vmul.f32 %v4631_v28, %v1147_v42  ;;  %v1041_v6 = vadd.f32 %v1040_v27, %v1020_v25  ;;  %vm7894_vm12 = vmor %vm1165_vm11, %vm1166_vm10 }
 0x168   :  { %v1131_v19 = vmul.f32 %v7832_v3, %v7818_v46  ;;  %v1162_v41 = vsub.f32 1.0, %v1161_v16  ;;  %v1156_v14 = vand.u32 2147483648, %v7808_v33  ;;  %v1126_v16 = vand.u32 2147483648, %v7812_v22 }
 0x169   :  { %v1118_v21 = vmul.f32 %v7821_v34, %v1117_v15  ;;  %4644 = vrcp.f32 %v7839_v30  ;;  %v1149_v42 = vadd.f32 %v4631_v28, %v1148_v18  ;;  %v1089_v1 = vadd.f32 %v1041_v6, %v364_v29  ;;  %v1060_v6 = vpop.f32.mrf.mxu2 }
 0x16a   :  { %v1132_v15 = vsub.f32 1.0, %v1131_v19  ;;  %v1154_v25 = vand.u32 2147483647, %v7808_v33  ;;  %v1163_v27 = vmul.f32 %v7829_v7, %v1162_v41  ;;  %v405_v19 = vadd.f32 %v7108_v45, %v7847_v24 }
 0x16b   :  { %v1119_v0 = vadd.f32 %v7821_v34, %v1118_v21  ;;  %4646 = vtanh.f32 %v1089_v1  ;;  %v1153_v33 = vsel %vm7863_vm5, %v4631_v28, %v1149_v42  ;;  %v1157_v22 = vor.u32 1.1754944e-38, %v1156_v14 }
 0x16c   :  { %v7844_v37 = vpop.eup %4642  ;;  %v1133_v45 = vmul.f32 %v7832_v3, %v1132_v15  ;;  %v1127_v61 = vor.u32 1.1754944e-38, %v1126_v16  ;;  %vm1155_vm8 = vcmp.eq.f32.partialorder %v1154_v25, 8.507059e+37  ;;  %v1081_v62 = vadd.f32 %v1080_v63, %v1060_v6 }
 0x16d   :  { %v1176_v5 = vmul.f32 %v7844_v37, %v7825_v20  ;;  %v1123_v1 = vsel %vm7871_vm6, %v7821_v34, %v1119_v0  ;;  %v1158_v60 = vsel %vm1155_vm8, %v1157_v22, %v1153_v33  ;;  %vm1136_vm9 = vweird.f32 %v7832_v3 }
 0x16e   :  { %v1164_v28 = vadd.f32 %v7829_v7, %v1163_v27  ;;  %v1171_v14 = vand.u32 2147483648, %v7816_v26  ;;  %v1128_v34 = vsel %vm1125_vm7, %v1127_v61, %v1123_v1  ;;  %v1090_v42 = vadd.f32 %v1081_v62, %v405_v19  ;;  %vm7907_vm14 = vmor %vm1135_vm13, %vm1136_vm9 }
 0x16f   :  { %v7877_v29 = vpop.eup %4644  ;;  %v1177_v41 = vsub.f32 1.0, %v1176_v5  ;;  %v1134_v63 = vadd.f32 %v7832_v3, %v1133_v45  ;;  %v1169_v55 = vand.u32 2147483647, %v7816_v26  ;;  %v1207_v16 = vmul.f32 0.0, %v1158_v60  ;;  %v7970_v60 = vld [vmem:[%s14463_s3 + $0x360] sm:$0xff] }
 0x170   :  { %v1191_v0 = vmul.f32 %v7877_v29, %v7839_v30  ;;  %v1141_v27 = vand.u32 2147483648, %v7818_v46  ;;  %4648 = vtanh.f32 %v1090_v42  ;;  %v1139_v62 = vand.u32 2147483647, %v7818_v46 }
 0x171   :  { %v4647_v5 = vpop.eup %4646  ;;  %v1178_v15 = vmul.f32 %v7844_v37, %v1177_v41  ;;  %v1168_v61 = vsel %vm7894_vm12, %v7829_v7, %v1164_v28  ;;  %v1172_v19 = vor.u32 1.1754944e-38, %v1171_v14  ;;  %vm1181_vm15 = vweird.f32 %v7844_v37 }
 0x172   :  { %v1209_v25 = vmul.f32 %v4647_v5, %v1128_v34  ;;  %v1192_v21 = vsub.f32 1.0, %v1191_v0  ;;  %v1138_v46 = vsel %vm7907_vm14, %v7832_v3, %v1134_v63  ;;  %vm1170_vm0 = vcmp.eq.f32.partialorder %v1169_v55, 8.507059e+37 }
 0x173   :  { %v1179_v33 = vadd.f32 %v7844_v37, %v1178_v15  ;;  %v1186_v7 = vand.u32 2147483648, %v7825_v20  ;;  %v1142_v22 = vor.u32 1.1754944e-38, %v1141_v27  ;;  %v1173_v41 = vsel %vm1170_vm0, %v1172_v19, %v1168_v61  ;;  %v7944_v27 = vld [vmem:[%s14463_s3 + $0x3e0] sm:$0xff] }
 0x174   :  { %v7903_v26 = vadd.f32 %v1209_v25, %v1207_v16  ;;  %vm1180_vm1 = vweird.f32 %v7825_v20  ;;  %v1184_v1 = vand.u32 2147483647, %v7825_v20  ;;  %vm1140_vm2 = vcmp.eq.f32.partialorder %v1139_v62, 8.507059e+37  ;;  %v7962_v62 = vld [vmem:[%s14463_s3 + $0x3a8] sm:$0xff]  ;;  %v8090_v16 = vld [vmem:[%s14463_s3 + $0x6e0] sm:$0xff] }
 0x175   :  { %vm1182_vm3 = vmor %vm1180_vm1, %vm1181_vm15  ;;  %v1193_v45 = vmul.f32 %v7877_v29, %v1192_v21  ;;  %v1143_v28 = vsel %vm1140_vm2, %v1142_v22, %v1138_v46  ;;  %v1208_v3 = vmul.f32 0.0, %v1173_v41  ;;  %v1187_v34 = vor.u32 1.1754944e-38, %v1186_v7  ;;  %v7984_v46 = vld [vmem:[%s14463_s3 + $0x320] sm:$0xff]  ;;  %v7996_v22 = vld [vmem:[%s14463_s3 + $0x328] sm:$0xff] }
 0x176   :  { %4650 = vtanh.f32 %v7903_v26  ;;  %v4649_v6 = vpop.eup %4648  ;;  %v1183_v14 = vsel %vm1182_vm3, %v7844_v37, %v1179_v33  ;;  %vm1185_vm4 = vcmp.eq.f32.partialorder %v1184_v1, 8.507059e+37  ;;  %vm1196_vm5 = vweird.f32 %v7877_v29  ;;  %v7976_v33 = vld [vmem:[%s14463_s3 + $0x368] sm:$0xff]  ;;  %v7990_v7 = vld [vmem:[%s14463_s3 + $0x7e0] sm:$0xff] }
 0x177   :  { %v1210_v0 = vmul.f32 %v4649_v6, %v1143_v28  ;;  %v1188_v15 = vsel %vm1185_vm4, %v1187_v34, %v1183_v14  ;;  %v1194_v63 = vadd.f32 %v7877_v29, %v1193_v45  ;;  %v1201_v20 = vand.u32 2147483648, %v7839_v30  ;;  %v8002_v41 = vld [vmem:[%s14463_s3 + $0x7e8] sm:$0xff]  ;;  %v8010_v1 = vld [vmem:[%s14463_s3 + $0x2e0] sm:$0xff] }
 0x178   :  { %vm1195_vm6 = vweird.f32 %v7839_v30  ;;  %v1199_v37 = vand.u32 2147483647, %v7839_v30  ;;  %v7950_v30 = vld [vmem:[%s14463_s3 + $0x3e8] sm:$0xff]  ;;  %v8016_v6 = vld [vmem:[%s14463_s3 + $0x7a0] sm:$0xff] }
 0x179   :  { %v7922_v42 = vadd.f32 %v1210_v0, %v1208_v3  ;;  %vm7932_vm7 = vmor %vm1195_vm6, %vm1196_vm5  ;;  %v1202_v18 = vor.u32 1.1754944e-38, %v1201_v20  ;;  %v8022_v45 = vld [vmem:[%s14463_s3 + $0x2e8] sm:$0xff]  ;;  %v8034_v14 = vld [vmem:[%s14463_s3 + $0x2a0] sm:$0xff] }
 0x17a   :  { %v1198_v25 = vsel %vm7932_vm7, %v7877_v29, %v1194_v63  ;;  %vm1200_vm8 = vcmp.eq.f32.partialorder %v1199_v37, 8.507059e+37  ;;  %v7956_v29 = vld [vmem:[%s14463_s3 + $0x3a0] sm:$0xff]  ;;  %v8028_v28 = vld [vmem:[%s14463_s3 + $0x7a8] sm:$0xff] }
 0x17b   :  { %4652 = vtanh.f32 %v7922_v42  ;;  %v1203_v19 = vsel %vm1200_vm8, %v1202_v18, %v1198_v25  ;;  %v8040_v3 = vld [vmem:[%s14463_s3 + $0x760] sm:$0xff]  ;;  %v8046_v0 = vld [vmem:[%s14463_s3 + $0x2a8] sm:$0xff] }
 0x17c   :  { %v4651_v5 = vpop.eup %4650  ;;  %v8052_v34 = vld [vmem:[%s14463_s3 + $0x768] sm:$0xff]  ;;  %v8084_v37 = vld [vmem:[%s14463_s3 + $0x220] sm:$0xff] }
 0x17d   :  { %v7927_v55 = vmul.f32 %v4651_v5, %v1188_v15  ;;  %v8058_v5 = vld [vmem:[%s14463_s3 + $0x260] sm:$0xff]  ;;  %v8070_v63 = vld [vmem:[%s14463_s3 + $0x268] sm:$0xff] }
 0x17e   :  { %v8064_v15 = vld [vmem:[%s14463_s3 + $0x720] sm:$0xff]  ;;  %v8076_v20 = vld [vmem:[%s14463_s3 + $0x728] sm:$0xff] }
 0x17f   :  { %1244 = vmatmul.f32.vlgmr.msra.gmra.mxu0 %v7927_v55  ;;  %1284 = vmatmul.f32.vlgmr.msra.gmra.mxu2 %v7927_v55  ;;  %v8096_v25 = vld [vmem:[%s14463_s3 + $0x228] sm:$0xff] }
 0x180   :  { %1388 = vmatpush.msra.mxu0 %v7944_v27  ;;  %1428 = vmatpush.msra.mxu2 %v7950_v30  ;;  %15241 = vst [vmem:[#allocation161_spill] sm:$0xff] %v8096_v25  ;;  %v8102_v18 = vld [vmem:[%s14463_s3 + $0x6e8] sm:$0xff] }
 0x181   :  { %v4653_v61 = vpop.eup %4652  ;;  %15242 = vst [vmem:[#allocation162_spill] sm:$0xff] %v8102_v18 }
 0x182   :  { %1389 = vmatpush.msra.mxu0 %v7956_v29  ;;  %1429 = vmatpush.msra.mxu2 %v7962_v62  ;;  %v7965_v21 = vmul.f32 %v4653_v61, %v1203_v19  ;;  %v8108_v61 = vld [vmem:[%s14463_s3 + $0x1e0] sm:$0xff] }
 0x183   :  { %15243 = vst [vmem:[#allocation163_spill] sm:$0xff] %v8108_v61  ;;  %v8114_v19 = vld [vmem:[%s14463_s3 + $0x6a0] sm:$0xff] }
 0x184   :  { %1390 = vmatpush.msra.mxu0 %v7970_v60  ;;  %1430 = vmatpush.msra.mxu2 %v7976_v33  ;;  %15244 = vst [vmem:[#allocation164_spill] sm:$0xff] %v8114_v19 }
 0x185   :  { %1264 = vmatmul.f32.vlgmr.msra.gmra.mxu1 %v7965_v21  ;;  %1304 = vmatmul.f32.vlgmr.msra.gmra.mxu3 %v7965_v21 }
 0x186   :  { %1391 = vmatpush.msra.mxu0 %v7984_v46  ;;  %1408 = vmatpush.msra.mxu1 %v7990_v7 }
 0x187   :  { %1431 = vmatpush.msra.mxu2 %v7996_v22  ;;  %1448 = vmatpush.msra.mxu3 %v8002_v41 }
 0x188   :  { %1324 = vmatmul.f32.vlgmr.msrb.gmra.mxu0 %v7927_v55  ;;  %1364 = vmatmul.f32.vlgmr.msrb.gmra.mxu2 %v7927_v55 }
 0x189   :  { %1392 = vmatpush.msra.mxu0 %v8010_v1  ;;  %1409 = vmatpush.msra.mxu1 %v8016_v6 }
 0x18a   :  { %1432 = vmatpush.msra.mxu2 %v8022_v45  ;;  %1449 = vmatpush.msra.mxu3 %v8028_v28 }
 0x18b   :  { %1393 = vmatpush.msra.mxu0 %v8034_v14  ;;  %1410 = vmatpush.msra.mxu1 %v8040_v3 }
 0x18c   :  { %1433 = vmatpush.msra.mxu2 %v8046_v0  ;;  %1450 = vmatpush.msra.mxu3 %v8052_v34 }
 0x18d   :  { %1394 = vmatpush.msra.mxu0 %v8058_v5  ;;  %1411 = vmatpush.msra.mxu1 %v8064_v15 }
 0x18e   :  { %1434 = vmatpush.msra.mxu2 %v8070_v63  ;;  %1451 = vmatpush.msra.mxu3 %v8076_v20 }
 0x18f   :  { %1344 = vmatmul.f32.vlgmr.msrb.gmra.mxu1 %v7965_v21  ;;  %1384 = vmatmul.f32.vlgmr.msrb.gmra.mxu3 %v7965_v21 }
 0x190   :  { %1395 = vmatpush.msra.mxu0 %v8084_v37  ;;  %1412 = vmatpush.msra.mxu1 %v8090_v16 }
 0x191   :  { %1435 = vmatpush.msra.mxu2 %v8096_v25  ;;  %1452 = vmatpush.msra.mxu3 %v8102_v18  ;;  %v8120_v25 = vld [vmem:[%s14463_s3 + $0x1e8] sm:$0xff] }
 0x192   :  { %1396 = vmatpush.msra.mxu0 %v8108_v61  ;;  %1413 = vmatpush.msra.mxu1 %v8114_v19  ;;  %15245 = vst [vmem:[#allocation165_spill] sm:$0xff] %v8120_v25  ;;  %v8126_v18 = vld [vmem:[%s14463_s3 + $0x6a8] sm:$0xff]  ;;  %v8132_v61 = vld [vmem:[%s14463_s3 + $0x1a0] sm:$0xff] }
 0x193   :  { %1436 = vmatpush.msra.mxu2 %v8120_v25  ;;  %15246 = vst [vmem:[#allocation166_spill] sm:$0xff] %v8126_v18  ;;  %1453 = vmatpush.msra.mxu3 %v8126_v18  ;;  %v8138_v19 = vld [vmem:[%s14463_s3 + $0x660] sm:$0xff]  ;;  %v8144_v25 = vld [vmem:[%s14463_s3 + $0x1a8] sm:$0xff] }
 0x194   :  { %15247 = vst [vmem:[#allocation167_spill] sm:$0xff] %v8132_v61  ;;  %1397 = vmatpush.msra.mxu0 %v8132_v61  ;;  %1414 = vmatpush.msra.mxu1 %v8138_v19  ;;  %v8150_v18 = vld [vmem:[%s14463_s3 + $0x668] sm:$0xff]  ;;  %v8156_v61 = vld [vmem:[%s14463_s3 + $0x160] sm:$0xff] }
 0x195   :  { %15248 = vst [vmem:[#allocation168_spill] sm:$0xff] %v8138_v19  ;;  %1437 = vmatpush.msra.mxu2 %v8144_v25  ;;  %1454 = vmatpush.msra.mxu3 %v8150_v18  ;;  %v8162_v19 = vld [vmem:[%s14463_s3 + $0x620] sm:$0xff] }
 0x196   :  { %15249 = vst [vmem:[#allocation169_spill] sm:$0xff] %v8144_v25  ;;  %1398 = vmatpush.msra.mxu0 %v8156_v61  ;;  %1415 = vmatpush.msra.mxu1 %v8162_v19  ;;  %v8168_v25 = vld [vmem:[%s14463_s3 + $0x168] sm:$0xff] }
 0x197   :  { %15250 = vst [vmem:[#allocation170_spill] sm:$0xff] %v8150_v18  ;;  %1438 = vmatpush.msra.mxu2 %v8168_v25  ;;  %v8174_v18 = vld [vmem:[%s14463_s3 + $0x628] sm:$0xff] }
 0x198   :  { %15251 = vst [vmem:[#allocation171_spill] sm:$0xff] %v8156_v61  ;;  %1455 = vmatpush.msra.mxu3 %v8174_v18  ;;  %v8180_v61 = vld [vmem:[%s14463_s3 + $0x120] sm:$0xff] }
 0x199   :  { %15252 = vst [vmem:[#allocation172_spill] sm:$0xff] %v8162_v19  ;;  %1399 = vmatpush.msra.mxu0 %v8180_v61  ;;  %v8186_v19 = vld [vmem:[%s14463_s3 + $0x5e0] sm:$0xff] }
 0x19a   :  { %15253 = vst [vmem:[#allocation173_spill] sm:$0xff] %v8168_v25  ;;  %1416 = vmatpush.msra.mxu1 %v8186_v19  ;;  %v8192_v25 = vld [vmem:[%s14463_s3 + $0x128] sm:$0xff] }
 0x19b   :  { %15254 = vst [vmem:[#allocation174_spill] sm:$0xff] %v8174_v18  ;;  %1439 = vmatpush.msra.mxu2 %v8192_v25  ;;  %v8198_v18 = vld [vmem:[%s14463_s3 + $0x5e8] sm:$0xff] }
 0x19c   :  { %15255 = vst [vmem:[#allocation175_spill] sm:$0xff] %v8180_v61  ;;  %1456 = vmatpush.msra.mxu3 %v8198_v18  ;;  %v8204_v61 = vld [vmem:[%s14463_s3 + $0xe0] sm:$0xff] }
 0x19d   :  { %15256 = vst [vmem:[#allocation176_spill] sm:$0xff] %v8186_v19  ;;  %1400 = vmatpush.msra.mxu0 %v8204_v61  ;;  %v8210_v19 = vld [vmem:[%s14463_s3 + $0x5a0] sm:$0xff] }
 0x19e   :  { %15257 = vst [vmem:[#allocation177_spill] sm:$0xff] %v8192_v25  ;;  %1417 = vmatpush.msra.mxu1 %v8210_v19  ;;  %v8216_v25 = vld [vmem:[%s14463_s3 + $0xe8] sm:$0xff] }
 0x19f   :  { %15258 = vst [vmem:[#allocation178_spill] sm:$0xff] %v8198_v18  ;;  %1440 = vmatpush.msra.mxu2 %v8216_v25  ;;  %v8222_v18 = vld [vmem:[%s14463_s3 + $0x5a8] sm:$0xff] }
 0x1a0   :  { %15259 = vst [vmem:[#allocation179_spill] sm:$0xff] %v8204_v61  ;;  %1457 = vmatpush.msra.mxu3 %v8222_v18  ;;  %v8228_v61 = vld [vmem:[%s14463_s3 + $0xa0] sm:$0xff] }
 0x1a1   :  { %15260 = vst [vmem:[#allocation180_spill] sm:$0xff] %v8210_v19  ;;  %1401 = vmatpush.msra.mxu0 %v8228_v61  ;;  %v8234_v19 = vld [vmem:[%s14463_s3 + $0x560] sm:$0xff] }
 0x1a2   :  { %15261 = vst [vmem:[#allocation181_spill] sm:$0xff] %v8216_v25  ;;  %1418 = vmatpush.msra.mxu1 %v8234_v19  ;;  %v8240_v25 = vld [vmem:[%s14463_s3 + $0xa8] sm:$0xff] }
 0x1a3   :  { %15262 = vst [vmem:[#allocation182_spill] sm:$0xff] %v8222_v18  ;;  %1441 = vmatpush.msra.mxu2 %v8240_v25  ;;  %v8246_v18 = vld [vmem:[%s14463_s3 + $0x568] sm:$0xff] }
 0x1a4   :  { %15263 = vst [vmem:[#allocation183_spill] sm:$0xff] %v8228_v61  ;;  %1458 = vmatpush.msra.mxu3 %v8246_v18  ;;  %v8252_v61 = vld [vmem:[%s14463_s3 + $0x60] sm:$0xff] }
 0x1a5   :  { %15264 = vst [vmem:[#allocation184_spill] sm:$0xff] %v8234_v19  ;;  %1402 = vmatpush.msra.mxu0 %v8252_v61  ;;  %v8258_v19 = vld [vmem:[%s14463_s3 + $0x520] sm:$0xff] }
 0x1a6   :  { %15265 = vst [vmem:[#allocation185_spill] sm:$0xff] %v8240_v25  ;;  %1419 = vmatpush.msra.mxu1 %v8258_v19  ;;  %v8264_v25 = vld [vmem:[%s14463_s3 + $0x68] sm:$0xff] }
 0x1a7   :  { %15266 = vst [vmem:[#allocation186_spill] sm:$0xff] %v8246_v18  ;;  %1442 = vmatpush.msra.mxu2 %v8264_v25  ;;  %v8270_v18 = vld [vmem:[%s14463_s3 + $0x528] sm:$0xff] }
 0x1a8   :  { %15267 = vst [vmem:[#allocation187_spill] sm:$0xff] %v8252_v61  ;;  %1459 = vmatpush.msra.mxu3 %v8270_v18  ;;  %v8276_v61 = vld [vmem:[%s14463_s3 + $0x20] sm:$0xff] }
 0x1a9   :  { %15268 = vst [vmem:[#allocation188_spill] sm:$0xff] %v8258_v19  ;;  %1403 = vmatpush.msra.mxu0 %v8276_v61  ;;  %v8282_v19 = vld [vmem:[%s14463_s3 + $0x4e0] sm:$0xff] }
 0x1aa   :  { %15269 = vst [vmem:[#allocation189_spill] sm:$0xff] %v8264_v25  ;;  %1420 = vmatpush.msra.mxu1 %v8282_v19  ;;  %v8288_v25 = vld [vmem:[%s14463_s3 + $0x28] sm:$0xff]  ;;  %1404 = vmatmul.f32.vlgmr.msra.gmra.mxu0 %v7927_v55 }
 0x1ab   :  { %15270 = vst [vmem:[#allocation190_spill] sm:$0xff] %v8270_v18  ;;  %1443 = vmatpush.msra.mxu2 %v8288_v25  ;;  %v8294_v18 = vld [vmem:[%s14463_s3 + $0x4e8] sm:$0xff] }
 0x1ac   :  { %15271 = vst [vmem:[#allocation191_spill] sm:$0xff] %v8276_v61  ;;  %1460 = vmatpush.msra.mxu3 %v8294_v18  ;;  %1444 = vmatmul.f32.vlgmr.msra.gmra.mxu2 %v7927_v55  ;;  %v8320_v61 = vld [vmem:[%s14463_s3 + $0x4a8] sm:$0xff] }
 0x1ad   :  { %15272 = vst [vmem:[#allocation192_spill] sm:$0xff] %v8282_v19  ;;  %v8302_v19 = vld [vmem:[%s14463_s3 + $0x3f0] sm:$0xff] }
 0x1ae   :  { %15273 = vst [vmem:[#allocation193_spill] sm:$0xff] %v8288_v25  ;;  %1468 = vmatpush.msrb.mxu0 %v8302_v19  ;;  %v8308_v25 = vld [vmem:[%s14463_s3 + $0x3f8] sm:$0xff]  ;;  %1461 = vmatpush.msra.mxu3 %v8320_v61 }
 0x1af   :  { %15274 = vst [vmem:[#allocation194_spill] sm:$0xff] %v8294_v18  ;;  %1508 = vmatpush.msrb.mxu2 %v8308_v25  ;;  %v8314_v18 = vld [vmem:[%s14463_s3 + $0x4a0] sm:$0xff] }
 0x1b0   :  { %15275 = vst [vmem:[#allocation195_spill] sm:$0xff] %v8302_v19  ;;  %1421 = vmatpush.msra.mxu1 %v8314_v18  ;;  %v8326_v19 = vld [vmem:[%s14463_s3 + $0x3b0] sm:$0xff] }
 0x1b1   :  { %15276 = vst [vmem:[#allocation196_spill] sm:$0xff] %v8308_v25  ;;  %1469 = vmatpush.msrb.mxu0 %v8326_v19  ;;  %v8332_v25 = vld [vmem:[%s14463_s3 + $0x3b8] sm:$0xff] }
 0x1b2   :  { %15277 = vst [vmem:[#allocation197_spill] sm:$0xff] %v8314_v18  ;;  %1509 = vmatpush.msrb.mxu2 %v8332_v25  ;;  %v8338_v18 = vld [vmem:[%s14463_s3 + $0x460] sm:$0xff] }
 0x1b3   :  { %15278 = vst [vmem:[#allocation198_spill] sm:$0xff] %v8320_v61  ;;  %1422 = vmatpush.msra.mxu1 %v8338_v18  ;;  %v8344_v61 = vld [vmem:[%s14463_s3 + $0x468] sm:$0xff] }
 0x1b4   :  { %15279 = vst [vmem:[#allocation199_spill] sm:$0xff] %v8326_v19  ;;  %1462 = vmatpush.msra.mxu3 %v8344_v61  ;;  %v8350_v19 = vld [vmem:[%s14463_s3 + $0x370] sm:$0xff] }
 0x1b5   :  { %15280 = vst [vmem:[#allocation200_spill] sm:$0xff] %v8332_v25  ;;  %1470 = vmatpush.msrb.mxu0 %v8350_v19  ;;  %v8356_v25 = vld [vmem:[%s14463_s3 + $0x378] sm:$0xff] }
 0x1b6   :  { %15281 = vst [vmem:[#allocation201_spill] sm:$0xff] %v8338_v18  ;;  %1510 = vmatpush.msrb.mxu2 %v8356_v25  ;;  %v8362_v18 = vld [vmem:[%s14463_s3 + $0x420] sm:$0xff] }
 0x1b7   :  { %15282 = vst [vmem:[#allocation202_spill] sm:$0xff] %v8344_v61  ;;  %1423 = vmatpush.msra.mxu1 %v8362_v18  ;;  %v8368_v61 = vld [vmem:[%s14463_s3 + $0x428] sm:$0xff] }
 0x1b8   :  { %15283 = vst [vmem:[#allocation203_spill] sm:$0xff] %v8350_v19  ;;  %1463 = vmatpush.msra.mxu3 %v8368_v61  ;;  %1424 = vmatmul.f32.vlgmr.msra.gmra.mxu1 %v7965_v21  ;;  %v8394_v19 = vld [vmem:[%s14463_s3 + $0x7f8] sm:$0xff] }
 0x1b9   :  { %15284 = vst [vmem:[#allocation204_spill] sm:$0xff] %v8356_v25  ;;  %1464 = vmatmul.f32.vlgmr.msra.gmra.mxu3 %v7965_v21  ;;  %v8376_v25 = vld [vmem:[%s14463_s3 + $0x330] sm:$0xff] }
 0x1ba   :  { %15285 = vst [vmem:[#allocation205_spill] sm:$0xff] %v8362_v18  ;;  %1471 = vmatpush.msrb.mxu0 %v8376_v25  ;;  %v8382_v18 = vld [vmem:[%s14463_s3 + $0x7f0] sm:$0xff]  ;;  %1528 = vmatpush.msrb.mxu3 %v8394_v19 }
 0x1bb   :  { %15286 = vst [vmem:[#allocation206_spill] sm:$0xff] %v8368_v61  ;;  %1488 = vmatpush.msrb.mxu1 %v8382_v18  ;;  %v8388_v61 = vld [vmem:[%s14463_s3 + $0x338] sm:$0xff] }
 0x1bc   :  { %15287 = vst [vmem:[#allocation207_spill] sm:$0xff] %v8376_v25  ;;  %1511 = vmatpush.msrb.mxu2 %v8388_v61  ;;  %v8400_v25 = vld [vmem:[%s14463_s3 + $0x2f0] sm:$0xff] }
 0x1bd   :  { %15288 = vst [vmem:[#allocation208_spill] sm:$0xff] %v8382_v18  ;;  %1472 = vmatpush.msrb.mxu0 %v8400_v25  ;;  %v8406_v18 = vld [vmem:[%s14463_s3 + $0x7b0] sm:$0xff] }
 0x1be   :  { %15289 = vst [vmem:[#allocation209_spill] sm:$0xff] %v8388_v61  ;;  %1489 = vmatpush.msrb.mxu1 %v8406_v18  ;;  %v8412_v61 = vld [vmem:[%s14463_s3 + $0x2f8] sm:$0xff] }
 0x1bf   :  { %15290 = vst [vmem:[#allocation210_spill] sm:$0xff] %v8394_v19  ;;  %1512 = vmatpush.msrb.mxu2 %v8412_v61  ;;  %v8418_v19 = vld [vmem:[%s14463_s3 + $0x7b8] sm:$0xff] }
 0x1c0   :  { %15291 = vst [vmem:[#allocation211_spill] sm:$0xff] %v8400_v25  ;;  %1529 = vmatpush.msrb.mxu3 %v8418_v19  ;;  %v8424_v25 = vld [vmem:[%s14463_s3 + $0x2b0] sm:$0xff] }
 0x1c1   :  { %15292 = vst [vmem:[#allocation212_spill] sm:$0xff] %v8406_v18  ;;  %1473 = vmatpush.msrb.mxu0 %v8424_v25  ;;  %v8430_v18 = vld [vmem:[%s14463_s3 + $0x770] sm:$0xff] }
 0x1c2   :  { %15293 = vst [vmem:[#allocation213_spill] sm:$0xff] %v8412_v61  ;;  %1490 = vmatpush.msrb.mxu1 %v8430_v18  ;;  %v8436_v61 = vld [vmem:[%s14463_s3 + $0x2b8] sm:$0xff] }
 0x1c3   :  { %15294 = vst [vmem:[#allocation214_spill] sm:$0xff] %v8418_v19  ;;  %1513 = vmatpush.msrb.mxu2 %v8436_v61  ;;  %v8442_v19 = vld [vmem:[%s14463_s3 + $0x778] sm:$0xff] }
 0x1c4   :  { %15295 = vst [vmem:[#allocation215_spill] sm:$0xff] %v8424_v25  ;;  %1530 = vmatpush.msrb.mxu3 %v8442_v19  ;;  %v8448_v25 = vld [vmem:[%s14463_s3 + $0x270] sm:$0xff] }
 0x1c5   :  { %15296 = vst [vmem:[#allocation216_spill] sm:$0xff] %v8430_v18  ;;  %1474 = vmatpush.msrb.mxu0 %v8448_v25  ;;  %v8454_v18 = vld [vmem:[%s14463_s3 + $0x730] sm:$0xff] }
 0x1c6   :  { %15297 = vst [vmem:[#allocation217_spill] sm:$0xff] %v8436_v61  ;;  %1491 = vmatpush.msrb.mxu1 %v8454_v18  ;;  %v8460_v61 = vld [vmem:[%s14463_s3 + $0x278] sm:$0xff] }
 0x1c7   :  { %15298 = vst [vmem:[#allocation218_spill] sm:$0xff] %v8442_v19  ;;  %1514 = vmatpush.msrb.mxu2 %v8460_v61  ;;  %v8466_v19 = vld [vmem:[%s14463_s3 + $0x738] sm:$0xff] }
 0x1c8   :  { %15299 = vst [vmem:[#allocation219_spill] sm:$0xff] %v8448_v25  ;;  %1531 = vmatpush.msrb.mxu3 %v8466_v19  ;;  %v8472_v25 = vld [vmem:[%s14463_s3 + $0x230] sm:$0xff] }
 0x1c9   :  { %15300 = vst [vmem:[#allocation220_spill] sm:$0xff] %v8454_v18  ;;  %1475 = vmatpush.msrb.mxu0 %v8472_v25  ;;  %v8478_v18 = vld [vmem:[%s14463_s3 + $0x6f0] sm:$0xff] }
 0x1ca   :  { %15301 = vst [vmem:[#allocation221_spill] sm:$0xff] %v8460_v61  ;;  %1492 = vmatpush.msrb.mxu1 %v8478_v18  ;;  %v8484_v61 = vld [vmem:[%s14463_s3 + $0x238] sm:$0xff] }
 0x1cb   :  { %15302 = vst [vmem:[#allocation222_spill] sm:$0xff] %v8466_v19  ;;  %1515 = vmatpush.msrb.mxu2 %v8484_v61  ;;  %v8490_v19 = vld [vmem:[%s14463_s3 + $0x6f8] sm:$0xff] }
 0x1cc   :  { %15303 = vst [vmem:[#allocation223_spill] sm:$0xff] %v8472_v25  ;;  %1532 = vmatpush.msrb.mxu3 %v8490_v19  ;;  %v8496_v25 = vld [vmem:[%s14463_s3 + $0x1f0] sm:$0xff] }
 0x1cd   :  { %15304 = vst [vmem:[#allocation224_spill] sm:$0xff] %v8478_v18  ;;  %1476 = vmatpush.msrb.mxu0 %v8496_v25  ;;  %v8502_v18 = vld [vmem:[%s14463_s3 + $0x6b0] sm:$0xff] }
 0x1ce   :  { %15305 = vst [vmem:[#allocation225_spill] sm:$0xff] %v8484_v61  ;;  %1493 = vmatpush.msrb.mxu1 %v8502_v18  ;;  %v8508_v61 = vld [vmem:[%s14463_s3 + $0x1f8] sm:$0xff] }
 0x1cf   :  { %15306 = vst [vmem:[#allocation226_spill] sm:$0xff] %v8490_v19  ;;  %1516 = vmatpush.msrb.mxu2 %v8508_v61  ;;  %v8514_v19 = vld [vmem:[%s14463_s3 + $0x6b8] sm:$0xff] }
 0x1d0   :  { %15307 = vst [vmem:[#allocation227_spill] sm:$0xff] %v8496_v25  ;;  %1533 = vmatpush.msrb.mxu3 %v8514_v19  ;;  %v8520_v25 = vld [vmem:[%s14463_s3 + $0x1b0] sm:$0xff] }
 0x1d1   :  { %15308 = vst [vmem:[#allocation228_spill] sm:$0xff] %v8502_v18  ;;  %1477 = vmatpush.msrb.mxu0 %v8520_v25  ;;  %v8526_v18 = vld [vmem:[%s14463_s3 + $0x670] sm:$0xff]  ;;  %1517 = vmatpush.msrb.mxu2 %v6965_v50  ;;  %v8547_v50 = vld [vmem:[%s14463_s3 + $0x638] sm:$0xff] }
 0x1d2   :  { %15309 = vst [vmem:[#allocation229_spill] sm:$0xff] %v8514_v19  ;;  %1494 = vmatpush.msrb.mxu1 %v8526_v18  ;;  %v8533_v19 = vld [vmem:[%s14463_s3 + $0x678] sm:$0xff] }
 0x1d3   :  { %15310 = vst [vmem:[#allocation230_spill] sm:$0xff] %v8520_v25  ;;  %1534 = vmatpush.msrb.mxu3 %v8533_v19  ;;  %1478 = vmatpush.msrb.mxu0 %v6973_v53  ;;  %v8540_v25 = vld [vmem:[%s14463_s3 + $0x630] sm:$0xff] }
 0x1d4   :  { %1495 = vmatpush.msrb.mxu1 %v8540_v25  ;;  %1518 = vmatpush.msrb.mxu2 %v6981_v43  ;;  %v8554_v53 = vld [vmem:[%s14463_s3 + $0x5f0] sm:$0xff]  ;;  %v8561_v43 = vld [vmem:[%s14463_s3 + $0x5f8] sm:$0xff] }
 0x1d5   :  { %1535 = vmatpush.msrb.mxu3 %v8547_v50  ;;  %1479 = vmatpush.msrb.mxu0 %v6990_v10  ;;  %v8568_v10 = vld [vmem:[%s14463_s3 + $0x5b0] sm:$0xff] }
 0x1d6   :  { %1496 = vmatpush.msrb.mxu1 %v8554_v53  ;;  %1519 = vmatpush.msrb.mxu2 %v6999_v32  ;;  %15311 = vst [vmem:[#allocation231_spill] sm:$0xff] %v8568_v10  ;;  %v8575_v32 = vld [vmem:[%s14463_s3 + $0x5b8] sm:$0xff] }
 0x1d7   :  { %1536 = vmatpush.msrb.mxu3 %v8561_v43  ;;  %1480 = vmatpush.msrb.mxu0 %v7008_v51  ;;  %15312 = vst [vmem:[#allocation232_spill] sm:$0xff] %v8575_v32  ;;  %v8582_v51 = vld [vmem:[%s14463_s3 + $0x570] sm:$0xff] }
 0x1d8   :  { %1497 = vmatpush.msrb.mxu1 %v8568_v10  ;;  %1520 = vmatpush.msrb.mxu2 %v7017_v48  ;;  %15313 = vst [vmem:[#allocation233_spill] sm:$0xff] %v8582_v51  ;;  %v8589_v48 = vld [vmem:[%s14463_s3 + $0x578] sm:$0xff] }
 0x1d9   :  { %1537 = vmatpush.msrb.mxu3 %v8575_v32  ;;  %1481 = vmatpush.msrb.mxu0 %v7032_v54  ;;  %15314 = vst [vmem:[#allocation234_spill] sm:$0xff] %v8589_v48  ;;  %v8596_v54 = vld [vmem:[%s14463_s3 + $0x530] sm:$0xff] }
 0x1da   :  { %1498 = vmatpush.msrb.mxu1 %v8582_v51  ;;  %1521 = vmatpush.msrb.mxu2 %v7047_v47  ;;  %15315 = vst [vmem:[#allocation235_spill] sm:$0xff] %v8596_v54  ;;  %v8603_v47 = vld [vmem:[%s14463_s3 + $0x538] sm:$0xff] }
 0x1db   :  { %1538 = vmatpush.msrb.mxu3 %v8589_v48  ;;  %1482 = vmatpush.msrb.mxu0 %v7059_v49  ;;  %15316 = vst [vmem:[#allocation236_spill] sm:$0xff] %v8603_v47  ;;  %v8610_v49 = vld [vmem:[%s14463_s3 + $0x4f0] sm:$0xff] }
 0x1dc   :  { %1499 = vmatpush.msrb.mxu1 %v8596_v54  ;;  %1522 = vmatpush.msrb.mxu2 %v7071_v58  ;;  %15317 = vst [vmem:[#allocation237_spill] sm:$0xff] %v8610_v49  ;;  %v15319_v58 = vld [vmem:[#allocation34_spill] sm:$0xff]  ;;  %v15324_v54 = vld [vmem:[#allocation37_spill] sm:$0xff] }
 0x1dd   :  { %1539 = vmatpush.msrb.mxu3 %v8603_v47  ;;  %1483 = vmatpush.msrb.mxu0 %v7083_v56  ;;  %v15318_v56 = vld [vmem:[#allocation40_spill] sm:$0xff]  ;;  %v15320_v47 = vld [vmem:[#allocation35_spill] sm:$0xff] }
 0x1de   :  { %1500 = vmatpush.msrb.mxu1 %v8610_v49  ;;  %1523 = vmatpush.msrb.mxu2 %v7095_v11  ;;  %v15321_v49 = vld [vmem:[#allocation43_spill] sm:$0xff]  ;;  %v15322_v11 = vld [vmem:[#allocation44_spill] sm:$0xff] }
 0x1df   :  { %1540 = vmatpush.msrb.mxu3 %v7022_v40  ;;  %1484 = vmatmul.f32.vlgmr.msrb.gmra.mxu0 %v7927_v55  ;;  %v15323_v40 = vld [vmem:[#allocation36_spill] sm:$0xff] }
 0x1e0   :  { %1524 = vmatmul.f32.vlgmr.msrb.gmra.mxu2 %v7927_v55  ;;  %1501 = vmatpush.msrb.mxu1 %v7037_v39  ;;  %v15326_v39 = vld [vmem:[#allocation41_spill] sm:$0xff]  ;;  %v15328_v55 = vld [vmem:[#allocation54_spill] sm:$0xff] }
 0x1e1   :  { %1541 = vmatpush.msrb.mxu3 %v7052_v38  ;;  %1693 = vmatpush.msra.mxu0 %v7123_v36  ;;  %v15325_v36 = vld [vmem:[#allocation49_spill] sm:$0xff]  ;;  %v15327_v38 = vld [vmem:[#allocation42_spill] sm:$0xff] }
 0x1e2   :  { %1733 = vmatpush.msra.mxu2 %v15318_v56  ;;  %1502 = vmatpush.msrb.mxu1 %v15319_v58  ;;  %v15331_v56 = vld [vmem:[#allocation46_spill] sm:$0xff]  ;;  %v15333_v58 = vld [vmem:[#allocation59_spill] sm:$0xff] }
 0x1e3   :  { %1542 = vmatpush.msrb.mxu3 %v15320_v47  ;;  %1694 = vmatpush.msra.mxu0 %v15321_v49  ;;  %v15329_v47 = vld [vmem:[#allocation55_spill] sm:$0xff]  ;;  %v15330_v49 = vld [vmem:[#allocation45_spill] sm:$0xff] }
 0x1e4   :  { %1734 = vmatpush.msra.mxu2 %v15322_v11  ;;  %1503 = vmatpush.msrb.mxu1 %v15323_v40  ;;  %v15336_v11 = vld [vmem:[#allocation62_spill] sm:$0xff]  ;;  %v15337_v40 = vld [vmem:[#allocation63_spill] sm:$0xff] }
 0x1e5   :  { %1543 = vmatpush.msrb.mxu3 %v15324_v54  ;;  %1504 = vmatmul.f32.vlgmr.msrb.gmra.mxu1 %v7965_v21  ;;  %v15332_v54 = vld [vmem:[#allocation58_spill] sm:$0xff] }
 0x1e6   :  { %1544 = vmatmul.f32.vlgmr.msrb.gmra.mxu3 %v7965_v21  ;;  %1695 = vmatpush.msra.mxu0 %v7175_v59  ;;  %v15334_v21 = vld [vmem:[#allocation52_spill] sm:$0xff]  ;;  %v15335_v59 = vld [vmem:[#allocation53_spill] sm:$0xff] }
 0x1e7   :  { %1735 = vmatpush.msra.mxu2 %v15325_v36  ;;  %1713 = vmatpush.msra.mxu1 %v15326_v39  ;;  %v15338_v36 = vld [vmem:[#allocation56_spill] sm:$0xff]  ;;  %v15339_v39 = vld [vmem:[#allocation57_spill] sm:$0xff] }
 0x1e8   :  { %1753 = vmatpush.msra.mxu3 %v15327_v38  ;;  %1696 = vmatpush.msra.mxu0 %v15328_v55  ;;  %v15340_v38 = vld [vmem:[#allocation68_spill] sm:$0xff]  ;;  %v15341_v55 = vld [vmem:[#allocation69_spill] sm:$0xff] }
 0x1e9   :  { %1736 = vmatpush.msra.mxu2 %v15329_v47  ;;  %1714 = vmatpush.msra.mxu1 %v15330_v49  ;;  %v15342_v47 = vld [vmem:[#allocation60_spill] sm:$0xff]  ;;  %v15343_v49 = vld [vmem:[#allocation61_spill] sm:$0xff] }
 0x1ea   :  { %1754 = vmatpush.msra.mxu3 %v15331_v56  ;;  %1697 = vmatpush.msra.mxu0 %v15332_v54  ;;  %v15344_v56 = vld [vmem:[#allocation72_spill] sm:$0xff]  ;;  %v15345_v54 = vld [vmem:[#allocation73_spill] sm:$0xff] }
 0x1eb   :  { %1737 = vmatpush.msra.mxu2 %v15333_v58  ;;  %1715 = vmatpush.msra.mxu1 %v15334_v21  ;;  %v15346_v58 = vld [vmem:[#allocation64_spill] sm:$0xff]  ;;  %v15347_v21 = vld [vmem:[#allocation65_spill] sm:$0xff] }
 0x1ec   :  { %1755 = vmatpush.msra.mxu3 %v15335_v59  ;;  %1698 = vmatpush.msra.mxu0 %v15336_v11  ;;  %v15348_v59 = vld [vmem:[#allocation78_spill] sm:$0xff]  ;;  %v15349_v11 = vld [vmem:[#allocation79_spill] sm:$0xff] }
 0x1ed   :  { %1738 = vmatpush.msra.mxu2 %v15337_v40  ;;  %1716 = vmatpush.msra.mxu1 %v15338_v36  ;;  %v15350_v40 = vld [vmem:[#allocation70_spill] sm:$0xff]  ;;  %v15351_v36 = vld [vmem:[#allocation71_spill] sm:$0xff] }
 0x1ee   :  { %1756 = vmatpush.msra.mxu3 %v15339_v39  ;;  %1699 = vmatpush.msra.mxu0 %v15340_v38  ;;  %v15352_v39 = vld [vmem:[#allocation82_spill] sm:$0xff]  ;;  %v15353_v38 = vld [vmem:[#allocation83_spill] sm:$0xff] }
 0x1ef   :  { %1739 = vmatpush.msra.mxu2 %v15341_v55  ;;  %1717 = vmatpush.msra.mxu1 %v15342_v47  ;;  %v15354_v55 = vld [vmem:[#allocation76_spill] sm:$0xff]  ;;  %v15355_v47 = vld [vmem:[#allocation77_spill] sm:$0xff] }
 0x1f0   :  { %1757 = vmatpush.msra.mxu3 %v15343_v49  ;;  %1700 = vmatpush.msra.mxu0 %v15344_v56  ;;  %v15356_v49 = vld [vmem:[#allocation86_spill] sm:$0xff]  ;;  %v15357_v56 = vld [vmem:[#allocation87_spill] sm:$0xff] }
 0x1f1   :  { %1740 = vmatpush.msra.mxu2 %v15345_v54  ;;  %1718 = vmatpush.msra.mxu1 %v15346_v58  ;;  %v15358_v54 = vld [vmem:[#allocation80_spill] sm:$0xff]  ;;  %v15359_v58 = vld [vmem:[#allocation81_spill] sm:$0xff] }
 0x1f2   :  { %1758 = vmatpush.msra.mxu3 %v15347_v21  ;;  %1701 = vmatpush.msra.mxu0 %v15348_v59  ;;  %v15360_v21 = vld [vmem:[#allocation92_spill] sm:$0xff]  ;;  %v15361_v59 = vld [vmem:[#allocation93_spill] sm:$0xff] }
 0x1f3   :  { %1741 = vmatpush.msra.mxu2 %v15349_v11  ;;  %1719 = vmatpush.msra.mxu1 %v15350_v40  ;;  %v15362_v11 = vld [vmem:[#allocation84_spill] sm:$0xff]  ;;  %v15363_v40 = vld [vmem:[#allocation85_spill] sm:$0xff] }
 0x1f4   :  { %1759 = vmatpush.msra.mxu3 %v15351_v36  ;;  %1702 = vmatpush.msra.mxu0 %v15352_v39  ;;  %v15364_v36 = vld [vmem:[#allocation96_spill] sm:$0xff]  ;;  %v15365_v39 = vld [vmem:[#allocation97_spill] sm:$0xff] }
 0x1f5   :  { %1742 = vmatpush.msra.mxu2 %v15353_v38  ;;  %1720 = vmatpush.msra.mxu1 %v15354_v55  ;;  %v15366_v38 = vld [vmem:[#allocation88_spill] sm:$0xff]  ;;  %v15367_v55 = vld [vmem:[#allocation89_spill] sm:$0xff] }
 0x1f6   :  { %1760 = vmatpush.msra.mxu3 %v15355_v47  ;;  %1703 = vmatpush.msra.mxu0 %v15356_v49  ;;  %v15368_v47 = vld [vmem:[#allocation102_spill] sm:$0xff]  ;;  %v15369_v49 = vld [vmem:[#allocation103_spill] sm:$0xff] }
 0x1f7   :  { %1743 = vmatpush.msra.mxu2 %v15357_v56  ;;  %1721 = vmatpush.msra.mxu1 %v15358_v54  ;;  %v15370_v56 = vld [vmem:[#allocation94_spill] sm:$0xff]  ;;  %v15371_v54 = vld [vmem:[#allocation95_spill] sm:$0xff] }
 0x1f8   :  { %1761 = vmatpush.msra.mxu3 %v15359_v58  ;;  %1704 = vmatpush.msra.mxu0 %v15360_v21  ;;  %v15372_v58 = vld [vmem:[#allocation106_spill] sm:$0xff]  ;;  %v15373_v21 = vld [vmem:[#allocation107_spill] sm:$0xff] }
 0x1f9   :  { %1744 = vmatpush.msra.mxu2 %v15361_v59  ;;  %1722 = vmatpush.msra.mxu1 %v15362_v11  ;;  %v15374_v59 = vld [vmem:[#allocation100_spill] sm:$0xff]  ;;  %v15375_v11 = vld [vmem:[#allocation101_spill] sm:$0xff] }
 0x1fa   :  { %1762 = vmatpush.msra.mxu3 %v15363_v40  ;;  %1705 = vmatpush.msra.mxu0 %v15364_v36  ;;  %v15376_v40 = vld [vmem:[#allocation110_spill] sm:$0xff]  ;;  %v15377_v36 = vld [vmem:[#allocation111_spill] sm:$0xff] }
 0x1fb   :  { %1745 = vmatpush.msra.mxu2 %v15365_v39  ;;  %1723 = vmatpush.msra.mxu1 %v15366_v38  ;;  %v15378_v39 = vld [vmem:[#allocation112_spill] sm:$0xff]  ;;  %v15379_v38 = vld [vmem:[#allocation113_spill] sm:$0xff] }
 0x1fc   :  { %1763 = vmatpush.msra.mxu3 %v15367_v55  ;;  %1706 = vmatpush.msra.mxu0 %v15368_v47  ;;  %v15380_v55 = vld [vmem:[#allocation104_spill] sm:$0xff]  ;;  %v15381_v47 = vld [vmem:[#allocation105_spill] sm:$0xff] }
 0x1fd   :  { %1746 = vmatpush.msra.mxu2 %v15369_v49  ;;  %1724 = vmatpush.msra.mxu1 %v15370_v56  ;;  %v15382_v49 = vld [vmem:[#allocation118_spill] sm:$0xff]  ;;  %v15383_v56 = vld [vmem:[#allocation119_spill] sm:$0xff] }
 0x1fe   :  { %1764 = vmatpush.msra.mxu3 %v15371_v54  ;;  %1707 = vmatpush.msra.mxu0 %v15372_v58  ;;  %v15384_v54 = vld [vmem:[#allocation108_spill] sm:$0xff]  ;;  %v15385_v58 = vld [vmem:[#allocation109_spill] sm:$0xff] }
 0x1ff   :  { %1747 = vmatpush.msra.mxu2 %v15373_v21  ;;  %1725 = vmatpush.msra.mxu1 %v15374_v59  ;;  %v15386_v21 = vld [vmem:[#allocation124_spill] sm:$0xff]  ;;  %v15387_v59 = vld [vmem:[#allocation125_spill] sm:$0xff] }
 0x200   :  { %1765 = vmatpush.msra.mxu3 %v15375_v11  ;;  %1708 = vmatpush.msra.mxu0 %v15376_v40  ;;  %v15388_v11 = vld [vmem:[#allocation116_spill] sm:$0xff]  ;;  %v15389_v40 = vld [vmem:[#allocation117_spill] sm:$0xff] }
 0x201   :  { %1748 = vmatpush.msra.mxu2 %v15377_v36  ;;  %1726 = vmatpush.msra.mxu1 %v15380_v55  ;;  %v15390_v36 = vld [vmem:[#allocation128_spill] sm:$0xff]  ;;  %v15393_v55 = vld [vmem:[#allocation121_spill] sm:$0xff] }
 0x202   :  { %1773 = vmatpush.msrb.mxu0 %v15378_v39  ;;  %1766 = vmatpush.msra.mxu3 %v15381_v47  ;;  %v15391_v39 = vld [vmem:[#allocation120_spill] sm:$0xff] }
 0x203   :  { %1813 = vmatpush.msrb.mxu2 %v15379_v38  ;;  %1727 = vmatpush.msra.mxu1 %v15384_v54  ;;  %v15392_v38 = vld [vmem:[#allocation129_spill] sm:$0xff]  ;;  %v15394_v47 = vld [vmem:[#allocation132_spill] sm:$0xff]  ;;  %v15397_v54 = vld [vmem:[#allocation127_spill] sm:$0xff] }
 0x204   :  { %1774 = vmatpush.msrb.mxu0 %v15382_v49  ;;  %1767 = vmatpush.msra.mxu3 %v15385_v58  ;;  %v15395_v49 = vld [vmem:[#allocation126_spill] sm:$0xff]  ;;  %v15398_v58 = vld [vmem:[#allocation136_spill] sm:$0xff] }
 0x205   :  { %1814 = vmatpush.msrb.mxu2 %v15383_v56  ;;  %1728 = vmatpush.msra.mxu1 %v15388_v11  ;;  %v15396_v56 = vld [vmem:[#allocation133_spill] sm:$0xff]  ;;  %v15401_v11 = vld [vmem:[#allocation131_spill] sm:$0xff] }
 0x206   :  { %1775 = vmatpush.msrb.mxu0 %v15386_v21  ;;  %1768 = vmatpush.msra.mxu3 %v15389_v40  ;;  %v15399_v21 = vld [vmem:[#allocation130_spill] sm:$0xff] }
 0x207   :  { %1815 = vmatpush.msrb.mxu2 %v15387_v59  ;;  %1793 = vmatpush.msrb.mxu1 %v15391_v39  ;;  %v15400_v59 = vld [vmem:[#allocation137_spill] sm:$0xff]  ;;  %v15402_v40 = vld [vmem:[#allocation142_spill] sm:$0xff]  ;;  %v15404_v39 = vld [vmem:[#allocation143_spill] sm:$0xff] }
 0x208   :  { %1776 = vmatpush.msrb.mxu0 %v15390_v36  ;;  %1833 = vmatpush.msrb.mxu3 %v15393_v55  ;;  %v15403_v36 = vld [vmem:[#allocation134_spill] sm:$0xff]  ;;  %v15406_v55 = vld [vmem:[#allocation140_spill] sm:$0xff] }
 0x209   :  { %1816 = vmatpush.msrb.mxu2 %v15392_v38  ;;  %1794 = vmatpush.msrb.mxu1 %v15395_v49  ;;  %v15405_v38 = vld [vmem:[#allocation135_spill] sm:$0xff]  ;;  %v15408_v49 = vld [vmem:[#allocation141_spill] sm:$0xff] }
 0x20a   :  { %1777 = vmatpush.msrb.mxu0 %v15394_v47  ;;  %1834 = vmatpush.msrb.mxu3 %v15397_v54  ;;  %v8716_v47 = vld [vmem:[%s14463_s3 + $0x218] sm:$0xff] }
 0x20b   :  { %1817 = vmatpush.msrb.mxu2 %v15396_v56  ;;  %1795 = vmatpush.msrb.mxu1 %v15399_v21  ;;  %15407 = vst [vmem:[#allocation40_spill] sm:$0xff] %v8716_v47  ;;  %v8723_v56 = vld [vmem:[%s14463_s3 + $0x1d0] sm:$0xff]  ;;  %v8744_v21 = vld [vmem:[%s14463_s3 + $0x198] sm:$0xff] }
 0x20c   :  { %1778 = vmatpush.msrb.mxu0 %v15398_v58  ;;  %1835 = vmatpush.msrb.mxu3 %v15401_v11  ;;  %15409 = vst [vmem:[#allocation34_spill] sm:$0xff] %v8723_v56  ;;  %v15410_v54 = vld [vmem:[#allocation144_spill] sm:$0xff] }
 0x20d   :  { %1818 = vmatpush.msrb.mxu2 %v15400_v59  ;;  %1796 = vmatpush.msrb.mxu1 %v15403_v36  ;;  %v8737_v58 = vld [vmem:[%s14463_s3 + $0x190] sm:$0xff]  ;;  %15413 = vst [vmem:[#allocation44_spill] sm:$0xff] %v8744_v21  ;;  %v8777_v59 = vld [vmem:[%s14463_s3 + $0x118] sm:$0xff] }
 0x20e   :  { %1779 = vmatpush.msrb.mxu0 %v15402_v40  ;;  %1836 = vmatpush.msrb.mxu3 %v15405_v38  ;;  %15412 = vst [vmem:[#allocation43_spill] sm:$0xff] %v8737_v58  ;;  %v8789_v11 = vld [vmem:[%s14463_s3 + $0xd0] sm:$0xff]  ;;  %v8801_v36 = vld [vmem:[%s14463_s3 + $0xd8] sm:$0xff] }
 0x20f   :  { %1819 = vmatpush.msrb.mxu2 %v15404_v39  ;;  %1797 = vmatpush.msrb.mxu1 %v15406_v55  ;;  %15418 = vst [vmem:[#allocation42_spill] sm:$0xff] %v8777_v59  ;;  %v8795_v40 = vld [vmem:[%s14463_s3 + $0x590] sm:$0xff]  ;;  %v8807_v39 = vld [vmem:[%s14463_s3 + $0x598] sm:$0xff] }
 0x210   :  { %1780 = vmatpush.msrb.mxu0 %v7703_v44  ;;  %1837 = vmatpush.msrb.mxu3 %v15408_v49  ;;  %v8730_v44 = vld [vmem:[%s14463_s3 + $0x1d8] sm:$0xff]  ;;  %15420 = vst [vmem:[#allocation55_spill] sm:$0xff] %v8789_v11  ;;  %v8813_v38 = vld [vmem:[%s14463_s3 + $0x90] sm:$0xff] }
 0x211   :  { %1820 = vmatpush.msrb.mxu2 %v8716_v47  ;;  %1798 = vmatpush.msrb.mxu1 %v15410_v54  ;;  %15411 = vst [vmem:[#allocation35_spill] sm:$0xff] %v8730_v44  ;;  %v8819_v55 = vld [vmem:[%s14463_s3 + $0x550] sm:$0xff]  ;;  %v8825_v49 = vld [vmem:[%s14463_s3 + $0x98] sm:$0xff] }
 0x212   :  { %1781 = vmatpush.msrb.mxu0 %v8723_v56  ;;  %1838 = vmatpush.msrb.mxu3 %v7693_v52  ;;  %v8751_v52 = vld [vmem:[%s14463_s3 + $0x150] sm:$0xff]  ;;  %15421 = vst [vmem:[#allocation45_spill] sm:$0xff] %v8795_v40  ;;  %v8831_v54 = vld [vmem:[%s14463_s3 + $0x558] sm:$0xff] }
 0x213   :  { %1821 = vmatpush.msrb.mxu2 %v8730_v44  ;;  %1799 = vmatpush.msrb.mxu1 %v7710_v35  ;;  %15414 = vst [vmem:[#allocation36_spill] sm:$0xff] %v8751_v52  ;;  %v8758_v35 = vld [vmem:[%s14463_s3 + $0x158] sm:$0xff] }
 0x214   :  { %1782 = vmatpush.msrb.mxu0 %v8737_v58  ;;  %1839 = vmatpush.msrb.mxu3 %v7716_v31  ;;  %15415 = vst [vmem:[#allocation37_spill] sm:$0xff] %v8758_v35  ;;  %v8765_v31 = vld [vmem:[%s14463_s3 + $0x110] sm:$0xff] }
 0x215   :  { %1822 = vmatpush.msrb.mxu2 %v8744_v21  ;;  %1800 = vmatpush.msrb.mxu1 %v7724_v57  ;;  %15416 = vst [vmem:[#allocation49_spill] sm:$0xff] %v8765_v31  ;;  %v8771_v57 = vld [vmem:[%s14463_s3 + $0x5d0] sm:$0xff] }
 0x216   :  { %1783 = vmatpush.msrb.mxu0 %v8751_v52  ;;  %1840 = vmatpush.msrb.mxu3 %v7730_v9  ;;  %15417 = vst [vmem:[#allocation41_spill] sm:$0xff] %v8771_v57  ;;  %v8783_v9 = vld [vmem:[%s14463_s3 + $0x5d8] sm:$0xff]  ;;  %v15443_v52 = vld [vmem:[#allocation6_spill] sm:$0xff] }
 0x217   :  { %1823 = vmatpush.msrb.mxu2 %v8758_v35  ;;  %1801 = vmatpush.msrb.mxu1 %v8771_v57  ;;  %15419 = vst [vmem:[#allocation54_spill] sm:$0xff] %v8783_v9  ;;  %v121_v21 = vadd.f32 %v15443_v52, %v7784_v13 }
 0x218   :  { %1784 = vmatpush.msrb.mxu0 %v8765_v31  ;;  %1841 = vmatpush.msrb.mxu3 %v8783_v9  ;;  %15422 = vst [vmem:[#allocation46_spill] sm:$0xff] %v8801_v36 }
 0x219   :  { %1824 = vmatpush.msrb.mxu2 %v8777_v59  ;;  %1802 = vmatpush.msrb.mxu1 %v8795_v40  ;;  %15423 = vst [vmem:[#allocation58_spill] sm:$0xff] %v8807_v39  ;;  %v1285_v40 = vpop.f32.mrf.mxu2  ;;  %v15442_v59 = vld [vmem:[#allocation8_spill] sm:$0xff] }
 0x21a   :  { %1785 = vmatpush.msrb.mxu0 %v8789_v11  ;;  %1842 = vmatpush.msrb.mxu3 %v8807_v39  ;;  %15424 = vst [vmem:[#allocation59_spill] sm:$0xff] %v8813_v38  ;;  %v1245_v39 = vpop.f32.mrf.mxu0  ;;  %v203_v57 = vadd.f32 %v15442_v59, %v7781_v12 }
 0x21b   :  { %1825 = vmatpush.msrb.mxu2 %v8801_v36  ;;  %15425 = vst [vmem:[#allocation52_spill] sm:$0xff] %v8819_v55  ;;  %1803 = vmatpush.msrb.mxu1 %v8819_v55  ;;  %v8843_v55 = vld [vmem:[%s14463_s3 + $0x510] sm:$0xff]  ;;  %v1305_v36 = vpop.f32.mrf.mxu3 }
 0x21c   :  { %1786 = vmatpush.msrb.mxu0 %v8813_v38  ;;  %15426 = vst [vmem:[#allocation53_spill] sm:$0xff] %v8825_v49  ;;  %1843 = vmatpush.msrb.mxu3 %v8831_v54  ;;  %v8837_v38 = vld [vmem:[%s14463_s3 + $0x50] sm:$0xff]  ;;  %v1306_v51 = vadd.f32 %v1305_v36, %v1285_v40 }
 0x21d   :  { %1826 = vmatpush.msrb.mxu2 %v8825_v49  ;;  %15427 = vst [vmem:[#allocation62_spill] sm:$0xff] %v8831_v54  ;;  %1804 = vmatpush.msrb.mxu1 %v8843_v55  ;;  %v8849_v49 = vld [vmem:[%s14463_s3 + $0x58] sm:$0xff] }
 0x21e   :  { %15428 = vst [vmem:[#allocation63_spill] sm:$0xff] %v8837_v38  ;;  %1787 = vmatpush.msrb.mxu0 %v8837_v38  ;;  %v8855_v54 = vld [vmem:[%s14463_s3 + $0x518] sm:$0xff]  ;;  %v8861_v38 = vld [vmem:[%s14463_s3 + $0x10] sm:$0xff] }
 0x21f   :  { %15429 = vst [vmem:[#allocation56_spill] sm:$0xff] %v8843_v55  ;;  %1827 = vmatpush.msrb.mxu2 %v8849_v49  ;;  %1844 = vmatpush.msrb.mxu3 %v8855_v54  ;;  %v8867_v55 = vld [vmem:[%s14463_s3 + $0x4d0] sm:$0xff] }
 0x220   :  { %15430 = vst [vmem:[#allocation57_spill] sm:$0xff] %v8849_v49  ;;  %1788 = vmatpush.msrb.mxu0 %v8861_v38  ;;  %1805 = vmatpush.msrb.mxu1 %v8867_v55  ;;  %v8873_v49 = vld [vmem:[%s14463_s3 + $0x18] sm:$0xff] }
 0x221   :  { %15431 = vst [vmem:[#allocation68_spill] sm:$0xff] %v8855_v54  ;;  %1828 = vmatpush.msrb.mxu2 %v8873_v49  ;;  %v8879_v54 = vld [vmem:[%s14463_s3 + $0x4d8] sm:$0xff]  ;;  %v1365_v58 = vpop.f32.mrf.mxu2 }
 0x222   :  { %15432 = vst [vmem:[#allocation69_spill] sm:$0xff] %v8861_v38  ;;  %1845 = vmatpush.msrb.mxu3 %v8879_v54  ;;  %v8885_v38 = vld [vmem:[%s14463_s3 + $0x490] sm:$0xff] }
 0x223   :  { %15433 = vst [vmem:[#allocation60_spill] sm:$0xff] %v8867_v55  ;;  %1806 = vmatpush.msrb.mxu1 %v8885_v38  ;;  %v8891_v55 = vld [vmem:[%s14463_s3 + $0x498] sm:$0xff]  ;;  %v1385_v35 = vpop.f32.mrf.mxu3 }
 0x224   :  { %15434 = vst [vmem:[#allocation61_spill] sm:$0xff] %v8873_v49  ;;  %1846 = vmatpush.msrb.mxu3 %v8891_v55  ;;  %v8897_v49 = vld [vmem:[%s14463_s3 + $0x450] sm:$0xff]  ;;  %v1386_v44 = vadd.f32 %v1385_v35, %v1365_v58  ;;  %v15446_v58 = vld [vmem:[#allocation38_spill] sm:$0xff] }
 0x225   :  { %15435 = vst [vmem:[#allocation72_spill] sm:$0xff] %v8879_v54  ;;  %1807 = vmatpush.msrb.mxu1 %v8897_v49  ;;  %v8903_v54 = vld [vmem:[%s14463_s3 + $0x458] sm:$0xff] }
 0x226   :  { %15436 = vst [vmem:[#allocation73_spill] sm:$0xff] %v8885_v38  ;;  %1847 = vmatpush.msrb.mxu3 %v8903_v54  ;;  %v8909_v38 = vld [vmem:[%s14463_s3 + $0x410] sm:$0xff] }
 0x227   :  { %15437 = vst [vmem:[#allocation64_spill] sm:$0xff] %v8891_v55  ;;  %1808 = vmatpush.msrb.mxu1 %v8909_v38  ;;  %v8915_v55 = vld [vmem:[%s14463_s3 + $0x418] sm:$0xff] }
 0x228   :  { %15438 = vst [vmem:[#allocation65_spill] sm:$0xff] %v8897_v49  ;;  %1848 = vmatpush.msrb.mxu3 %v8915_v55  ;;  %v1265_v49 = vpop.f32.mrf.mxu1 }
 0x229   :  { %15439 = vst [vmem:[#allocation78_spill] sm:$0xff] %v8903_v54  ;;  %v1325_v54 = vpop.f32.mrf.mxu0  ;;  %v1266_v31 = vadd.f32 %v1265_v49, %v1245_v39 }
 0x22a   :  { %15440 = vst [vmem:[#allocation79_spill] sm:$0xff] %v8909_v38 }
 0x22b   :  { %15441 = vst [vmem:[#allocation70_spill] sm:$0xff] %v8915_v55  ;;  %v1548_v56 = vadd.f32 %v1266_v31, %v121_v21  ;;  %v15444_v55 = vld [vmem:[#allocation9_spill] sm:$0xff]  ;;  %v285_v21 = vadd.f32 %v15446_v58, %v7801_v2 }
 0x22c   :  { %v244_v47 = vadd.f32 %v15444_v55, %v7791_v8 }
 0x22d   :  { %v4578_v10 = vmul.f32 -1.442695, %v1548_v56 }
 0x22e   :  { %v1551_v32 = vadd.f32 %v1386_v44, %v244_v47 }
 0x22f   :  { %v1445_v47 = vpop.f32.mrf.mxu2 }
 0x230   :  { %v1345_v11 = vpop.f32.mrf.mxu1 }
 0x231   :  { %v1346_v9 = vadd.f32 %v1345_v11, %v1325_v54  ;;  %v15445_v11 = vld [vmem:[#allocation7_spill] sm:$0xff] }
 0x232   :  { %v162_v54 = vadd.f32 %v15445_v11, %v7794_v23 }
 0x233   :  { %v1550_v38 = vadd.f32 %v1346_v9, %v203_v57  ;;  %v1405_v57 = vpop.f32.mrf.mxu0  ;;  %v4581_v9 = vmul.f32 -1.442695, %v1551_v32 }
 0x234   :  { %v1549_v39 = vadd.f32 %v1306_v51, %v162_v54  ;;  %v15447_v51 = vld [vmem:[#allocation39_spill] sm:$0xff] }
 0x235   :  { %v4580_v48 = vmul.f32 -1.442695, %v1550_v38 }
 0x236   :  { %v4579_v52 = vmul.f32 -1.442695, %v1549_v39 }
 0x237   :  { %4654 = vpow2.f32 %v4580_v48  ;;  %v326_v48 = vadd.f32 %v15447_v51, %v7806_v17 }
 0x238   :  { %v1425_v59 = vpop.f32.mrf.mxu1  ;;  %4656 = vpow2.f32 %v4578_v10 }
 0x239   :  { %v1426_v49 = vadd.f32 %v1425_v59, %v1405_v57  ;;  %4658 = vpow2.f32 %v4581_v9 }
 0x23a   :  { %4660 = vpow2.f32 %v4579_v52 }
 0x23b   :  { %v1552_v31 = vadd.f32 %v1426_v49, %v285_v21 }
 0x23c   :  { %v1465_v40 = vpop.f32.mrf.mxu3 }
 0x23d   :  { %v4655_v35 = vpop.eup %4654  ;;  %v1466_v44 = vadd.f32 %v1465_v40, %v1445_v47  ;;  %v4582_v32 = vmul.f32 -1.442695, %v1552_v31 }
 0x23e   :  { %v4657_v36 = vpop.eup %4656  ;;  %v8928_v56 = vadd.f32 1.0, %v4655_v35 }
 0x23f   :  { %v4659_v38 = vpop.eup %4658  ;;  %v1574_v10 = vadd.f32 1.0, %v4657_v36  ;;  %v1553_v55 = vadd.f32 %v1466_v44, %v326_v48 }
 0x240   :  { %4662 = vrcp.f32 %v8928_v56  ;;  %v4661_v11 = vpop.eup %4660  ;;  %v8933_v54 = vadd.f32 1.0, %v4659_v38  ;;  %v1621_v8 = vand.u32 2147483648, %v8928_v56  ;;  %vm1615_vm11 = vweird.f32 %v8928_v56 }
 0x241   :  { %4664 = vpow2.f32 %v4582_v32  ;;  %v4583_v59 = vmul.f32 -1.442695, %v1553_v55  ;;  %v8935_v39 = vadd.f32 1.0, %v4661_v11  ;;  %v1591_v23 = vand.u32 2147483648, %v1574_v10 }
 0x242   :  { %4666 = vrcp.f32 %v1574_v10  ;;  %vm1585_vm13 = vweird.f32 %v1574_v10  ;;  %vm1630_vm3 = vweird.f32 %v8933_v54 }
 0x243   :  { %4668 = vrcp.f32 %v8933_v54  ;;  %vm1600_vm0 = vweird.f32 %v8935_v39 }
 0x244   :  { %4670 = vpow2.f32 %v4583_v59 }
 0x245   :  { %4672 = vrcp.f32 %v8935_v39 }
 0x246   :  { %v8937_v57 = vpop.eup %4662 }
 0x247   :  { %v4665_v9 = vpop.eup %4664  ;;  %v1611_v58 = vmul.f32 %v8937_v57, %v8928_v56  ;;  %vm1616_vm9 = vweird.f32 %v8937_v57 }
 0x248   :  { %v8940_v49 = vpop.eup %4666  ;;  %v8945_v21 = vadd.f32 1.0, %v4665_v9  ;;  %vm8978_vm12 = vmor %vm1615_vm11, %vm1616_vm9 }
 0x249   :  { %v8947_v52 = vpop.eup %4668  ;;  %v1581_v35 = vmul.f32 %v8940_v49, %v1574_v10  ;;  %v1612_v40 = vsub.f32 1.0, %v1611_v58  ;;  %v15448_v58 = vld [vmem:[#allocation47_spill] sm:$0xff]  ;;  %vm1586_vm10 = vweird.f32 %v8940_v49 }
 0x24a   :  { %v4671_v31 = vpop.eup %4670  ;;  %4674 = vrcp.f32 %v8945_v21  ;;  %v1626_v36 = vmul.f32 %v8947_v52, %v8933_v54  ;;  %vm8994_vm15 = vmor %vm1585_vm13, %vm1586_vm10  ;;  %vm1631_vm1 = vweird.f32 %v8947_v52  ;;  %vm1645_vm10 = vweird.f32 %v8945_v21 }
 0x24b   :  { %v8951_v47 = vpop.eup %4672  ;;  %v1582_v44 = vsub.f32 1.0, %v1581_v35  ;;  %v8955_v51 = vadd.f32 1.0, %v4671_v31  ;;  %v1613_v32 = vmul.f32 %v8937_v57, %v1612_v40  ;;  %v367_v35 = vadd.f32 %v15448_v58, %v7835_v4  ;;  %vm9011_vm5 = vmor %vm1630_vm3, %vm1631_vm1 }
 0x24c   :  { %v1596_v48 = vmul.f32 %v8951_v47, %v8935_v39  ;;  %v1627_v55 = vsub.f32 1.0, %v1626_v36  ;;  %v1589_v31 = vand.u32 2147483647, %v1574_v10  ;;  %vm1601_vm4 = vweird.f32 %v8951_v47 }
 0x24d   :  { %4676 = vrcp.f32 %v8955_v51  ;;  %v1583_v9 = vmul.f32 %v8940_v49, %v1582_v44  ;;  %v1614_v40 = vadd.f32 %v8937_v57, %v1613_v32  ;;  %vm9026_vm6 = vmor %vm1600_vm0, %vm1601_vm4 }
 0x24e   :  { %v1597_v2 = vsub.f32 1.0, %v1596_v48  ;;  %v1628_v44 = vmul.f32 %v8947_v52, %v1627_v55  ;;  %v1619_v48 = vand.u32 2147483647, %v8928_v56  ;;  %vm8984_vm14 = vcmp.eq.f32.partialorder %v1589_v31, 8.507059e+37 }
 0x24f   :  { %v1592_v55 = vor.u32 1.1754944e-38, %v1591_v23  ;;  %v1618_v56 = vsel %vm8978_vm12, %v8937_v57, %v1614_v40 }
 0x250   :  { %v8960_v38 = vpop.eup %4674  ;;  %vm1620_vm2 = vcmp.eq.f32.partialorder %v1619_v48, 8.507059e+37 }
 0x251   :  { %v1641_v36 = vmul.f32 %v8960_v38, %v8945_v21  ;;  %vm1646_vm8 = vweird.f32 %v8960_v38 }
 0x252   :  { %vm1647_vm11 = vmor %vm1645_vm10, %vm1646_vm8 }
 0x253   :  { %v1642_v12 = vsub.f32 1.0, %v1641_v36  ;;  %v1634_v36 = vand.u32 2147483647, %v8933_v54 }
 0x255   :  { %vm1635_vm7 = vcmp.eq.f32.partialorder %v1634_v36, 8.507059e+37 }
 0x25c   :  { %v1485_v11 = vpop.f32.mrf.mxu0 }
 0x262   :  { %v1505_v59 = vpop.f32.mrf.mxu1 }
 0x263   :  { %v1506_v17 = vadd.f32 %v1505_v59, %v1485_v11  ;;  %v1584_v11 = vadd.f32 %v8940_v49, %v1583_v9  ;;  %v15449_v59 = vld [vmem:[#allocation48_spill] sm:$0xff]  ;;  %v1525_v9 = vpop.f32.mrf.mxu2 }
 0x264   :  { %v408_v58 = vadd.f32 %v15449_v59, %v7847_v24  ;;  %v1598_v59 = vmul.f32 %v8951_v47, %v1597_v2  ;;  %v1622_v24 = vor.u32 1.1754944e-38, %v1621_v8  ;;  %v1629_v2 = vadd.f32 %v8947_v52, %v1628_v44 }
 0x265   :  { %v1554_v13 = vadd.f32 %v1506_v17, %v367_v35  ;;  %v8982_v17 = vpop.eup %4676  ;;  %v1588_v23 = vsel %vm8994_vm15, %v8940_v49, %v1584_v11  ;;  %v1636_v8 = vand.u32 2147483648, %v8933_v54  ;;  %v1643_v44 = vmul.f32 %v8960_v38, %v1642_v12  ;;  %v15490_v12 = vld [vmem:[#allocation191_spill] sm:$0xff] }
 0x266   :  { %v1656_v57 = vmul.f32 %v8982_v17, %v8955_v51  ;;  %v1623_v31 = vsel %vm1620_vm2, %v1622_v24, %v1618_v56  ;;  %v1593_v11 = vsel %vm8984_vm14, %v1592_v55, %v1588_v23  ;;  %v1606_v24 = vand.u32 2147483648, %v8935_v39 }
 0x267   :  { %4678 = vtanh.f32 %v1554_v13  ;;  %v1672_v48 = vmul.f32 %v1623_v31, %v7903_v26  ;;  %v1604_v56 = vand.u32 2147483647, %v8935_v39  ;;  %v1633_v54 = vsel %vm9011_vm5, %v8947_v52, %v1629_v2 }
 0x268   :  { %v1644_v55 = vadd.f32 %v8960_v38, %v1643_v44  ;;  %v1607_v52 = vor.u32 1.1754944e-38, %v1606_v24  ;;  %v1649_v23 = vand.u32 2147483647, %v8945_v21  ;;  %vm1661_vm13 = vweird.f32 %v8982_v17 }
 0x269   :  { %v1545_v4 = vpop.f32.mrf.mxu3  ;;  %vm1605_vm9 = vcmp.eq.f32.partialorder %v1604_v56, 8.507059e+37  ;;  %vm1660_vm14 = vweird.f32 %v8955_v51  ;;  %v15486_v56 = vld [vmem:[#allocation187_spill] sm:$0xff] }
 0x26a   :  { %v1546_v10 = vadd.f32 %v1545_v4, %v1525_v9  ;;  %v1599_v4 = vadd.f32 %v8951_v47, %v1598_v59  ;;  %v1637_v9 = vor.u32 1.1754944e-38, %v1636_v8  ;;  %v1657_v59 = vsub.f32 1.0, %v1656_v57  ;;  %vm1662_vm15 = vmor %vm1660_vm14, %vm1661_vm13 }
 0x26b   :  { %v1648_v31 = vsel %vm1647_vm11, %v8960_v38, %v1644_v55  ;;  %vm1650_vm12 = vcmp.eq.f32.partialorder %v1649_v23, 8.507059e+37  ;;  %v15492_v55 = vld [vmem:[#allocation193_spill] sm:$0xff]  ;;  %v15497_v23 = vld [vmem:[#allocation198_spill] sm:$0xff] }
 0x26c   :  { %v1555_v40 = vadd.f32 %v1546_v10, %v408_v58  ;;  %v1603_v26 = vsel %vm9026_vm6, %v8951_v47, %v1599_v4  ;;  %v1638_v13 = vsel %vm1635_vm7, %v1637_v9, %v1633_v54  ;;  %v1651_v10 = vand.u32 2147483648, %v8945_v21  ;;  %v15487_v54 = vld [vmem:[#allocation188_spill] sm:$0xff]  ;;  %v15488_v9 = vld [vmem:[#allocation189_spill] sm:$0xff] }
 0x26d   :  { %v4679_v32 = vpop.eup %4678  ;;  %v1658_v2 = vmul.f32 %v8982_v17, %v1657_v59  ;;  %v1608_v47 = vsel %vm1605_vm9, %v1607_v52, %v1603_v26  ;;  %v1673_v8 = vmul.f32 %v1638_v13, %v7922_v42  ;;  %v1666_v21 = vand.u32 2147483648, %v8955_v51  ;;  %v15489_v59 = vld [vmem:[#allocation190_spill] sm:$0xff]  ;;  %v15491_v26 = vld [vmem:[#allocation192_spill] sm:$0xff]  ;;  %v15494_v13 = vld [vmem:[#allocation195_spill] sm:$0xff] }
 0x26e   :  { %4680 = vtanh.f32 %v1555_v40  ;;  %v1674_v58 = vmul.f32 %v4679_v32, %v1593_v11  ;;  %v1652_v40 = vor.u32 1.1754944e-38, %v1651_v10  ;;  %v1664_v42 = vand.u32 2147483647, %v8955_v51  ;;  %v15493_v52 = vld [vmem:[#allocation194_spill] sm:$0xff]  ;;  %v15495_v10 = vld [vmem:[#allocation196_spill] sm:$0xff] }
 0x26f   :  { %v1659_v36 = vadd.f32 %v8982_v17, %v1658_v2  ;;  %v1667_v11 = vor.u32 1.1754944e-38, %v1666_v21  ;;  %v15498_v2 = vld [vmem:[#allocation199_spill] sm:$0xff]  ;;  %v15507_v21 = vld [vmem:[#allocation208_spill] sm:$0xff] }
 0x270   :  { %v9030_v35 = vadd.f32 %v1674_v58, %v1672_v48  ;;  %v1653_v49 = vsel %vm1650_vm12, %v1652_v40, %v1648_v31  ;;  %vm1665_vm0 = vcmp.eq.f32.partialorder %v1664_v42, 8.507059e+37  ;;  %v15485_v58 = vld [vmem:[#allocation186_spill] sm:$0xff]  ;;  %v15502_v31 = vld [vmem:[#allocation203_spill] sm:$0xff]  ;;  %v15503_v40 = vld [vmem:[#allocation204_spill] sm:$0xff] }
 0x271   :  { %v1663_v38 = vsel %vm1662_vm15, %v8982_v17, %v1659_v36  ;;  %v15484_v17 = vld [vmem:[#allocation185_spill] sm:$0xff] }
 0x272   :  { %4682 = vtanh.f32 %v9030_v35  ;;  %v1668_v48 = vsel %vm1665_vm0, %v1667_v11, %v1663_v38  ;;  %v15504_v36 = vld [vmem:[#allocation205_spill] sm:$0xff]  ;;  %v15509_v38 = vld [vmem:[#allocation210_spill] sm:$0xff]  ;;  %v15510_v11 = vld [vmem:[#allocation211_spill] sm:$0xff] }
 0x273   :  { %v15508_v42 = vld [vmem:[#allocation209_spill] sm:$0xff] }
 0x274   :  { %v4681_v39 = vpop.eup %4680 }
 0x275   :  { %v1675_v57 = vmul.f32 %v4681_v39, %v1608_v47  ;;  %v15496_v39 = vld [vmem:[#allocation197_spill] sm:$0xff]  ;;  %v15499_v47 = vld [vmem:[#allocation200_spill] sm:$0xff] }
 0x277   :  { %v9044_v4 = vadd.f32 %v1675_v57, %v1673_v8  ;;  %v15500_v8 = vld [vmem:[#allocation201_spill] sm:$0xff]  ;;  %v15501_v57 = vld [vmem:[#allocation202_spill] sm:$0xff] }
 0x278   :  { %v4683_v32 = vpop.eup %4682 }
 0x279   :  { %4684 = vtanh.f32 %v9044_v4  ;;  %v9052_v44 = vmul.f32 %v4683_v32, %v1653_v49  ;;  %v15505_v32 = vld [vmem:[#allocation206_spill] sm:$0xff]  ;;  %v15506_v49 = vld [vmem:[#allocation207_spill] sm:$0xff] }
 0x27b   :  { %1709 = vmatmul.f32.vlgmr.msra.gmra.mxu0 %v9052_v44  ;;  %1749 = vmatmul.f32.vlgmr.msra.gmra.mxu2 %v9052_v44 }
 0x27c   :  { %1853 = vmatpush.msra.mxu0 %v7944_v27  ;;  %1893 = vmatpush.msra.mxu2 %v7950_v30  ;;  %v15460_v27 = vld [vmem:[#allocation161_spill] sm:$0xff]  ;;  %v15461_v30 = vld [vmem:[#allocation162_spill] sm:$0xff] }
 0x27e   :  { %1854 = vmatpush.msra.mxu0 %v7956_v29  ;;  %1894 = vmatpush.msra.mxu2 %v7962_v62  ;;  %v15462_v29 = vld [vmem:[#allocation163_spill] sm:$0xff]  ;;  %v15463_v62 = vld [vmem:[#allocation164_spill] sm:$0xff] }
 0x27f   :  { %v4685_v24 = vpop.eup %4684 }
 0x280   :  { %v9061_v51 = vmul.f32 %v4685_v24, %v1668_v48  ;;  %1855 = vmatpush.msra.mxu0 %v7970_v60  ;;  %1895 = vmatpush.msra.mxu2 %v7976_v33  ;;  %v15464_v60 = vld [vmem:[#allocation165_spill] sm:$0xff]  ;;  %v15465_v33 = vld [vmem:[#allocation166_spill] sm:$0xff]  ;;  %v15511_v24 = vld [vmem:[#allocation212_spill] sm:$0xff] }
 0x281   :  { %v15512_v48 = vld [vmem:[#allocation213_spill] sm:$0xff] }
 0x282   :  { %1729 = vmatmul.f32.vlgmr.msra.gmra.mxu1 %v9061_v51  ;;  %1769 = vmatmul.f32.vlgmr.msra.gmra.mxu3 %v9061_v51 }
 0x283   :  { %1856 = vmatpush.msra.mxu0 %v7984_v46  ;;  %1873 = vmatpush.msra.mxu1 %v7990_v7  ;;  %v15466_v46 = vld [vmem:[#allocation167_spill] sm:$0xff]  ;;  %v15467_v7 = vld [vmem:[#allocation168_spill] sm:$0xff] }
 0x284   :  { %1896 = vmatpush.msra.mxu2 %v7996_v22  ;;  %1913 = vmatpush.msra.mxu3 %v8002_v41  ;;  %v15468_v22 = vld [vmem:[#allocation169_spill] sm:$0xff]  ;;  %v15469_v41 = vld [vmem:[#allocation170_spill] sm:$0xff] }
 0x285   :  { %1789 = vmatmul.f32.vlgmr.msrb.gmra.mxu0 %v9052_v44  ;;  %1829 = vmatmul.f32.vlgmr.msrb.gmra.mxu2 %v9052_v44 }
 0x286   :  { %1857 = vmatpush.msra.mxu0 %v8010_v1  ;;  %1874 = vmatpush.msra.mxu1 %v8016_v6  ;;  %v15470_v1 = vld [vmem:[#allocation171_spill] sm:$0xff]  ;;  %v15471_v6 = vld [vmem:[#allocation172_spill] sm:$0xff] }
 0x287   :  { %1897 = vmatpush.msra.mxu2 %v8022_v45  ;;  %1914 = vmatpush.msra.mxu3 %v8028_v28  ;;  %v15472_v45 = vld [vmem:[#allocation173_spill] sm:$0xff]  ;;  %v15473_v28 = vld [vmem:[#allocation174_spill] sm:$0xff] }
 0x288   :  { %1858 = vmatpush.msra.mxu0 %v8034_v14  ;;  %1875 = vmatpush.msra.mxu1 %v8040_v3  ;;  %v15474_v14 = vld [vmem:[#allocation175_spill] sm:$0xff]  ;;  %v15475_v3 = vld [vmem:[#allocation176_spill] sm:$0xff] }
 0x289   :  { %1898 = vmatpush.msra.mxu2 %v8046_v0  ;;  %1915 = vmatpush.msra.mxu3 %v8052_v34  ;;  %v15476_v0 = vld [vmem:[#allocation177_spill] sm:$0xff]  ;;  %v15477_v34 = vld [vmem:[#allocation178_spill] sm:$0xff] }
 0x28a   :  { %1859 = vmatpush.msra.mxu0 %v8058_v5  ;;  %1876 = vmatpush.msra.mxu1 %v8064_v15  ;;  %v15478_v5 = vld [vmem:[#allocation179_spill] sm:$0xff]  ;;  %v15479_v15 = vld [vmem:[#allocation180_spill] sm:$0xff] }
 0x28b   :  { %1899 = vmatpush.msra.mxu2 %v8070_v63  ;;  %1916 = vmatpush.msra.mxu3 %v8076_v20  ;;  %v15480_v63 = vld [vmem:[#allocation181_spill] sm:$0xff]  ;;  %v15481_v20 = vld [vmem:[#allocation182_spill] sm:$0xff] }
 0x28c   :  { %1809 = vmatmul.f32.vlgmr.msrb.gmra.mxu1 %v9061_v51  ;;  %1849 = vmatmul.f32.vlgmr.msrb.gmra.mxu3 %v9061_v51 }
 0x28d   :  { %1860 = vmatpush.msra.mxu0 %v8084_v37  ;;  %1877 = vmatpush.msra.mxu1 %v8090_v16  ;;  %v15482_v37 = vld [vmem:[#allocation183_spill] sm:$0xff]  ;;  %v15483_v16 = vld [vmem:[#allocation184_spill] sm:$0xff] }
 0x28e   :  { %1900 = vmatpush.msra.mxu2 %v15460_v27  ;;  %1917 = vmatpush.msra.mxu3 %v15461_v30  ;;  %v15513_v27 = vld [vmem:[#allocation214_spill] sm:$0xff]  ;;  %v15514_v30 = vld [vmem:[#allocation215_spill] sm:$0xff] }
 0x28f   :  { %1861 = vmatpush.msra.mxu0 %v15462_v29  ;;  %1878 = vmatpush.msra.mxu1 %v15463_v62  ;;  %v15515_v29 = vld [vmem:[#allocation216_spill] sm:$0xff]  ;;  %v15516_v62 = vld [vmem:[#allocation217_spill] sm:$0xff] }
 0x290   :  { %1901 = vmatpush.msra.mxu2 %v15464_v60  ;;  %1918 = vmatpush.msra.mxu3 %v15465_v33  ;;  %v15517_v60 = vld [vmem:[#allocation218_spill] sm:$0xff]  ;;  %v15518_v33 = vld [vmem:[#allocation219_spill] sm:$0xff] }
 0x291   :  { %1862 = vmatpush.msra.mxu0 %v15466_v46  ;;  %1879 = vmatpush.msra.mxu1 %v15467_v7  ;;  %v15519_v46 = vld [vmem:[#allocation220_spill] sm:$0xff]  ;;  %v15520_v7 = vld [vmem:[#allocation221_spill] sm:$0xff] }
 0x292   :  { %1902 = vmatpush.msra.mxu2 %v15468_v22  ;;  %1919 = vmatpush.msra.mxu3 %v15469_v41  ;;  %v15521_v22 = vld [vmem:[#allocation222_spill] sm:$0xff]  ;;  %v15522_v41 = vld [vmem:[#allocation223_spill] sm:$0xff] }
 0x293   :  { %1863 = vmatpush.msra.mxu0 %v15470_v1  ;;  %1880 = vmatpush.msra.mxu1 %v15471_v6  ;;  %v15523_v1 = vld [vmem:[#allocation224_spill] sm:$0xff]  ;;  %v15524_v6 = vld [vmem:[#allocation225_spill] sm:$0xff] }
 0x294   :  { %1903 = vmatpush.msra.mxu2 %v15472_v45  ;;  %1920 = vmatpush.msra.mxu3 %v15473_v28  ;;  %v15525_v45 = vld [vmem:[#allocation226_spill] sm:$0xff]  ;;  %v15526_v28 = vld [vmem:[#allocation227_spill] sm:$0xff] }
 0x295   :  { %1864 = vmatpush.msra.mxu0 %v15474_v14  ;;  %1881 = vmatpush.msra.mxu1 %v15475_v3  ;;  %v15527_v14 = vld [vmem:[#allocation228_spill] sm:$0xff]  ;;  %v15528_v3 = vld [vmem:[#allocation229_spill] sm:$0xff] }
 0x296   :  { %1904 = vmatpush.msra.mxu2 %v15476_v0  ;;  %1921 = vmatpush.msra.mxu3 %v15477_v34  ;;  %v15529_v0 = vld [vmem:[#allocation230_spill] sm:$0xff]  ;;  %v9168_v34 = vld [vmem:[%s14463_s3 + $0x1b8] sm:$0xff] }
 0x297   :  { %1865 = vmatpush.msra.mxu0 %v15478_v5  ;;  %1882 = vmatpush.msra.mxu1 %v15479_v15  ;;  %v9175_v5 = vld [vmem:[%s14463_s3 + $0x170] sm:$0xff] }
 0x298   :  { %1905 = vmatpush.msra.mxu2 %v15480_v63  ;;  %1922 = vmatpush.msra.mxu3 %v15481_v20  ;;  %v15531_v15 = vld [vmem:[#allocation232_spill] sm:$0xff]  ;;  %v15532_v63 = vld [vmem:[#allocation233_spill] sm:$0xff] }
 0x299   :  { %1866 = vmatpush.msra.mxu0 %v15482_v37  ;;  %1883 = vmatpush.msra.mxu1 %v15483_v16  ;;  %v9224_v20 = vld [vmem:[%s14463_s3 + $0xb8] sm:$0xff]  ;;  %v15533_v37 = vld [vmem:[#allocation234_spill] sm:$0xff]  ;;  %v9231_v16 = vld [vmem:[%s14463_s3 + $0x70] sm:$0xff] }
 0x29a   :  { %1906 = vmatpush.msra.mxu2 %v15484_v17  ;;  %1923 = vmatpush.msra.mxu3 %v15485_v58  ;;  %v15534_v17 = vld [vmem:[#allocation235_spill] sm:$0xff]  ;;  %v9238_v58 = vld [vmem:[%s14463_s3 + $0x78] sm:$0xff] }
 0x29b   :  { %1867 = vmatpush.msra.mxu0 %v15486_v56  ;;  %1884 = vmatpush.msra.mxu1 %v15487_v54  ;;  %v15535_v56 = vld [vmem:[#allocation236_spill] sm:$0xff] }
 0x29c   :  { %1907 = vmatpush.msra.mxu2 %v15488_v9  ;;  %1924 = vmatpush.msra.mxu3 %v15489_v59  ;;  %v9245_v54 = vld [vmem:[%s14463_s3 + $0x30] sm:$0xff]  ;;  %v15536_v9 = vld [vmem:[#allocation237_spill] sm:$0xff] }
 0x29d   :  { %1868 = vmatpush.msra.mxu0 %v15490_v12  ;;  %1885 = vmatpush.msra.mxu1 %v15491_v26  ;;  %v9252_v59 = vld [vmem:[%s14463_s3 + $0x38] sm:$0xff]  ;;  %v9266_v26 = vld [vmem:[%s14463_s3 + $0x4b0] sm:$0xff] }
 0x29e   :  { %1908 = vmatpush.msra.mxu2 %v15492_v55  ;;  %1925 = vmatpush.msra.mxu3 %v15493_v52  ;;  %v9258_v12 = vld [vmem:[%s14463_s3 + $0x4f8] sm:$0xff]  ;;  %v9278_v52 = vld [vmem:[%s14463_s3 + $0x3c0] sm:$0xff] }
 0x29f   :  { %1869 = vmatmul.f32.vlgmr.msra.gmra.mxu0 %v9052_v44  ;;  %1909 = vmatmul.f32.vlgmr.msra.gmra.mxu2 %v9052_v44  ;;  %v9272_v55 = vld [vmem:[%s14463_s3 + $0x4b8] sm:$0xff] }
 0x2a0   :  { %1933 = vmatpush.msrb.mxu0 %v15494_v13  ;;  %1973 = vmatpush.msrb.mxu2 %v15495_v10  ;;  %v9290_v13 = vld [vmem:[%s14463_s3 + $0x470] sm:$0xff]  ;;  %v9296_v10 = vld [vmem:[%s14463_s3 + $0x478] sm:$0xff] }
 0x2a1   :  { %1886 = vmatpush.msra.mxu1 %v15496_v39  ;;  %1926 = vmatpush.msra.mxu3 %v15497_v23  ;;  %v9302_v39 = vld [vmem:[%s14463_s3 + $0x380] sm:$0xff]  ;;  %v9308_v23 = vld [vmem:[%s14463_s3 + $0x388] sm:$0xff] }
 0x2a2   :  { %1934 = vmatpush.msrb.mxu0 %v15498_v2  ;;  %1974 = vmatpush.msrb.mxu2 %v15499_v47  ;;  %v9314_v2 = vld [vmem:[%s14463_s3 + $0x430] sm:$0xff]  ;;  %v9320_v47 = vld [vmem:[%s14463_s3 + $0x438] sm:$0xff] }
 0x2a3   :  { %1887 = vmatpush.msra.mxu1 %v15500_v8  ;;  %1927 = vmatpush.msra.mxu3 %v15501_v57  ;;  %v9328_v8 = vld [vmem:[%s14463_s3 + $0x340] sm:$0xff]  ;;  %v9334_v57 = vld [vmem:[%s14463_s3 + $0x348] sm:$0xff] }
 0x2a4   :  { %1935 = vmatpush.msrb.mxu0 %v15502_v31  ;;  %1975 = vmatpush.msrb.mxu2 %v15503_v40  ;;  %v9340_v31 = vld [vmem:[%s14463_s3 + $0x7c0] sm:$0xff] }
 0x2a5   :  { %1888 = vmatpush.msra.mxu1 %v15504_v36  ;;  %1928 = vmatpush.msra.mxu3 %v15505_v32  ;;  %v9352_v40 = vld [vmem:[%s14463_s3 + $0x300] sm:$0xff]  ;;  %v9358_v36 = vld [vmem:[%s14463_s3 + $0x308] sm:$0xff] }
 0x2a6   :  { %1889 = vmatmul.f32.vlgmr.msra.gmra.mxu1 %v9061_v51  ;;  %1929 = vmatmul.f32.vlgmr.msra.gmra.mxu3 %v9061_v51  ;;  %v9364_v32 = vld [vmem:[%s14463_s3 + $0x780] sm:$0xff] }
 0x2a7   :  { %1936 = vmatpush.msrb.mxu0 %v15506_v49  ;;  %1953 = vmatpush.msrb.mxu1 %v15507_v21  ;;  %v9370_v49 = vld [vmem:[%s14463_s3 + $0x788] sm:$0xff]  ;;  %v9376_v21 = vld [vmem:[%s14463_s3 + $0x2c0] sm:$0xff] }
 0x2a8   :  { %1976 = vmatpush.msrb.mxu2 %v15508_v42  ;;  %1993 = vmatpush.msrb.mxu3 %v15509_v38  ;;  %15537 = vst [vmem:[#allocation71_spill] sm:$0xff] %v9370_v49  ;;  %v9382_v42 = vld [vmem:[%s14463_s3 + $0x2c8] sm:$0xff]  ;;  %v9388_v38 = vld [vmem:[%s14463_s3 + $0x740] sm:$0xff] }
 0x2a9   :  { %1937 = vmatpush.msrb.mxu0 %v15510_v11  ;;  %1954 = vmatpush.msrb.mxu1 %v15511_v24  ;;  %15538 = vst [vmem:[#allocation82_spill] sm:$0xff] %v9376_v21  ;;  %v9394_v11 = vld [vmem:[%s14463_s3 + $0x748] sm:$0xff]  ;;  %v9400_v24 = vld [vmem:[%s14463_s3 + $0x280] sm:$0xff] }
 0x2aa   :  { %1977 = vmatpush.msrb.mxu2 %v15512_v48  ;;  %1994 = vmatpush.msrb.mxu3 %v15513_v27  ;;  %15539 = vst [vmem:[#allocation83_spill] sm:$0xff] %v9382_v42  ;;  %v9406_v48 = vld [vmem:[%s14463_s3 + $0x288] sm:$0xff]  ;;  %v9412_v27 = vld [vmem:[%s14463_s3 + $0x700] sm:$0xff] }
 0x2ab   :  { %1938 = vmatpush.msrb.mxu0 %v15514_v30  ;;  %1955 = vmatpush.msrb.mxu1 %v15515_v29  ;;  %15540 = vst [vmem:[#allocation76_spill] sm:$0xff] %v9388_v38  ;;  %v9418_v30 = vld [vmem:[%s14463_s3 + $0x708] sm:$0xff]  ;;  %v9424_v29 = vld [vmem:[%s14463_s3 + $0x240] sm:$0xff] }
 0x2ac   :  { %1978 = vmatpush.msrb.mxu2 %v15516_v62  ;;  %1995 = vmatpush.msrb.mxu3 %v15517_v60  ;;  %15541 = vst [vmem:[#allocation77_spill] sm:$0xff] %v9394_v11  ;;  %v9430_v62 = vld [vmem:[%s14463_s3 + $0x248] sm:$0xff]  ;;  %v9436_v60 = vld [vmem:[%s14463_s3 + $0x6c0] sm:$0xff] }
 0x2ad   :  { %1939 = vmatpush.msrb.mxu0 %v15518_v33  ;;  %1956 = vmatpush.msrb.mxu1 %v15519_v46  ;;  %15542 = vst [vmem:[#allocation86_spill] sm:$0xff] %v9400_v24  ;;  %v9442_v33 = vld [vmem:[%s14463_s3 + $0x6c8] sm:$0xff]  ;;  %v9448_v46 = vld [vmem:[%s14463_s3 + $0x200] sm:$0xff] }
 0x2ae   :  { %1979 = vmatpush.msrb.mxu2 %v15520_v7  ;;  %1996 = vmatpush.msrb.mxu3 %v15521_v22  ;;  %15543 = vst [vmem:[#allocation87_spill] sm:$0xff] %v9406_v48  ;;  %v9454_v7 = vld [vmem:[%s14463_s3 + $0x208] sm:$0xff]  ;;  %v9460_v22 = vld [vmem:[%s14463_s3 + $0x680] sm:$0xff] }
 0x2af   :  { %1940 = vmatpush.msrb.mxu0 %v15522_v41  ;;  %1957 = vmatpush.msrb.mxu1 %v15523_v1  ;;  %15544 = vst [vmem:[#allocation80_spill] sm:$0xff] %v9412_v27  ;;  %v9466_v41 = vld [vmem:[%s14463_s3 + $0x688] sm:$0xff]  ;;  %v9472_v1 = vld [vmem:[%s14463_s3 + $0x1c0] sm:$0xff] }
 0x2b0   :  { %1980 = vmatpush.msrb.mxu2 %v15524_v6  ;;  %1997 = vmatpush.msrb.mxu3 %v15525_v45  ;;  %15545 = vst [vmem:[#allocation81_spill] sm:$0xff] %v9418_v30  ;;  %v9478_v6 = vld [vmem:[%s14463_s3 + $0x1c8] sm:$0xff]  ;;  %v9484_v45 = vld [vmem:[%s14463_s3 + $0x640] sm:$0xff] }
 0x2b1   :  { %1941 = vmatpush.msrb.mxu0 %v15526_v28  ;;  %1958 = vmatpush.msrb.mxu1 %v15527_v14  ;;  %15546 = vst [vmem:[#allocation92_spill] sm:$0xff] %v9424_v29  ;;  %v9490_v28 = vld [vmem:[%s14463_s3 + $0x648] sm:$0xff]  ;;  %v9496_v14 = vld [vmem:[%s14463_s3 + $0x180] sm:$0xff] }
 0x2b2   :  { %1981 = vmatpush.msrb.mxu2 %v8508_v61  ;;  %1998 = vmatpush.msrb.mxu3 %v15528_v3  ;;  %v9189_v61 = vld [vmem:[%s14463_s3 + $0x130] sm:$0xff]  ;;  %15547 = vst [vmem:[#allocation93_spill] sm:$0xff] %v9430_v62  ;;  %v9502_v3 = vld [vmem:[%s14463_s3 + $0x188] sm:$0xff] }
 0x2b3   :  { %1942 = vmatpush.msrb.mxu0 %v15529_v0  ;;  %1959 = vmatpush.msrb.mxu1 %v8526_v18  ;;  %v9182_v18 = vld [vmem:[%s14463_s3 + $0x178] sm:$0xff]  ;;  %15548 = vst [vmem:[#allocation84_spill] sm:$0xff] %v9436_v60  ;;  %v9508_v0 = vld [vmem:[%s14463_s3 + $0x600] sm:$0xff] }
 0x2b4   :  { %1982 = vmatpush.msrb.mxu2 %v9168_v34  ;;  %1999 = vmatpush.msrb.mxu3 %v8533_v19  ;;  %v9203_v19 = vld [vmem:[%s14463_s3 + $0xf0] sm:$0xff]  ;;  %15549 = vst [vmem:[#allocation85_spill] sm:$0xff] %v9442_v33 }
 0x2b5   :  { %1943 = vmatpush.msrb.mxu0 %v9175_v5  ;;  %1960 = vmatpush.msrb.mxu1 %v8540_v25  ;;  %v9196_v25 = vld [vmem:[%s14463_s3 + $0x138] sm:$0xff]  ;;  %15550 = vst [vmem:[#allocation96_spill] sm:$0xff] %v9448_v46 }
 0x2b6   :  { %1983 = vmatpush.msrb.mxu2 %v9182_v18  ;;  %2000 = vmatpush.msrb.mxu3 %v8547_v50  ;;  %v15530_v50 = vld [vmem:[#allocation231_spill] sm:$0xff]  ;;  %15551 = vst [vmem:[#allocation97_spill] sm:$0xff] %v9454_v7 }
 0x2b7   :  { %1944 = vmatpush.msrb.mxu0 %v9189_v61  ;;  %1961 = vmatpush.msrb.mxu1 %v8554_v53  ;;  %v9210_v53 = vld [vmem:[%s14463_s3 + $0xf8] sm:$0xff]  ;;  %15552 = vst [vmem:[#allocation88_spill] sm:$0xff] %v9460_v22 }
 0x2b8   :  { %1984 = vmatpush.msrb.mxu2 %v9196_v25  ;;  %2001 = vmatpush.msrb.mxu3 %v8561_v43  ;;  %v9217_v43 = vld [vmem:[%s14463_s3 + $0xb0] sm:$0xff]  ;;  %15553 = vst [vmem:[#allocation89_spill] sm:$0xff] %v9466_v41 }
 0x2b9   :  { %1945 = vmatpush.msrb.mxu0 %v9203_v19  ;;  %1962 = vmatpush.msrb.mxu1 %v15530_v50  ;;  %15554 = vst [vmem:[#allocation102_spill] sm:$0xff] %v9472_v1  ;;  %v9514_v50 = vld [vmem:[%s14463_s3 + $0x608] sm:$0xff] }
 0x2ba   :  { %1985 = vmatpush.msrb.mxu2 %v9210_v53  ;;  %2002 = vmatpush.msrb.mxu3 %v15531_v15  ;;  %15555 = vst [vmem:[#allocation103_spill] sm:$0xff] %v9478_v6  ;;  %v9520_v15 = vld [vmem:[%s14463_s3 + $0x140] sm:$0xff] }
 0x2bb   :  { %1946 = vmatpush.msrb.mxu0 %v9217_v43  ;;  %1963 = vmatpush.msrb.mxu1 %v15532_v63  ;;  %15556 = vst [vmem:[#allocation94_spill] sm:$0xff] %v9484_v45  ;;  %v9526_v63 = vld [vmem:[%s14463_s3 + $0x148] sm:$0xff] }
 0x2bc   :  { %1986 = vmatpush.msrb.mxu2 %v9224_v20  ;;  %2003 = vmatpush.msrb.mxu3 %v15533_v37  ;;  %15557 = vst [vmem:[#allocation95_spill] sm:$0xff] %v9490_v28  ;;  %v9532_v37 = vld [vmem:[%s14463_s3 + $0x5c0] sm:$0xff] }
 0x2bd   :  { %1947 = vmatpush.msrb.mxu0 %v9231_v16  ;;  %1964 = vmatpush.msrb.mxu1 %v15534_v17  ;;  %15558 = vst [vmem:[#allocation106_spill] sm:$0xff] %v9496_v14  ;;  %v9538_v17 = vld [vmem:[%s14463_s3 + $0x5c8] sm:$0xff] }
 0x2be   :  { %1987 = vmatpush.msrb.mxu2 %v9238_v58  ;;  %2004 = vmatpush.msrb.mxu3 %v15535_v56  ;;  %15559 = vst [vmem:[#allocation107_spill] sm:$0xff] %v9502_v3  ;;  %v9544_v56 = vld [vmem:[%s14463_s3 + $0x100] sm:$0xff] }
 0x2bf   :  { %1948 = vmatpush.msrb.mxu0 %v9245_v54  ;;  %1965 = vmatpush.msrb.mxu1 %v15536_v9  ;;  %15560 = vst [vmem:[#allocation100_spill] sm:$0xff] %v9508_v0  ;;  %v9550_v9 = vld [vmem:[%s14463_s3 + $0x108] sm:$0xff] }
 0x2c0   :  { %1988 = vmatpush.msrb.mxu2 %v9252_v59  ;;  %2005 = vmatpush.msrb.mxu3 %v9258_v12  ;;  %15561 = vst [vmem:[#allocation101_spill] sm:$0xff] %v9514_v50 }
 0x2c1   :  { %1949 = vmatmul.f32.vlgmr.msrb.gmra.mxu0 %v9052_v44  ;;  %1989 = vmatmul.f32.vlgmr.msrb.gmra.mxu2 %v9052_v44  ;;  %v9284_v44 = vld [vmem:[%s14463_s3 + $0x3c8] sm:$0xff]  ;;  %15562 = vst [vmem:[#allocation110_spill] sm:$0xff] %v9520_v15 }
 0x2c2   :  { %1966 = vmatpush.msrb.mxu1 %v9266_v26  ;;  %2006 = vmatpush.msrb.mxu3 %v9272_v55  ;;  %15563 = vst [vmem:[#allocation111_spill] sm:$0xff] %v9526_v63 }
 0x2c3   :  { %2158 = vmatpush.msra.mxu0 %v9278_v52  ;;  %2198 = vmatpush.msra.mxu2 %v9284_v44  ;;  %15564 = vst [vmem:[#allocation112_spill] sm:$0xff] %v9532_v37 }
 0x2c4   :  { %1967 = vmatpush.msrb.mxu1 %v9290_v13  ;;  %2007 = vmatpush.msrb.mxu3 %v9296_v10  ;;  %15565 = vst [vmem:[#allocation113_spill] sm:$0xff] %v9538_v17 }
 0x2c5   :  { %2159 = vmatpush.msra.mxu0 %v9302_v39  ;;  %2199 = vmatpush.msra.mxu2 %v9308_v23  ;;  %15566 = vst [vmem:[#allocation104_spill] sm:$0xff] %v9544_v56 }
 0x2c6   :  { %1968 = vmatpush.msrb.mxu1 %v9314_v2  ;;  %2008 = vmatpush.msrb.mxu3 %v9320_v47  ;;  %15567 = vst [vmem:[#allocation105_spill] sm:$0xff] %v9550_v9 }
 0x2c7   :  { %1969 = vmatmul.f32.vlgmr.msrb.gmra.mxu1 %v9061_v51  ;;  %2009 = vmatmul.f32.vlgmr.msrb.gmra.mxu3 %v9061_v51  ;;  %v9346_v51 = vld [vmem:[%s14463_s3 + $0x7c8] sm:$0xff] }
 0x2c8   :  { %2160 = vmatpush.msra.mxu0 %v9328_v8  ;;  %2200 = vmatpush.msra.mxu2 %v9334_v57 }
 0x2c9   :  { %2178 = vmatpush.msra.mxu1 %v9340_v31  ;;  %2218 = vmatpush.msra.mxu3 %v9346_v51 }
 0x2ca   :  { %2161 = vmatpush.msra.mxu0 %v9352_v40  ;;  %2201 = vmatpush.msra.mxu2 %v9358_v36 }
 0x2cb   :  { %2179 = vmatpush.msra.mxu1 %v9364_v32  ;;  %2219 = vmatpush.msra.mxu3 %v9370_v49 }
 0x2cc   :  { %2162 = vmatpush.msra.mxu0 %v9376_v21  ;;  %2202 = vmatpush.msra.mxu2 %v9382_v42 }
 0x2cd   :  { %2180 = vmatpush.msra.mxu1 %v9388_v38  ;;  %2220 = vmatpush.msra.mxu3 %v9394_v11 }
 0x2ce   :  { %2163 = vmatpush.msra.mxu0 %v9400_v24  ;;  %2203 = vmatpush.msra.mxu2 %v9406_v48  ;;  %v15660_v24 = vld [vmem:[#allocation156_spill] sm:$0xff] }
 0x2cf   :  { %2181 = vmatpush.msra.mxu1 %v9412_v27  ;;  %2221 = vmatpush.msra.mxu3 %v9418_v30 }
 0x2d0   :  { %2164 = vmatpush.msra.mxu0 %v9424_v29  ;;  %2204 = vmatpush.msra.mxu2 %v9430_v62  ;;  %v15659_v62 = vld [vmem:[#allocation13_spill] sm:$0xff] }
 0x2d1   :  { %2182 = vmatpush.msra.mxu1 %v9436_v60  ;;  %2222 = vmatpush.msra.mxu3 %v9442_v33 }
 0x2d2   :  { %2165 = vmatpush.msra.mxu0 %v9448_v46  ;;  %2205 = vmatpush.msra.mxu2 %v9454_v7  ;;  %v15657_v46 = vld [vmem:[#allocation10_spill] sm:$0xff] }
 0x2d3   :  { %2183 = vmatpush.msra.mxu1 %v9460_v22  ;;  %2223 = vmatpush.msra.mxu3 %v9466_v41  ;;  %v15655_v41 = vld [vmem:[#allocation12_spill] sm:$0xff] }
 0x2d4   :  { %2166 = vmatpush.msra.mxu0 %v9472_v1  ;;  %2206 = vmatpush.msra.mxu2 %v9478_v6 }
 0x2d5   :  { %2184 = vmatpush.msra.mxu1 %v9484_v45  ;;  %2224 = vmatpush.msra.mxu3 %v9490_v28  ;;  %v15637_v28 = vld [vmem:[#allocation52_spill] sm:$0xff] }
 0x2d6   :  { %2167 = vmatpush.msra.mxu0 %v9496_v14  ;;  %2207 = vmatpush.msra.mxu2 %v9502_v3  ;;  %v15635_v3 = vld [vmem:[#allocation58_spill] sm:$0xff]  ;;  %v15636_v14 = vld [vmem:[#allocation59_spill] sm:$0xff] }
 0x2d7   :  { %2185 = vmatpush.msra.mxu1 %v9508_v0  ;;  %2225 = vmatpush.msra.mxu3 %v9514_v50  ;;  %v15631_v50 = vld [vmem:[#allocation54_spill] sm:$0xff]  ;;  %v15632_v0 = vld [vmem:[#allocation55_spill] sm:$0xff] }
 0x2d8   :  { %2168 = vmatpush.msra.mxu0 %v9520_v15  ;;  %2208 = vmatpush.msra.mxu2 %v9526_v63  ;;  %v15616_v63 = vld [vmem:[#allocation34_spill] sm:$0xff]  ;;  %v15618_v15 = vld [vmem:[#allocation35_spill] sm:$0xff] }
 0x2d9   :  { %2186 = vmatpush.msra.mxu1 %v9532_v37  ;;  %2226 = vmatpush.msra.mxu3 %v9538_v17  ;;  %v9556_v37 = vld [vmem:[%s14463_s3 + $0x580] sm:$0xff]  ;;  %v9562_v17 = vld [vmem:[%s14463_s3 + $0x588] sm:$0xff] }
 0x2da   :  { %2169 = vmatpush.msra.mxu0 %v9544_v56  ;;  %2209 = vmatpush.msra.mxu2 %v9550_v9  ;;  %15568 = vst [vmem:[#allocation118_spill] sm:$0xff] %v9556_v37  ;;  %v9568_v56 = vld [vmem:[%s14463_s3 + $0xc0] sm:$0xff]  ;;  %v9574_v9 = vld [vmem:[%s14463_s3 + $0xc8] sm:$0xff] }
 0x2db   :  { %2187 = vmatpush.msra.mxu1 %v9556_v37  ;;  %15569 = vst [vmem:[#allocation119_spill] sm:$0xff] %v9562_v17  ;;  %2227 = vmatpush.msra.mxu3 %v9562_v17  ;;  %v9580_v37 = vld [vmem:[%s14463_s3 + $0x540] sm:$0xff]  ;;  %v9586_v17 = vld [vmem:[%s14463_s3 + $0x548] sm:$0xff] }
 0x2dc   :  { %15570 = vst [vmem:[#allocation108_spill] sm:$0xff] %v9568_v56  ;;  %2170 = vmatpush.msra.mxu0 %v9568_v56  ;;  %2210 = vmatpush.msra.mxu2 %v9574_v9  ;;  %v9592_v56 = vld [vmem:[%s14463_s3 + $0x80] sm:$0xff] }
 0x2dd   :  { %15571 = vst [vmem:[#allocation109_spill] sm:$0xff] %v9574_v9  ;;  %2188 = vmatpush.msra.mxu1 %v9580_v37  ;;  %2228 = vmatpush.msra.mxu3 %v9586_v17  ;;  %v9598_v9 = vld [vmem:[%s14463_s3 + $0x88] sm:$0xff] }
 0x2de   :  { %15572 = vst [vmem:[#allocation124_spill] sm:$0xff] %v9580_v37  ;;  %2171 = vmatpush.msra.mxu0 %v9592_v56  ;;  %2211 = vmatpush.msra.mxu2 %v9598_v9  ;;  %v9604_v37 = vld [vmem:[%s14463_s3 + $0x500] sm:$0xff] }
 0x2df   :  { %15573 = vst [vmem:[#allocation125_spill] sm:$0xff] %v9586_v17  ;;  %2189 = vmatpush.msra.mxu1 %v9604_v37  ;;  %v9610_v17 = vld [vmem:[%s14463_s3 + $0x508] sm:$0xff] }
 0x2e0   :  { %15574 = vst [vmem:[#allocation116_spill] sm:$0xff] %v9592_v56  ;;  %2229 = vmatpush.msra.mxu3 %v9610_v17  ;;  %v9616_v56 = vld [vmem:[%s14463_s3 + $0x40] sm:$0xff] }
 0x2e1   :  { %15575 = vst [vmem:[#allocation117_spill] sm:$0xff] %v9598_v9  ;;  %2172 = vmatpush.msra.mxu0 %v9616_v56  ;;  %v9622_v9 = vld [vmem:[%s14463_s3 + $0x48] sm:$0xff] }
 0x2e2   :  { %15576 = vst [vmem:[#allocation128_spill] sm:$0xff] %v9604_v37  ;;  %2212 = vmatpush.msra.mxu2 %v9622_v9  ;;  %v9628_v37 = vld [vmem:[%s14463_s3 + $0x4c0] sm:$0xff] }
 0x2e3   :  { %15577 = vst [vmem:[#allocation120_spill] sm:$0xff] %v9610_v17  ;;  %2190 = vmatpush.msra.mxu1 %v9628_v37  ;;  %v9634_v17 = vld [vmem:[%s14463_s3 + $0x4c8] sm:$0xff] }
 0x2e4   :  { %15578 = vst [vmem:[#allocation129_spill] sm:$0xff] %v9616_v56  ;;  %2230 = vmatpush.msra.mxu3 %v9634_v17  ;;  %v9640_v56 = vld [vmem:[%s14463_s3] sm:$0xff] }
 0x2e5   :  { %15579 = vst [vmem:[#allocation121_spill] sm:$0xff] %v9622_v9  ;;  %2173 = vmatpush.msra.mxu0 %v9640_v56  ;;  %v9646_v9 = vld [vmem:[%s14463_s3 + $0x8] sm:$0xff] }
 0x2e6   :  { %15580 = vst [vmem:[#allocation132_spill] sm:$0xff] %v9628_v37  ;;  %2213 = vmatpush.msra.mxu2 %v9646_v9  ;;  %v9652_v37 = vld [vmem:[%s14463_s3 + $0x3d0] sm:$0xff] }
 0x2e7   :  { %15581 = vst [vmem:[#allocation126_spill] sm:$0xff] %v9634_v17  ;;  %2238 = vmatpush.msrb.mxu0 %v9652_v37  ;;  %v9658_v17 = vld [vmem:[%s14463_s3 + $0x3d8] sm:$0xff] }
 0x2e8   :  { %15582 = vst [vmem:[#allocation133_spill] sm:$0xff] %v9640_v56  ;;  %2278 = vmatpush.msrb.mxu2 %v9658_v17  ;;  %v9664_v56 = vld [vmem:[%s14463_s3 + $0x480] sm:$0xff] }
 0x2e9   :  { %15583 = vst [vmem:[#allocation127_spill] sm:$0xff] %v9646_v9  ;;  %2191 = vmatpush.msra.mxu1 %v9664_v56  ;;  %v9670_v9 = vld [vmem:[%s14463_s3 + $0x488] sm:$0xff] }
 0x2ea   :  { %15584 = vst [vmem:[#allocation136_spill] sm:$0xff] %v9652_v37  ;;  %2231 = vmatpush.msra.mxu3 %v9670_v9  ;;  %v9676_v37 = vld [vmem:[%s14463_s3 + $0x390] sm:$0xff] }
 0x2eb   :  { %15585 = vst [vmem:[#allocation130_spill] sm:$0xff] %v9658_v17  ;;  %2239 = vmatpush.msrb.mxu0 %v9676_v37  ;;  %v9682_v17 = vld [vmem:[%s14463_s3 + $0x398] sm:$0xff] }
 0x2ec   :  { %15586 = vst [vmem:[#allocation137_spill] sm:$0xff] %v9664_v56  ;;  %2279 = vmatpush.msrb.mxu2 %v9682_v17  ;;  %v9688_v56 = vld [vmem:[%s14463_s3 + $0x440] sm:$0xff] }
 0x2ed   :  { %15587 = vst [vmem:[#allocation131_spill] sm:$0xff] %v9670_v9  ;;  %2192 = vmatpush.msra.mxu1 %v9688_v56  ;;  %v9694_v9 = vld [vmem:[%s14463_s3 + $0x448] sm:$0xff] }
 0x2ee   :  { %15588 = vst [vmem:[#allocation142_spill] sm:$0xff] %v9676_v37  ;;  %2232 = vmatpush.msra.mxu3 %v9694_v9  ;;  %v9700_v37 = vld [vmem:[%s14463_s3 + $0x350] sm:$0xff] }
 0x2ef   :  { %15589 = vst [vmem:[#allocation134_spill] sm:$0xff] %v9682_v17  ;;  %2240 = vmatpush.msrb.mxu0 %v9700_v37  ;;  %v9706_v17 = vld [vmem:[%s14463_s3 + $0x358] sm:$0xff] }
 0x2f0   :  { %15590 = vst [vmem:[#allocation143_spill] sm:$0xff] %v9688_v56  ;;  %2280 = vmatpush.msrb.mxu2 %v9706_v17  ;;  %v9712_v56 = vld [vmem:[%s14463_s3 + $0x400] sm:$0xff] }
 0x2f1   :  { %15591 = vst [vmem:[#allocation135_spill] sm:$0xff] %v9694_v9  ;;  %2193 = vmatpush.msra.mxu1 %v9712_v56  ;;  %v9718_v9 = vld [vmem:[%s14463_s3 + $0x408] sm:$0xff] }
 0x2f2   :  { %15592 = vst [vmem:[#allocation140_spill] sm:$0xff] %v9700_v37  ;;  %2233 = vmatpush.msra.mxu3 %v9718_v9  ;;  %v9724_v37 = vld [vmem:[%s14463_s3 + $0x310] sm:$0xff] }
 0x2f3   :  { %15593 = vst [vmem:[#allocation141_spill] sm:$0xff] %v9706_v17  ;;  %2241 = vmatpush.msrb.mxu0 %v9724_v37  ;;  %v9730_v17 = vld [vmem:[%s14463_s3 + $0x7d0] sm:$0xff] }
 0x2f4   :  { %15594 = vst [vmem:[#allocation144_spill] sm:$0xff] %v9712_v56  ;;  %2258 = vmatpush.msrb.mxu1 %v9730_v17  ;;  %v9736_v56 = vld [vmem:[%s14463_s3 + $0x318] sm:$0xff] }
 0x2f5   :  { %15595 = vst [vmem:[#allocation8_spill] sm:$0xff] %v9718_v9  ;;  %2281 = vmatpush.msrb.mxu2 %v9736_v56  ;;  %v9742_v9 = vld [vmem:[%s14463_s3 + $0x7d8] sm:$0xff] }
 0x2f6   :  { %15596 = vst [vmem:[#allocation6_spill] sm:$0xff] %v9724_v37  ;;  %2298 = vmatpush.msrb.mxu3 %v9742_v9  ;;  %v9748_v37 = vld [vmem:[%s14463_s3 + $0x2d0] sm:$0xff] }
 0x2f7   :  { %15597 = vst [vmem:[#allocation9_spill] sm:$0xff] %v9730_v17  ;;  %2242 = vmatpush.msrb.mxu0 %v9748_v37  ;;  %v9754_v17 = vld [vmem:[%s14463_s3 + $0x790] sm:$0xff] }
 0x2f8   :  { %15598 = vst [vmem:[#allocation7_spill] sm:$0xff] %v9736_v56  ;;  %2259 = vmatpush.msrb.mxu1 %v9754_v17  ;;  %v9760_v56 = vld [vmem:[%s14463_s3 + $0x2d8] sm:$0xff] }
 0x2f9   :  { %15599 = vst [vmem:[#allocation38_spill] sm:$0xff] %v9742_v9  ;;  %2282 = vmatpush.msrb.mxu2 %v9760_v56  ;;  %v9766_v9 = vld [vmem:[%s14463_s3 + $0x798] sm:$0xff] }
 0x2fa   :  { %15600 = vst [vmem:[#allocation39_spill] sm:$0xff] %v9748_v37  ;;  %2299 = vmatpush.msrb.mxu3 %v9766_v9  ;;  %v9772_v37 = vld [vmem:[%s14463_s3 + $0x290] sm:$0xff] }
 0x2fb   :  { %15601 = vst [vmem:[#allocation47_spill] sm:$0xff] %v9754_v17  ;;  %2243 = vmatpush.msrb.mxu0 %v9772_v37  ;;  %v9778_v17 = vld [vmem:[%s14463_s3 + $0x750] sm:$0xff] }
 0x2fc   :  { %15602 = vst [vmem:[#allocation48_spill] sm:$0xff] %v9760_v56  ;;  %2260 = vmatpush.msrb.mxu1 %v9778_v17  ;;  %v9784_v56 = vld [vmem:[%s14463_s3 + $0x298] sm:$0xff] }
 0x2fd   :  { %15603 = vst [vmem:[#allocation161_spill] sm:$0xff] %v9766_v9  ;;  %2283 = vmatpush.msrb.mxu2 %v9784_v56  ;;  %v9790_v9 = vld [vmem:[%s14463_s3 + $0x758] sm:$0xff] }
 0x2fe   :  { %15604 = vst [vmem:[#allocation162_spill] sm:$0xff] %v9772_v37  ;;  %2300 = vmatpush.msrb.mxu3 %v9790_v9  ;;  %v9796_v37 = vld [vmem:[%s14463_s3 + $0x250] sm:$0xff] }
 0x2ff   :  { %15605 = vst [vmem:[#allocation163_spill] sm:$0xff] %v9778_v17  ;;  %2244 = vmatpush.msrb.mxu0 %v9796_v37  ;;  %v9802_v17 = vld [vmem:[%s14463_s3 + $0x710] sm:$0xff] }
 0x300   :  { %15606 = vst [vmem:[#allocation164_spill] sm:$0xff] %v9784_v56  ;;  %2261 = vmatpush.msrb.mxu1 %v9802_v17  ;;  %v9808_v56 = vld [vmem:[%s14463_s3 + $0x258] sm:$0xff] }
 0x301   :  { %15607 = vst [vmem:[#allocation165_spill] sm:$0xff] %v9790_v9  ;;  %2284 = vmatpush.msrb.mxu2 %v9808_v56  ;;  %v9814_v9 = vld [vmem:[%s14463_s3 + $0x718] sm:$0xff] }
 0x302   :  { %15608 = vst [vmem:[#allocation166_spill] sm:$0xff] %v9796_v37  ;;  %2301 = vmatpush.msrb.mxu3 %v9814_v9  ;;  %v9820_v37 = vld [vmem:[%s14463_s3 + $0x210] sm:$0xff] }
 0x303   :  { %15609 = vst [vmem:[#allocation167_spill] sm:$0xff] %v9802_v17  ;;  %2245 = vmatpush.msrb.mxu0 %v9820_v37  ;;  %v9826_v17 = vld [vmem:[%s14463_s3 + $0x6d0] sm:$0xff] }
 0x304   :  { %15610 = vst [vmem:[#allocation168_spill] sm:$0xff] %v9808_v56  ;;  %2262 = vmatpush.msrb.mxu1 %v9826_v17  ;;  %v15614_v56 = vld [vmem:[#allocation40_spill] sm:$0xff] }
 0x305   :  { %15611 = vst [vmem:[#allocation169_spill] sm:$0xff] %v9814_v9  ;;  %2285 = vmatpush.msrb.mxu2 %v15614_v56  ;;  %v9833_v9 = vld [vmem:[%s14463_s3 + $0x6d8] sm:$0xff]  ;;  %2246 = vmatpush.msrb.mxu0 %v15616_v63  ;;  %v9854_v63 = vld [vmem:[%s14463_s3 + $0x650] sm:$0xff]  ;;  %v1770_v45 = vpop.f32.mrf.mxu3 }
 0x306   :  { %15612 = vst [vmem:[#allocation170_spill] sm:$0xff] %v9820_v37  ;;  %2302 = vmatpush.msrb.mxu3 %v9833_v9  ;;  %v9840_v37 = vld [vmem:[%s14463_s3 + $0x690] sm:$0xff]  ;;  %v9847_v56 = vld [vmem:[%s14463_s3 + $0x698] sm:$0xff] }
 0x307   :  { %15613 = vst [vmem:[#allocation171_spill] sm:$0xff] %v9826_v17  ;;  %2263 = vmatpush.msrb.mxu1 %v9840_v37  ;;  %2286 = vmatpush.msrb.mxu2 %v15618_v15  ;;  %v15620_v17 = vld [vmem:[#allocation43_spill] sm:$0xff]  ;;  %v9861_v15 = vld [vmem:[%s14463_s3 + $0x658] sm:$0xff] }
 0x308   :  { %15615 = vst [vmem:[#allocation172_spill] sm:$0xff] %v9833_v9  ;;  %2303 = vmatpush.msrb.mxu3 %v9847_v56  ;;  %2247 = vmatpush.msrb.mxu0 %v15620_v17  ;;  %v15622_v9 = vld [vmem:[#allocation44_spill] sm:$0xff] }
 0x309   :  { %15617 = vst [vmem:[#allocation173_spill] sm:$0xff] %v9840_v37  ;;  %2264 = vmatpush.msrb.mxu1 %v9854_v63  ;;  %2287 = vmatpush.msrb.mxu2 %v15622_v9  ;;  %v15624_v37 = vld [vmem:[#allocation36_spill] sm:$0xff] }
 0x30a   :  { %15619 = vst [vmem:[#allocation174_spill] sm:$0xff] %v9847_v56  ;;  %2304 = vmatpush.msrb.mxu3 %v9861_v15  ;;  %2248 = vmatpush.msrb.mxu0 %v15624_v37  ;;  %v9868_v17 = vld [vmem:[%s14463_s3 + $0x610] sm:$0xff]  ;;  %v15626_v56 = vld [vmem:[#allocation37_spill] sm:$0xff]  ;;  %v15630_v37 = vld [vmem:[#allocation42_spill] sm:$0xff] }
 0x30b   :  { %15621 = vst [vmem:[#allocation175_spill] sm:$0xff] %v9854_v63  ;;  %2265 = vmatpush.msrb.mxu1 %v9868_v17  ;;  %2288 = vmatpush.msrb.mxu2 %v15626_v56  ;;  %v9875_v9 = vld [vmem:[%s14463_s3 + $0x618] sm:$0xff]  ;;  %v15634_v56 = vld [vmem:[#allocation46_spill] sm:$0xff] }
 0x30c   :  { %15623 = vst [vmem:[#allocation176_spill] sm:$0xff] %v9861_v15  ;;  %2305 = vmatpush.msrb.mxu3 %v9875_v9  ;;  %v15628_v63 = vld [vmem:[#allocation49_spill] sm:$0xff] }
 0x30d   :  { %15625 = vst [vmem:[#allocation177_spill] sm:$0xff] %v9868_v17  ;;  %2249 = vmatpush.msrb.mxu0 %v15628_v63  ;;  %v15629_v15 = vld [vmem:[#allocation41_spill] sm:$0xff]  ;;  %2289 = vmatpush.msrb.mxu2 %v15630_v37  ;;  %v15639_v63 = vld [vmem:[#allocation62_spill] sm:$0xff]  ;;  %v15641_v37 = vld [vmem:[#allocation56_spill] sm:$0xff] }
 0x30e   :  { %15627 = vst [vmem:[#allocation178_spill] sm:$0xff] %v9875_v9  ;;  %2266 = vmatpush.msrb.mxu1 %v15629_v15  ;;  %2306 = vmatpush.msrb.mxu3 %v15631_v50  ;;  %v15633_v17 = vld [vmem:[#allocation45_spill] sm:$0xff]  ;;  %v15640_v15 = vld [vmem:[#allocation63_spill] sm:$0xff] }
 0x30f   :  { %2250 = vmatpush.msrb.mxu0 %v15632_v0  ;;  %2290 = vmatpush.msrb.mxu2 %v15634_v56  ;;  %v15638_v9 = vld [vmem:[#allocation53_spill] sm:$0xff]  ;;  %v15643_v0 = vld [vmem:[#allocation68_spill] sm:$0xff] }
 0x310   :  { %2267 = vmatpush.msrb.mxu1 %v15633_v17  ;;  %2307 = vmatpush.msrb.mxu3 %v15635_v3  ;;  %v15642_v50 = vld [vmem:[#allocation57_spill] sm:$0xff]  ;;  %v15645_v56 = vld [vmem:[#allocation60_spill] sm:$0xff] }
 0x311   :  { %2251 = vmatpush.msrb.mxu0 %v15636_v14  ;;  %2291 = vmatpush.msrb.mxu2 %v15638_v9  ;;  %v15644_v17 = vld [vmem:[#allocation69_spill] sm:$0xff]  ;;  %v15647_v14 = vld [vmem:[#allocation72_spill] sm:$0xff] }
 0x312   :  { %2268 = vmatpush.msrb.mxu1 %v15637_v28  ;;  %2308 = vmatpush.msrb.mxu3 %v15639_v63  ;;  %v15646_v3 = vld [vmem:[#allocation61_spill] sm:$0xff]  ;;  %v15649_v9 = vld [vmem:[#allocation64_spill] sm:$0xff] }
 0x313   :  { %2252 = vmatpush.msrb.mxu0 %v15640_v15  ;;  %2292 = vmatpush.msrb.mxu2 %v15642_v50  ;;  %v15648_v28 = vld [vmem:[#allocation73_spill] sm:$0xff]  ;;  %v15651_v15 = vld [vmem:[#allocation78_spill] sm:$0xff] }
 0x314   :  { %2269 = vmatpush.msrb.mxu1 %v15641_v37  ;;  %2309 = vmatpush.msrb.mxu3 %v15643_v0  ;;  %v15650_v63 = vld [vmem:[#allocation65_spill] sm:$0xff]  ;;  %v15652_v37 = vld [vmem:[#allocation79_spill] sm:$0xff]  ;;  %v15653_v50 = vld [vmem:[#allocation70_spill] sm:$0xff]  ;;  %v1730_v0 = vpop.f32.mrf.mxu1 }
 0x315   :  { %2253 = vmatpush.msrb.mxu0 %v15644_v17  ;;  %2293 = vmatpush.msrb.mxu2 %v15646_v3  ;;  %v1710_v17 = vpop.f32.mrf.mxu0 }
 0x316   :  { %2270 = vmatpush.msrb.mxu1 %v15645_v56  ;;  %2310 = vmatpush.msrb.mxu3 %v15647_v14  ;;  %v1750_v56 = vpop.f32.mrf.mxu2  ;;  %v15654_v14 = vld [vmem:[#allocation153_spill] sm:$0xff]  ;;  %v1731_v22 = vadd.f32 %v1730_v0, %v1710_v17 }
 0x317   :  { %v1771_v27 = vadd.f32 %v1770_v45, %v1750_v56 }
 0x318   :  { %2271 = vmatpush.msrb.mxu1 %v15648_v28  ;;  %2311 = vmatpush.msrb.mxu3 %v15649_v9  ;;  %v206_v28 = vadd.f32 %v15655_v41, %v15654_v14  ;;  %v1850_v9 = vpop.f32.mrf.mxu3 }
 0x31a   :  { %2272 = vmatpush.msrb.mxu1 %v15650_v63  ;;  %2312 = vmatpush.msrb.mxu3 %v15651_v15  ;;  %v15656_v63 = vld [vmem:[#allocation154_spill] sm:$0xff] }
 0x31b   :  { %v124_v15 = vadd.f32 %v15657_v46, %v15656_v63  ;;  %v15662_v46 = vld [vmem:[#allocation157_spill] sm:$0xff] }
 0x31c   :  { %2273 = vmatpush.msrb.mxu1 %v15652_v37  ;;  %2313 = vmatpush.msrb.mxu3 %v15653_v50  ;;  %v1810_v6 = vpop.f32.mrf.mxu1  ;;  %v15658_v50 = vld [vmem:[#allocation155_spill] sm:$0xff] }
 0x31d   :  { %v1790_v3 = vpop.f32.mrf.mxu0  ;;  %v2013_v60 = vadd.f32 %v1731_v22, %v124_v15  ;;  %v247_v29 = vadd.f32 %v15659_v62, %v15658_v50 }
 0x31e   :  { %v1811_v1 = vadd.f32 %v1810_v6, %v1790_v3  ;;  %v1830_v33 = vpop.f32.mrf.mxu2  ;;  %v15661_v6 = vld [vmem:[#allocation11_spill] sm:$0xff] }
 0x31f   :  { %v1851_v37 = vadd.f32 %v1850_v9, %v1830_v33  ;;  %v165_v3 = vadd.f32 %v15661_v6, %v15660_v24  ;;  %v4584_v11 = vmul.f32 -1.442695, %v2013_v60  ;;  %v15663_v33 = vld [vmem:[#allocation50_spill] sm:$0xff] }
 0x320   :  { %v2015_v7 = vadd.f32 %v1811_v1, %v206_v28  ;;  %v288_v22 = vadd.f32 %v15663_v33, %v15662_v46  ;;  %v15667_v46 = vld [vmem:[#allocation66_spill] sm:$0xff] }
 0x321   :  { %v2016_v48 = vadd.f32 %v1851_v37, %v247_v29  ;;  %v2014_v0 = vadd.f32 %v1771_v27, %v165_v3  ;;  %v15665_v27 = vld [vmem:[#allocation51_spill] sm:$0xff] }
 0x322   :  { %v4586_v30 = vmul.f32 -1.442695, %v2015_v7 }
 0x323   :  { %v4587_v17 = vmul.f32 -1.442695, %v2016_v48  ;;  %v4585_v9 = vmul.f32 -1.442695, %v2014_v0 }
 0x324   :  { %4686 = vpow2.f32 %v4586_v30  ;;  %v1890_v41 = vpop.f32.mrf.mxu1  ;;  %v15664_v30 = vld [vmem:[#allocation158_spill] sm:$0xff] }
 0x325   :  { %v1870_v1 = vpop.f32.mrf.mxu0  ;;  %4688 = vpow2.f32 %v4584_v11  ;;  %v329_v37 = vadd.f32 %v15665_v27, %v15664_v30 }
 0x326   :  { %v1891_v28 = vadd.f32 %v1890_v41, %v1870_v1  ;;  %4690 = vpow2.f32 %v4587_v17  ;;  %v1910_v29 = vpop.f32.mrf.mxu2 }
 0x327   :  { %4692 = vpow2.f32 %v4585_v9 }
 0x328   :  { %v2017_v62 = vadd.f32 %v1891_v28, %v288_v22 }
 0x329   :  { %v1930_v7 = vpop.f32.mrf.mxu3 }
 0x32a   :  { %v4687_v15 = vpop.eup %4686  ;;  %v1931_v45 = vadd.f32 %v1930_v7, %v1910_v29  ;;  %v4588_v48 = vmul.f32 -1.442695, %v2017_v62 }
 0x32b   :  { %v4689_v56 = vpop.eup %4688  ;;  %v9914_v60 = vadd.f32 1.0, %v4687_v15 }
 0x32c   :  { %v4691_v6 = vpop.eup %4690  ;;  %v2039_v11 = vadd.f32 1.0, %v4689_v56  ;;  %v2018_v3 = vadd.f32 %v1931_v45, %v329_v37 }
 0x32d   :  { %4694 = vrcp.f32 %v9914_v60  ;;  %v4693_v41 = vpop.eup %4692  ;;  %v9919_v0 = vadd.f32 1.0, %v4691_v6  ;;  %v2086_v38 = vand.u32 2147483648, %v9914_v60  ;;  %vm2080_vm3 = vweird.f32 %v9914_v60 }
 0x32e   :  { %4696 = vpow2.f32 %v4588_v48  ;;  %v4589_v1 = vmul.f32 -1.442695, %v2018_v3  ;;  %v9921_v17 = vadd.f32 1.0, %v4693_v41  ;;  %v2056_v14 = vand.u32 2147483648, %v2039_v11 }
 0x32f   :  { %4698 = vrcp.f32 %v2039_v11  ;;  %vm2050_vm5 = vweird.f32 %v2039_v11  ;;  %vm2095_vm11 = vweird.f32 %v9919_v0 }
 0x330   :  { %4700 = vrcp.f32 %v9919_v0  ;;  %vm2065_vm8 = vweird.f32 %v9921_v17 }
 0x331   :  { %4702 = vpow2.f32 %v4589_v1 }
 0x332   :  { %4704 = vrcp.f32 %v9921_v17 }
 0x333   :  { %v9923_v28 = vpop.eup %4694 }
 0x334   :  { %v4697_v33 = vpop.eup %4696  ;;  %v2076_v9 = vmul.f32 %v9923_v28, %v9914_v60  ;;  %vm2081_vm1 = vweird.f32 %v9923_v28 }
 0x335   :  { %v9926_v22 = vpop.eup %4698  ;;  %v9931_v15 = vadd.f32 1.0, %v4697_v33  ;;  %vm9964_vm4 = vmor %vm2080_vm3, %vm2081_vm1 }
 0x336   :  { %v9933_v62 = vpop.eup %4700  ;;  %v2046_v7 = vmul.f32 %v9926_v22, %v2039_v11  ;;  %v2077_v45 = vsub.f32 1.0, %v2076_v9  ;;  %vm2051_vm2 = vweird.f32 %v9926_v22 }
 0x337   :  { %v4703_v29 = vpop.eup %4702  ;;  %4706 = vrcp.f32 %v9931_v15  ;;  %v2091_v37 = vmul.f32 %v9933_v62, %v9919_v0  ;;  %vm9980_vm7 = vmor %vm2050_vm5, %vm2051_vm2  ;;  %vm2096_vm9 = vweird.f32 %v9933_v62  ;;  %vm2110_vm2 = vweird.f32 %v9931_v15 }
 0x338   :  { %v9937_v56 = vpop.eup %4704  ;;  %v2047_v27 = vsub.f32 1.0, %v2046_v7  ;;  %v9941_v48 = vadd.f32 1.0, %v4703_v29  ;;  %v2078_v3 = vmul.f32 %v9923_v28, %v2077_v45  ;;  %v15666_v7 = vld [vmem:[#allocation159_spill] sm:$0xff]  ;;  %v2054_v29 = vand.u32 2147483647, %v2039_v11  ;;  %vm9997_vm13 = vmor %vm2095_vm11, %vm2096_vm9 }
 0x339   :  { %v2061_v6 = vmul.f32 %v9937_v56, %v9921_v17  ;;  %v2092_v1 = vsub.f32 1.0, %v2091_v37  ;;  %v370_v24 = vadd.f32 %v15667_v46, %v15666_v7  ;;  %vm2066_vm12 = vweird.f32 %v9937_v56 }
 0x33a   :  { %4708 = vrcp.f32 %v9941_v48  ;;  %v2048_v30 = vmul.f32 %v9926_v22, %v2047_v27  ;;  %v2079_v45 = vadd.f32 %v9923_v28, %v2078_v3  ;;  %vm9970_vm6 = vcmp.eq.f32.partialorder %v2054_v29, 8.507059e+37  ;;  %vm10012_vm14 = vmor %vm2065_vm8, %vm2066_vm12 }
 0x33b   :  { %v2062_v63 = vsub.f32 1.0, %v2061_v6  ;;  %v2093_v46 = vmul.f32 %v9933_v62, %v2092_v1  ;;  %v2084_v6 = vand.u32 2147483647, %v9914_v60  ;;  %v2057_v1 = vor.u32 1.1754944e-38, %v2056_v14 }
 0x33c   :  { %v2049_v27 = vadd.f32 %v9926_v22, %v2048_v30  ;;  %v2083_v60 = vsel %vm9964_vm4, %v9923_v28, %v2079_v45 }
 0x33d   :  { %v9946_v41 = vpop.eup %4706  ;;  %vm2085_vm10 = vcmp.eq.f32.partialorder %v2084_v6, 8.507059e+37 }
 0x33e   :  { %v1950_v33 = vpop.f32.mrf.mxu0  ;;  %v2106_v37 = vmul.f32 %v9946_v41, %v9931_v15  ;;  %v2053_v14 = vsel %vm9980_vm7, %v9926_v22, %v2049_v27  ;;  %vm2111_vm0 = vweird.f32 %v9946_v41 }
 0x33f   :  { %v2058_v27 = vsel %vm9970_vm6, %v2057_v1, %v2053_v14  ;;  %v2114_v14 = vand.u32 2147483647, %v9931_v15  ;;  %vm2112_vm3 = vmor %vm2110_vm2, %vm2111_vm0  ;;  %vm2125_vm6 = vweird.f32 %v9941_v48 }
 0x340   :  { %v2107_v49 = vsub.f32 1.0, %v2106_v37  ;;  %v2099_v37 = vand.u32 2147483647, %v9919_v0 }
 0x341   :  { %vm2115_vm4 = vcmp.eq.f32.partialorder %v2114_v14, 8.507059e+37  ;;  %v10130_v14 = vld [vmem:[%s14463_s3 + $0x7a8] sm:$0xff] }
 0x342   :  { %vm2100_vm15 = vcmp.eq.f32.partialorder %v2099_v37, 8.507059e+37 }
 0x344   :  { %v1970_v9 = vpop.f32.mrf.mxu1  ;;  %v1990_v30 = vpop.f32.mrf.mxu2 }
 0x345   :  { %v1971_v50 = vadd.f32 %v1970_v9, %v1950_v33  ;;  %v15668_v33 = vld [vmem:[#allocation160_spill] sm:$0xff]  ;;  %v15669_v9 = vld [vmem:[#allocation67_spill] sm:$0xff] }
 0x346   :  { %v411_v7 = vadd.f32 %v15669_v9, %v15668_v33  ;;  %v2063_v9 = vmul.f32 %v9937_v56, %v2062_v63  ;;  %v2087_v33 = vor.u32 1.1754944e-38, %v2086_v38  ;;  %v2094_v63 = vadd.f32 %v9933_v62, %v2093_v46 }
 0x347   :  { %v2019_v42 = vadd.f32 %v1971_v50, %v370_v24  ;;  %v9968_v24 = vpop.eup %4708  ;;  %v2101_v38 = vand.u32 2147483648, %v9919_v0  ;;  %v2108_v46 = vmul.f32 %v9946_v41, %v2107_v49  ;;  %v10086_v49 = vld [vmem:[%s14463_s3 + $0x320] sm:$0xff] }
 0x348   :  { %v2121_v28 = vmul.f32 %v9968_v24, %v9941_v48  ;;  %v2088_v29 = vsel %vm2085_vm10, %v2087_v33, %v2083_v60  ;;  %v2069_v60 = vand.u32 2147483647, %v9921_v17  ;;  %v2098_v0 = vsel %vm9997_vm13, %v9933_v62, %v2094_v63 }
 0x349   :  { %4710 = vtanh.f32 %v2019_v42  ;;  %v2137_v6 = vmul.f32 %v2088_v29, %v9030_v35  ;;  %v2109_v1 = vadd.f32 %v9946_v41, %v2108_v46  ;;  %vm2126_vm5 = vweird.f32 %v9968_v24 }
 0x34a   :  { %v2010_v21 = vpop.f32.mrf.mxu3  ;;  %vm2070_vm1 = vcmp.eq.f32.partialorder %v2069_v60, 8.507059e+37  ;;  %vm2127_vm7 = vmor %vm2125_vm6, %vm2126_vm5  ;;  %v10064_v60 = vld [vmem:[%s14463_s3 + $0x3a8] sm:$0xff] }
 0x34b   :  { %v2011_v11 = vadd.f32 %v2010_v21, %v1990_v30  ;;  %v2064_v21 = vadd.f32 %v9937_v56, %v2063_v9  ;;  %v2102_v30 = vor.u32 1.1754944e-38, %v2101_v38  ;;  %v2122_v9 = vsub.f32 1.0, %v2121_v28 }
 0x34c   :  { %v2113_v29 = vsel %vm2112_vm3, %v9946_v41, %v2109_v1  ;;  %v10098_v1 = vld [vmem:[%s14463_s3 + $0x328] sm:$0xff] }
 0x34d   :  { %v2020_v45 = vadd.f32 %v2011_v11, %v411_v7  ;;  %v2071_v7 = vand.u32 2147483648, %v9921_v17  ;;  %v2068_v35 = vsel %vm10012_vm14, %v9937_v56, %v2064_v21  ;;  %v2103_v42 = vsel %vm2100_vm15, %v2102_v30, %v2098_v0  ;;  %v10072_v30 = vld [vmem:[%s14463_s3 + $0x360] sm:$0xff] }
 0x34e   :  { %v2116_v11 = vand.u32 2147483648, %v9931_v15  ;;  %v2123_v63 = vmul.f32 %v9968_v24, %v2122_v9  ;;  %v2138_v38 = vmul.f32 %v2103_v42, %v9044_v4  ;;  %v2131_v15 = vand.u32 2147483648, %v9941_v48  ;;  %v10078_v9 = vld [vmem:[%s14463_s3 + $0x368] sm:$0xff]  ;;  %v10112_v42 = vld [vmem:[%s14463_s3 + $0x2e0] sm:$0xff] }
 0x34f   :  { %v4711_v3 = vpop.eup %4710  ;;  %4712 = vtanh.f32 %v2020_v45  ;;  %v2072_v62 = vor.u32 1.1754944e-38, %v2071_v7  ;;  %v2129_v4 = vand.u32 2147483647, %v9941_v48  ;;  %v10046_v7 = vld [vmem:[%s14463_s3 + $0x3e0] sm:$0xff]  ;;  %v10052_v48 = vld [vmem:[%s14463_s3 + $0x3e8] sm:$0xff] }
 0x350   :  { %v2139_v33 = vmul.f32 %v4711_v3, %v2058_v27  ;;  %v2117_v45 = vor.u32 1.1754944e-38, %v2116_v11  ;;  %v2124_v37 = vadd.f32 %v9968_v24, %v2123_v63  ;;  %v2132_v27 = vor.u32 1.1754944e-38, %v2131_v15  ;;  %v10118_v11 = vld [vmem:[%s14463_s3 + $0x7a0] sm:$0xff] }
 0x351   :  { %v2073_v56 = vsel %vm2070_vm1, %v2072_v62, %v2068_v35  ;;  %vm2130_vm8 = vcmp.eq.f32.partialorder %v2129_v4, 8.507059e+37  ;;  %v10092_v35 = vld [vmem:[%s14463_s3 + $0x7e0] sm:$0xff]  ;;  %v10104_v62 = vld [vmem:[%s14463_s3 + $0x7e8] sm:$0xff] }
 0x352   :  { %v10016_v50 = vadd.f32 %v2139_v33, %v2137_v6  ;;  %v2118_v22 = vsel %vm2115_vm4, %v2117_v45, %v2113_v29  ;;  %v2128_v41 = vsel %vm2127_vm7, %v9968_v24, %v2124_v37  ;;  %v10058_v33 = vld [vmem:[%s14463_s3 + $0x3a0] sm:$0xff]  ;;  %v10172_v37 = vld [vmem:[%s14463_s3 + $0x268] sm:$0xff] }
 0x353   :  { %v2133_v6 = vsel %vm2130_vm8, %v2132_v27, %v2128_v41  ;;  %v10136_v63 = vld [vmem:[%s14463_s3 + $0x2a0] sm:$0xff]  ;;  %v10198_v4 = vld [vmem:[%s14463_s3 + $0x228] sm:$0xff] }
 0x354   :  { %4714 = vtanh.f32 %v10016_v50  ;;  %v10160_v29 = vld [vmem:[%s14463_s3 + $0x260] sm:$0xff]  ;;  %v10204_v41 = vld [vmem:[%s14463_s3 + $0x6e8] sm:$0xff] }
 0x355   :  { %v4713_v17 = vpop.eup %4712  ;;  %v10166_v45 = vld [vmem:[%s14463_s3 + $0x720] sm:$0xff]  ;;  %15680 = vst [vmem:[#allocation179_spill] sm:$0xff] %v10204_v41 }
 0x356   :  { %v2140_v28 = vmul.f32 %v4713_v17, %v2073_v56  ;;  %v10124_v17 = vld [vmem:[%s14463_s3 + $0x2e8] sm:$0xff]  ;;  %v10142_v56 = vld [vmem:[%s14463_s3 + $0x760] sm:$0xff] }
 0x357   :  { %v10192_v15 = vld [vmem:[%s14463_s3 + $0x6e0] sm:$0xff] }
 0x358   :  { %v10030_v21 = vadd.f32 %v2140_v28, %v2138_v38  ;;  %v10148_v38 = vld [vmem:[%s14463_s3 + $0x2a8] sm:$0xff]  ;;  %v10210_v27 = vld [vmem:[%s14463_s3 + $0x1e0] sm:$0xff] }
 0x359   :  { %v10154_v28 = vld [vmem:[%s14463_s3 + $0x768] sm:$0xff]  ;;  %15681 = vst [vmem:[#allocation180_spill] sm:$0xff] %v10210_v27 }
 0x35a   :  { %v4715_v3 = vpop.eup %4714  ;;  %4716 = vtanh.f32 %v10030_v21 }
 0x35b   :  { %v10038_v46 = vmul.f32 %v4715_v3, %v2118_v22  ;;  %v10178_v3 = vld [vmem:[%s14463_s3 + $0x728] sm:$0xff]  ;;  %v10186_v22 = vld [vmem:[%s14463_s3 + $0x220] sm:$0xff] }
 0x35d   :  { %2174 = vmatmul.f32.vlgmr.msra.gmra.mxu0 %v10038_v46  ;;  %2214 = vmatmul.f32.vlgmr.msra.gmra.mxu2 %v10038_v46 }
 0x35e   :  { %2318 = vmatpush.msra.mxu0 %v10046_v7  ;;  %2358 = vmatpush.msra.mxu2 %v10052_v48 }
 0x360   :  { %v4717_v24 = vpop.eup %4716  ;;  %2319 = vmatpush.msra.mxu0 %v10058_v33  ;;  %2359 = vmatpush.msra.mxu2 %v10064_v60 }
 0x361   :  { %v10067_v0 = vmul.f32 %v4717_v24, %v2133_v6  ;;  %v10216_v24 = vld [vmem:[%s14463_s3 + $0x6a0] sm:$0xff]  ;;  %v10222_v6 = vld [vmem:[%s14463_s3 + $0x1e8] sm:$0xff] }
 0x362   :  { %2320 = vmatpush.msra.mxu0 %v10072_v30  ;;  %2360 = vmatpush.msra.mxu2 %v10078_v9  ;;  %15682 = vst [vmem:[#allocation181_spill] sm:$0xff] %v10216_v24 }
 0x363   :  { %2194 = vmatmul.f32.vlgmr.msra.gmra.mxu1 %v10067_v0  ;;  %2234 = vmatmul.f32.vlgmr.msra.gmra.mxu3 %v10067_v0  ;;  %15683 = vst [vmem:[#allocation182_spill] sm:$0xff] %v10222_v6 }
 0x364   :  { %2321 = vmatpush.msra.mxu0 %v10086_v49  ;;  %2338 = vmatpush.msra.mxu1 %v10092_v35 }
 0x365   :  { %2361 = vmatpush.msra.mxu2 %v10098_v1  ;;  %2378 = vmatpush.msra.mxu3 %v10104_v62 }
 0x366   :  { %2254 = vmatmul.f32.vlgmr.msrb.gmra.mxu0 %v10038_v46  ;;  %2294 = vmatmul.f32.vlgmr.msrb.gmra.mxu2 %v10038_v46 }
 0x367   :  { %2322 = vmatpush.msra.mxu0 %v10112_v42  ;;  %2339 = vmatpush.msra.mxu1 %v10118_v11 }
 0x368   :  { %2362 = vmatpush.msra.mxu2 %v10124_v17  ;;  %2379 = vmatpush.msra.mxu3 %v10130_v14 }
 0x369   :  { %2323 = vmatpush.msra.mxu0 %v10136_v63  ;;  %2340 = vmatpush.msra.mxu1 %v10142_v56 }
 0x36a   :  { %2363 = vmatpush.msra.mxu2 %v10148_v38  ;;  %2380 = vmatpush.msra.mxu3 %v10154_v28 }
 0x36b   :  { %2324 = vmatpush.msra.mxu0 %v10160_v29  ;;  %2341 = vmatpush.msra.mxu1 %v10166_v45 }
 0x36c   :  { %2364 = vmatpush.msra.mxu2 %v10172_v37  ;;  %2381 = vmatpush.msra.mxu3 %v10178_v3 }
 0x36d   :  { %2274 = vmatmul.f32.vlgmr.msrb.gmra.mxu1 %v10067_v0  ;;  %2314 = vmatmul.f32.vlgmr.msrb.gmra.mxu3 %v10067_v0 }
 0x36e   :  { %2325 = vmatpush.msra.mxu0 %v10186_v22  ;;  %2342 = vmatpush.msra.mxu1 %v10192_v15 }
 0x36f   :  { %2365 = vmatpush.msra.mxu2 %v10198_v4  ;;  %2382 = vmatpush.msra.mxu3 %v10204_v41  ;;  %v10228_v41 = vld [vmem:[%s14463_s3 + $0x6a8] sm:$0xff] }
 0x370   :  { %2326 = vmatpush.msra.mxu0 %v10210_v27  ;;  %2343 = vmatpush.msra.mxu1 %v10216_v24  ;;  %15684 = vst [vmem:[#allocation183_spill] sm:$0xff] %v10228_v41  ;;  %v10234_v27 = vld [vmem:[%s14463_s3 + $0x1a0] sm:$0xff] }
 0x371   :  { %2366 = vmatpush.msra.mxu2 %v10222_v6  ;;  %2383 = vmatpush.msra.mxu3 %v10228_v41  ;;  %15685 = vst [vmem:[#allocation184_spill] sm:$0xff] %v10234_v27  ;;  %v10240_v24 = vld [vmem:[%s14463_s3 + $0x660] sm:$0xff]  ;;  %v10246_v6 = vld [vmem:[%s14463_s3 + $0x1a8] sm:$0xff] }
 0x372   :  { %2327 = vmatpush.msra.mxu0 %v10234_v27  ;;  %15686 = vst [vmem:[#allocation185_spill] sm:$0xff] %v10240_v24  ;;  %2344 = vmatpush.msra.mxu1 %v10240_v24  ;;  %v10252_v41 = vld [vmem:[%s14463_s3 + $0x668] sm:$0xff]  ;;  %v10258_v27 = vld [vmem:[%s14463_s3 + $0x160] sm:$0xff] }
 0x373   :  { %15687 = vst [vmem:[#allocation186_spill] sm:$0xff] %v10246_v6  ;;  %2367 = vmatpush.msra.mxu2 %v10246_v6  ;;  %2384 = vmatpush.msra.mxu3 %v10252_v41  ;;  %v10264_v24 = vld [vmem:[%s14463_s3 + $0x620] sm:$0xff]  ;;  %v10270_v6 = vld [vmem:[%s14463_s3 + $0x168] sm:$0xff] }
 0x374   :  { %15688 = vst [vmem:[#allocation187_spill] sm:$0xff] %v10252_v41  ;;  %2328 = vmatpush.msra.mxu0 %v10258_v27  ;;  %2345 = vmatpush.msra.mxu1 %v10264_v24  ;;  %v10276_v41 = vld [vmem:[%s14463_s3 + $0x628] sm:$0xff] }
 0x375   :  { %15689 = vst [vmem:[#allocation188_spill] sm:$0xff] %v10258_v27  ;;  %2368 = vmatpush.msra.mxu2 %v10270_v6  ;;  %2385 = vmatpush.msra.mxu3 %v10276_v41  ;;  %v10282_v27 = vld [vmem:[%s14463_s3 + $0x120] sm:$0xff] }
 0x376   :  { %15690 = vst [vmem:[#allocation189_spill] sm:$0xff] %v10264_v24  ;;  %2329 = vmatpush.msra.mxu0 %v10282_v27  ;;  %v10288_v24 = vld [vmem:[%s14463_s3 + $0x5e0] sm:$0xff] }
 0x377   :  { %15691 = vst [vmem:[#allocation190_spill] sm:$0xff] %v10270_v6  ;;  %2346 = vmatpush.msra.mxu1 %v10288_v24  ;;  %v10294_v6 = vld [vmem:[%s14463_s3 + $0x128] sm:$0xff] }
 0x378   :  { %15692 = vst [vmem:[#allocation191_spill] sm:$0xff] %v10276_v41  ;;  %2369 = vmatpush.msra.mxu2 %v10294_v6  ;;  %v10300_v41 = vld [vmem:[%s14463_s3 + $0x5e8] sm:$0xff] }
 0x379   :  { %15693 = vst [vmem:[#allocation192_spill] sm:$0xff] %v10282_v27  ;;  %2386 = vmatpush.msra.mxu3 %v10300_v41  ;;  %v10306_v27 = vld [vmem:[%s14463_s3 + $0xe0] sm:$0xff] }
 0x37a   :  { %15694 = vst [vmem:[#allocation193_spill] sm:$0xff] %v10288_v24  ;;  %2330 = vmatpush.msra.mxu0 %v10306_v27  ;;  %v10312_v24 = vld [vmem:[%s14463_s3 + $0x5a0] sm:$0xff] }
 0x37b   :  { %15695 = vst [vmem:[#allocation194_spill] sm:$0xff] %v10294_v6  ;;  %2347 = vmatpush.msra.mxu1 %v10312_v24  ;;  %v10318_v6 = vld [vmem:[%s14463_s3 + $0xe8] sm:$0xff] }
 0x37c   :  { %15696 = vst [vmem:[#allocation195_spill] sm:$0xff] %v10300_v41  ;;  %2370 = vmatpush.msra.mxu2 %v10318_v6  ;;  %v10324_v41 = vld [vmem:[%s14463_s3 + $0x5a8] sm:$0xff] }
 0x37d   :  { %15697 = vst [vmem:[#allocation196_spill] sm:$0xff] %v10306_v27  ;;  %2387 = vmatpush.msra.mxu3 %v10324_v41  ;;  %v10330_v27 = vld [vmem:[%s14463_s3 + $0xa0] sm:$0xff] }
 0x37e   :  { %15698 = vst [vmem:[#allocation197_spill] sm:$0xff] %v10312_v24  ;;  %2331 = vmatpush.msra.mxu0 %v10330_v27  ;;  %v10336_v24 = vld [vmem:[%s14463_s3 + $0x560] sm:$0xff] }
 0x37f   :  { %15699 = vst [vmem:[#allocation198_spill] sm:$0xff] %v10318_v6  ;;  %2348 = vmatpush.msra.mxu1 %v10336_v24  ;;  %v10342_v6 = vld [vmem:[%s14463_s3 + $0xa8] sm:$0xff] }
 0x380   :  { %15700 = vst [vmem:[#allocation199_spill] sm:$0xff] %v10324_v41  ;;  %2371 = vmatpush.msra.mxu2 %v10342_v6  ;;  %v10348_v41 = vld [vmem:[%s14463_s3 + $0x568] sm:$0xff] }
 0x381   :  { %15701 = vst [vmem:[#allocation200_spill] sm:$0xff] %v10330_v27  ;;  %2388 = vmatpush.msra.mxu3 %v10348_v41  ;;  %v10354_v27 = vld [vmem:[%s14463_s3 + $0x60] sm:$0xff] }
 0x382   :  { %15702 = vst [vmem:[#allocation201_spill] sm:$0xff] %v10336_v24  ;;  %2332 = vmatpush.msra.mxu0 %v10354_v27  ;;  %v10360_v24 = vld [vmem:[%s14463_s3 + $0x520] sm:$0xff] }
 0x383   :  { %15703 = vst [vmem:[#allocation202_spill] sm:$0xff] %v10342_v6  ;;  %2349 = vmatpush.msra.mxu1 %v10360_v24  ;;  %v10366_v6 = vld [vmem:[%s14463_s3 + $0x68] sm:$0xff] }
 0x384   :  { %15704 = vst [vmem:[#allocation203_spill] sm:$0xff] %v10348_v41  ;;  %2372 = vmatpush.msra.mxu2 %v10366_v6  ;;  %v10372_v41 = vld [vmem:[%s14463_s3 + $0x528] sm:$0xff] }
 0x385   :  { %15705 = vst [vmem:[#allocation204_spill] sm:$0xff] %v10354_v27  ;;  %2389 = vmatpush.msra.mxu3 %v10372_v41  ;;  %v10378_v27 = vld [vmem:[%s14463_s3 + $0x20] sm:$0xff] }
 0x386   :  { %15706 = vst [vmem:[#allocation205_spill] sm:$0xff] %v10360_v24  ;;  %2333 = vmatpush.msra.mxu0 %v10378_v27  ;;  %v10384_v24 = vld [vmem:[%s14463_s3 + $0x4e0] sm:$0xff] }
 0x387   :  { %15707 = vst [vmem:[#allocation206_spill] sm:$0xff] %v10366_v6  ;;  %2350 = vmatpush.msra.mxu1 %v10384_v24  ;;  %v10390_v6 = vld [vmem:[%s14463_s3 + $0x28] sm:$0xff]  ;;  %2334 = vmatmul.f32.vlgmr.msra.gmra.mxu0 %v10038_v46 }
 0x388   :  { %15708 = vst [vmem:[#allocation207_spill] sm:$0xff] %v10372_v41  ;;  %2373 = vmatpush.msra.mxu2 %v10390_v6  ;;  %v10396_v41 = vld [vmem:[%s14463_s3 + $0x4e8] sm:$0xff] }
 0x389   :  { %15709 = vst [vmem:[#allocation208_spill] sm:$0xff] %v10378_v27  ;;  %2390 = vmatpush.msra.mxu3 %v10396_v41  ;;  %2374 = vmatmul.f32.vlgmr.msra.gmra.mxu2 %v10038_v46  ;;  %v10422_v27 = vld [vmem:[%s14463_s3 + $0x4a8] sm:$0xff] }
 0x38a   :  { %15710 = vst [vmem:[#allocation209_spill] sm:$0xff] %v10384_v24  ;;  %v10404_v24 = vld [vmem:[%s14463_s3 + $0x3f0] sm:$0xff] }
 0x38b   :  { %15711 = vst [vmem:[#allocation210_spill] sm:$0xff] %v10390_v6  ;;  %2398 = vmatpush.msrb.mxu0 %v10404_v24  ;;  %v10410_v6 = vld [vmem:[%s14463_s3 + $0x3f8] sm:$0xff]  ;;  %2391 = vmatpush.msra.mxu3 %v10422_v27 }
 0x38c   :  { %15712 = vst [vmem:[#allocation211_spill] sm:$0xff] %v10396_v41  ;;  %2438 = vmatpush.msrb.mxu2 %v10410_v6  ;;  %v10416_v41 = vld [vmem:[%s14463_s3 + $0x4a0] sm:$0xff] }
 0x38d   :  { %15713 = vst [vmem:[#allocation212_spill] sm:$0xff] %v10404_v24  ;;  %2351 = vmatpush.msra.mxu1 %v10416_v41  ;;  %v10428_v24 = vld [vmem:[%s14463_s3 + $0x3b0] sm:$0xff] }
 0x38e   :  { %15714 = vst [vmem:[#allocation213_spill] sm:$0xff] %v10410_v6  ;;  %2399 = vmatpush.msrb.mxu0 %v10428_v24  ;;  %v10434_v6 = vld [vmem:[%s14463_s3 + $0x3b8] sm:$0xff] }
 0x38f   :  { %15715 = vst [vmem:[#allocation214_spill] sm:$0xff] %v10416_v41  ;;  %2439 = vmatpush.msrb.mxu2 %v10434_v6  ;;  %v10440_v41 = vld [vmem:[%s14463_s3 + $0x460] sm:$0xff] }
 0x390   :  { %15716 = vst [vmem:[#allocation215_spill] sm:$0xff] %v10422_v27  ;;  %2352 = vmatpush.msra.mxu1 %v10440_v41  ;;  %v10446_v27 = vld [vmem:[%s14463_s3 + $0x468] sm:$0xff] }
 0x391   :  { %15717 = vst [vmem:[#allocation216_spill] sm:$0xff] %v10428_v24  ;;  %2392 = vmatpush.msra.mxu3 %v10446_v27  ;;  %v10452_v24 = vld [vmem:[%s14463_s3 + $0x370] sm:$0xff] }
 0x392   :  { %15718 = vst [vmem:[#allocation217_spill] sm:$0xff] %v10434_v6  ;;  %2400 = vmatpush.msrb.mxu0 %v10452_v24  ;;  %v10458_v6 = vld [vmem:[%s14463_s3 + $0x378] sm:$0xff] }
 0x393   :  { %15719 = vst [vmem:[#allocation218_spill] sm:$0xff] %v10440_v41  ;;  %2440 = vmatpush.msrb.mxu2 %v10458_v6  ;;  %v10464_v41 = vld [vmem:[%s14463_s3 + $0x420] sm:$0xff] }
 0x394   :  { %15720 = vst [vmem:[#allocation219_spill] sm:$0xff] %v10446_v27  ;;  %2353 = vmatpush.msra.mxu1 %v10464_v41  ;;  %v10470_v27 = vld [vmem:[%s14463_s3 + $0x428] sm:$0xff] }
 0x395   :  { %15721 = vst [vmem:[#allocation220_spill] sm:$0xff] %v10452_v24  ;;  %2393 = vmatpush.msra.mxu3 %v10470_v27  ;;  %2354 = vmatmul.f32.vlgmr.msra.gmra.mxu1 %v10067_v0  ;;  %v10496_v24 = vld [vmem:[%s14463_s3 + $0x7f8] sm:$0xff] }
 0x396   :  { %15722 = vst [vmem:[#allocation221_spill] sm:$0xff] %v10458_v6  ;;  %2394 = vmatmul.f32.vlgmr.msra.gmra.mxu3 %v10067_v0  ;;  %v10478_v6 = vld [vmem:[%s14463_s3 + $0x330] sm:$0xff] }
 0x397   :  { %15723 = vst [vmem:[#allocation222_spill] sm:$0xff] %v10464_v41  ;;  %2401 = vmatpush.msrb.mxu0 %v10478_v6  ;;  %v10484_v41 = vld [vmem:[%s14463_s3 + $0x7f0] sm:$0xff]  ;;  %2458 = vmatpush.msrb.mxu3 %v10496_v24 }
 0x398   :  { %15724 = vst [vmem:[#allocation223_spill] sm:$0xff] %v10470_v27  ;;  %2418 = vmatpush.msrb.mxu1 %v10484_v41  ;;  %v10490_v27 = vld [vmem:[%s14463_s3 + $0x338] sm:$0xff] }
 0x399   :  { %15725 = vst [vmem:[#allocation224_spill] sm:$0xff] %v10478_v6  ;;  %2441 = vmatpush.msrb.mxu2 %v10490_v27  ;;  %v10502_v6 = vld [vmem:[%s14463_s3 + $0x2f0] sm:$0xff] }
 0x39a   :  { %15726 = vst [vmem:[#allocation225_spill] sm:$0xff] %v10484_v41  ;;  %2402 = vmatpush.msrb.mxu0 %v10502_v6  ;;  %v10508_v41 = vld [vmem:[%s14463_s3 + $0x7b0] sm:$0xff] }
 0x39b   :  { %15727 = vst [vmem:[#allocation226_spill] sm:$0xff] %v10490_v27  ;;  %2419 = vmatpush.msrb.mxu1 %v10508_v41  ;;  %v10514_v27 = vld [vmem:[%s14463_s3 + $0x2f8] sm:$0xff] }
 0x39c   :  { %15728 = vst [vmem:[#allocation227_spill] sm:$0xff] %v10496_v24  ;;  %2442 = vmatpush.msrb.mxu2 %v10514_v27  ;;  %v10520_v24 = vld [vmem:[%s14463_s3 + $0x7b8] sm:$0xff] }
 0x39d   :  { %15729 = vst [vmem:[#allocation228_spill] sm:$0xff] %v10502_v6  ;;  %2459 = vmatpush.msrb.mxu3 %v10520_v24  ;;  %v10526_v6 = vld [vmem:[%s14463_s3 + $0x2b0] sm:$0xff] }
 0x39e   :  { %15730 = vst [vmem:[#allocation229_spill] sm:$0xff] %v10508_v41  ;;  %2403 = vmatpush.msrb.mxu0 %v10526_v6  ;;  %v10532_v41 = vld [vmem:[%s14463_s3 + $0x770] sm:$0xff] }
 0x39f   :  { %15731 = vst [vmem:[#allocation230_spill] sm:$0xff] %v10514_v27  ;;  %2420 = vmatpush.msrb.mxu1 %v10532_v41  ;;  %v10538_v27 = vld [vmem:[%s14463_s3 + $0x2b8] sm:$0xff] }
 0x3a0   :  { %15732 = vst [vmem:[#allocation231_spill] sm:$0xff] %v10520_v24  ;;  %2443 = vmatpush.msrb.mxu2 %v10538_v27  ;;  %v10544_v24 = vld [vmem:[%s14463_s3 + $0x778] sm:$0xff] }
 0x3a1   :  { %15733 = vst [vmem:[#allocation232_spill] sm:$0xff] %v10526_v6  ;;  %2460 = vmatpush.msrb.mxu3 %v10544_v24  ;;  %v10550_v6 = vld [vmem:[%s14463_s3 + $0x270] sm:$0xff] }
 0x3a2   :  { %15734 = vst [vmem:[#allocation233_spill] sm:$0xff] %v10532_v41  ;;  %2404 = vmatpush.msrb.mxu0 %v10550_v6  ;;  %v10556_v41 = vld [vmem:[%s14463_s3 + $0x730] sm:$0xff] }
 0x3a3   :  { %15735 = vst [vmem:[#allocation234_spill] sm:$0xff] %v10538_v27  ;;  %2421 = vmatpush.msrb.mxu1 %v10556_v41  ;;  %v10562_v27 = vld [vmem:[%s14463_s3 + $0x278] sm:$0xff] }
 0x3a4   :  { %15736 = vst [vmem:[#allocation235_spill] sm:$0xff] %v10544_v24  ;;  %2444 = vmatpush.msrb.mxu2 %v10562_v27  ;;  %v10568_v24 = vld [vmem:[%s14463_s3 + $0x738] sm:$0xff] }
 0x3a5   :  { %15737 = vst [vmem:[#allocation236_spill] sm:$0xff] %v10550_v6  ;;  %2461 = vmatpush.msrb.mxu3 %v10568_v24  ;;  %v10574_v6 = vld [vmem:[%s14463_s3 + $0x230] sm:$0xff] }
 0x3a6   :  { %15738 = vst [vmem:[#allocation237_spill] sm:$0xff] %v10556_v41  ;;  %2405 = vmatpush.msrb.mxu0 %v10574_v6  ;;  %v10580_v41 = vld [vmem:[%s14463_s3 + $0x6f0] sm:$0xff] }
 0x3a7   :  { %15739 = vst [vmem:[#allocation40_spill] sm:$0xff] %v10562_v27  ;;  %2422 = vmatpush.msrb.mxu1 %v10580_v41  ;;  %v10586_v27 = vld [vmem:[%s14463_s3 + $0x238] sm:$0xff] }
 0x3a8   :  { %15740 = vst [vmem:[#allocation34_spill] sm:$0xff] %v10568_v24  ;;  %2445 = vmatpush.msrb.mxu2 %v10586_v27  ;;  %v10592_v24 = vld [vmem:[%s14463_s3 + $0x6f8] sm:$0xff] }
 0x3a9   :  { %15741 = vst [vmem:[#allocation35_spill] sm:$0xff] %v10574_v6  ;;  %2462 = vmatpush.msrb.mxu3 %v10592_v24  ;;  %v10598_v6 = vld [vmem:[%s14463_s3 + $0x1f0] sm:$0xff] }
 0x3aa   :  { %15742 = vst [vmem:[#allocation43_spill] sm:$0xff] %v10580_v41  ;;  %2406 = vmatpush.msrb.mxu0 %v10598_v6  ;;  %v10604_v41 = vld [vmem:[%s14463_s3 + $0x6b0] sm:$0xff] }
 0x3ab   :  { %15743 = vst [vmem:[#allocation44_spill] sm:$0xff] %v10586_v27  ;;  %2423 = vmatpush.msrb.mxu1 %v10604_v41  ;;  %v10610_v27 = vld [vmem:[%s14463_s3 + $0x1f8] sm:$0xff] }
 0x3ac   :  { %15744 = vst [vmem:[#allocation36_spill] sm:$0xff] %v10592_v24  ;;  %2446 = vmatpush.msrb.mxu2 %v10610_v27  ;;  %v10616_v24 = vld [vmem:[%s14463_s3 + $0x6b8] sm:$0xff] }
 0x3ad   :  { %15745 = vst [vmem:[#allocation37_spill] sm:$0xff] %v10598_v6  ;;  %2463 = vmatpush.msrb.mxu3 %v10616_v24  ;;  %v10622_v6 = vld [vmem:[%s14463_s3 + $0x1b0] sm:$0xff] }
 0x3ae   :  { %15746 = vst [vmem:[#allocation49_spill] sm:$0xff] %v10604_v41  ;;  %2407 = vmatpush.msrb.mxu0 %v10622_v6  ;;  %v10628_v41 = vld [vmem:[%s14463_s3 + $0x670] sm:$0xff]  ;;  %2447 = vmatpush.msrb.mxu2 %v9168_v34  ;;  %v10649_v34 = vld [vmem:[%s14463_s3 + $0x638] sm:$0xff] }
 0x3af   :  { %15747 = vst [vmem:[#allocation41_spill] sm:$0xff] %v10616_v24  ;;  %2424 = vmatpush.msrb.mxu1 %v10628_v41  ;;  %v10635_v24 = vld [vmem:[%s14463_s3 + $0x678] sm:$0xff] }
 0x3b0   :  { %15748 = vst [vmem:[#allocation42_spill] sm:$0xff] %v10622_v6  ;;  %2464 = vmatpush.msrb.mxu3 %v10635_v24  ;;  %2408 = vmatpush.msrb.mxu0 %v9175_v5  ;;  %v10642_v6 = vld [vmem:[%s14463_s3 + $0x630] sm:$0xff] }
 0x3b1   :  { %2425 = vmatpush.msrb.mxu1 %v10642_v6  ;;  %2448 = vmatpush.msrb.mxu2 %v9182_v18  ;;  %v10656_v5 = vld [vmem:[%s14463_s3 + $0x5f0] sm:$0xff]  ;;  %v10663_v18 = vld [vmem:[%s14463_s3 + $0x5f8] sm:$0xff] }
 0x3b2   :  { %2465 = vmatpush.msrb.mxu3 %v10649_v34  ;;  %2409 = vmatpush.msrb.mxu0 %v9189_v61  ;;  %15749 = vst [vmem:[#allocation54_spill] sm:$0xff] %v10663_v18  ;;  %v10670_v61 = vld [vmem:[%s14463_s3 + $0x5b0] sm:$0xff] }
 0x3b3   :  { %2426 = vmatpush.msrb.mxu1 %v10656_v5  ;;  %2449 = vmatpush.msrb.mxu2 %v9196_v25  ;;  %15750 = vst [vmem:[#allocation55_spill] sm:$0xff] %v10670_v61  ;;  %v10677_v25 = vld [vmem:[%s14463_s3 + $0x5b8] sm:$0xff] }
 0x3b4   :  { %2466 = vmatpush.msrb.mxu3 %v10663_v18  ;;  %2410 = vmatpush.msrb.mxu0 %v9203_v19  ;;  %15751 = vst [vmem:[#allocation45_spill] sm:$0xff] %v10677_v25  ;;  %v10684_v19 = vld [vmem:[%s14463_s3 + $0x570] sm:$0xff] }
 0x3b5   :  { %2427 = vmatpush.msrb.mxu1 %v10670_v61  ;;  %2450 = vmatpush.msrb.mxu2 %v9210_v53  ;;  %15752 = vst [vmem:[#allocation46_spill] sm:$0xff] %v10684_v19  ;;  %v10691_v53 = vld [vmem:[%s14463_s3 + $0x578] sm:$0xff] }
 0x3b6   :  { %2467 = vmatpush.msrb.mxu3 %v10677_v25  ;;  %2411 = vmatpush.msrb.mxu0 %v9217_v43  ;;  %15753 = vst [vmem:[#allocation58_spill] sm:$0xff] %v10691_v53  ;;  %v10698_v43 = vld [vmem:[%s14463_s3 + $0x530] sm:$0xff] }
 0x3b7   :  { %2428 = vmatpush.msrb.mxu1 %v10684_v19  ;;  %2451 = vmatpush.msrb.mxu2 %v9224_v20  ;;  %15754 = vst [vmem:[#allocation59_spill] sm:$0xff] %v10698_v43  ;;  %v10705_v20 = vld [vmem:[%s14463_s3 + $0x538] sm:$0xff] }
 0x3b8   :  { %2468 = vmatpush.msrb.mxu3 %v10691_v53  ;;  %2412 = vmatpush.msrb.mxu0 %v9231_v16  ;;  %15755 = vst [vmem:[#allocation52_spill] sm:$0xff] %v10705_v20  ;;  %v10712_v16 = vld [vmem:[%s14463_s3 + $0x4f0] sm:$0xff] }
 0x3b9   :  { %2429 = vmatpush.msrb.mxu1 %v10698_v43  ;;  %2452 = vmatpush.msrb.mxu2 %v9238_v58  ;;  %15756 = vst [vmem:[#allocation53_spill] sm:$0xff] %v10712_v16  ;;  %v15757_v58 = vld [vmem:[#allocation71_spill] sm:$0xff]  ;;  %v15880_v43 = vld [vmem:[#allocation156_spill] sm:$0xff] }
 0x3ba   :  { %2469 = vmatpush.msrb.mxu3 %v10705_v20  ;;  %2413 = vmatpush.msrb.mxu0 %v9245_v54  ;;  %v15758_v54 = vld [vmem:[#allocation82_spill] sm:$0xff] }
 0x3bb   :  { %2430 = vmatpush.msrb.mxu1 %v10712_v16  ;;  %2453 = vmatpush.msrb.mxu2 %v9252_v59  ;;  %v15759_v59 = vld [vmem:[#allocation83_spill] sm:$0xff] }
 0x3bc   :  { %2470 = vmatpush.msrb.mxu3 %v9258_v12  ;;  %2414 = vmatmul.f32.vlgmr.msrb.gmra.mxu0 %v10038_v46  ;;  %v15760_v12 = vld [vmem:[#allocation76_spill] sm:$0xff] }
 0x3bd   :  { %2454 = vmatmul.f32.vlgmr.msrb.gmra.mxu2 %v10038_v46  ;;  %2431 = vmatpush.msrb.mxu1 %v9266_v26  ;;  %v15761_v26 = vld [vmem:[#allocation77_spill] sm:$0xff]  ;;  %v15778_v46 = vld [vmem:[#allocation106_spill] sm:$0xff] }
 0x3be   :  { %2471 = vmatpush.msrb.mxu3 %v9272_v55  ;;  %2623 = vmatpush.msra.mxu0 %v9278_v52  ;;  %v15762_v55 = vld [vmem:[#allocation86_spill] sm:$0xff]  ;;  %v15763_v52 = vld [vmem:[#allocation87_spill] sm:$0xff] }
 0x3bf   :  { %2663 = vmatpush.msra.mxu2 %v9284_v44  ;;  %2432 = vmatpush.msrb.mxu1 %v9290_v13  ;;  %v15764_v44 = vld [vmem:[#allocation80_spill] sm:$0xff]  ;;  %v15765_v13 = vld [vmem:[#allocation81_spill] sm:$0xff] }
 0x3c0   :  { %2472 = vmatpush.msrb.mxu3 %v9296_v10  ;;  %2624 = vmatpush.msra.mxu0 %v9302_v39  ;;  %v15766_v10 = vld [vmem:[#allocation92_spill] sm:$0xff]  ;;  %v15767_v39 = vld [vmem:[#allocation93_spill] sm:$0xff] }
 0x3c1   :  { %2664 = vmatpush.msra.mxu2 %v9308_v23  ;;  %2433 = vmatpush.msrb.mxu1 %v9314_v2  ;;  %v15768_v23 = vld [vmem:[#allocation84_spill] sm:$0xff]  ;;  %v15769_v2 = vld [vmem:[#allocation85_spill] sm:$0xff] }
 0x3c2   :  { %2473 = vmatpush.msrb.mxu3 %v9320_v47  ;;  %2434 = vmatmul.f32.vlgmr.msrb.gmra.mxu1 %v10067_v0  ;;  %v15770_v47 = vld [vmem:[#allocation96_spill] sm:$0xff] }
 0x3c3   :  { %2474 = vmatmul.f32.vlgmr.msrb.gmra.mxu3 %v10067_v0  ;;  %2625 = vmatpush.msra.mxu0 %v9328_v8  ;;  %v15771_v8 = vld [vmem:[#allocation97_spill] sm:$0xff]  ;;  %v15779_v0 = vld [vmem:[#allocation107_spill] sm:$0xff] }
 0x3c4   :  { %2665 = vmatpush.msra.mxu2 %v9334_v57  ;;  %2643 = vmatpush.msra.mxu1 %v9340_v31  ;;  %v15772_v57 = vld [vmem:[#allocation88_spill] sm:$0xff]  ;;  %v15773_v31 = vld [vmem:[#allocation89_spill] sm:$0xff] }
 0x3c5   :  { %2683 = vmatpush.msra.mxu3 %v9346_v51  ;;  %2626 = vmatpush.msra.mxu0 %v9352_v40  ;;  %v15774_v51 = vld [vmem:[#allocation102_spill] sm:$0xff]  ;;  %v15775_v40 = vld [vmem:[#allocation103_spill] sm:$0xff] }
 0x3c6   :  { %2666 = vmatpush.msra.mxu2 %v9358_v36  ;;  %2644 = vmatpush.msra.mxu1 %v9364_v32  ;;  %v15776_v36 = vld [vmem:[#allocation94_spill] sm:$0xff]  ;;  %v15777_v32 = vld [vmem:[#allocation95_spill] sm:$0xff] }
 0x3c7   :  { %2684 = vmatpush.msra.mxu3 %v15757_v58  ;;  %2627 = vmatpush.msra.mxu0 %v15758_v54  ;;  %v15780_v58 = vld [vmem:[#allocation100_spill] sm:$0xff]  ;;  %v15781_v54 = vld [vmem:[#allocation101_spill] sm:$0xff] }
 0x3c8   :  { %2667 = vmatpush.msra.mxu2 %v15759_v59  ;;  %2645 = vmatpush.msra.mxu1 %v15760_v12  ;;  %v15782_v59 = vld [vmem:[#allocation110_spill] sm:$0xff]  ;;  %v15783_v12 = vld [vmem:[#allocation111_spill] sm:$0xff] }
 0x3c9   :  { %2685 = vmatpush.msra.mxu3 %v15761_v26  ;;  %2628 = vmatpush.msra.mxu0 %v15762_v55  ;;  %v15784_v26 = vld [vmem:[#allocation112_spill] sm:$0xff]  ;;  %v15785_v55 = vld [vmem:[#allocation113_spill] sm:$0xff] }
 0x3ca   :  { %2668 = vmatpush.msra.mxu2 %v15763_v52  ;;  %2646 = vmatpush.msra.mxu1 %v15764_v44  ;;  %v15786_v52 = vld [vmem:[#allocation104_spill] sm:$0xff]  ;;  %v15787_v44 = vld [vmem:[#allocation105_spill] sm:$0xff] }
 0x3cb   :  { %2686 = vmatpush.msra.mxu3 %v15765_v13  ;;  %2629 = vmatpush.msra.mxu0 %v15766_v10  ;;  %v15788_v13 = vld [vmem:[#allocation118_spill] sm:$0xff]  ;;  %v15789_v10 = vld [vmem:[#allocation119_spill] sm:$0xff] }
 0x3cc   :  { %2669 = vmatpush.msra.mxu2 %v15767_v39  ;;  %2647 = vmatpush.msra.mxu1 %v15768_v23  ;;  %v15790_v39 = vld [vmem:[#allocation108_spill] sm:$0xff]  ;;  %v15791_v23 = vld [vmem:[#allocation109_spill] sm:$0xff] }
 0x3cd   :  { %2687 = vmatpush.msra.mxu3 %v15769_v2  ;;  %2630 = vmatpush.msra.mxu0 %v15770_v47  ;;  %v15792_v2 = vld [vmem:[#allocation124_spill] sm:$0xff]  ;;  %v15793_v47 = vld [vmem:[#allocation125_spill] sm:$0xff] }
 0x3ce   :  { %2670 = vmatpush.msra.mxu2 %v15771_v8  ;;  %2648 = vmatpush.msra.mxu1 %v15772_v57  ;;  %v15794_v8 = vld [vmem:[#allocation116_spill] sm:$0xff]  ;;  %v15795_v57 = vld [vmem:[#allocation117_spill] sm:$0xff] }
 0x3cf   :  { %2688 = vmatpush.msra.mxu3 %v15773_v31  ;;  %2631 = vmatpush.msra.mxu0 %v15774_v51  ;;  %v15796_v31 = vld [vmem:[#allocation128_spill] sm:$0xff] }
 0x3d0   :  { %2671 = vmatpush.msra.mxu2 %v15775_v40  ;;  %2649 = vmatpush.msra.mxu1 %v15776_v36  ;;  %v15797_v51 = vld [vmem:[#allocation120_spill] sm:$0xff]  ;;  %v15798_v40 = vld [vmem:[#allocation129_spill] sm:$0xff] }
 0x3d1   :  { %2689 = vmatpush.msra.mxu3 %v15777_v32  ;;  %2632 = vmatpush.msra.mxu0 %v15778_v46  ;;  %v15799_v36 = vld [vmem:[#allocation121_spill] sm:$0xff]  ;;  %v15800_v32 = vld [vmem:[#allocation132_spill] sm:$0xff]  ;;  %v15801_v46 = vld [vmem:[#allocation126_spill] sm:$0xff] }
 0x3d2   :  { %2672 = vmatpush.msra.mxu2 %v15779_v0  ;;  %2650 = vmatpush.msra.mxu1 %v15780_v58  ;;  %v15802_v0 = vld [vmem:[#allocation133_spill] sm:$0xff]  ;;  %v15803_v58 = vld [vmem:[#allocation127_spill] sm:$0xff] }
 0x3d3   :  { %2690 = vmatpush.msra.mxu3 %v15781_v54  ;;  %2633 = vmatpush.msra.mxu0 %v15782_v59  ;;  %v15804_v54 = vld [vmem:[#allocation136_spill] sm:$0xff]  ;;  %v15805_v59 = vld [vmem:[#allocation130_spill] sm:$0xff] }
 0x3d4   :  { %2673 = vmatpush.msra.mxu2 %v15783_v12  ;;  %2651 = vmatpush.msra.mxu1 %v15784_v26  ;;  %v15806_v12 = vld [vmem:[#allocation137_spill] sm:$0xff]  ;;  %v15807_v26 = vld [vmem:[#allocation131_spill] sm:$0xff] }
 0x3d5   :  { %2691 = vmatpush.msra.mxu3 %v15785_v55  ;;  %2634 = vmatpush.msra.mxu0 %v15786_v52  ;;  %v15808_v55 = vld [vmem:[#allocation142_spill] sm:$0xff] }
 0x3d6   :  { %2674 = vmatpush.msra.mxu2 %v15787_v44  ;;  %2652 = vmatpush.msra.mxu1 %v15788_v13  ;;  %v15809_v52 = vld [vmem:[#allocation134_spill] sm:$0xff]  ;;  %v15810_v44 = vld [vmem:[#allocation143_spill] sm:$0xff] }
 0x3d7   :  { %2692 = vmatpush.msra.mxu3 %v15789_v10  ;;  %2635 = vmatpush.msra.mxu0 %v15790_v39  ;;  %v15811_v13 = vld [vmem:[#allocation135_spill] sm:$0xff]  ;;  %v15812_v10 = vld [vmem:[#allocation140_spill] sm:$0xff]  ;;  %v15813_v39 = vld [vmem:[#allocation141_spill] sm:$0xff] }
 0x3d8   :  { %2675 = vmatpush.msra.mxu2 %v15791_v23  ;;  %2653 = vmatpush.msra.mxu1 %v15792_v2  ;;  %v15814_v23 = vld [vmem:[#allocation144_spill] sm:$0xff] }
 0x3d9   :  { %2693 = vmatpush.msra.mxu3 %v15793_v47  ;;  %2636 = vmatpush.msra.mxu0 %v15794_v8  ;;  %v15815_v2 = vld [vmem:[#allocation8_spill] sm:$0xff]  ;;  %v15816_v47 = vld [vmem:[#allocation6_spill] sm:$0xff]  ;;  %v15817_v8 = vld [vmem:[#allocation9_spill] sm:$0xff] }
 0x3da   :  { %2676 = vmatpush.msra.mxu2 %v15795_v57  ;;  %2654 = vmatpush.msra.mxu1 %v15796_v31  ;;  %v15818_v57 = vld [vmem:[#allocation7_spill] sm:$0xff]  ;;  %v15819_v31 = vld [vmem:[#allocation38_spill] sm:$0xff] }
 0x3db   :  { %2694 = vmatpush.msra.mxu3 %v15797_v51  ;;  %2637 = vmatpush.msra.mxu0 %v15798_v40  ;;  %v15820_v51 = vld [vmem:[#allocation39_spill] sm:$0xff] }
 0x3dc   :  { %2677 = vmatpush.msra.mxu2 %v15799_v36  ;;  %2655 = vmatpush.msra.mxu1 %v15800_v32  ;;  %v15821_v40 = vld [vmem:[#allocation47_spill] sm:$0xff]  ;;  %v15822_v36 = vld [vmem:[#allocation48_spill] sm:$0xff]  ;;  %v15823_v32 = vld [vmem:[#allocation161_spill] sm:$0xff] }
 0x3dd   :  { %2695 = vmatpush.msra.mxu3 %v15801_v46  ;;  %2638 = vmatpush.msra.mxu0 %v15802_v0  ;;  %v15824_v46 = vld [vmem:[#allocation162_spill] sm:$0xff]  ;;  %v15825_v0 = vld [vmem:[#allocation163_spill] sm:$0xff] }
 0x3de   :  { %2678 = vmatpush.msra.mxu2 %v15803_v58  ;;  %2656 = vmatpush.msra.mxu1 %v15806_v12  ;;  %v15826_v58 = vld [vmem:[#allocation164_spill] sm:$0xff]  ;;  %v15829_v12 = vld [vmem:[#allocation167_spill] sm:$0xff] }
 0x3df   :  { %2703 = vmatpush.msrb.mxu0 %v15804_v54  ;;  %2696 = vmatpush.msra.mxu3 %v15807_v26  ;;  %v15827_v54 = vld [vmem:[#allocation165_spill] sm:$0xff]  ;;  %v15830_v26 = vld [vmem:[#allocation168_spill] sm:$0xff] }
 0x3e0   :  { %2743 = vmatpush.msrb.mxu2 %v15805_v59  ;;  %2657 = vmatpush.msra.mxu1 %v15810_v44  ;;  %v15828_v59 = vld [vmem:[#allocation166_spill] sm:$0xff]  ;;  %v15833_v44 = vld [vmem:[#allocation171_spill] sm:$0xff] }
 0x3e1   :  { %2704 = vmatpush.msrb.mxu0 %v15808_v55  ;;  %2697 = vmatpush.msra.mxu3 %v15811_v13  ;;  %v15831_v55 = vld [vmem:[#allocation169_spill] sm:$0xff] }
 0x3e2   :  { %2744 = vmatpush.msrb.mxu2 %v15809_v52  ;;  %2658 = vmatpush.msra.mxu1 %v15814_v23  ;;  %v15832_v52 = vld [vmem:[#allocation170_spill] sm:$0xff]  ;;  %v10818_v13 = vld [vmem:[%s14463_s3 + $0x218] sm:$0xff] }
 0x3e3   :  { %2705 = vmatpush.msrb.mxu0 %v15812_v10  ;;  %2698 = vmatpush.msra.mxu3 %v15815_v2  ;;  %15834 = vst [vmem:[#allocation62_spill] sm:$0xff] %v10818_v13  ;;  %v15835_v10 = vld [vmem:[#allocation172_spill] sm:$0xff]  ;;  %v15837_v23 = vld [vmem:[#allocation173_spill] sm:$0xff] }
 0x3e4   :  { %2745 = vmatpush.msrb.mxu2 %v15813_v39  ;;  %2723 = vmatpush.msrb.mxu1 %v15817_v8  ;;  %v10825_v39 = vld [vmem:[%s14463_s3 + $0x1d0] sm:$0xff]  ;;  %v10832_v2 = vld [vmem:[%s14463_s3 + $0x1d8] sm:$0xff] }
 0x3e5   :  { %2706 = vmatpush.msrb.mxu0 %v15816_v47  ;;  %2763 = vmatpush.msrb.mxu3 %v15819_v31  ;;  %15836 = vst [vmem:[#allocation63_spill] sm:$0xff] %v10825_v39  ;;  %v15839_v47 = vld [vmem:[#allocation174_spill] sm:$0xff]  ;;  %v10839_v8 = vld [vmem:[%s14463_s3 + $0x190] sm:$0xff]  ;;  %v10846_v31 = vld [vmem:[%s14463_s3 + $0x198] sm:$0xff] }
 0x3e6   :  { %2746 = vmatpush.msrb.mxu2 %v15818_v57  ;;  %2724 = vmatpush.msrb.mxu1 %v15821_v40  ;;  %15838 = vst [vmem:[#allocation56_spill] sm:$0xff] %v10832_v2  ;;  %v15841_v57 = vld [vmem:[#allocation175_spill] sm:$0xff] }
 0x3e7   :  { %2707 = vmatpush.msrb.mxu0 %v15820_v51  ;;  %2764 = vmatpush.msrb.mxu3 %v15823_v32  ;;  %15840 = vst [vmem:[#allocation57_spill] sm:$0xff] %v10839_v8  ;;  %v15843_v51 = vld [vmem:[#allocation176_spill] sm:$0xff] }
 0x3e8   :  { %2747 = vmatpush.msrb.mxu2 %v15822_v36  ;;  %2725 = vmatpush.msrb.mxu1 %v15825_v0  ;;  %15842 = vst [vmem:[#allocation68_spill] sm:$0xff] %v10846_v31  ;;  %v10853_v40 = vld [vmem:[%s14463_s3 + $0x150] sm:$0xff]  ;;  %v15845_v36 = vld [vmem:[#allocation177_spill] sm:$0xff] }
 0x3e9   :  { %2708 = vmatpush.msrb.mxu0 %v15824_v46  ;;  %2765 = vmatpush.msrb.mxu3 %v15827_v54  ;;  %15844 = vst [vmem:[#allocation69_spill] sm:$0xff] %v10853_v40  ;;  %v10860_v32 = vld [vmem:[%s14463_s3 + $0x158] sm:$0xff]  ;;  %v15847_v46 = vld [vmem:[#allocation178_spill] sm:$0xff]  ;;  %v10867_v0 = vld [vmem:[%s14463_s3 + $0x110] sm:$0xff] }
 0x3ea   :  { %2748 = vmatpush.msrb.mxu2 %v15826_v58  ;;  %2726 = vmatpush.msrb.mxu1 %v15829_v12  ;;  %15846 = vst [vmem:[#allocation60_spill] sm:$0xff] %v10860_v32  ;;  %v10873_v58 = vld [vmem:[%s14463_s3 + $0x5d0] sm:$0xff]  ;;  %v10879_v54 = vld [vmem:[%s14463_s3 + $0x118] sm:$0xff] }
 0x3eb   :  { %2709 = vmatpush.msrb.mxu0 %v15828_v59  ;;  %2766 = vmatpush.msrb.mxu3 %v15831_v55  ;;  %15848 = vst [vmem:[#allocation61_spill] sm:$0xff] %v10867_v0  ;;  %v10885_v59 = vld [vmem:[%s14463_s3 + $0x5d8] sm:$0xff]  ;;  %v10891_v12 = vld [vmem:[%s14463_s3 + $0xd0] sm:$0xff] }
 0x3ec   :  { %2749 = vmatpush.msrb.mxu2 %v15830_v26  ;;  %2727 = vmatpush.msrb.mxu1 %v15833_v44  ;;  %15849 = vst [vmem:[#allocation72_spill] sm:$0xff] %v10873_v58  ;;  %v10897_v26 = vld [vmem:[%s14463_s3 + $0x590] sm:$0xff]  ;;  %v10903_v55 = vld [vmem:[%s14463_s3 + $0xd8] sm:$0xff] }
 0x3ed   :  { %2710 = vmatpush.msrb.mxu0 %v15832_v52  ;;  %2767 = vmatpush.msrb.mxu3 %v15835_v10  ;;  %15850 = vst [vmem:[#allocation73_spill] sm:$0xff] %v10879_v54  ;;  %v10909_v52 = vld [vmem:[%s14463_s3 + $0x598] sm:$0xff]  ;;  %v10915_v44 = vld [vmem:[%s14463_s3 + $0x90] sm:$0xff] }
 0x3ee   :  { %2750 = vmatpush.msrb.mxu2 %v10818_v13  ;;  %2728 = vmatpush.msrb.mxu1 %v15837_v23  ;;  %15851 = vst [vmem:[#allocation64_spill] sm:$0xff] %v10885_v59  ;;  %v10921_v10 = vld [vmem:[%s14463_s3 + $0x550] sm:$0xff]  ;;  %v10927_v23 = vld [vmem:[%s14463_s3 + $0x98] sm:$0xff] }
 0x3ef   :  { %2711 = vmatpush.msrb.mxu0 %v10825_v39  ;;  %2768 = vmatpush.msrb.mxu3 %v15839_v47  ;;  %15852 = vst [vmem:[#allocation65_spill] sm:$0xff] %v10891_v12  ;;  %v10933_v47 = vld [vmem:[%s14463_s3 + $0x558] sm:$0xff] }
 0x3f0   :  { %2751 = vmatpush.msrb.mxu2 %v10832_v2  ;;  %2729 = vmatpush.msrb.mxu1 %v15841_v57  ;;  %15853 = vst [vmem:[#allocation78_spill] sm:$0xff] %v10897_v26  ;;  %v10939_v57 = vld [vmem:[%s14463_s3 + $0x50] sm:$0xff]  ;;  %v15879_v2 = vld [vmem:[#allocation17_spill] sm:$0xff] }
 0x3f1   :  { %2712 = vmatpush.msrb.mxu0 %v10839_v8  ;;  %2769 = vmatpush.msrb.mxu3 %v15843_v51  ;;  %15854 = vst [vmem:[#allocation79_spill] sm:$0xff] %v10903_v55  ;;  %v10945_v51 = vld [vmem:[%s14463_s3 + $0x510] sm:$0xff] }
 0x3f2   :  { %2752 = vmatpush.msrb.mxu2 %v10846_v31  ;;  %2730 = vmatpush.msrb.mxu1 %v15845_v36  ;;  %15855 = vst [vmem:[#allocation70_spill] sm:$0xff] %v10909_v52  ;;  %v10951_v36 = vld [vmem:[%s14463_s3 + $0x58] sm:$0xff] }
 0x3f3   :  { %2713 = vmatpush.msrb.mxu0 %v10853_v40  ;;  %2770 = vmatpush.msrb.mxu3 %v15847_v46  ;;  %15856 = vst [vmem:[#allocation12_spill] sm:$0xff] %v10915_v44  ;;  %v10957_v46 = vld [vmem:[%s14463_s3 + $0x518] sm:$0xff] }
 0x3f4   :  { %2753 = vmatpush.msrb.mxu2 %v10860_v32  ;;  %2731 = vmatpush.msrb.mxu1 %v10873_v58  ;;  %15857 = vst [vmem:[#allocation10_spill] sm:$0xff] %v10921_v10  ;;  %v15876_v58 = vld [vmem:[#allocation154_spill] sm:$0xff] }
 0x3f5   :  { %2714 = vmatpush.msrb.mxu0 %v10867_v0  ;;  %2771 = vmatpush.msrb.mxu3 %v10885_v59  ;;  %15858 = vst [vmem:[#allocation13_spill] sm:$0xff] %v10927_v23  ;;  %v15877_v0 = vld [vmem:[#allocation14_spill] sm:$0xff] }
 0x3f6   :  { %2754 = vmatpush.msrb.mxu2 %v10879_v54  ;;  %2732 = vmatpush.msrb.mxu1 %v10897_v26  ;;  %15859 = vst [vmem:[#allocation11_spill] sm:$0xff] %v10933_v47  ;;  %v15875_v26 = vld [vmem:[#allocation16_spill] sm:$0xff]  ;;  %v127_v32 = vadd.f32 %v15877_v0, %v15876_v58  ;;  %v15882_v0 = vld [vmem:[#allocation157_spill] sm:$0xff] }
 0x3f7   :  { %2715 = vmatpush.msrb.mxu0 %v10891_v12  ;;  %2772 = vmatpush.msrb.mxu3 %v10909_v52  ;;  %15860 = vst [vmem:[#allocation50_spill] sm:$0xff] %v10939_v57 }
 0x3f8   :  { %2755 = vmatpush.msrb.mxu2 %v10903_v55  ;;  %2733 = vmatpush.msrb.mxu1 %v10921_v10  ;;  %15861 = vst [vmem:[#allocation51_spill] sm:$0xff] %v10945_v51  ;;  %v2215_v10 = vpop.f32.mrf.mxu2  ;;  %v15874_v55 = vld [vmem:[#allocation153_spill] sm:$0xff] }
 0x3f9   :  { %2716 = vmatpush.msrb.mxu0 %v10915_v44  ;;  %2773 = vmatpush.msrb.mxu3 %v10933_v47  ;;  %15862 = vst [vmem:[#allocation66_spill] sm:$0xff] %v10951_v36  ;;  %v2175_v47 = vpop.f32.mrf.mxu0  ;;  %v209_v12 = vadd.f32 %v15875_v26, %v15874_v55 }
 0x3fa   :  { %2756 = vmatpush.msrb.mxu2 %v10927_v23  ;;  %2734 = vmatpush.msrb.mxu1 %v10945_v51  ;;  %15863 = vst [vmem:[#allocation67_spill] sm:$0xff] %v10957_v46  ;;  %v10969_v51 = vld [vmem:[%s14463_s3 + $0x4d0] sm:$0xff]  ;;  %v2235_v23 = vpop.f32.mrf.mxu3 }
 0x3fb   :  { %2717 = vmatpush.msrb.mxu0 %v10939_v57  ;;  %2774 = vmatpush.msrb.mxu3 %v10957_v46  ;;  %v10963_v57 = vld [vmem:[%s14463_s3 + $0x10] sm:$0xff]  ;;  %15865 = vst [vmem:[#allocation82_spill] sm:$0xff] %v10969_v51  ;;  %v10981_v46 = vld [vmem:[%s14463_s3 + $0x4d8] sm:$0xff]  ;;  %v2236_v16 = vadd.f32 %v2235_v23, %v2215_v10 }
 0x3fc   :  { %2757 = vmatpush.msrb.mxu2 %v10951_v36  ;;  %15864 = vst [vmem:[#allocation71_spill] sm:$0xff] %v10963_v57  ;;  %2735 = vmatpush.msrb.mxu1 %v10969_v51  ;;  %v10975_v36 = vld [vmem:[%s14463_s3 + $0x18] sm:$0xff] }
 0x3fd   :  { %2718 = vmatpush.msrb.mxu0 %v10963_v57  ;;  %15866 = vst [vmem:[#allocation83_spill] sm:$0xff] %v10975_v36  ;;  %2775 = vmatpush.msrb.mxu3 %v10981_v46  ;;  %v10987_v57 = vld [vmem:[%s14463_s3 + $0x490] sm:$0xff]  ;;  %v10993_v51 = vld [vmem:[%s14463_s3 + $0x498] sm:$0xff] }
 0x3fe   :  { %2758 = vmatpush.msrb.mxu2 %v10975_v36  ;;  %15867 = vst [vmem:[#allocation76_spill] sm:$0xff] %v10981_v46  ;;  %2736 = vmatpush.msrb.mxu1 %v10987_v57  ;;  %v10999_v36 = vld [vmem:[%s14463_s3 + $0x450] sm:$0xff]  ;;  %v11005_v46 = vld [vmem:[%s14463_s3 + $0x458] sm:$0xff] }
 0x3ff   :  { %15868 = vst [vmem:[#allocation77_spill] sm:$0xff] %v10987_v57  ;;  %2776 = vmatpush.msrb.mxu3 %v10993_v51  ;;  %v11011_v57 = vld [vmem:[%s14463_s3 + $0x410] sm:$0xff] }
 0x400   :  { %15869 = vst [vmem:[#allocation86_spill] sm:$0xff] %v10993_v51  ;;  %2737 = vmatpush.msrb.mxu1 %v10999_v36  ;;  %v11017_v51 = vld [vmem:[%s14463_s3 + $0x418] sm:$0xff]  ;;  %v2295_v40 = vpop.f32.mrf.mxu2 }
 0x401   :  { %15870 = vst [vmem:[#allocation87_spill] sm:$0xff] %v10999_v36  ;;  %2777 = vmatpush.msrb.mxu3 %v11005_v46  ;;  %v2195_v36 = vpop.f32.mrf.mxu1 }
 0x402   :  { %15871 = vst [vmem:[#allocation80_spill] sm:$0xff] %v11005_v46  ;;  %2738 = vmatpush.msrb.mxu1 %v11011_v57  ;;  %v2255_v46 = vpop.f32.mrf.mxu0  ;;  %v2196_v59 = vadd.f32 %v2195_v36, %v2175_v47  ;;  %v2315_v54 = vpop.f32.mrf.mxu3 }
 0x403   :  { %15872 = vst [vmem:[#allocation81_spill] sm:$0xff] %v11011_v57  ;;  %2778 = vmatpush.msrb.mxu3 %v11017_v51  ;;  %v2316_v31 = vadd.f32 %v2315_v54, %v2295_v40  ;;  %v15883_v40 = vld [vmem:[#allocation74_spill] sm:$0xff] }
 0x404   :  { %15873 = vst [vmem:[#allocation92_spill] sm:$0xff] %v11017_v51  ;;  %v2478_v8 = vadd.f32 %v2196_v59, %v127_v32  ;;  %v15878_v51 = vld [vmem:[#allocation155_spill] sm:$0xff]  ;;  %v291_v32 = vadd.f32 %v15883_v40, %v15882_v0  ;;  %v15887_v0 = vld [vmem:[#allocation90_spill] sm:$0xff] }
 0x405   :  { %v250_v39 = vadd.f32 %v15879_v2, %v15878_v51 }
 0x406   :  { %v4590_v53 = vmul.f32 -1.442695, %v2478_v8 }
 0x407   :  { %v2481_v20 = vadd.f32 %v2316_v31, %v250_v39 }
 0x409   :  { %v2275_v44 = vpop.f32.mrf.mxu1 }
 0x40a   :  { %v2276_v52 = vadd.f32 %v2275_v44, %v2255_v46  ;;  %v15881_v44 = vld [vmem:[#allocation15_spill] sm:$0xff] }
 0x40b   :  { %v168_v46 = vadd.f32 %v15881_v44, %v15880_v43 }
 0x40c   :  { %v2480_v57 = vadd.f32 %v2276_v52, %v209_v12  ;;  %v2335_v12 = vpop.f32.mrf.mxu0  ;;  %v4593_v52 = vmul.f32 -1.442695, %v2481_v20  ;;  %v2375_v39 = vpop.f32.mrf.mxu2 }
 0x40d   :  { %v2479_v47 = vadd.f32 %v2236_v16, %v168_v46  ;;  %v15885_v16 = vld [vmem:[#allocation75_spill] sm:$0xff] }
 0x40e   :  { %v4592_v13 = vmul.f32 -1.442695, %v2480_v57 }
 0x40f   :  { %v4591_v54 = vmul.f32 -1.442695, %v2479_v47 }
 0x410   :  { %4718 = vpow2.f32 %v4592_v13  ;;  %v15884_v13 = vld [vmem:[#allocation158_spill] sm:$0xff] }
 0x411   :  { %4720 = vpow2.f32 %v4590_v53  ;;  %v332_v57 = vadd.f32 %v15885_v16, %v15884_v13 }
 0x412   :  { %v2355_v26 = vpop.f32.mrf.mxu1  ;;  %4722 = vpow2.f32 %v4593_v52 }
 0x413   :  { %v2356_v36 = vadd.f32 %v2355_v26, %v2335_v12  ;;  %4724 = vpow2.f32 %v4591_v54 }
 0x415   :  { %v2482_v2 = vadd.f32 %v2356_v36, %v291_v32 }
 0x416   :  { %v4719_v59 = vpop.eup %4718 }
 0x417   :  { %v4721_v23 = vpop.eup %4720  ;;  %v11030_v8 = vadd.f32 1.0, %v4719_v59  ;;  %v4594_v20 = vmul.f32 -1.442695, %v2482_v2 }
 0x418   :  { %v4723_v44 = vpop.eup %4722  ;;  %v2504_v53 = vadd.f32 1.0, %v4721_v23 }
 0x419   :  { %v2395_v10 = vpop.f32.mrf.mxu3  ;;  %4726 = vrcp.f32 %v11030_v8  ;;  %v4725_v26 = vpop.eup %4724  ;;  %v11035_v47 = vadd.f32 1.0, %v4723_v44  ;;  %v2551_v19 = vand.u32 2147483648, %v11030_v8  ;;  %vm2545_vm11 = vweird.f32 %v11030_v8 }
 0x41a   :  { %v2396_v31 = vadd.f32 %v2395_v10, %v2375_v39  ;;  %4728 = vpow2.f32 %v4594_v20  ;;  %v11037_v52 = vadd.f32 1.0, %v4725_v26  ;;  %v2521_v55 = vand.u32 2147483648, %v2504_v53 }
 0x41b   :  { %4730 = vrcp.f32 %v2504_v53  ;;  %vm2515_vm13 = vweird.f32 %v2504_v53  ;;  %vm2560_vm3 = vweird.f32 %v11035_v47 }
 0x41c   :  { %v2483_v46 = vadd.f32 %v2396_v31, %v332_v57  ;;  %4732 = vrcp.f32 %v11035_v47  ;;  %vm2530_vm0 = vweird.f32 %v11037_v52 }
 0x41e   :  { %v4595_v12 = vmul.f32 -1.442695, %v2483_v46 }
 0x41f   :  { %v11039_v36 = vpop.eup %4726 }
 0x420   :  { %v4729_v40 = vpop.eup %4728  ;;  %4734 = vpow2.f32 %v4595_v12  ;;  %v2541_v54 = vmul.f32 %v11039_v36, %v11030_v8  ;;  %vm2546_vm9 = vweird.f32 %v11039_v36 }
 0x421   :  { %v11042_v32 = vpop.eup %4730  ;;  %4736 = vrcp.f32 %v11037_v52  ;;  %v11047_v59 = vadd.f32 1.0, %v4729_v40  ;;  %vm11080_vm12 = vmor %vm2545_vm11, %vm2546_vm9 }
 0x422   :  { %v11049_v2 = vpop.eup %4732  ;;  %v2511_v10 = vmul.f32 %v11042_v32, %v2504_v53  ;;  %v2542_v31 = vsub.f32 1.0, %v2541_v54  ;;  %vm2516_vm10 = vweird.f32 %v11042_v32 }
 0x423   :  { %4738 = vrcp.f32 %v11047_v59  ;;  %v2556_v57 = vmul.f32 %v11049_v2, %v11035_v47  ;;  %vm11096_vm15 = vmor %vm2515_vm13, %vm2516_vm10  ;;  %vm2561_vm1 = vweird.f32 %v11049_v2  ;;  %vm2575_vm10 = vweird.f32 %v11047_v59 }
 0x424   :  { %v2512_v16 = vsub.f32 1.0, %v2511_v10  ;;  %v2543_v46 = vmul.f32 %v11039_v36, %v2542_v31  ;;  %v15886_v10 = vld [vmem:[#allocation159_spill] sm:$0xff]  ;;  %vm11113_vm5 = vmor %vm2560_vm3, %vm2561_vm1 }
 0x425   :  { %v2557_v12 = vsub.f32 1.0, %v2556_v57  ;;  %v373_v43 = vadd.f32 %v15887_v0, %v15886_v10 }
 0x426   :  { %v4735_v39 = vpop.eup %4734  ;;  %v2513_v13 = vmul.f32 %v11042_v32, %v2512_v16  ;;  %v2544_v31 = vadd.f32 %v11039_v36, %v2543_v46 }
 0x427   :  { %v11053_v23 = vpop.eup %4736  ;;  %v11057_v20 = vadd.f32 1.0, %v4735_v39  ;;  %v2519_v39 = vand.u32 2147483647, %v2504_v53  ;;  %v2558_v0 = vmul.f32 %v11049_v2, %v2557_v12  ;;  %v2522_v12 = vor.u32 1.1754944e-38, %v2521_v55 }
 0x428   :  { %v2526_v44 = vmul.f32 %v11053_v23, %v11037_v52  ;;  %v2514_v16 = vadd.f32 %v11042_v32, %v2513_v13  ;;  %vm2531_vm4 = vweird.f32 %v11053_v23 }
 0x429   :  { %v11062_v26 = vpop.eup %4738  ;;  %4740 = vrcp.f32 %v11057_v20  ;;  %vm11086_vm14 = vcmp.eq.f32.partialorder %v2519_v39, 8.507059e+37  ;;  %vm11128_vm6 = vmor %vm2530_vm0, %vm2531_vm4 }
 0x42a   :  { %v2527_v58 = vsub.f32 1.0, %v2526_v44  ;;  %v2571_v57 = vmul.f32 %v11062_v26, %v11047_v59  ;;  %v2549_v44 = vand.u32 2147483647, %v11030_v8  ;;  %v2548_v8 = vsel %vm11080_vm12, %v11039_v36, %v2544_v31 }
 0x42b   :  { %v2518_v55 = vsel %vm11096_vm15, %v11042_v32, %v2514_v16  ;;  %vm2576_vm8 = vweird.f32 %v11062_v26 }
 0x42c   :  { %v2572_v18 = vsub.f32 1.0, %v2571_v57  ;;  %vm2550_vm2 = vcmp.eq.f32.partialorder %v2549_v44, 8.507059e+37  ;;  %v2564_v57 = vand.u32 2147483647, %v11035_v47  ;;  %v2523_v16 = vsel %vm11086_vm14, %v2522_v12, %v2518_v55  ;;  %vm2577_vm11 = vmor %vm2575_vm10, %vm2576_vm8 }
 0x42d   :  { %v2579_v55 = vand.u32 2147483647, %v11047_v59  ;;  %vm2590_vm14 = vweird.f32 %v11057_v20 }
 0x42e   :  { %vm2565_vm7 = vcmp.eq.f32.partialorder %v2564_v57, 8.507059e+37 }
 0x42f   :  { %vm2580_vm12 = vcmp.eq.f32.partialorder %v2579_v55, 8.507059e+37  ;;  %v15938_v55 = vld [vmem:[#allocation217_spill] sm:$0xff] }
 0x439   :  { %v2415_v40 = vpop.f32.mrf.mxu0 }
 0x43f   :  { %v2435_v54 = vpop.f32.mrf.mxu1 }
 0x440   :  { %v2436_v51 = vadd.f32 %v2435_v54, %v2415_v40  ;;  %v15888_v40 = vld [vmem:[#allocation160_spill] sm:$0xff]  ;;  %v15889_v54 = vld [vmem:[#allocation91_spill] sm:$0xff]  ;;  %v2455_v13 = vpop.f32.mrf.mxu2 }
 0x441   :  { %v414_v10 = vadd.f32 %v15889_v54, %v15888_v40  ;;  %v2528_v54 = vmul.f32 %v11053_v23, %v2527_v58  ;;  %v2552_v40 = vor.u32 1.1754944e-38, %v2551_v19  ;;  %v2559_v58 = vadd.f32 %v11049_v2, %v2558_v0 }
 0x442   :  { %v2484_v25 = vadd.f32 %v2436_v51, %v373_v43  ;;  %v11084_v43 = vpop.eup %4740  ;;  %v2566_v19 = vand.u32 2147483648, %v11035_v47  ;;  %v2573_v0 = vmul.f32 %v11062_v26, %v2572_v18  ;;  %v15931_v18 = vld [vmem:[#allocation210_spill] sm:$0xff] }
 0x443   :  { %v2586_v36 = vmul.f32 %v11084_v43, %v11057_v20  ;;  %v2553_v39 = vsel %vm2550_vm2, %v2552_v40, %v2548_v8  ;;  %v2534_v8 = vand.u32 2147483647, %v11037_v52  ;;  %v2563_v47 = vsel %vm11113_vm5, %v11049_v2, %v2559_v58 }
 0x444   :  { %4742 = vtanh.f32 %v2484_v25  ;;  %v2602_v44 = vmul.f32 %v2553_v39, %v10016_v50  ;;  %v2574_v12 = vadd.f32 %v11062_v26, %v2573_v0  ;;  %vm2591_vm13 = vweird.f32 %v11084_v43 }
 0x445   :  { %vm2535_vm9 = vcmp.eq.f32.partialorder %v2534_v8, 8.507059e+37  ;;  %vm2592_vm15 = vmor %vm2590_vm14, %vm2591_vm13  ;;  %v15927_v8 = vld [vmem:[#allocation206_spill] sm:$0xff] }
 0x446   :  { %v2475_v61 = vpop.f32.mrf.mxu3  ;;  %v2578_v39 = vsel %vm2577_vm11, %v11062_v26, %v2574_v12  ;;  %v15933_v12 = vld [vmem:[#allocation212_spill] sm:$0xff] }
 0x447   :  { %v2476_v53 = vadd.f32 %v2475_v61, %v2455_v13  ;;  %v2529_v61 = vadd.f32 %v11053_v23, %v2528_v54  ;;  %v2567_v13 = vor.u32 1.1754944e-38, %v2566_v19  ;;  %v2587_v54 = vsub.f32 1.0, %v2586_v36 }
 0x449   :  { %v2485_v31 = vadd.f32 %v2476_v53, %v414_v10  ;;  %v2536_v10 = vand.u32 2147483648, %v11037_v52  ;;  %v2533_v50 = vsel %vm11128_vm6, %v11053_v23, %v2529_v61  ;;  %v2568_v25 = vsel %vm2565_vm7, %v2567_v13, %v2563_v47  ;;  %v15928_v47 = vld [vmem:[#allocation207_spill] sm:$0xff]  ;;  %v15929_v13 = vld [vmem:[#allocation208_spill] sm:$0xff] }
 0x44a   :  { %v4743_v46 = vpop.eup %4742  ;;  %v2581_v53 = vand.u32 2147483648, %v11047_v59  ;;  %v2588_v58 = vmul.f32 %v11084_v43, %v2587_v54  ;;  %v2603_v19 = vmul.f32 %v2568_v25, %v10030_v21  ;;  %v2596_v59 = vand.u32 2147483648, %v11057_v20  ;;  %v15930_v54 = vld [vmem:[#allocation209_spill] sm:$0xff]  ;;  %v15935_v25 = vld [vmem:[#allocation214_spill] sm:$0xff] }
 0x44b   :  { %4744 = vtanh.f32 %v2485_v31  ;;  %v2604_v40 = vmul.f32 %v4743_v46, %v2523_v16  ;;  %v2537_v2 = vor.u32 1.1754944e-38, %v2536_v10  ;;  %v2594_v21 = vand.u32 2147483647, %v11057_v20 }
 0x44c   :  { %v2582_v31 = vor.u32 1.1754944e-38, %v2581_v53  ;;  %v2589_v57 = vadd.f32 %v11084_v43, %v2588_v58  ;;  %v2597_v16 = vor.u32 1.1754944e-38, %v2596_v59  ;;  %v15936_v53 = vld [vmem:[#allocation215_spill] sm:$0xff]  ;;  %v15939_v58 = vld [vmem:[#allocation218_spill] sm:$0xff] }
 0x44d   :  { %v11132_v51 = vadd.f32 %v2604_v40, %v2602_v44  ;;  %v2538_v23 = vsel %vm2535_vm9, %v2537_v2, %v2533_v50  ;;  %vm2595_vm0 = vcmp.eq.f32.partialorder %v2594_v21, 8.507059e+37  ;;  %v15926_v40 = vld [vmem:[#allocation205_spill] sm:$0xff]  ;;  %v15932_v50 = vld [vmem:[#allocation211_spill] sm:$0xff]  ;;  %v15949_v21 = vld [vmem:[#allocation228_spill] sm:$0xff] }
 0x44e   :  { %v2583_v32 = vsel %vm2580_vm12, %v2582_v31, %v2578_v39  ;;  %v2593_v26 = vsel %vm2592_vm15, %v11084_v43, %v2589_v57  ;;  %v15925_v43 = vld [vmem:[#allocation204_spill] sm:$0xff]  ;;  %v15934_v2 = vld [vmem:[#allocation213_spill] sm:$0xff]  ;;  %v15943_v39 = vld [vmem:[#allocation222_spill] sm:$0xff] }
 0x44f   :  { %4746 = vtanh.f32 %v11132_v51  ;;  %v2598_v44 = vsel %vm2595_vm0, %v2597_v16, %v2593_v26  ;;  %v15944_v31 = vld [vmem:[#allocation223_spill] sm:$0xff]  ;;  %v15945_v57 = vld [vmem:[#allocation224_spill] sm:$0xff]  ;;  %v15950_v26 = vld [vmem:[#allocation229_spill] sm:$0xff] }
 0x450   :  { %v15948_v59 = vld [vmem:[#allocation227_spill] sm:$0xff]  ;;  %v15951_v16 = vld [vmem:[#allocation230_spill] sm:$0xff] }
 0x451   :  { %v4745_v52 = vpop.eup %4744 }
 0x452   :  { %v2605_v36 = vmul.f32 %v4745_v52, %v2538_v23  ;;  %v15937_v52 = vld [vmem:[#allocation216_spill] sm:$0xff]  ;;  %v15940_v23 = vld [vmem:[#allocation219_spill] sm:$0xff] }
 0x454   :  { %v11146_v61 = vadd.f32 %v2605_v36, %v2603_v19  ;;  %v15941_v19 = vld [vmem:[#allocation220_spill] sm:$0xff]  ;;  %v15942_v36 = vld [vmem:[#allocation221_spill] sm:$0xff] }
 0x455   :  { %v4747_v46 = vpop.eup %4746 }
 0x456   :  { %4748 = vtanh.f32 %v11146_v61  ;;  %v11154_v0 = vmul.f32 %v4747_v46, %v2583_v32  ;;  %v15946_v46 = vld [vmem:[#allocation225_spill] sm:$0xff]  ;;  %v15947_v32 = vld [vmem:[#allocation226_spill] sm:$0xff] }
 0x458   :  { %2639 = vmatmul.f32.vlgmr.msra.gmra.mxu0 %v11154_v0  ;;  %2679 = vmatmul.f32.vlgmr.msra.gmra.mxu2 %v11154_v0 }
 0x459   :  { %2783 = vmatpush.msra.mxu0 %v10046_v7  ;;  %2823 = vmatpush.msra.mxu2 %v10052_v48  ;;  %v15900_v7 = vld [vmem:[#allocation179_spill] sm:$0xff]  ;;  %v15901_v48 = vld [vmem:[#allocation180_spill] sm:$0xff] }
 0x45b   :  { %2784 = vmatpush.msra.mxu0 %v10058_v33  ;;  %2824 = vmatpush.msra.mxu2 %v10064_v60  ;;  %v15902_v33 = vld [vmem:[#allocation181_spill] sm:$0xff]  ;;  %v15903_v60 = vld [vmem:[#allocation182_spill] sm:$0xff] }
 0x45c   :  { %v4749_v10 = vpop.eup %4748 }
 0x45d   :  { %v11163_v20 = vmul.f32 %v4749_v10, %v2598_v44  ;;  %2785 = vmatpush.msra.mxu0 %v10072_v30  ;;  %2825 = vmatpush.msra.mxu2 %v10078_v9  ;;  %v15904_v30 = vld [vmem:[#allocation183_spill] sm:$0xff]  ;;  %v15905_v9 = vld [vmem:[#allocation184_spill] sm:$0xff] }
 0x45e   :  { %v15952_v10 = vld [vmem:[#allocation231_spill] sm:$0xff]  ;;  %v15953_v44 = vld [vmem:[#allocation232_spill] sm:$0xff] }
 0x45f   :  { %2659 = vmatmul.f32.vlgmr.msra.gmra.mxu1 %v11163_v20  ;;  %2699 = vmatmul.f32.vlgmr.msra.gmra.mxu3 %v11163_v20 }
 0x460   :  { %2786 = vmatpush.msra.mxu0 %v10086_v49  ;;  %2803 = vmatpush.msra.mxu1 %v10092_v35  ;;  %v15906_v49 = vld [vmem:[#allocation185_spill] sm:$0xff]  ;;  %v15907_v35 = vld [vmem:[#allocation186_spill] sm:$0xff] }
 0x461   :  { %2826 = vmatpush.msra.mxu2 %v10098_v1  ;;  %2843 = vmatpush.msra.mxu3 %v10104_v62  ;;  %v15908_v1 = vld [vmem:[#allocation187_spill] sm:$0xff]  ;;  %v15909_v62 = vld [vmem:[#allocation188_spill] sm:$0xff] }
 0x462   :  { %2719 = vmatmul.f32.vlgmr.msrb.gmra.mxu0 %v11154_v0  ;;  %2759 = vmatmul.f32.vlgmr.msrb.gmra.mxu2 %v11154_v0 }
 0x463   :  { %2787 = vmatpush.msra.mxu0 %v10112_v42  ;;  %2804 = vmatpush.msra.mxu1 %v10118_v11  ;;  %v15910_v42 = vld [vmem:[#allocation189_spill] sm:$0xff]  ;;  %v15911_v11 = vld [vmem:[#allocation190_spill] sm:$0xff] }
 0x464   :  { %2827 = vmatpush.msra.mxu2 %v10124_v17  ;;  %2844 = vmatpush.msra.mxu3 %v10130_v14  ;;  %v15912_v17 = vld [vmem:[#allocation191_spill] sm:$0xff]  ;;  %v15913_v14 = vld [vmem:[#allocation192_spill] sm:$0xff] }
 0x465   :  { %2788 = vmatpush.msra.mxu0 %v10136_v63  ;;  %2805 = vmatpush.msra.mxu1 %v10142_v56  ;;  %v15914_v63 = vld [vmem:[#allocation193_spill] sm:$0xff]  ;;  %v15915_v56 = vld [vmem:[#allocation194_spill] sm:$0xff] }
 0x466   :  { %2828 = vmatpush.msra.mxu2 %v10148_v38  ;;  %2845 = vmatpush.msra.mxu3 %v10154_v28  ;;  %v15916_v38 = vld [vmem:[#allocation195_spill] sm:$0xff]  ;;  %v15917_v28 = vld [vmem:[#allocation196_spill] sm:$0xff] }
 0x467   :  { %2789 = vmatpush.msra.mxu0 %v10160_v29  ;;  %2806 = vmatpush.msra.mxu1 %v10166_v45  ;;  %v15918_v29 = vld [vmem:[#allocation197_spill] sm:$0xff]  ;;  %v15919_v45 = vld [vmem:[#allocation198_spill] sm:$0xff] }
 0x468   :  { %2829 = vmatpush.msra.mxu2 %v10172_v37  ;;  %2846 = vmatpush.msra.mxu3 %v10178_v3  ;;  %v15920_v37 = vld [vmem:[#allocation199_spill] sm:$0xff]  ;;  %v15921_v3 = vld [vmem:[#allocation200_spill] sm:$0xff] }
 0x469   :  { %2739 = vmatmul.f32.vlgmr.msrb.gmra.mxu1 %v11163_v20  ;;  %2779 = vmatmul.f32.vlgmr.msrb.gmra.mxu3 %v11163_v20 }
 0x46a   :  { %2790 = vmatpush.msra.mxu0 %v10186_v22  ;;  %2807 = vmatpush.msra.mxu1 %v10192_v15  ;;  %v15922_v22 = vld [vmem:[#allocation201_spill] sm:$0xff]  ;;  %v15923_v15 = vld [vmem:[#allocation202_spill] sm:$0xff] }
 0x46b   :  { %2830 = vmatpush.msra.mxu2 %v10198_v4  ;;  %2847 = vmatpush.msra.mxu3 %v15900_v7  ;;  %v15924_v4 = vld [vmem:[#allocation203_spill] sm:$0xff]  ;;  %v15954_v7 = vld [vmem:[#allocation233_spill] sm:$0xff] }
 0x46c   :  { %2791 = vmatpush.msra.mxu0 %v15901_v48  ;;  %2808 = vmatpush.msra.mxu1 %v15902_v33  ;;  %v15955_v48 = vld [vmem:[#allocation234_spill] sm:$0xff]  ;;  %v15956_v33 = vld [vmem:[#allocation235_spill] sm:$0xff] }
 0x46d   :  { %2831 = vmatpush.msra.mxu2 %v15903_v60  ;;  %2848 = vmatpush.msra.mxu3 %v15904_v30  ;;  %v15957_v60 = vld [vmem:[#allocation236_spill] sm:$0xff]  ;;  %v15958_v30 = vld [vmem:[#allocation237_spill] sm:$0xff] }
 0x46e   :  { %2792 = vmatpush.msra.mxu0 %v15905_v9  ;;  %2809 = vmatpush.msra.mxu1 %v15906_v49  ;;  %v15959_v9 = vld [vmem:[#allocation40_spill] sm:$0xff]  ;;  %v15960_v49 = vld [vmem:[#allocation34_spill] sm:$0xff] }
 0x46f   :  { %2832 = vmatpush.msra.mxu2 %v15907_v35  ;;  %2849 = vmatpush.msra.mxu3 %v15908_v1  ;;  %v15961_v35 = vld [vmem:[#allocation35_spill] sm:$0xff] }
 0x470   :  { %2793 = vmatpush.msra.mxu0 %v15909_v62  ;;  %2810 = vmatpush.msra.mxu1 %v15910_v42  ;;  %v15962_v1 = vld [vmem:[#allocation43_spill] sm:$0xff]  ;;  %v15963_v62 = vld [vmem:[#allocation44_spill] sm:$0xff] }
 0x471   :  { %2833 = vmatpush.msra.mxu2 %v15911_v11  ;;  %2850 = vmatpush.msra.mxu3 %v15912_v17  ;;  %v15964_v42 = vld [vmem:[#allocation36_spill] sm:$0xff]  ;;  %v15965_v11 = vld [vmem:[#allocation37_spill] sm:$0xff] }
 0x472   :  { %2794 = vmatpush.msra.mxu0 %v15913_v14  ;;  %2811 = vmatpush.msra.mxu1 %v15914_v63  ;;  %v15966_v17 = vld [vmem:[#allocation49_spill] sm:$0xff]  ;;  %v15968_v63 = vld [vmem:[#allocation42_spill] sm:$0xff] }
 0x473   :  { %2834 = vmatpush.msra.mxu2 %v15915_v56  ;;  %2851 = vmatpush.msra.mxu3 %v15916_v38  ;;  %v15967_v14 = vld [vmem:[#allocation41_spill] sm:$0xff]  ;;  %v11277_v38 = vld [vmem:[%s14463_s3 + $0x170] sm:$0xff] }
 0x474   :  { %2795 = vmatpush.msra.mxu0 %v15917_v28  ;;  %2812 = vmatpush.msra.mxu1 %v15918_v29  ;;  %v11270_v56 = vld [vmem:[%s14463_s3 + $0x1b8] sm:$0xff]  ;;  %v15970_v28 = vld [vmem:[#allocation55_spill] sm:$0xff] }
 0x475   :  { %2835 = vmatpush.msra.mxu2 %v15919_v45  ;;  %2852 = vmatpush.msra.mxu3 %v15920_v37  ;;  %v15971_v29 = vld [vmem:[#allocation45_spill] sm:$0xff]  ;;  %v11319_v45 = vld [vmem:[%s14463_s3 + $0xb0] sm:$0xff]  ;;  %v15972_v37 = vld [vmem:[#allocation46_spill] sm:$0xff] }
 0x476   :  { %2796 = vmatpush.msra.mxu0 %v15921_v3  ;;  %2813 = vmatpush.msra.mxu1 %v15922_v22  ;;  %v11326_v3 = vld [vmem:[%s14463_s3 + $0xb8] sm:$0xff]  ;;  %v15973_v22 = vld [vmem:[#allocation58_spill] sm:$0xff] }
 0x477   :  { %2836 = vmatpush.msra.mxu2 %v15923_v15  ;;  %2853 = vmatpush.msra.mxu3 %v15924_v4  ;;  %v11333_v15 = vld [vmem:[%s14463_s3 + $0x70] sm:$0xff] }
 0x478   :  { %2797 = vmatpush.msra.mxu0 %v15925_v43  ;;  %2814 = vmatpush.msra.mxu1 %v15926_v40  ;;  %v15974_v4 = vld [vmem:[#allocation59_spill] sm:$0xff]  ;;  %v11340_v43 = vld [vmem:[%s14463_s3 + $0x78] sm:$0xff] }
 0x479   :  { %2837 = vmatpush.msra.mxu2 %v15927_v8  ;;  %2854 = vmatpush.msra.mxu3 %v15928_v47  ;;  %v15975_v40 = vld [vmem:[#allocation52_spill] sm:$0xff]  ;;  %v15976_v47 = vld [vmem:[#allocation53_spill] sm:$0xff] }
 0x47a   :  { %2798 = vmatpush.msra.mxu0 %v15929_v13  ;;  %2815 = vmatpush.msra.mxu1 %v15930_v54  ;;  %v11347_v8 = vld [vmem:[%s14463_s3 + $0x30] sm:$0xff]  ;;  %v11354_v13 = vld [vmem:[%s14463_s3 + $0x38] sm:$0xff] }
 0x47b   :  { %2838 = vmatpush.msra.mxu2 %v15931_v18  ;;  %2855 = vmatpush.msra.mxu3 %v15932_v50  ;;  %v11360_v54 = vld [vmem:[%s14463_s3 + $0x4f8] sm:$0xff]  ;;  %v11368_v18 = vld [vmem:[%s14463_s3 + $0x4b0] sm:$0xff] }
 0x47c   :  { %2799 = vmatmul.f32.vlgmr.msra.gmra.mxu0 %v11154_v0  ;;  %2839 = vmatmul.f32.vlgmr.msra.gmra.mxu2 %v11154_v0  ;;  %v11374_v50 = vld [vmem:[%s14463_s3 + $0x4b8] sm:$0xff] }
 0x47d   :  { %2863 = vmatpush.msrb.mxu0 %v15933_v12  ;;  %2903 = vmatpush.msrb.mxu2 %v15934_v2  ;;  %v11380_v12 = vld [vmem:[%s14463_s3 + $0x3c0] sm:$0xff]  ;;  %v11392_v2 = vld [vmem:[%s14463_s3 + $0x470] sm:$0xff] }
 0x47e   :  { %2816 = vmatpush.msra.mxu1 %v15935_v25  ;;  %2856 = vmatpush.msra.mxu3 %v15936_v53  ;;  %v11398_v25 = vld [vmem:[%s14463_s3 + $0x478] sm:$0xff]  ;;  %v11404_v53 = vld [vmem:[%s14463_s3 + $0x380] sm:$0xff] }
 0x47f   :  { %2864 = vmatpush.msrb.mxu0 %v15937_v52  ;;  %2904 = vmatpush.msrb.mxu2 %v15938_v55  ;;  %v11410_v52 = vld [vmem:[%s14463_s3 + $0x388] sm:$0xff]  ;;  %v11416_v55 = vld [vmem:[%s14463_s3 + $0x430] sm:$0xff] }
 0x480   :  { %2817 = vmatpush.msra.mxu1 %v15939_v58  ;;  %2857 = vmatpush.msra.mxu3 %v15940_v23  ;;  %v11422_v58 = vld [vmem:[%s14463_s3 + $0x438] sm:$0xff]  ;;  %v11430_v23 = vld [vmem:[%s14463_s3 + $0x340] sm:$0xff] }
 0x481   :  { %2865 = vmatpush.msrb.mxu0 %v15941_v19  ;;  %2905 = vmatpush.msrb.mxu2 %v15942_v36  ;;  %v11436_v19 = vld [vmem:[%s14463_s3 + $0x348] sm:$0xff]  ;;  %v11442_v36 = vld [vmem:[%s14463_s3 + $0x7c0] sm:$0xff] }
 0x482   :  { %2818 = vmatpush.msra.mxu1 %v15943_v39  ;;  %2858 = vmatpush.msra.mxu3 %v15944_v31  ;;  %v11454_v39 = vld [vmem:[%s14463_s3 + $0x300] sm:$0xff]  ;;  %v11460_v31 = vld [vmem:[%s14463_s3 + $0x308] sm:$0xff] }
 0x483   :  { %2819 = vmatmul.f32.vlgmr.msra.gmra.mxu1 %v11163_v20  ;;  %2859 = vmatmul.f32.vlgmr.msra.gmra.mxu3 %v11163_v20 }
 0x484   :  { %2866 = vmatpush.msrb.mxu0 %v15945_v57  ;;  %2883 = vmatpush.msrb.mxu1 %v15946_v46  ;;  %v11466_v57 = vld [vmem:[%s14463_s3 + $0x780] sm:$0xff]  ;;  %v11472_v46 = vld [vmem:[%s14463_s3 + $0x788] sm:$0xff] }
 0x485   :  { %2906 = vmatpush.msrb.mxu2 %v15947_v32  ;;  %2923 = vmatpush.msrb.mxu3 %v15948_v59  ;;  %15977 = vst [vmem:[#allocation93_spill] sm:$0xff] %v11472_v46  ;;  %v11478_v32 = vld [vmem:[%s14463_s3 + $0x2c0] sm:$0xff]  ;;  %v11484_v59 = vld [vmem:[%s14463_s3 + $0x2c8] sm:$0xff] }
 0x486   :  { %2867 = vmatpush.msrb.mxu0 %v15949_v21  ;;  %2884 = vmatpush.msrb.mxu1 %v15950_v26  ;;  %15978 = vst [vmem:[#allocation84_spill] sm:$0xff] %v11478_v32  ;;  %v11490_v21 = vld [vmem:[%s14463_s3 + $0x740] sm:$0xff]  ;;  %v11496_v26 = vld [vmem:[%s14463_s3 + $0x748] sm:$0xff] }
 0x487   :  { %2907 = vmatpush.msrb.mxu2 %v15951_v16  ;;  %2924 = vmatpush.msrb.mxu3 %v15952_v10  ;;  %15979 = vst [vmem:[#allocation85_spill] sm:$0xff] %v11484_v59  ;;  %v11502_v16 = vld [vmem:[%s14463_s3 + $0x280] sm:$0xff]  ;;  %v11508_v10 = vld [vmem:[%s14463_s3 + $0x288] sm:$0xff] }
 0x488   :  { %2868 = vmatpush.msrb.mxu0 %v15953_v44  ;;  %2885 = vmatpush.msrb.mxu1 %v15954_v7  ;;  %15980 = vst [vmem:[#allocation96_spill] sm:$0xff] %v11490_v21  ;;  %v11514_v44 = vld [vmem:[%s14463_s3 + $0x700] sm:$0xff]  ;;  %v11520_v7 = vld [vmem:[%s14463_s3 + $0x708] sm:$0xff] }
 0x489   :  { %2908 = vmatpush.msrb.mxu2 %v15955_v48  ;;  %2925 = vmatpush.msrb.mxu3 %v15956_v33  ;;  %15981 = vst [vmem:[#allocation97_spill] sm:$0xff] %v11496_v26  ;;  %v11526_v48 = vld [vmem:[%s14463_s3 + $0x240] sm:$0xff]  ;;  %v11532_v33 = vld [vmem:[%s14463_s3 + $0x248] sm:$0xff] }
 0x48a   :  { %2869 = vmatpush.msrb.mxu0 %v15957_v60  ;;  %2886 = vmatpush.msrb.mxu1 %v15958_v30  ;;  %15982 = vst [vmem:[#allocation88_spill] sm:$0xff] %v11502_v16  ;;  %v11538_v60 = vld [vmem:[%s14463_s3 + $0x6c0] sm:$0xff]  ;;  %v11544_v30 = vld [vmem:[%s14463_s3 + $0x6c8] sm:$0xff] }
 0x48b   :  { %2909 = vmatpush.msrb.mxu2 %v15959_v9  ;;  %2926 = vmatpush.msrb.mxu3 %v15960_v49  ;;  %15983 = vst [vmem:[#allocation89_spill] sm:$0xff] %v11508_v10  ;;  %v11550_v9 = vld [vmem:[%s14463_s3 + $0x200] sm:$0xff]  ;;  %v11556_v49 = vld [vmem:[%s14463_s3 + $0x208] sm:$0xff] }
 0x48c   :  { %2870 = vmatpush.msrb.mxu0 %v15961_v35  ;;  %2887 = vmatpush.msrb.mxu1 %v15962_v1  ;;  %15984 = vst [vmem:[#allocation102_spill] sm:$0xff] %v11514_v44  ;;  %v11562_v35 = vld [vmem:[%s14463_s3 + $0x680] sm:$0xff]  ;;  %v11568_v1 = vld [vmem:[%s14463_s3 + $0x688] sm:$0xff] }
 0x48d   :  { %2910 = vmatpush.msrb.mxu2 %v15963_v62  ;;  %2927 = vmatpush.msrb.mxu3 %v15964_v42  ;;  %15985 = vst [vmem:[#allocation103_spill] sm:$0xff] %v11520_v7  ;;  %v11574_v62 = vld [vmem:[%s14463_s3 + $0x1c0] sm:$0xff]  ;;  %v11580_v42 = vld [vmem:[%s14463_s3 + $0x1c8] sm:$0xff] }
 0x48e   :  { %2871 = vmatpush.msrb.mxu0 %v15965_v11  ;;  %2888 = vmatpush.msrb.mxu1 %v15966_v17  ;;  %15986 = vst [vmem:[#allocation94_spill] sm:$0xff] %v11526_v48  ;;  %v11586_v11 = vld [vmem:[%s14463_s3 + $0x640] sm:$0xff]  ;;  %v11592_v17 = vld [vmem:[%s14463_s3 + $0x648] sm:$0xff] }
 0x48f   :  { %2911 = vmatpush.msrb.mxu2 %v10610_v27  ;;  %2928 = vmatpush.msrb.mxu3 %v15967_v14  ;;  %v11291_v27 = vld [vmem:[%s14463_s3 + $0x130] sm:$0xff]  ;;  %15987 = vst [vmem:[#allocation95_spill] sm:$0xff] %v11532_v33  ;;  %v11598_v14 = vld [vmem:[%s14463_s3 + $0x180] sm:$0xff] }
 0x490   :  { %2872 = vmatpush.msrb.mxu0 %v15968_v63  ;;  %2889 = vmatpush.msrb.mxu1 %v10628_v41  ;;  %v11284_v41 = vld [vmem:[%s14463_s3 + $0x178] sm:$0xff]  ;;  %15988 = vst [vmem:[#allocation106_spill] sm:$0xff] %v11538_v60  ;;  %v11604_v63 = vld [vmem:[%s14463_s3 + $0x188] sm:$0xff] }
 0x491   :  { %2912 = vmatpush.msrb.mxu2 %v11270_v56  ;;  %2929 = vmatpush.msrb.mxu3 %v10635_v24  ;;  %v11298_v24 = vld [vmem:[%s14463_s3 + $0x138] sm:$0xff]  ;;  %15989 = vst [vmem:[#allocation107_spill] sm:$0xff] %v11544_v30 }
 0x492   :  { %2873 = vmatpush.msrb.mxu0 %v11277_v38  ;;  %2890 = vmatpush.msrb.mxu1 %v10642_v6  ;;  %v15969_v6 = vld [vmem:[#allocation54_spill] sm:$0xff]  ;;  %15990 = vst [vmem:[#allocation100_spill] sm:$0xff] %v11550_v9 }
 0x493   :  { %2913 = vmatpush.msrb.mxu2 %v11284_v41  ;;  %2930 = vmatpush.msrb.mxu3 %v10649_v34  ;;  %v11305_v34 = vld [vmem:[%s14463_s3 + $0xf0] sm:$0xff]  ;;  %15991 = vst [vmem:[#allocation101_spill] sm:$0xff] %v11556_v49 }
 0x494   :  { %2874 = vmatpush.msrb.mxu0 %v11291_v27  ;;  %2891 = vmatpush.msrb.mxu1 %v10656_v5  ;;  %v11312_v5 = vld [vmem:[%s14463_s3 + $0xf8] sm:$0xff]  ;;  %15992 = vst [vmem:[#allocation110_spill] sm:$0xff] %v11562_v35 }
 0x495   :  { %2914 = vmatpush.msrb.mxu2 %v11298_v24  ;;  %2931 = vmatpush.msrb.mxu3 %v15969_v6  ;;  %15993 = vst [vmem:[#allocation111_spill] sm:$0xff] %v11568_v1  ;;  %v11610_v6 = vld [vmem:[%s14463_s3 + $0x600] sm:$0xff] }
 0x496   :  { %2875 = vmatpush.msrb.mxu0 %v11305_v34  ;;  %2892 = vmatpush.msrb.mxu1 %v15970_v28  ;;  %15994 = vst [vmem:[#allocation112_spill] sm:$0xff] %v11574_v62  ;;  %v11616_v28 = vld [vmem:[%s14463_s3 + $0x608] sm:$0xff] }
 0x497   :  { %2915 = vmatpush.msrb.mxu2 %v11312_v5  ;;  %2932 = vmatpush.msrb.mxu3 %v15971_v29  ;;  %15995 = vst [vmem:[#allocation113_spill] sm:$0xff] %v11580_v42  ;;  %v11622_v29 = vld [vmem:[%s14463_s3 + $0x140] sm:$0xff] }
 0x498   :  { %2876 = vmatpush.msrb.mxu0 %v11319_v45  ;;  %2893 = vmatpush.msrb.mxu1 %v15972_v37  ;;  %15996 = vst [vmem:[#allocation104_spill] sm:$0xff] %v11586_v11  ;;  %v11628_v37 = vld [vmem:[%s14463_s3 + $0x148] sm:$0xff] }
 0x499   :  { %2916 = vmatpush.msrb.mxu2 %v11326_v3  ;;  %2933 = vmatpush.msrb.mxu3 %v15973_v22  ;;  %15997 = vst [vmem:[#allocation105_spill] sm:$0xff] %v11592_v17  ;;  %v11634_v22 = vld [vmem:[%s14463_s3 + $0x5c0] sm:$0xff] }
 0x49a   :  { %2877 = vmatpush.msrb.mxu0 %v11333_v15  ;;  %2894 = vmatpush.msrb.mxu1 %v15974_v4  ;;  %15998 = vst [vmem:[#allocation118_spill] sm:$0xff] %v11598_v14  ;;  %v11640_v4 = vld [vmem:[%s14463_s3 + $0x5c8] sm:$0xff] }
 0x49b   :  { %2917 = vmatpush.msrb.mxu2 %v11340_v43  ;;  %2934 = vmatpush.msrb.mxu3 %v15975_v40  ;;  %15999 = vst [vmem:[#allocation119_spill] sm:$0xff] %v11604_v63  ;;  %v11646_v40 = vld [vmem:[%s14463_s3 + $0x100] sm:$0xff] }
 0x49c   :  { %2878 = vmatpush.msrb.mxu0 %v11347_v8  ;;  %2895 = vmatpush.msrb.mxu1 %v15976_v47  ;;  %16000 = vst [vmem:[#allocation108_spill] sm:$0xff] %v11610_v6  ;;  %v11652_v47 = vld [vmem:[%s14463_s3 + $0x108] sm:$0xff] }
 0x49d   :  { %2918 = vmatpush.msrb.mxu2 %v11354_v13  ;;  %2935 = vmatpush.msrb.mxu3 %v11360_v54  ;;  %16001 = vst [vmem:[#allocation109_spill] sm:$0xff] %v11616_v28 }
 0x49e   :  { %2879 = vmatmul.f32.vlgmr.msrb.gmra.mxu0 %v11154_v0  ;;  %2919 = vmatmul.f32.vlgmr.msrb.gmra.mxu2 %v11154_v0  ;;  %v11386_v0 = vld [vmem:[%s14463_s3 + $0x3c8] sm:$0xff]  ;;  %16002 = vst [vmem:[#allocation124_spill] sm:$0xff] %v11622_v29 }
 0x49f   :  { %2896 = vmatpush.msrb.mxu1 %v11368_v18  ;;  %2936 = vmatpush.msrb.mxu3 %v11374_v50  ;;  %16003 = vst [vmem:[#allocation125_spill] sm:$0xff] %v11628_v37 }
 0x4a0   :  { %3088 = vmatpush.msra.mxu0 %v11380_v12  ;;  %3128 = vmatpush.msra.mxu2 %v11386_v0  ;;  %16004 = vst [vmem:[#allocation116_spill] sm:$0xff] %v11634_v22 }
 0x4a1   :  { %2897 = vmatpush.msrb.mxu1 %v11392_v2  ;;  %2937 = vmatpush.msrb.mxu3 %v11398_v25  ;;  %16005 = vst [vmem:[#allocation117_spill] sm:$0xff] %v11640_v4 }
 0x4a2   :  { %3089 = vmatpush.msra.mxu0 %v11404_v53  ;;  %3129 = vmatpush.msra.mxu2 %v11410_v52  ;;  %16006 = vst [vmem:[#allocation128_spill] sm:$0xff] %v11646_v40 }
 0x4a3   :  { %2898 = vmatpush.msrb.mxu1 %v11416_v55  ;;  %2938 = vmatpush.msrb.mxu3 %v11422_v58  ;;  %16007 = vst [vmem:[#allocation120_spill] sm:$0xff] %v11652_v47 }
 0x4a4   :  { %2899 = vmatmul.f32.vlgmr.msrb.gmra.mxu1 %v11163_v20  ;;  %2939 = vmatmul.f32.vlgmr.msrb.gmra.mxu3 %v11163_v20  ;;  %v11448_v20 = vld [vmem:[%s14463_s3 + $0x7c8] sm:$0xff] }
 0x4a5   :  { %3090 = vmatpush.msra.mxu0 %v11430_v23  ;;  %3130 = vmatpush.msra.mxu2 %v11436_v19 }
 0x4a6   :  { %3108 = vmatpush.msra.mxu1 %v11442_v36  ;;  %3148 = vmatpush.msra.mxu3 %v11448_v20 }
 0x4a7   :  { %3091 = vmatpush.msra.mxu0 %v11454_v39  ;;  %3131 = vmatpush.msra.mxu2 %v11460_v31 }
 0x4a8   :  { %3109 = vmatpush.msra.mxu1 %v11466_v57  ;;  %3149 = vmatpush.msra.mxu3 %v11472_v46 }
 0x4a9   :  { %3092 = vmatpush.msra.mxu0 %v11478_v32  ;;  %3132 = vmatpush.msra.mxu2 %v11484_v59 }
 0x4aa   :  { %3110 = vmatpush.msra.mxu1 %v11490_v21  ;;  %3150 = vmatpush.msra.mxu3 %v11496_v26 }
 0x4ab   :  { %3093 = vmatpush.msra.mxu0 %v11502_v16  ;;  %3133 = vmatpush.msra.mxu2 %v11508_v10  ;;  %v16100_v16 = vld [vmem:[#allocation156_spill] sm:$0xff] }
 0x4ac   :  { %3111 = vmatpush.msra.mxu1 %v11514_v44  ;;  %3151 = vmatpush.msra.mxu3 %v11520_v7 }
 0x4ad   :  { %3094 = vmatpush.msra.mxu0 %v11526_v48  ;;  %3134 = vmatpush.msra.mxu2 %v11532_v33  ;;  %v16099_v33 = vld [vmem:[#allocation21_spill] sm:$0xff] }
 0x4ae   :  { %3112 = vmatpush.msra.mxu1 %v11538_v60  ;;  %3152 = vmatpush.msra.mxu3 %v11544_v30 }
 0x4af   :  { %3095 = vmatpush.msra.mxu0 %v11550_v9  ;;  %3135 = vmatpush.msra.mxu2 %v11556_v49  ;;  %v16097_v9 = vld [vmem:[#allocation18_spill] sm:$0xff] }
 0x4b0   :  { %3113 = vmatpush.msra.mxu1 %v11562_v35  ;;  %3153 = vmatpush.msra.mxu3 %v11568_v1  ;;  %v16095_v1 = vld [vmem:[#allocation20_spill] sm:$0xff] }
 0x4b1   :  { %3096 = vmatpush.msra.mxu0 %v11574_v62  ;;  %3136 = vmatpush.msra.mxu2 %v11580_v42 }
 0x4b2   :  { %3114 = vmatpush.msra.mxu1 %v11586_v11  ;;  %3154 = vmatpush.msra.mxu3 %v11592_v17  ;;  %v16077_v17 = vld [vmem:[#allocation10_spill] sm:$0xff] }
 0x4b3   :  { %3097 = vmatpush.msra.mxu0 %v11598_v14  ;;  %3137 = vmatpush.msra.mxu2 %v11604_v63  ;;  %v16075_v63 = vld [vmem:[#allocation70_spill] sm:$0xff]  ;;  %v16076_v14 = vld [vmem:[#allocation12_spill] sm:$0xff] }
 0x4b4   :  { %3115 = vmatpush.msra.mxu1 %v11610_v6  ;;  %3155 = vmatpush.msra.mxu3 %v11616_v28  ;;  %v16071_v28 = vld [vmem:[#allocation64_spill] sm:$0xff]  ;;  %v16072_v6 = vld [vmem:[#allocation65_spill] sm:$0xff] }
 0x4b5   :  { %3098 = vmatpush.msra.mxu0 %v11622_v29  ;;  %3138 = vmatpush.msra.mxu2 %v11628_v37  ;;  %v16056_v37 = vld [vmem:[#allocation63_spill] sm:$0xff]  ;;  %v16058_v29 = vld [vmem:[#allocation56_spill] sm:$0xff] }
 0x4b6   :  { %3116 = vmatpush.msra.mxu1 %v11634_v22  ;;  %3156 = vmatpush.msra.mxu3 %v11640_v4  ;;  %v11658_v22 = vld [vmem:[%s14463_s3 + $0x580] sm:$0xff]  ;;  %v11664_v4 = vld [vmem:[%s14463_s3 + $0x588] sm:$0xff] }
 0x4b7   :  { %3099 = vmatpush.msra.mxu0 %v11646_v40  ;;  %3139 = vmatpush.msra.mxu2 %v11652_v47  ;;  %16008 = vst [vmem:[#allocation129_spill] sm:$0xff] %v11658_v22  ;;  %v11670_v40 = vld [vmem:[%s14463_s3 + $0xc0] sm:$0xff]  ;;  %v11676_v47 = vld [vmem:[%s14463_s3 + $0xc8] sm:$0xff] }
 0x4b8   :  { %3117 = vmatpush.msra.mxu1 %v11658_v22  ;;  %16009 = vst [vmem:[#allocation121_spill] sm:$0xff] %v11664_v4  ;;  %3157 = vmatpush.msra.mxu3 %v11664_v4  ;;  %v11682_v22 = vld [vmem:[%s14463_s3 + $0x540] sm:$0xff]  ;;  %v11688_v4 = vld [vmem:[%s14463_s3 + $0x548] sm:$0xff] }
 0x4b9   :  { %16010 = vst [vmem:[#allocation132_spill] sm:$0xff] %v11670_v40  ;;  %3100 = vmatpush.msra.mxu0 %v11670_v40  ;;  %3140 = vmatpush.msra.mxu2 %v11676_v47  ;;  %v11694_v40 = vld [vmem:[%s14463_s3 + $0x80] sm:$0xff] }
 0x4ba   :  { %16011 = vst [vmem:[#allocation126_spill] sm:$0xff] %v11676_v47  ;;  %3118 = vmatpush.msra.mxu1 %v11682_v22  ;;  %3158 = vmatpush.msra.mxu3 %v11688_v4  ;;  %v11700_v47 = vld [vmem:[%s14463_s3 + $0x88] sm:$0xff] }
 0x4bb   :  { %16012 = vst [vmem:[#allocation133_spill] sm:$0xff] %v11682_v22  ;;  %3101 = vmatpush.msra.mxu0 %v11694_v40  ;;  %3141 = vmatpush.msra.mxu2 %v11700_v47  ;;  %v11706_v22 = vld [vmem:[%s14463_s3 + $0x500] sm:$0xff] }
 0x4bc   :  { %16013 = vst [vmem:[#allocation127_spill] sm:$0xff] %v11688_v4  ;;  %3119 = vmatpush.msra.mxu1 %v11706_v22  ;;  %v11712_v4 = vld [vmem:[%s14463_s3 + $0x508] sm:$0xff] }
 0x4bd   :  { %16014 = vst [vmem:[#allocation136_spill] sm:$0xff] %v11694_v40  ;;  %3159 = vmatpush.msra.mxu3 %v11712_v4  ;;  %v11718_v40 = vld [vmem:[%s14463_s3 + $0x40] sm:$0xff] }
 0x4be   :  { %16015 = vst [vmem:[#allocation130_spill] sm:$0xff] %v11700_v47  ;;  %3102 = vmatpush.msra.mxu0 %v11718_v40  ;;  %v11724_v47 = vld [vmem:[%s14463_s3 + $0x48] sm:$0xff] }
 0x4bf   :  { %16016 = vst [vmem:[#allocation137_spill] sm:$0xff] %v11706_v22  ;;  %3142 = vmatpush.msra.mxu2 %v11724_v47  ;;  %v11730_v22 = vld [vmem:[%s14463_s3 + $0x4c0] sm:$0xff] }
 0x4c0   :  { %16017 = vst [vmem:[#allocation131_spill] sm:$0xff] %v11712_v4  ;;  %3120 = vmatpush.msra.mxu1 %v11730_v22  ;;  %v11736_v4 = vld [vmem:[%s14463_s3 + $0x4c8] sm:$0xff] }
 0x4c1   :  { %16018 = vst [vmem:[#allocation142_spill] sm:$0xff] %v11718_v40  ;;  %3160 = vmatpush.msra.mxu3 %v11736_v4  ;;  %v11742_v40 = vld [vmem:[%s14463_s3] sm:$0xff] }
 0x4c2   :  { %16019 = vst [vmem:[#allocation134_spill] sm:$0xff] %v11724_v47  ;;  %3103 = vmatpush.msra.mxu0 %v11742_v40  ;;  %v11748_v47 = vld [vmem:[%s14463_s3 + $0x8] sm:$0xff] }
 0x4c3   :  { %16020 = vst [vmem:[#allocation143_spill] sm:$0xff] %v11730_v22  ;;  %3143 = vmatpush.msra.mxu2 %v11748_v47  ;;  %v11754_v22 = vld [vmem:[%s14463_s3 + $0x3d0] sm:$0xff] }
 0x4c4   :  { %16021 = vst [vmem:[#allocation135_spill] sm:$0xff] %v11736_v4  ;;  %3168 = vmatpush.msrb.mxu0 %v11754_v22  ;;  %v11760_v4 = vld [vmem:[%s14463_s3 + $0x3d8] sm:$0xff] }
 0x4c5   :  { %16022 = vst [vmem:[#allocation140_spill] sm:$0xff] %v11742_v40  ;;  %3208 = vmatpush.msrb.mxu2 %v11760_v4  ;;  %v11766_v40 = vld [vmem:[%s14463_s3 + $0x480] sm:$0xff] }
 0x4c6   :  { %16023 = vst [vmem:[#allocation141_spill] sm:$0xff] %v11748_v47  ;;  %3121 = vmatpush.msra.mxu1 %v11766_v40  ;;  %v11772_v47 = vld [vmem:[%s14463_s3 + $0x488] sm:$0xff] }
 0x4c7   :  { %16024 = vst [vmem:[#allocation144_spill] sm:$0xff] %v11754_v22  ;;  %3161 = vmatpush.msra.mxu3 %v11772_v47  ;;  %v11778_v22 = vld [vmem:[%s14463_s3 + $0x390] sm:$0xff] }
 0x4c8   :  { %16025 = vst [vmem:[#allocation8_spill] sm:$0xff] %v11760_v4  ;;  %3169 = vmatpush.msrb.mxu0 %v11778_v22  ;;  %v11784_v4 = vld [vmem:[%s14463_s3 + $0x398] sm:$0xff] }
 0x4c9   :  { %16026 = vst [vmem:[#allocation6_spill] sm:$0xff] %v11766_v40  ;;  %3209 = vmatpush.msrb.mxu2 %v11784_v4  ;;  %v11790_v40 = vld [vmem:[%s14463_s3 + $0x440] sm:$0xff] }
 0x4ca   :  { %16027 = vst [vmem:[#allocation9_spill] sm:$0xff] %v11772_v47  ;;  %3122 = vmatpush.msra.mxu1 %v11790_v40  ;;  %v11796_v47 = vld [vmem:[%s14463_s3 + $0x448] sm:$0xff] }
 0x4cb   :  { %16028 = vst [vmem:[#allocation7_spill] sm:$0xff] %v11778_v22  ;;  %3162 = vmatpush.msra.mxu3 %v11796_v47  ;;  %v11802_v22 = vld [vmem:[%s14463_s3 + $0x350] sm:$0xff] }
 0x4cc   :  { %16029 = vst [vmem:[#allocation38_spill] sm:$0xff] %v11784_v4  ;;  %3170 = vmatpush.msrb.mxu0 %v11802_v22  ;;  %v11808_v4 = vld [vmem:[%s14463_s3 + $0x358] sm:$0xff] }
 0x4cd   :  { %16030 = vst [vmem:[#allocation39_spill] sm:$0xff] %v11790_v40  ;;  %3210 = vmatpush.msrb.mxu2 %v11808_v4  ;;  %v11814_v40 = vld [vmem:[%s14463_s3 + $0x400] sm:$0xff] }
 0x4ce   :  { %16031 = vst [vmem:[#allocation47_spill] sm:$0xff] %v11796_v47  ;;  %3123 = vmatpush.msra.mxu1 %v11814_v40  ;;  %v11820_v47 = vld [vmem:[%s14463_s3 + $0x408] sm:$0xff] }
 0x4cf   :  { %16032 = vst [vmem:[#allocation48_spill] sm:$0xff] %v11802_v22  ;;  %3163 = vmatpush.msra.mxu3 %v11820_v47  ;;  %v11826_v22 = vld [vmem:[%s14463_s3 + $0x310] sm:$0xff] }
 0x4d0   :  { %16033 = vst [vmem:[#allocation161_spill] sm:$0xff] %v11808_v4  ;;  %3171 = vmatpush.msrb.mxu0 %v11826_v22  ;;  %v11832_v4 = vld [vmem:[%s14463_s3 + $0x7d0] sm:$0xff] }
 0x4d1   :  { %16034 = vst [vmem:[#allocation162_spill] sm:$0xff] %v11814_v40  ;;  %3188 = vmatpush.msrb.mxu1 %v11832_v4  ;;  %v11838_v40 = vld [vmem:[%s14463_s3 + $0x318] sm:$0xff] }
 0x4d2   :  { %16035 = vst [vmem:[#allocation163_spill] sm:$0xff] %v11820_v47  ;;  %3211 = vmatpush.msrb.mxu2 %v11838_v40  ;;  %v11844_v47 = vld [vmem:[%s14463_s3 + $0x7d8] sm:$0xff] }
 0x4d3   :  { %16036 = vst [vmem:[#allocation164_spill] sm:$0xff] %v11826_v22  ;;  %3228 = vmatpush.msrb.mxu3 %v11844_v47  ;;  %v11850_v22 = vld [vmem:[%s14463_s3 + $0x2d0] sm:$0xff] }
 0x4d4   :  { %16037 = vst [vmem:[#allocation165_spill] sm:$0xff] %v11832_v4  ;;  %3172 = vmatpush.msrb.mxu0 %v11850_v22  ;;  %v11856_v4 = vld [vmem:[%s14463_s3 + $0x790] sm:$0xff] }
 0x4d5   :  { %16038 = vst [vmem:[#allocation166_spill] sm:$0xff] %v11838_v40  ;;  %3189 = vmatpush.msrb.mxu1 %v11856_v4  ;;  %v11862_v40 = vld [vmem:[%s14463_s3 + $0x2d8] sm:$0xff] }
 0x4d6   :  { %16039 = vst [vmem:[#allocation167_spill] sm:$0xff] %v11844_v47  ;;  %3212 = vmatpush.msrb.mxu2 %v11862_v40  ;;  %v11868_v47 = vld [vmem:[%s14463_s3 + $0x798] sm:$0xff] }
 0x4d7   :  { %16040 = vst [vmem:[#allocation168_spill] sm:$0xff] %v11850_v22  ;;  %3229 = vmatpush.msrb.mxu3 %v11868_v47  ;;  %v11874_v22 = vld [vmem:[%s14463_s3 + $0x290] sm:$0xff] }
 0x4d8   :  { %16041 = vst [vmem:[#allocation169_spill] sm:$0xff] %v11856_v4  ;;  %3173 = vmatpush.msrb.mxu0 %v11874_v22  ;;  %v11880_v4 = vld [vmem:[%s14463_s3 + $0x750] sm:$0xff] }
 0x4d9   :  { %16042 = vst [vmem:[#allocation170_spill] sm:$0xff] %v11862_v40  ;;  %3190 = vmatpush.msrb.mxu1 %v11880_v4  ;;  %v11886_v40 = vld [vmem:[%s14463_s3 + $0x298] sm:$0xff] }
 0x4da   :  { %16043 = vst [vmem:[#allocation171_spill] sm:$0xff] %v11868_v47  ;;  %3213 = vmatpush.msrb.mxu2 %v11886_v40  ;;  %v11892_v47 = vld [vmem:[%s14463_s3 + $0x758] sm:$0xff] }
 0x4db   :  { %16044 = vst [vmem:[#allocation172_spill] sm:$0xff] %v11874_v22  ;;  %3230 = vmatpush.msrb.mxu3 %v11892_v47  ;;  %v11898_v22 = vld [vmem:[%s14463_s3 + $0x250] sm:$0xff] }
 0x4dc   :  { %16045 = vst [vmem:[#allocation173_spill] sm:$0xff] %v11880_v4  ;;  %3174 = vmatpush.msrb.mxu0 %v11898_v22  ;;  %v11904_v4 = vld [vmem:[%s14463_s3 + $0x710] sm:$0xff] }
 0x4dd   :  { %16046 = vst [vmem:[#allocation174_spill] sm:$0xff] %v11886_v40  ;;  %3191 = vmatpush.msrb.mxu1 %v11904_v4  ;;  %v11910_v40 = vld [vmem:[%s14463_s3 + $0x258] sm:$0xff] }
 0x4de   :  { %16047 = vst [vmem:[#allocation175_spill] sm:$0xff] %v11892_v47  ;;  %3214 = vmatpush.msrb.mxu2 %v11910_v40  ;;  %v11916_v47 = vld [vmem:[%s14463_s3 + $0x718] sm:$0xff] }
 0x4df   :  { %16048 = vst [vmem:[#allocation176_spill] sm:$0xff] %v11898_v22  ;;  %3231 = vmatpush.msrb.mxu3 %v11916_v47  ;;  %v11922_v22 = vld [vmem:[%s14463_s3 + $0x210] sm:$0xff] }
 0x4e0   :  { %16049 = vst [vmem:[#allocation177_spill] sm:$0xff] %v11904_v4  ;;  %3175 = vmatpush.msrb.mxu0 %v11922_v22  ;;  %v11928_v4 = vld [vmem:[%s14463_s3 + $0x6d0] sm:$0xff] }
 0x4e1   :  { %16050 = vst [vmem:[#allocation178_spill] sm:$0xff] %v11910_v40  ;;  %3192 = vmatpush.msrb.mxu1 %v11928_v4  ;;  %v16054_v40 = vld [vmem:[#allocation62_spill] sm:$0xff] }
 0x4e2   :  { %16051 = vst [vmem:[#allocation16_spill] sm:$0xff] %v11916_v47  ;;  %3215 = vmatpush.msrb.mxu2 %v16054_v40  ;;  %v11935_v47 = vld [vmem:[%s14463_s3 + $0x6d8] sm:$0xff]  ;;  %3176 = vmatpush.msrb.mxu0 %v16056_v37  ;;  %v11956_v37 = vld [vmem:[%s14463_s3 + $0x650] sm:$0xff]  ;;  %v2700_v11 = vpop.f32.mrf.mxu3 }
 0x4e3   :  { %16052 = vst [vmem:[#allocation14_spill] sm:$0xff] %v11922_v22  ;;  %3232 = vmatpush.msrb.mxu3 %v11935_v47  ;;  %v11942_v22 = vld [vmem:[%s14463_s3 + $0x690] sm:$0xff]  ;;  %v11949_v40 = vld [vmem:[%s14463_s3 + $0x698] sm:$0xff] }
 0x4e4   :  { %16053 = vst [vmem:[#allocation17_spill] sm:$0xff] %v11928_v4  ;;  %3193 = vmatpush.msrb.mxu1 %v11942_v22  ;;  %3216 = vmatpush.msrb.mxu2 %v16058_v29  ;;  %v16060_v4 = vld [vmem:[#allocation57_spill] sm:$0xff] }
 0x4e5   :  { %16055 = vst [vmem:[#allocation15_spill] sm:$0xff] %v11935_v47  ;;  %3233 = vmatpush.msrb.mxu3 %v11949_v40  ;;  %3177 = vmatpush.msrb.mxu0 %v16060_v4  ;;  %v16062_v47 = vld [vmem:[#allocation68_spill] sm:$0xff] }
 0x4e6   :  { %16057 = vst [vmem:[#allocation74_spill] sm:$0xff] %v11942_v22  ;;  %3194 = vmatpush.msrb.mxu1 %v11956_v37  ;;  %3217 = vmatpush.msrb.mxu2 %v16062_v47  ;;  %v11963_v29 = vld [vmem:[%s14463_s3 + $0x658] sm:$0xff]  ;;  %v11970_v4 = vld [vmem:[%s14463_s3 + $0x610] sm:$0xff] }
 0x4e7   :  { %16059 = vst [vmem:[#allocation75_spill] sm:$0xff] %v11949_v40  ;;  %3234 = vmatpush.msrb.mxu3 %v11963_v29  ;;  %v16064_v22 = vld [vmem:[#allocation69_spill] sm:$0xff]  ;;  %v16066_v40 = vld [vmem:[#allocation60_spill] sm:$0xff] }
 0x4e8   :  { %16061 = vst [vmem:[#allocation90_spill] sm:$0xff] %v11956_v37  ;;  %3178 = vmatpush.msrb.mxu0 %v16064_v22  ;;  %3195 = vmatpush.msrb.mxu1 %v11970_v4  ;;  %v11977_v47 = vld [vmem:[%s14463_s3 + $0x618] sm:$0xff] }
 0x4e9   :  { %16063 = vst [vmem:[#allocation91_spill] sm:$0xff] %v11963_v29  ;;  %3218 = vmatpush.msrb.mxu2 %v16066_v40  ;;  %3235 = vmatpush.msrb.mxu3 %v11977_v47  ;;  %v16068_v37 = vld [vmem:[#allocation61_spill] sm:$0xff]  ;;  %v16069_v29 = vld [vmem:[#allocation72_spill] sm:$0xff]  ;;  %v16074_v40 = vld [vmem:[#allocation79_spill] sm:$0xff] }
 0x4ea   :  { %16065 = vst [vmem:[#allocation179_spill] sm:$0xff] %v11970_v4  ;;  %3179 = vmatpush.msrb.mxu0 %v16068_v37  ;;  %3196 = vmatpush.msrb.mxu1 %v16069_v29  ;;  %v16070_v22 = vld [vmem:[#allocation73_spill] sm:$0xff]  ;;  %v16073_v4 = vld [vmem:[#allocation78_spill] sm:$0xff]  ;;  %v16079_v37 = vld [vmem:[#allocation11_spill] sm:$0xff] }
 0x4eb   :  { %16067 = vst [vmem:[#allocation180_spill] sm:$0xff] %v11977_v47  ;;  %3219 = vmatpush.msrb.mxu2 %v16070_v22  ;;  %3236 = vmatpush.msrb.mxu3 %v16071_v28  ;;  %v16078_v47 = vld [vmem:[#allocation13_spill] sm:$0xff]  ;;  %v16080_v29 = vld [vmem:[#allocation50_spill] sm:$0xff]  ;;  %v16081_v22 = vld [vmem:[#allocation51_spill] sm:$0xff] }
 0x4ec   :  { %3180 = vmatpush.msrb.mxu0 %v16072_v6  ;;  %3197 = vmatpush.msrb.mxu1 %v16073_v4  ;;  %v16082_v28 = vld [vmem:[#allocation66_spill] sm:$0xff]  ;;  %v16083_v6 = vld [vmem:[#allocation67_spill] sm:$0xff] }
 0x4ed   :  { %3220 = vmatpush.msrb.mxu2 %v16074_v40  ;;  %3237 = vmatpush.msrb.mxu3 %v16075_v63  ;;  %v16084_v4 = vld [vmem:[#allocation71_spill] sm:$0xff]  ;;  %v16085_v40 = vld [vmem:[#allocation82_spill] sm:$0xff] }
 0x4ee   :  { %3181 = vmatpush.msrb.mxu0 %v16076_v14  ;;  %3198 = vmatpush.msrb.mxu1 %v16077_v17  ;;  %v16086_v63 = vld [vmem:[#allocation83_spill] sm:$0xff]  ;;  %v16087_v14 = vld [vmem:[#allocation76_spill] sm:$0xff]  ;;  %v16088_v17 = vld [vmem:[#allocation77_spill] sm:$0xff] }
 0x4ef   :  { %3221 = vmatpush.msrb.mxu2 %v16078_v47  ;;  %3238 = vmatpush.msrb.mxu3 %v16079_v37  ;;  %v16089_v47 = vld [vmem:[#allocation86_spill] sm:$0xff]  ;;  %v16090_v37 = vld [vmem:[#allocation87_spill] sm:$0xff] }
 0x4f0   :  { %3182 = vmatpush.msrb.mxu0 %v16080_v29  ;;  %3199 = vmatpush.msrb.mxu1 %v16081_v22  ;;  %v16091_v29 = vld [vmem:[#allocation80_spill] sm:$0xff]  ;;  %v16092_v22 = vld [vmem:[#allocation81_spill] sm:$0xff] }
 0x4f1   :  { %3222 = vmatpush.msrb.mxu2 %v16082_v28  ;;  %3239 = vmatpush.msrb.mxu3 %v16083_v6  ;;  %v16093_v28 = vld [vmem:[#allocation92_spill] sm:$0xff]  ;;  %v2660_v6 = vpop.f32.mrf.mxu1 }
 0x4f2   :  { %3183 = vmatpush.msrb.mxu0 %v16084_v4  ;;  %3200 = vmatpush.msrb.mxu1 %v16085_v40  ;;  %v2640_v4 = vpop.f32.mrf.mxu0  ;;  %v2680_v40 = vpop.f32.mrf.mxu2 }
 0x4f3   :  { %3223 = vmatpush.msrb.mxu2 %v16086_v63  ;;  %3240 = vmatpush.msrb.mxu3 %v16087_v14  ;;  %v16094_v14 = vld [vmem:[#allocation153_spill] sm:$0xff]  ;;  %v2661_v35 = vadd.f32 %v2660_v6, %v2640_v4  ;;  %v2701_v44 = vadd.f32 %v2700_v11, %v2680_v40 }
 0x4f4   :  { %3201 = vmatpush.msrb.mxu1 %v16088_v17  ;;  %v212_v17 = vadd.f32 %v16095_v1, %v16094_v14 }
 0x4f5   :  { %3241 = vmatpush.msrb.mxu3 %v16089_v47  ;;  %v2780_v47 = vpop.f32.mrf.mxu3 }
 0x4f6   :  { %3202 = vmatpush.msrb.mxu1 %v16090_v37  ;;  %v16096_v37 = vld [vmem:[#allocation154_spill] sm:$0xff] }
 0x4f7   :  { %3242 = vmatpush.msrb.mxu3 %v16091_v29  ;;  %v130_v29 = vadd.f32 %v16097_v9, %v16096_v37  ;;  %v16102_v9 = vld [vmem:[#allocation157_spill] sm:$0xff] }
 0x4f8   :  { %3203 = vmatpush.msrb.mxu1 %v16092_v22 }
 0x4f9   :  { %3243 = vmatpush.msrb.mxu3 %v16093_v28  ;;  %v2740_v42 = vpop.f32.mrf.mxu1  ;;  %v2943_v60 = vadd.f32 %v2661_v35, %v130_v29  ;;  %v16098_v28 = vld [vmem:[#allocation155_spill] sm:$0xff] }
 0x4fa   :  { %v2720_v63 = vpop.f32.mrf.mxu0  ;;  %v2760_v30 = vpop.f32.mrf.mxu2  ;;  %v253_v48 = vadd.f32 %v16099_v33, %v16098_v28 }
 0x4fb   :  { %v2741_v62 = vadd.f32 %v2740_v42, %v2720_v63  ;;  %v2781_v22 = vadd.f32 %v2780_v47, %v2760_v30  ;;  %v16101_v42 = vld [vmem:[#allocation19_spill] sm:$0xff]  ;;  %v4596_v26 = vmul.f32 -1.442695, %v2943_v60  ;;  %v16103_v30 = vld [vmem:[#allocation98_spill] sm:$0xff] }
 0x4fc   :  { %v171_v63 = vadd.f32 %v16101_v42, %v16100_v16  ;;  %v294_v35 = vadd.f32 %v16103_v30, %v16102_v9  ;;  %v16107_v9 = vld [vmem:[#allocation114_spill] sm:$0xff] }
 0x4fd   :  { %v2945_v49 = vadd.f32 %v2741_v62, %v212_v17  ;;  %v2946_v10 = vadd.f32 %v2781_v22, %v253_v48 }
 0x4fe   :  { %v2944_v6 = vadd.f32 %v2701_v44, %v171_v63  ;;  %v16105_v44 = vld [vmem:[#allocation99_spill] sm:$0xff] }
 0x4ff   :  { %v4598_v7 = vmul.f32 -1.442695, %v2945_v49  ;;  %v4599_v4 = vmul.f32 -1.442695, %v2946_v10 }
 0x500   :  { %v4597_v47 = vmul.f32 -1.442695, %v2944_v6 }
 0x501   :  { %4750 = vpow2.f32 %v4598_v7  ;;  %v2820_v1 = vpop.f32.mrf.mxu1  ;;  %v16104_v7 = vld [vmem:[#allocation158_spill] sm:$0xff] }
 0x502   :  { %v2800_v62 = vpop.f32.mrf.mxu0  ;;  %4752 = vpow2.f32 %v4596_v26  ;;  %v2840_v48 = vpop.f32.mrf.mxu2  ;;  %v335_v22 = vadd.f32 %v16105_v44, %v16104_v7 }
 0x503   :  { %v2821_v17 = vadd.f32 %v2820_v1, %v2800_v62  ;;  %4754 = vpow2.f32 %v4599_v4 }
 0x504   :  { %4756 = vpow2.f32 %v4597_v47 }
 0x505   :  { %v2947_v33 = vadd.f32 %v2821_v17, %v294_v35 }
 0x506   :  { %v2860_v49 = vpop.f32.mrf.mxu3 }
 0x507   :  { %v4751_v29 = vpop.eup %4750  ;;  %v2861_v11 = vadd.f32 %v2860_v49, %v2840_v48  ;;  %v4600_v10 = vmul.f32 -1.442695, %v2947_v33 }
 0x508   :  { %v4753_v40 = vpop.eup %4752  ;;  %v12016_v60 = vadd.f32 1.0, %v4751_v29 }
 0x509   :  { %v4755_v42 = vpop.eup %4754  ;;  %v2969_v26 = vadd.f32 1.0, %v4753_v40  ;;  %v2948_v63 = vadd.f32 %v2861_v11, %v335_v22 }
 0x50a   :  { %4758 = vrcp.f32 %v12016_v60  ;;  %v4757_v1 = vpop.eup %4756  ;;  %v12021_v6 = vadd.f32 1.0, %v4755_v42  ;;  %v3016_v21 = vand.u32 2147483648, %v12016_v60  ;;  %vm3010_vm3 = vweird.f32 %v12016_v60 }
 0x50b   :  { %4760 = vpow2.f32 %v4600_v10  ;;  %v4601_v62 = vmul.f32 -1.442695, %v2948_v63  ;;  %v12023_v4 = vadd.f32 1.0, %v4757_v1  ;;  %v2986_v14 = vand.u32 2147483648, %v2969_v26 }
 0x50c   :  { %4762 = vrcp.f32 %v2969_v26  ;;  %vm2980_vm5 = vweird.f32 %v2969_v26  ;;  %vm3025_vm11 = vweird.f32 %v12021_v6 }
 0x50d   :  { %4764 = vrcp.f32 %v12021_v6  ;;  %vm2995_vm8 = vweird.f32 %v12023_v4 }
 0x50e   :  { %4766 = vpow2.f32 %v4601_v62 }
 0x50f   :  { %4768 = vrcp.f32 %v12023_v4 }
 0x510   :  { %v12025_v17 = vpop.eup %4758 }
 0x511   :  { %v4761_v30 = vpop.eup %4760  ;;  %v3006_v47 = vmul.f32 %v12025_v17, %v12016_v60  ;;  %vm3011_vm1 = vweird.f32 %v12025_v17 }
 0x512   :  { %v12028_v35 = vpop.eup %4762  ;;  %v12033_v29 = vadd.f32 1.0, %v4761_v30  ;;  %vm12066_vm4 = vmor %vm3010_vm3, %vm3011_vm1 }
 0x513   :  { %v12035_v33 = vpop.eup %4764  ;;  %v2976_v49 = vmul.f32 %v12028_v35, %v2969_v26  ;;  %v3007_v11 = vsub.f32 1.0, %v3006_v47  ;;  %vm2981_vm2 = vweird.f32 %v12028_v35 }
 0x514   :  { %v4767_v48 = vpop.eup %4766  ;;  %4770 = vrcp.f32 %v12033_v29  ;;  %v3021_v22 = vmul.f32 %v12035_v33, %v12021_v6  ;;  %vm12082_vm7 = vmor %vm2980_vm5, %vm2981_vm2  ;;  %vm3026_vm9 = vweird.f32 %v12035_v33  ;;  %vm3040_vm2 = vweird.f32 %v12033_v29 }
 0x515   :  { %v12039_v40 = vpop.eup %4768  ;;  %v2977_v44 = vsub.f32 1.0, %v2976_v49  ;;  %v12043_v10 = vadd.f32 1.0, %v4767_v48  ;;  %v3008_v63 = vmul.f32 %v12025_v17, %v3007_v11  ;;  %v16106_v49 = vld [vmem:[#allocation159_spill] sm:$0xff]  ;;  %v2984_v48 = vand.u32 2147483647, %v2969_v26  ;;  %vm12099_vm13 = vmor %vm3025_vm11, %vm3026_vm9 }
 0x516   :  { %v2991_v42 = vmul.f32 %v12039_v40, %v12023_v4  ;;  %v3022_v62 = vsub.f32 1.0, %v3021_v22  ;;  %v376_v16 = vadd.f32 %v16107_v9, %v16106_v49  ;;  %vm2996_vm12 = vweird.f32 %v12039_v40 }
 0x517   :  { %4772 = vrcp.f32 %v12043_v10  ;;  %v2978_v7 = vmul.f32 %v12028_v35, %v2977_v44  ;;  %v3009_v11 = vadd.f32 %v12025_v17, %v3008_v63  ;;  %vm12072_vm6 = vcmp.eq.f32.partialorder %v2984_v48, 8.507059e+37  ;;  %vm12114_vm14 = vmor %vm2995_vm8, %vm2996_vm12 }
 0x518   :  { %v2992_v37 = vsub.f32 1.0, %v2991_v42  ;;  %v3023_v9 = vmul.f32 %v12035_v33, %v3022_v62  ;;  %v3014_v42 = vand.u32 2147483647, %v12016_v60  ;;  %v2987_v62 = vor.u32 1.1754944e-38, %v2986_v14 }
 0x519   :  { %v2979_v44 = vadd.f32 %v12028_v35, %v2978_v7  ;;  %v3013_v60 = vsel %vm12066_vm4, %v12025_v17, %v3009_v11 }
 0x51a   :  { %v12048_v1 = vpop.eup %4770  ;;  %vm3015_vm10 = vcmp.eq.f32.partialorder %v3014_v42, 8.507059e+37 }
 0x51b   :  { %v2880_v30 = vpop.f32.mrf.mxu0  ;;  %v3036_v22 = vmul.f32 %v12048_v1, %v12033_v29  ;;  %v2983_v14 = vsel %vm12082_vm7, %v12028_v35, %v2979_v44  ;;  %vm3041_vm0 = vweird.f32 %v12048_v1 }
 0x51c   :  { %v2988_v44 = vsel %vm12072_vm6, %v2987_v62, %v2983_v14  ;;  %v3044_v14 = vand.u32 2147483647, %v12033_v29  ;;  %vm3042_vm3 = vmor %vm3040_vm2, %vm3041_vm0  ;;  %vm3055_vm6 = vweird.f32 %v12043_v10 }
 0x51d   :  { %v3037_v46 = vsub.f32 1.0, %v3036_v22  ;;  %v3029_v22 = vand.u32 2147483647, %v12021_v6 }
 0x51e   :  { %vm3045_vm4 = vcmp.eq.f32.partialorder %v3044_v14, 8.507059e+37  ;;  %v12232_v14 = vld [vmem:[%s14463_s3 + $0x7a8] sm:$0xff] }
 0x51f   :  { %vm3030_vm15 = vcmp.eq.f32.partialorder %v3029_v22, 8.507059e+37 }
 0x521   :  { %v2900_v47 = vpop.f32.mrf.mxu1  ;;  %v2920_v7 = vpop.f32.mrf.mxu2 }
 0x522   :  { %v2901_v28 = vadd.f32 %v2900_v47, %v2880_v30  ;;  %v16108_v30 = vld [vmem:[#allocation160_spill] sm:$0xff]  ;;  %v16109_v47 = vld [vmem:[#allocation115_spill] sm:$0xff] }
 0x523   :  { %v417_v49 = vadd.f32 %v16109_v47, %v16108_v30  ;;  %v2993_v47 = vmul.f32 %v12039_v40, %v2992_v37  ;;  %v3017_v30 = vor.u32 1.1754944e-38, %v3016_v21  ;;  %v3024_v37 = vadd.f32 %v12035_v33, %v3023_v9 }
 0x524   :  { %v2949_v59 = vadd.f32 %v2901_v28, %v376_v16  ;;  %v12070_v16 = vpop.eup %4772  ;;  %v3031_v21 = vand.u32 2147483648, %v12021_v6  ;;  %v3038_v9 = vmul.f32 %v12048_v1, %v3037_v46  ;;  %v12188_v46 = vld [vmem:[%s14463_s3 + $0x320] sm:$0xff] }
 0x525   :  { %v3051_v17 = vmul.f32 %v12070_v16, %v12043_v10  ;;  %v3018_v48 = vsel %vm3015_vm10, %v3017_v30, %v3013_v60  ;;  %v2999_v60 = vand.u32 2147483647, %v12023_v4  ;;  %v3028_v6 = vsel %vm12099_vm13, %v12035_v33, %v3024_v37 }
 0x526   :  { %4774 = vtanh.f32 %v2949_v59  ;;  %v3067_v42 = vmul.f32 %v3018_v48, %v11132_v51  ;;  %v3039_v62 = vadd.f32 %v12048_v1, %v3038_v9  ;;  %vm3056_vm5 = vweird.f32 %v12070_v16 }
 0x527   :  { %v2940_v32 = vpop.f32.mrf.mxu3  ;;  %vm3000_vm1 = vcmp.eq.f32.partialorder %v2999_v60, 8.507059e+37  ;;  %vm3057_vm7 = vmor %vm3055_vm6, %vm3056_vm5  ;;  %v12166_v60 = vld [vmem:[%s14463_s3 + $0x3a8] sm:$0xff] }
 0x528   :  { %v2941_v26 = vadd.f32 %v2940_v32, %v2920_v7  ;;  %v2994_v32 = vadd.f32 %v12039_v40, %v2993_v47  ;;  %v3032_v7 = vor.u32 1.1754944e-38, %v3031_v21  ;;  %v3052_v47 = vsub.f32 1.0, %v3051_v17 }
 0x529   :  { %v3043_v48 = vsel %vm3042_vm3, %v12048_v1, %v3039_v62  ;;  %v12200_v62 = vld [vmem:[%s14463_s3 + $0x328] sm:$0xff] }
 0x52a   :  { %v2950_v11 = vadd.f32 %v2941_v26, %v417_v49  ;;  %v3001_v49 = vand.u32 2147483648, %v12023_v4  ;;  %v2998_v51 = vsel %vm12114_vm14, %v12039_v40, %v2994_v32  ;;  %v3033_v59 = vsel %vm3030_vm15, %v3032_v7, %v3028_v6  ;;  %v12174_v7 = vld [vmem:[%s14463_s3 + $0x360] sm:$0xff] }
 0x52b   :  { %v3046_v26 = vand.u32 2147483648, %v12033_v29  ;;  %v3053_v37 = vmul.f32 %v12070_v16, %v3052_v47  ;;  %v3068_v21 = vmul.f32 %v3033_v59, %v11146_v61  ;;  %v3061_v29 = vand.u32 2147483648, %v12043_v10  ;;  %v12180_v47 = vld [vmem:[%s14463_s3 + $0x368] sm:$0xff]  ;;  %v12214_v59 = vld [vmem:[%s14463_s3 + $0x2e0] sm:$0xff] }
 0x52c   :  { %v4775_v63 = vpop.eup %4774  ;;  %4776 = vtanh.f32 %v2950_v11  ;;  %v3002_v33 = vor.u32 1.1754944e-38, %v3001_v49  ;;  %v3059_v61 = vand.u32 2147483647, %v12043_v10  ;;  %v12148_v49 = vld [vmem:[%s14463_s3 + $0x3e0] sm:$0xff]  ;;  %v12154_v10 = vld [vmem:[%s14463_s3 + $0x3e8] sm:$0xff] }
 0x52d   :  { %v3069_v30 = vmul.f32 %v4775_v63, %v2988_v44  ;;  %v3047_v11 = vor.u32 1.1754944e-38, %v3046_v26  ;;  %v3054_v22 = vadd.f32 %v12070_v16, %v3053_v37  ;;  %v3062_v44 = vor.u32 1.1754944e-38, %v3061_v29  ;;  %v12220_v26 = vld [vmem:[%s14463_s3 + $0x7a0] sm:$0xff] }
 0x52e   :  { %v3003_v40 = vsel %vm3000_vm1, %v3002_v33, %v2998_v51  ;;  %vm3060_vm8 = vcmp.eq.f32.partialorder %v3059_v61, 8.507059e+37  ;;  %v12194_v51 = vld [vmem:[%s14463_s3 + $0x7e0] sm:$0xff]  ;;  %v12206_v33 = vld [vmem:[%s14463_s3 + $0x7e8] sm:$0xff] }
 0x52f   :  { %v12118_v28 = vadd.f32 %v3069_v30, %v3067_v42  ;;  %v3048_v35 = vsel %vm3045_vm4, %v3047_v11, %v3043_v48  ;;  %v3058_v1 = vsel %vm3057_vm7, %v12070_v16, %v3054_v22  ;;  %v12160_v30 = vld [vmem:[%s14463_s3 + $0x3a0] sm:$0xff]  ;;  %v12274_v22 = vld [vmem:[%s14463_s3 + $0x268] sm:$0xff] }
 0x530   :  { %v3063_v42 = vsel %vm3060_vm8, %v3062_v44, %v3058_v1  ;;  %v12238_v37 = vld [vmem:[%s14463_s3 + $0x2a0] sm:$0xff]  ;;  %v12300_v61 = vld [vmem:[%s14463_s3 + $0x228] sm:$0xff] }
 0x531   :  { %4778 = vtanh.f32 %v12118_v28  ;;  %v12262_v48 = vld [vmem:[%s14463_s3 + $0x260] sm:$0xff]  ;;  %v12306_v1 = vld [vmem:[%s14463_s3 + $0x6e8] sm:$0xff] }
 0x532   :  { %v4777_v4 = vpop.eup %4776  ;;  %v12268_v11 = vld [vmem:[%s14463_s3 + $0x720] sm:$0xff]  ;;  %16120 = vst [vmem:[#allocation181_spill] sm:$0xff] %v12306_v1 }
 0x533   :  { %v3070_v17 = vmul.f32 %v4777_v4, %v3003_v40  ;;  %v12226_v4 = vld [vmem:[%s14463_s3 + $0x2e8] sm:$0xff]  ;;  %v12244_v40 = vld [vmem:[%s14463_s3 + $0x760] sm:$0xff] }
 0x534   :  { %v12294_v29 = vld [vmem:[%s14463_s3 + $0x6e0] sm:$0xff] }
 0x535   :  { %v12132_v32 = vadd.f32 %v3070_v17, %v3068_v21  ;;  %v12250_v21 = vld [vmem:[%s14463_s3 + $0x2a8] sm:$0xff]  ;;  %v12312_v44 = vld [vmem:[%s14463_s3 + $0x1e0] sm:$0xff] }
 0x536   :  { %v12256_v17 = vld [vmem:[%s14463_s3 + $0x768] sm:$0xff]  ;;  %16121 = vst [vmem:[#allocation182_spill] sm:$0xff] %v12312_v44 }
 0x537   :  { %v4779_v63 = vpop.eup %4778  ;;  %4780 = vtanh.f32 %v12132_v32 }
 0x538   :  { %v12140_v9 = vmul.f32 %v4779_v63, %v3048_v35  ;;  %v12280_v63 = vld [vmem:[%s14463_s3 + $0x728] sm:$0xff]  ;;  %v12288_v35 = vld [vmem:[%s14463_s3 + $0x220] sm:$0xff] }
 0x53a   :  { %3104 = vmatmul.f32.vlgmr.msra.gmra.mxu0 %v12140_v9  ;;  %3144 = vmatmul.f32.vlgmr.msra.gmra.mxu2 %v12140_v9 }
 0x53b   :  { %3248 = vmatpush.msra.mxu0 %v12148_v49  ;;  %3288 = vmatpush.msra.mxu2 %v12154_v10 }
 0x53d   :  { %v4781_v16 = vpop.eup %4780  ;;  %3249 = vmatpush.msra.mxu0 %v12160_v30  ;;  %3289 = vmatpush.msra.mxu2 %v12166_v60 }
 0x53e   :  { %v12169_v6 = vmul.f32 %v4781_v16, %v3063_v42  ;;  %v12318_v16 = vld [vmem:[%s14463_s3 + $0x6a0] sm:$0xff]  ;;  %v12324_v42 = vld [vmem:[%s14463_s3 + $0x1e8] sm:$0xff] }
 0x53f   :  { %3250 = vmatpush.msra.mxu0 %v12174_v7  ;;  %3290 = vmatpush.msra.mxu2 %v12180_v47  ;;  %16122 = vst [vmem:[#allocation183_spill] sm:$0xff] %v12318_v16 }
 0x540   :  { %3124 = vmatmul.f32.vlgmr.msra.gmra.mxu1 %v12169_v6  ;;  %3164 = vmatmul.f32.vlgmr.msra.gmra.mxu3 %v12169_v6  ;;  %16123 = vst [vmem:[#allocation184_spill] sm:$0xff] %v12324_v42 }
 0x541   :  { %3251 = vmatpush.msra.mxu0 %v12188_v46  ;;  %3268 = vmatpush.msra.mxu1 %v12194_v51 }
 0x542   :  { %3291 = vmatpush.msra.mxu2 %v12200_v62  ;;  %3308 = vmatpush.msra.mxu3 %v12206_v33 }
 0x543   :  { %3184 = vmatmul.f32.vlgmr.msrb.gmra.mxu0 %v12140_v9  ;;  %3224 = vmatmul.f32.vlgmr.msrb.gmra.mxu2 %v12140_v9 }
 0x544   :  { %3252 = vmatpush.msra.mxu0 %v12214_v59  ;;  %3269 = vmatpush.msra.mxu1 %v12220_v26 }
 0x545   :  { %3292 = vmatpush.msra.mxu2 %v12226_v4  ;;  %3309 = vmatpush.msra.mxu3 %v12232_v14 }
 0x546   :  { %3253 = vmatpush.msra.mxu0 %v12238_v37  ;;  %3270 = vmatpush.msra.mxu1 %v12244_v40 }
 0x547   :  { %3293 = vmatpush.msra.mxu2 %v12250_v21  ;;  %3310 = vmatpush.msra.mxu3 %v12256_v17 }
 0x548   :  { %3254 = vmatpush.msra.mxu0 %v12262_v48  ;;  %3271 = vmatpush.msra.mxu1 %v12268_v11 }
 0x549   :  { %3294 = vmatpush.msra.mxu2 %v12274_v22  ;;  %3311 = vmatpush.msra.mxu3 %v12280_v63 }
 0x54a   :  { %3204 = vmatmul.f32.vlgmr.msrb.gmra.mxu1 %v12169_v6  ;;  %3244 = vmatmul.f32.vlgmr.msrb.gmra.mxu3 %v12169_v6 }
 0x54b   :  { %3255 = vmatpush.msra.mxu0 %v12288_v35  ;;  %3272 = vmatpush.msra.mxu1 %v12294_v29 }
 0x54c   :  { %3295 = vmatpush.msra.mxu2 %v12300_v61  ;;  %3312 = vmatpush.msra.mxu3 %v12306_v1  ;;  %v12330_v1 = vld [vmem:[%s14463_s3 + $0x6a8] sm:$0xff] }
 0x54d   :  { %3256 = vmatpush.msra.mxu0 %v12312_v44  ;;  %3273 = vmatpush.msra.mxu1 %v12318_v16  ;;  %16124 = vst [vmem:[#allocation185_spill] sm:$0xff] %v12330_v1  ;;  %v12336_v44 = vld [vmem:[%s14463_s3 + $0x1a0] sm:$0xff] }
 0x54e   :  { %3296 = vmatpush.msra.mxu2 %v12324_v42  ;;  %3313 = vmatpush.msra.mxu3 %v12330_v1  ;;  %16125 = vst [vmem:[#allocation186_spill] sm:$0xff] %v12336_v44  ;;  %v12342_v16 = vld [vmem:[%s14463_s3 + $0x660] sm:$0xff]  ;;  %v12348_v42 = vld [vmem:[%s14463_s3 + $0x1a8] sm:$0xff] }
 0x54f   :  { %3257 = vmatpush.msra.mxu0 %v12336_v44  ;;  %16126 = vst [vmem:[#allocation187_spill] sm:$0xff] %v12342_v16  ;;  %3274 = vmatpush.msra.mxu1 %v12342_v16  ;;  %v12354_v1 = vld [vmem:[%s14463_s3 + $0x668] sm:$0xff]  ;;  %v12360_v44 = vld [vmem:[%s14463_s3 + $0x160] sm:$0xff] }
 0x550   :  { %16127 = vst [vmem:[#allocation188_spill] sm:$0xff] %v12348_v42  ;;  %3297 = vmatpush.msra.mxu2 %v12348_v42  ;;  %3314 = vmatpush.msra.mxu3 %v12354_v1  ;;  %v12366_v16 = vld [vmem:[%s14463_s3 + $0x620] sm:$0xff]  ;;  %v12372_v42 = vld [vmem:[%s14463_s3 + $0x168] sm:$0xff] }
 0x551   :  { %16128 = vst [vmem:[#allocation189_spill] sm:$0xff] %v12354_v1  ;;  %3258 = vmatpush.msra.mxu0 %v12360_v44  ;;  %3275 = vmatpush.msra.mxu1 %v12366_v16  ;;  %v12378_v1 = vld [vmem:[%s14463_s3 + $0x628] sm:$0xff] }
 0x552   :  { %16129 = vst [vmem:[#allocation190_spill] sm:$0xff] %v12360_v44  ;;  %3298 = vmatpush.msra.mxu2 %v12372_v42  ;;  %3315 = vmatpush.msra.mxu3 %v12378_v1  ;;  %v12384_v44 = vld [vmem:[%s14463_s3 + $0x120] sm:$0xff] }
 0x553   :  { %16130 = vst [vmem:[#allocation191_spill] sm:$0xff] %v12366_v16  ;;  %3259 = vmatpush.msra.mxu0 %v12384_v44  ;;  %v12390_v16 = vld [vmem:[%s14463_s3 + $0x5e0] sm:$0xff] }
 0x554   :  { %16131 = vst [vmem:[#allocation192_spill] sm:$0xff] %v12372_v42  ;;  %3276 = vmatpush.msra.mxu1 %v12390_v16  ;;  %v12396_v42 = vld [vmem:[%s14463_s3 + $0x128] sm:$0xff] }
 0x555   :  { %16132 = vst [vmem:[#allocation193_spill] sm:$0xff] %v12378_v1  ;;  %3299 = vmatpush.msra.mxu2 %v12396_v42  ;;  %v12402_v1 = vld [vmem:[%s14463_s3 + $0x5e8] sm:$0xff] }
 0x556   :  { %16133 = vst [vmem:[#allocation194_spill] sm:$0xff] %v12384_v44  ;;  %3316 = vmatpush.msra.mxu3 %v12402_v1  ;;  %v12408_v44 = vld [vmem:[%s14463_s3 + $0xe0] sm:$0xff] }
 0x557   :  { %16134 = vst [vmem:[#allocation195_spill] sm:$0xff] %v12390_v16  ;;  %3260 = vmatpush.msra.mxu0 %v12408_v44  ;;  %v12414_v16 = vld [vmem:[%s14463_s3 + $0x5a0] sm:$0xff] }
 0x558   :  { %16135 = vst [vmem:[#allocation196_spill] sm:$0xff] %v12396_v42  ;;  %3277 = vmatpush.msra.mxu1 %v12414_v16  ;;  %v12420_v42 = vld [vmem:[%s14463_s3 + $0xe8] sm:$0xff] }
 0x559   :  { %16136 = vst [vmem:[#allocation197_spill] sm:$0xff] %v12402_v1  ;;  %3300 = vmatpush.msra.mxu2 %v12420_v42  ;;  %v12426_v1 = vld [vmem:[%s14463_s3 + $0x5a8] sm:$0xff] }
 0x55a   :  { %16137 = vst [vmem:[#allocation198_spill] sm:$0xff] %v12408_v44  ;;  %3317 = vmatpush.msra.mxu3 %v12426_v1  ;;  %v12432_v44 = vld [vmem:[%s14463_s3 + $0xa0] sm:$0xff] }
 0x55b   :  { %16138 = vst [vmem:[#allocation199_spill] sm:$0xff] %v12414_v16  ;;  %3261 = vmatpush.msra.mxu0 %v12432_v44  ;;  %v12438_v16 = vld [vmem:[%s14463_s3 + $0x560] sm:$0xff] }
 0x55c   :  { %16139 = vst [vmem:[#allocation200_spill] sm:$0xff] %v12420_v42  ;;  %3278 = vmatpush.msra.mxu1 %v12438_v16  ;;  %v12444_v42 = vld [vmem:[%s14463_s3 + $0xa8] sm:$0xff] }
 0x55d   :  { %16140 = vst [vmem:[#allocation201_spill] sm:$0xff] %v12426_v1  ;;  %3301 = vmatpush.msra.mxu2 %v12444_v42  ;;  %v12450_v1 = vld [vmem:[%s14463_s3 + $0x568] sm:$0xff] }
 0x55e   :  { %16141 = vst [vmem:[#allocation202_spill] sm:$0xff] %v12432_v44  ;;  %3318 = vmatpush.msra.mxu3 %v12450_v1  ;;  %v12456_v44 = vld [vmem:[%s14463_s3 + $0x60] sm:$0xff] }
 0x55f   :  { %16142 = vst [vmem:[#allocation203_spill] sm:$0xff] %v12438_v16  ;;  %3262 = vmatpush.msra.mxu0 %v12456_v44  ;;  %v12462_v16 = vld [vmem:[%s14463_s3 + $0x520] sm:$0xff] }
 0x560   :  { %16143 = vst [vmem:[#allocation204_spill] sm:$0xff] %v12444_v42  ;;  %3279 = vmatpush.msra.mxu1 %v12462_v16  ;;  %v12468_v42 = vld [vmem:[%s14463_s3 + $0x68] sm:$0xff] }
 0x561   :  { %16144 = vst [vmem:[#allocation205_spill] sm:$0xff] %v12450_v1  ;;  %3302 = vmatpush.msra.mxu2 %v12468_v42  ;;  %v12474_v1 = vld [vmem:[%s14463_s3 + $0x528] sm:$0xff] }
 0x562   :  { %16145 = vst [vmem:[#allocation206_spill] sm:$0xff] %v12456_v44  ;;  %3319 = vmatpush.msra.mxu3 %v12474_v1  ;;  %v12480_v44 = vld [vmem:[%s14463_s3 + $0x20] sm:$0xff] }
 0x563   :  { %16146 = vst [vmem:[#allocation207_spill] sm:$0xff] %v12462_v16  ;;  %3263 = vmatpush.msra.mxu0 %v12480_v44  ;;  %v12486_v16 = vld [vmem:[%s14463_s3 + $0x4e0] sm:$0xff] }
 0x564   :  { %16147 = vst [vmem:[#allocation208_spill] sm:$0xff] %v12468_v42  ;;  %3280 = vmatpush.msra.mxu1 %v12486_v16  ;;  %v12492_v42 = vld [vmem:[%s14463_s3 + $0x28] sm:$0xff]  ;;  %3264 = vmatmul.f32.vlgmr.msra.gmra.mxu0 %v12140_v9 }
 0x565   :  { %16148 = vst [vmem:[#allocation209_spill] sm:$0xff] %v12474_v1  ;;  %3303 = vmatpush.msra.mxu2 %v12492_v42  ;;  %v12498_v1 = vld [vmem:[%s14463_s3 + $0x4e8] sm:$0xff] }
 0x566   :  { %16149 = vst [vmem:[#allocation210_spill] sm:$0xff] %v12480_v44  ;;  %3320 = vmatpush.msra.mxu3 %v12498_v1  ;;  %3304 = vmatmul.f32.vlgmr.msra.gmra.mxu2 %v12140_v9  ;;  %v12524_v44 = vld [vmem:[%s14463_s3 + $0x4a8] sm:$0xff] }
 0x567   :  { %16150 = vst [vmem:[#allocation211_spill] sm:$0xff] %v12486_v16  ;;  %v12506_v16 = vld [vmem:[%s14463_s3 + $0x3f0] sm:$0xff] }
 0x568   :  { %16151 = vst [vmem:[#allocation212_spill] sm:$0xff] %v12492_v42  ;;  %3328 = vmatpush.msrb.mxu0 %v12506_v16  ;;  %v12512_v42 = vld [vmem:[%s14463_s3 + $0x3f8] sm:$0xff]  ;;  %3321 = vmatpush.msra.mxu3 %v12524_v44 }
 0x569   :  { %16152 = vst [vmem:[#allocation213_spill] sm:$0xff] %v12498_v1  ;;  %3368 = vmatpush.msrb.mxu2 %v12512_v42  ;;  %v12518_v1 = vld [vmem:[%s14463_s3 + $0x4a0] sm:$0xff] }
 0x56a   :  { %16153 = vst [vmem:[#allocation214_spill] sm:$0xff] %v12506_v16  ;;  %3281 = vmatpush.msra.mxu1 %v12518_v1  ;;  %v12530_v16 = vld [vmem:[%s14463_s3 + $0x3b0] sm:$0xff] }
 0x56b   :  { %16154 = vst [vmem:[#allocation215_spill] sm:$0xff] %v12512_v42  ;;  %3329 = vmatpush.msrb.mxu0 %v12530_v16  ;;  %v12536_v42 = vld [vmem:[%s14463_s3 + $0x3b8] sm:$0xff] }
 0x56c   :  { %16155 = vst [vmem:[#allocation216_spill] sm:$0xff] %v12518_v1  ;;  %3369 = vmatpush.msrb.mxu2 %v12536_v42  ;;  %v12542_v1 = vld [vmem:[%s14463_s3 + $0x460] sm:$0xff] }
 0x56d   :  { %16156 = vst [vmem:[#allocation217_spill] sm:$0xff] %v12524_v44  ;;  %3282 = vmatpush.msra.mxu1 %v12542_v1  ;;  %v12548_v44 = vld [vmem:[%s14463_s3 + $0x468] sm:$0xff] }
 0x56e   :  { %16157 = vst [vmem:[#allocation218_spill] sm:$0xff] %v12530_v16  ;;  %3322 = vmatpush.msra.mxu3 %v12548_v44  ;;  %v12554_v16 = vld [vmem:[%s14463_s3 + $0x370] sm:$0xff] }
 0x56f   :  { %16158 = vst [vmem:[#allocation219_spill] sm:$0xff] %v12536_v42  ;;  %3330 = vmatpush.msrb.mxu0 %v12554_v16  ;;  %v12560_v42 = vld [vmem:[%s14463_s3 + $0x378] sm:$0xff] }
 0x570   :  { %16159 = vst [vmem:[#allocation220_spill] sm:$0xff] %v12542_v1  ;;  %3370 = vmatpush.msrb.mxu2 %v12560_v42  ;;  %v12566_v1 = vld [vmem:[%s14463_s3 + $0x420] sm:$0xff] }
 0x571   :  { %16160 = vst [vmem:[#allocation221_spill] sm:$0xff] %v12548_v44  ;;  %3283 = vmatpush.msra.mxu1 %v12566_v1  ;;  %v12572_v44 = vld [vmem:[%s14463_s3 + $0x428] sm:$0xff] }
 0x572   :  { %16161 = vst [vmem:[#allocation222_spill] sm:$0xff] %v12554_v16  ;;  %3323 = vmatpush.msra.mxu3 %v12572_v44  ;;  %3284 = vmatmul.f32.vlgmr.msra.gmra.mxu1 %v12169_v6  ;;  %v12598_v16 = vld [vmem:[%s14463_s3 + $0x7f8] sm:$0xff] }
 0x573   :  { %16162 = vst [vmem:[#allocation223_spill] sm:$0xff] %v12560_v42  ;;  %3324 = vmatmul.f32.vlgmr.msra.gmra.mxu3 %v12169_v6  ;;  %v12580_v42 = vld [vmem:[%s14463_s3 + $0x330] sm:$0xff] }
 0x574   :  { %16163 = vst [vmem:[#allocation224_spill] sm:$0xff] %v12566_v1  ;;  %3331 = vmatpush.msrb.mxu0 %v12580_v42  ;;  %v12586_v1 = vld [vmem:[%s14463_s3 + $0x7f0] sm:$0xff]  ;;  %3388 = vmatpush.msrb.mxu3 %v12598_v16 }
 0x575   :  { %16164 = vst [vmem:[#allocation225_spill] sm:$0xff] %v12572_v44  ;;  %3348 = vmatpush.msrb.mxu1 %v12586_v1  ;;  %v12592_v44 = vld [vmem:[%s14463_s3 + $0x338] sm:$0xff] }
 0x576   :  { %16165 = vst [vmem:[#allocation226_spill] sm:$0xff] %v12580_v42  ;;  %3371 = vmatpush.msrb.mxu2 %v12592_v44  ;;  %v12604_v42 = vld [vmem:[%s14463_s3 + $0x2f0] sm:$0xff] }
 0x577   :  { %16166 = vst [vmem:[#allocation227_spill] sm:$0xff] %v12586_v1  ;;  %3332 = vmatpush.msrb.mxu0 %v12604_v42  ;;  %v12610_v1 = vld [vmem:[%s14463_s3 + $0x7b0] sm:$0xff] }
 0x578   :  { %16167 = vst [vmem:[#allocation228_spill] sm:$0xff] %v12592_v44  ;;  %3349 = vmatpush.msrb.mxu1 %v12610_v1  ;;  %v12616_v44 = vld [vmem:[%s14463_s3 + $0x2f8] sm:$0xff] }
 0x579   :  { %16168 = vst [vmem:[#allocation229_spill] sm:$0xff] %v12598_v16  ;;  %3372 = vmatpush.msrb.mxu2 %v12616_v44  ;;  %v12622_v16 = vld [vmem:[%s14463_s3 + $0x7b8] sm:$0xff] }
 0x57a   :  { %16169 = vst [vmem:[#allocation230_spill] sm:$0xff] %v12604_v42  ;;  %3389 = vmatpush.msrb.mxu3 %v12622_v16  ;;  %v12628_v42 = vld [vmem:[%s14463_s3 + $0x2b0] sm:$0xff] }
 0x57b   :  { %16170 = vst [vmem:[#allocation231_spill] sm:$0xff] %v12610_v1  ;;  %3333 = vmatpush.msrb.mxu0 %v12628_v42  ;;  %v12634_v1 = vld [vmem:[%s14463_s3 + $0x770] sm:$0xff] }
 0x57c   :  { %16171 = vst [vmem:[#allocation232_spill] sm:$0xff] %v12616_v44  ;;  %3350 = vmatpush.msrb.mxu1 %v12634_v1  ;;  %v12640_v44 = vld [vmem:[%s14463_s3 + $0x2b8] sm:$0xff] }
 0x57d   :  { %16172 = vst [vmem:[#allocation233_spill] sm:$0xff] %v12622_v16  ;;  %3373 = vmatpush.msrb.mxu2 %v12640_v44  ;;  %v12646_v16 = vld [vmem:[%s14463_s3 + $0x778] sm:$0xff] }
 0x57e   :  { %16173 = vst [vmem:[#allocation234_spill] sm:$0xff] %v12628_v42  ;;  %3390 = vmatpush.msrb.mxu3 %v12646_v16  ;;  %v12652_v42 = vld [vmem:[%s14463_s3 + $0x270] sm:$0xff] }
 0x57f   :  { %16174 = vst [vmem:[#allocation235_spill] sm:$0xff] %v12634_v1  ;;  %3334 = vmatpush.msrb.mxu0 %v12652_v42  ;;  %v12658_v1 = vld [vmem:[%s14463_s3 + $0x730] sm:$0xff] }
 0x580   :  { %16175 = vst [vmem:[#allocation236_spill] sm:$0xff] %v12640_v44  ;;  %3351 = vmatpush.msrb.mxu1 %v12658_v1  ;;  %v12664_v44 = vld [vmem:[%s14463_s3 + $0x278] sm:$0xff] }
 0x581   :  { %16176 = vst [vmem:[#allocation237_spill] sm:$0xff] %v12646_v16  ;;  %3374 = vmatpush.msrb.mxu2 %v12664_v44  ;;  %v12670_v16 = vld [vmem:[%s14463_s3 + $0x738] sm:$0xff] }
 0x582   :  { %16177 = vst [vmem:[#allocation40_spill] sm:$0xff] %v12652_v42  ;;  %3391 = vmatpush.msrb.mxu3 %v12670_v16  ;;  %v12676_v42 = vld [vmem:[%s14463_s3 + $0x230] sm:$0xff] }
 0x583   :  { %16178 = vst [vmem:[#allocation34_spill] sm:$0xff] %v12658_v1  ;;  %3335 = vmatpush.msrb.mxu0 %v12676_v42  ;;  %v12682_v1 = vld [vmem:[%s14463_s3 + $0x6f0] sm:$0xff] }
 0x584   :  { %16179 = vst [vmem:[#allocation35_spill] sm:$0xff] %v12664_v44  ;;  %3352 = vmatpush.msrb.mxu1 %v12682_v1  ;;  %v12688_v44 = vld [vmem:[%s14463_s3 + $0x238] sm:$0xff] }
 0x585   :  { %16180 = vst [vmem:[#allocation43_spill] sm:$0xff] %v12670_v16  ;;  %3375 = vmatpush.msrb.mxu2 %v12688_v44  ;;  %v12694_v16 = vld [vmem:[%s14463_s3 + $0x6f8] sm:$0xff] }
 0x586   :  { %16181 = vst [vmem:[#allocation44_spill] sm:$0xff] %v12676_v42  ;;  %3392 = vmatpush.msrb.mxu3 %v12694_v16  ;;  %v12700_v42 = vld [vmem:[%s14463_s3 + $0x1f0] sm:$0xff] }
 0x587   :  { %16182 = vst [vmem:[#allocation36_spill] sm:$0xff] %v12682_v1  ;;  %3336 = vmatpush.msrb.mxu0 %v12700_v42  ;;  %v12706_v1 = vld [vmem:[%s14463_s3 + $0x6b0] sm:$0xff] }
 0x588   :  { %16183 = vst [vmem:[#allocation37_spill] sm:$0xff] %v12688_v44  ;;  %3353 = vmatpush.msrb.mxu1 %v12706_v1  ;;  %v12712_v44 = vld [vmem:[%s14463_s3 + $0x1f8] sm:$0xff] }
 0x589   :  { %16184 = vst [vmem:[#allocation49_spill] sm:$0xff] %v12694_v16  ;;  %3376 = vmatpush.msrb.mxu2 %v12712_v44  ;;  %v12718_v16 = vld [vmem:[%s14463_s3 + $0x6b8] sm:$0xff] }
 0x58a   :  { %16185 = vst [vmem:[#allocation41_spill] sm:$0xff] %v12700_v42  ;;  %3393 = vmatpush.msrb.mxu3 %v12718_v16  ;;  %v12724_v42 = vld [vmem:[%s14463_s3 + $0x1b0] sm:$0xff] }
 0x58b   :  { %16186 = vst [vmem:[#allocation42_spill] sm:$0xff] %v12706_v1  ;;  %3337 = vmatpush.msrb.mxu0 %v12724_v42  ;;  %v12730_v1 = vld [vmem:[%s14463_s3 + $0x670] sm:$0xff]  ;;  %3377 = vmatpush.msrb.mxu2 %v11270_v56  ;;  %v12751_v56 = vld [vmem:[%s14463_s3 + $0x638] sm:$0xff] }
 0x58c   :  { %16187 = vst [vmem:[#allocation54_spill] sm:$0xff] %v12718_v16  ;;  %3354 = vmatpush.msrb.mxu1 %v12730_v1  ;;  %v12737_v16 = vld [vmem:[%s14463_s3 + $0x678] sm:$0xff] }
 0x58d   :  { %16188 = vst [vmem:[#allocation55_spill] sm:$0xff] %v12724_v42  ;;  %3394 = vmatpush.msrb.mxu3 %v12737_v16  ;;  %3338 = vmatpush.msrb.mxu0 %v11277_v38  ;;  %v12744_v42 = vld [vmem:[%s14463_s3 + $0x630] sm:$0xff] }
 0x58e   :  { %3355 = vmatpush.msrb.mxu1 %v12744_v42  ;;  %3378 = vmatpush.msrb.mxu2 %v11284_v41  ;;  %v12758_v38 = vld [vmem:[%s14463_s3 + $0x5f0] sm:$0xff]  ;;  %v12765_v41 = vld [vmem:[%s14463_s3 + $0x5f8] sm:$0xff] }
 0x58f   :  { %3395 = vmatpush.msrb.mxu3 %v12751_v56  ;;  %3339 = vmatpush.msrb.mxu0 %v11291_v27  ;;  %16189 = vst [vmem:[#allocation45_spill] sm:$0xff] %v12765_v41  ;;  %v12772_v27 = vld [vmem:[%s14463_s3 + $0x5b0] sm:$0xff] }
 0x590   :  { %3356 = vmatpush.msrb.mxu1 %v12758_v38  ;;  %3379 = vmatpush.msrb.mxu2 %v11298_v24  ;;  %16190 = vst [vmem:[#allocation46_spill] sm:$0xff] %v12772_v27  ;;  %v12779_v24 = vld [vmem:[%s14463_s3 + $0x5b8] sm:$0xff] }
 0x591   :  { %3396 = vmatpush.msrb.mxu3 %v12765_v41  ;;  %3340 = vmatpush.msrb.mxu0 %v11305_v34  ;;  %16191 = vst [vmem:[#allocation58_spill] sm:$0xff] %v12779_v24  ;;  %v12786_v34 = vld [vmem:[%s14463_s3 + $0x570] sm:$0xff] }
 0x592   :  { %3357 = vmatpush.msrb.mxu1 %v12772_v27  ;;  %3380 = vmatpush.msrb.mxu2 %v11312_v5  ;;  %16192 = vst [vmem:[#allocation59_spill] sm:$0xff] %v12786_v34  ;;  %v12793_v5 = vld [vmem:[%s14463_s3 + $0x578] sm:$0xff] }
 0x593   :  { %3397 = vmatpush.msrb.mxu3 %v12779_v24  ;;  %3341 = vmatpush.msrb.mxu0 %v11319_v45  ;;  %16193 = vst [vmem:[#allocation52_spill] sm:$0xff] %v12793_v5  ;;  %v12800_v45 = vld [vmem:[%s14463_s3 + $0x530] sm:$0xff] }
 0x594   :  { %3358 = vmatpush.msrb.mxu1 %v12786_v34  ;;  %3381 = vmatpush.msrb.mxu2 %v11326_v3  ;;  %16194 = vst [vmem:[#allocation53_spill] sm:$0xff] %v12800_v45  ;;  %v12807_v3 = vld [vmem:[%s14463_s3 + $0x538] sm:$0xff] }
 0x595   :  { %3398 = vmatpush.msrb.mxu3 %v12793_v5  ;;  %3342 = vmatpush.msrb.mxu0 %v11333_v15  ;;  %16195 = vst [vmem:[#allocation62_spill] sm:$0xff] %v12807_v3  ;;  %v12814_v15 = vld [vmem:[%s14463_s3 + $0x4f0] sm:$0xff] }
 0x596   :  { %3359 = vmatpush.msrb.mxu1 %v12800_v45  ;;  %3382 = vmatpush.msrb.mxu2 %v11340_v43  ;;  %16196 = vst [vmem:[#allocation63_spill] sm:$0xff] %v12814_v15  ;;  %v16197_v43 = vld [vmem:[#allocation93_spill] sm:$0xff]  ;;  %v16320_v45 = vld [vmem:[#allocation156_spill] sm:$0xff] }
 0x597   :  { %3399 = vmatpush.msrb.mxu3 %v12807_v3  ;;  %3343 = vmatpush.msrb.mxu0 %v11347_v8  ;;  %v16198_v8 = vld [vmem:[#allocation84_spill] sm:$0xff] }
 0x598   :  { %3360 = vmatpush.msrb.mxu1 %v12814_v15  ;;  %3383 = vmatpush.msrb.mxu2 %v11354_v13  ;;  %v16199_v13 = vld [vmem:[#allocation85_spill] sm:$0xff] }
 0x599   :  { %3400 = vmatpush.msrb.mxu3 %v11360_v54  ;;  %3344 = vmatmul.f32.vlgmr.msrb.gmra.mxu0 %v12140_v9  ;;  %v16200_v54 = vld [vmem:[#allocation96_spill] sm:$0xff] }
 0x59a   :  { %3384 = vmatmul.f32.vlgmr.msrb.gmra.mxu2 %v12140_v9  ;;  %3361 = vmatpush.msrb.mxu1 %v11368_v18  ;;  %v16201_v18 = vld [vmem:[#allocation97_spill] sm:$0xff]  ;;  %v16218_v9 = vld [vmem:[#allocation118_spill] sm:$0xff] }
 0x59b   :  { %3401 = vmatpush.msrb.mxu3 %v11374_v50  ;;  %3553 = vmatpush.msra.mxu0 %v11380_v12  ;;  %v16202_v50 = vld [vmem:[#allocation88_spill] sm:$0xff]  ;;  %v16203_v12 = vld [vmem:[#allocation89_spill] sm:$0xff] }
 0x59c   :  { %3593 = vmatpush.msra.mxu2 %v11386_v0  ;;  %3362 = vmatpush.msrb.mxu1 %v11392_v2  ;;  %v16204_v0 = vld [vmem:[#allocation102_spill] sm:$0xff]  ;;  %v16205_v2 = vld [vmem:[#allocation103_spill] sm:$0xff] }
 0x59d   :  { %3402 = vmatpush.msrb.mxu3 %v11398_v25  ;;  %3554 = vmatpush.msra.mxu0 %v11404_v53  ;;  %v16206_v25 = vld [vmem:[#allocation94_spill] sm:$0xff]  ;;  %v16207_v53 = vld [vmem:[#allocation95_spill] sm:$0xff] }
 0x59e   :  { %3594 = vmatpush.msra.mxu2 %v11410_v52  ;;  %3363 = vmatpush.msrb.mxu1 %v11416_v55  ;;  %v16208_v52 = vld [vmem:[#allocation106_spill] sm:$0xff]  ;;  %v16209_v55 = vld [vmem:[#allocation107_spill] sm:$0xff] }
 0x59f   :  { %3403 = vmatpush.msrb.mxu3 %v11422_v58  ;;  %3364 = vmatmul.f32.vlgmr.msrb.gmra.mxu1 %v12169_v6  ;;  %v16210_v58 = vld [vmem:[#allocation100_spill] sm:$0xff] }
 0x5a0   :  { %3404 = vmatmul.f32.vlgmr.msrb.gmra.mxu3 %v12169_v6  ;;  %3555 = vmatpush.msra.mxu0 %v11430_v23  ;;  %v16211_v23 = vld [vmem:[#allocation101_spill] sm:$0xff]  ;;  %v16219_v6 = vld [vmem:[#allocation119_spill] sm:$0xff] }
 0x5a1   :  { %3595 = vmatpush.msra.mxu2 %v11436_v19  ;;  %3573 = vmatpush.msra.mxu1 %v11442_v36  ;;  %v16212_v19 = vld [vmem:[#allocation110_spill] sm:$0xff]  ;;  %v16213_v36 = vld [vmem:[#allocation111_spill] sm:$0xff] }
 0x5a2   :  { %3613 = vmatpush.msra.mxu3 %v11448_v20  ;;  %3556 = vmatpush.msra.mxu0 %v11454_v39  ;;  %v16214_v20 = vld [vmem:[#allocation112_spill] sm:$0xff]  ;;  %v16215_v39 = vld [vmem:[#allocation113_spill] sm:$0xff] }
 0x5a3   :  { %3596 = vmatpush.msra.mxu2 %v11460_v31  ;;  %3574 = vmatpush.msra.mxu1 %v11466_v57  ;;  %v16216_v31 = vld [vmem:[#allocation104_spill] sm:$0xff]  ;;  %v16217_v57 = vld [vmem:[#allocation105_spill] sm:$0xff] }
 0x5a4   :  { %3614 = vmatpush.msra.mxu3 %v16197_v43  ;;  %3557 = vmatpush.msra.mxu0 %v16198_v8  ;;  %v16220_v43 = vld [vmem:[#allocation108_spill] sm:$0xff]  ;;  %v16221_v8 = vld [vmem:[#allocation109_spill] sm:$0xff] }
 0x5a5   :  { %3597 = vmatpush.msra.mxu2 %v16199_v13  ;;  %3575 = vmatpush.msra.mxu1 %v16200_v54  ;;  %v16222_v13 = vld [vmem:[#allocation124_spill] sm:$0xff]  ;;  %v16223_v54 = vld [vmem:[#allocation125_spill] sm:$0xff] }
 0x5a6   :  { %3615 = vmatpush.msra.mxu3 %v16201_v18  ;;  %3558 = vmatpush.msra.mxu0 %v16202_v50  ;;  %v16224_v18 = vld [vmem:[#allocation116_spill] sm:$0xff]  ;;  %v16225_v50 = vld [vmem:[#allocation117_spill] sm:$0xff] }
 0x5a7   :  { %3598 = vmatpush.msra.mxu2 %v16203_v12  ;;  %3576 = vmatpush.msra.mxu1 %v16204_v0  ;;  %v16226_v12 = vld [vmem:[#allocation128_spill] sm:$0xff] }
 0x5a8   :  { %3616 = vmatpush.msra.mxu3 %v16205_v2  ;;  %3559 = vmatpush.msra.mxu0 %v16206_v25  ;;  %v16227_v0 = vld [vmem:[#allocation120_spill] sm:$0xff]  ;;  %v16228_v2 = vld [vmem:[#allocation129_spill] sm:$0xff] }
 0x5a9   :  { %3599 = vmatpush.msra.mxu2 %v16207_v53  ;;  %3577 = vmatpush.msra.mxu1 %v16208_v52  ;;  %v16229_v25 = vld [vmem:[#allocation121_spill] sm:$0xff]  ;;  %v16230_v53 = vld [vmem:[#allocation132_spill] sm:$0xff]  ;;  %v16231_v52 = vld [vmem:[#allocation126_spill] sm:$0xff] }
 0x5aa   :  { %3617 = vmatpush.msra.mxu3 %v16209_v55  ;;  %3560 = vmatpush.msra.mxu0 %v16210_v58  ;;  %v16232_v55 = vld [vmem:[#allocation133_spill] sm:$0xff]  ;;  %v16233_v58 = vld [vmem:[#allocation127_spill] sm:$0xff] }
 0x5ab   :  { %3600 = vmatpush.msra.mxu2 %v16211_v23  ;;  %3578 = vmatpush.msra.mxu1 %v16212_v19  ;;  %v16234_v23 = vld [vmem:[#allocation136_spill] sm:$0xff]  ;;  %v16235_v19 = vld [vmem:[#allocation130_spill] sm:$0xff] }
 0x5ac   :  { %3618 = vmatpush.msra.mxu3 %v16213_v36  ;;  %3561 = vmatpush.msra.mxu0 %v16214_v20  ;;  %v16236_v36 = vld [vmem:[#allocation137_spill] sm:$0xff]  ;;  %v16237_v20 = vld [vmem:[#allocation131_spill] sm:$0xff] }
 0x5ad   :  { %3601 = vmatpush.msra.mxu2 %v16215_v39  ;;  %3579 = vmatpush.msra.mxu1 %v16216_v31  ;;  %v16238_v39 = vld [vmem:[#allocation142_spill] sm:$0xff] }
 0x5ae   :  { %3619 = vmatpush.msra.mxu3 %v16217_v57  ;;  %3562 = vmatpush.msra.mxu0 %v16218_v9  ;;  %v16239_v31 = vld [vmem:[#allocation134_spill] sm:$0xff]  ;;  %v16240_v57 = vld [vmem:[#allocation143_spill] sm:$0xff] }
 0x5af   :  { %3602 = vmatpush.msra.mxu2 %v16219_v6  ;;  %3580 = vmatpush.msra.mxu1 %v16220_v43  ;;  %v16241_v9 = vld [vmem:[#allocation135_spill] sm:$0xff]  ;;  %v16242_v6 = vld [vmem:[#allocation140_spill] sm:$0xff]  ;;  %v16243_v43 = vld [vmem:[#allocation141_spill] sm:$0xff] }
 0x5b0   :  { %3620 = vmatpush.msra.mxu3 %v16221_v8  ;;  %3563 = vmatpush.msra.mxu0 %v16222_v13  ;;  %v16244_v8 = vld [vmem:[#allocation144_spill] sm:$0xff] }
 0x5b1   :  { %3603 = vmatpush.msra.mxu2 %v16223_v54  ;;  %3581 = vmatpush.msra.mxu1 %v16224_v18  ;;  %v16245_v13 = vld [vmem:[#allocation8_spill] sm:$0xff]  ;;  %v16246_v54 = vld [vmem:[#allocation6_spill] sm:$0xff]  ;;  %v16247_v18 = vld [vmem:[#allocation9_spill] sm:$0xff] }
 0x5b2   :  { %3621 = vmatpush.msra.mxu3 %v16225_v50  ;;  %3564 = vmatpush.msra.mxu0 %v16226_v12  ;;  %v16248_v50 = vld [vmem:[#allocation7_spill] sm:$0xff]  ;;  %v16249_v12 = vld [vmem:[#allocation38_spill] sm:$0xff] }
 0x5b3   :  { %3604 = vmatpush.msra.mxu2 %v16227_v0  ;;  %3582 = vmatpush.msra.mxu1 %v16228_v2  ;;  %v16250_v0 = vld [vmem:[#allocation39_spill] sm:$0xff] }
 0x5b4   :  { %3622 = vmatpush.msra.mxu3 %v16229_v25  ;;  %3565 = vmatpush.msra.mxu0 %v16230_v53  ;;  %v16251_v2 = vld [vmem:[#allocation47_spill] sm:$0xff]  ;;  %v16252_v25 = vld [vmem:[#allocation48_spill] sm:$0xff]  ;;  %v16253_v53 = vld [vmem:[#allocation161_spill] sm:$0xff] }
 0x5b5   :  { %3605 = vmatpush.msra.mxu2 %v16231_v52  ;;  %3583 = vmatpush.msra.mxu1 %v16232_v55  ;;  %v16254_v52 = vld [vmem:[#allocation162_spill] sm:$0xff]  ;;  %v16255_v55 = vld [vmem:[#allocation163_spill] sm:$0xff] }
 0x5b6   :  { %3623 = vmatpush.msra.mxu3 %v16233_v58  ;;  %3566 = vmatpush.msra.mxu0 %v16234_v23  ;;  %v16256_v58 = vld [vmem:[#allocation164_spill] sm:$0xff]  ;;  %v16257_v23 = vld [vmem:[#allocation165_spill] sm:$0xff] }
 0x5b7   :  { %3606 = vmatpush.msra.mxu2 %v16235_v19  ;;  %3584 = vmatpush.msra.mxu1 %v16236_v36  ;;  %v16258_v19 = vld [vmem:[#allocation166_spill] sm:$0xff]  ;;  %v16259_v36 = vld [vmem:[#allocation167_spill] sm:$0xff] }
 0x5b8   :  { %3624 = vmatpush.msra.mxu3 %v16237_v20  ;;  %3567 = vmatpush.msra.mxu0 %v16238_v39  ;;  %v16260_v20 = vld [vmem:[#allocation168_spill] sm:$0xff]  ;;  %v16261_v39 = vld [vmem:[#allocation169_spill] sm:$0xff] }
 0x5b9   :  { %3607 = vmatpush.msra.mxu2 %v16239_v31  ;;  %3585 = vmatpush.msra.mxu1 %v16240_v57  ;;  %v16262_v31 = vld [vmem:[#allocation170_spill] sm:$0xff]  ;;  %v16263_v57 = vld [vmem:[#allocation171_spill] sm:$0xff] }
 0x5ba   :  { %3625 = vmatpush.msra.mxu3 %v16241_v9  ;;  %3568 = vmatpush.msra.mxu0 %v16242_v6  ;;  %v16264_v9 = vld [vmem:[#allocation172_spill] sm:$0xff]  ;;  %v16265_v6 = vld [vmem:[#allocation173_spill] sm:$0xff] }
 0x5bb   :  { %3608 = vmatpush.msra.mxu2 %v16243_v43  ;;  %3586 = vmatpush.msra.mxu1 %v16246_v54  ;;  %v16266_v43 = vld [vmem:[#allocation174_spill] sm:$0xff]  ;;  %v16269_v54 = vld [vmem:[#allocation177_spill] sm:$0xff] }
 0x5bc   :  { %3633 = vmatpush.msrb.mxu0 %v16244_v8  ;;  %3626 = vmatpush.msra.mxu3 %v16247_v18  ;;  %v16267_v8 = vld [vmem:[#allocation175_spill] sm:$0xff]  ;;  %v16270_v18 = vld [vmem:[#allocation178_spill] sm:$0xff] }
 0x5bd   :  { %3673 = vmatpush.msrb.mxu2 %v16245_v13  ;;  %3587 = vmatpush.msra.mxu1 %v16250_v0  ;;  %v16268_v13 = vld [vmem:[#allocation176_spill] sm:$0xff]  ;;  %v16273_v0 = vld [vmem:[#allocation17_spill] sm:$0xff] }
 0x5be   :  { %3634 = vmatpush.msrb.mxu0 %v16248_v50  ;;  %3627 = vmatpush.msra.mxu3 %v16251_v2  ;;  %v16271_v50 = vld [vmem:[#allocation16_spill] sm:$0xff] }
 0x5bf   :  { %3674 = vmatpush.msrb.mxu2 %v16249_v12  ;;  %3588 = vmatpush.msra.mxu1 %v16254_v52  ;;  %v16272_v12 = vld [vmem:[#allocation14_spill] sm:$0xff]  ;;  %v12920_v2 = vld [vmem:[%s14463_s3 + $0x218] sm:$0xff] }
 0x5c0   :  { %3635 = vmatpush.msrb.mxu0 %v16252_v25  ;;  %3628 = vmatpush.msra.mxu3 %v16255_v55  ;;  %16274 = vst [vmem:[#allocation56_spill] sm:$0xff] %v12920_v2  ;;  %v16275_v25 = vld [vmem:[#allocation15_spill] sm:$0xff]  ;;  %v16277_v52 = vld [vmem:[#allocation74_spill] sm:$0xff]  ;;  %v12934_v55 = vld [vmem:[%s14463_s3 + $0x1d8] sm:$0xff] }
 0x5c1   :  { %3675 = vmatpush.msrb.mxu2 %v16253_v53  ;;  %3653 = vmatpush.msrb.mxu1 %v16257_v23  ;;  %v12927_v53 = vld [vmem:[%s14463_s3 + $0x1d0] sm:$0xff]  ;;  %16278 = vst [vmem:[#allocation68_spill] sm:$0xff] %v12934_v55 }
 0x5c2   :  { %3636 = vmatpush.msrb.mxu0 %v16256_v58  ;;  %3693 = vmatpush.msrb.mxu3 %v16259_v36  ;;  %16276 = vst [vmem:[#allocation57_spill] sm:$0xff] %v12927_v53  ;;  %v16279_v58 = vld [vmem:[#allocation75_spill] sm:$0xff]  ;;  %v12948_v36 = vld [vmem:[%s14463_s3 + $0x198] sm:$0xff] }
 0x5c3   :  { %3676 = vmatpush.msrb.mxu2 %v16258_v19  ;;  %3654 = vmatpush.msrb.mxu1 %v16261_v39  ;;  %v12941_v23 = vld [vmem:[%s14463_s3 + $0x190] sm:$0xff]  ;;  %v16281_v19 = vld [vmem:[#allocation90_spill] sm:$0xff]  ;;  %16282 = vst [vmem:[#allocation60_spill] sm:$0xff] %v12948_v36 }
 0x5c4   :  { %3637 = vmatpush.msrb.mxu0 %v16260_v20  ;;  %3694 = vmatpush.msrb.mxu3 %v16263_v57  ;;  %16280 = vst [vmem:[#allocation69_spill] sm:$0xff] %v12941_v23  ;;  %v16283_v20 = vld [vmem:[#allocation91_spill] sm:$0xff]  ;;  %v12962_v57 = vld [vmem:[%s14463_s3 + $0x158] sm:$0xff] }
 0x5c5   :  { %3677 = vmatpush.msrb.mxu2 %v16262_v31  ;;  %3655 = vmatpush.msrb.mxu1 %v16265_v6  ;;  %v12955_v39 = vld [vmem:[%s14463_s3 + $0x150] sm:$0xff]  ;;  %16286 = vst [vmem:[#allocation72_spill] sm:$0xff] %v12962_v57 }
 0x5c6   :  { %3638 = vmatpush.msrb.mxu0 %v16264_v9  ;;  %3695 = vmatpush.msrb.mxu3 %v16267_v8  ;;  %16284 = vst [vmem:[#allocation61_spill] sm:$0xff] %v12955_v39  ;;  %v16285_v31 = vld [vmem:[#allocation179_spill] sm:$0xff]  ;;  %v16287_v9 = vld [vmem:[#allocation180_spill] sm:$0xff] }
 0x5c7   :  { %3678 = vmatpush.msrb.mxu2 %v16266_v43  ;;  %3656 = vmatpush.msrb.mxu1 %v16269_v54  ;;  %v12969_v6 = vld [vmem:[%s14463_s3 + $0x110] sm:$0xff]  ;;  %v12981_v8 = vld [vmem:[%s14463_s3 + $0x118] sm:$0xff] }
 0x5c8   :  { %3639 = vmatpush.msrb.mxu0 %v16268_v13  ;;  %3696 = vmatpush.msrb.mxu3 %v16271_v50  ;;  %16288 = vst [vmem:[#allocation73_spill] sm:$0xff] %v12969_v6  ;;  %v12975_v43 = vld [vmem:[%s14463_s3 + $0x5d0] sm:$0xff]  ;;  %v12987_v13 = vld [vmem:[%s14463_s3 + $0x5d8] sm:$0xff] }
 0x5c9   :  { %3679 = vmatpush.msrb.mxu2 %v16270_v18  ;;  %3657 = vmatpush.msrb.mxu1 %v16273_v0  ;;  %16289 = vst [vmem:[#allocation64_spill] sm:$0xff] %v12975_v43  ;;  %v12993_v54 = vld [vmem:[%s14463_s3 + $0xd0] sm:$0xff]  ;;  %v13005_v50 = vld [vmem:[%s14463_s3 + $0xd8] sm:$0xff] }
 0x5ca   :  { %3640 = vmatpush.msrb.mxu0 %v16272_v12  ;;  %3697 = vmatpush.msrb.mxu3 %v16275_v25  ;;  %16290 = vst [vmem:[#allocation65_spill] sm:$0xff] %v12981_v8  ;;  %v12999_v18 = vld [vmem:[%s14463_s3 + $0x590] sm:$0xff]  ;;  %v13011_v12 = vld [vmem:[%s14463_s3 + $0x598] sm:$0xff] }
 0x5cb   :  { %3680 = vmatpush.msrb.mxu2 %v12920_v2  ;;  %3658 = vmatpush.msrb.mxu1 %v16277_v52  ;;  %16291 = vst [vmem:[#allocation78_spill] sm:$0xff] %v12987_v13  ;;  %v13017_v0 = vld [vmem:[%s14463_s3 + $0x90] sm:$0xff]  ;;  %v13029_v52 = vld [vmem:[%s14463_s3 + $0x98] sm:$0xff] }
 0x5cc   :  { %3641 = vmatpush.msrb.mxu0 %v12927_v53  ;;  %3698 = vmatpush.msrb.mxu3 %v16279_v58  ;;  %16292 = vst [vmem:[#allocation79_spill] sm:$0xff] %v12993_v54  ;;  %v13023_v25 = vld [vmem:[%s14463_s3 + $0x550] sm:$0xff]  ;;  %v13035_v58 = vld [vmem:[%s14463_s3 + $0x558] sm:$0xff] }
 0x5cd   :  { %3681 = vmatpush.msrb.mxu2 %v12934_v55  ;;  %3659 = vmatpush.msrb.mxu1 %v16281_v19  ;;  %16293 = vst [vmem:[#allocation70_spill] sm:$0xff] %v12999_v18  ;;  %v13041_v19 = vld [vmem:[%s14463_s3 + $0x50] sm:$0xff]  ;;  %v16319_v55 = vld [vmem:[#allocation25_spill] sm:$0xff] }
 0x5ce   :  { %3642 = vmatpush.msrb.mxu0 %v12941_v23  ;;  %3699 = vmatpush.msrb.mxu3 %v16283_v20  ;;  %16294 = vst [vmem:[#allocation12_spill] sm:$0xff] %v13005_v50  ;;  %v13047_v20 = vld [vmem:[%s14463_s3 + $0x510] sm:$0xff] }
 0x5cf   :  { %3682 = vmatpush.msrb.mxu2 %v12948_v36  ;;  %3660 = vmatpush.msrb.mxu1 %v16285_v31  ;;  %16295 = vst [vmem:[#allocation10_spill] sm:$0xff] %v13011_v12  ;;  %v13053_v31 = vld [vmem:[%s14463_s3 + $0x58] sm:$0xff] }
 0x5d0   :  { %3643 = vmatpush.msrb.mxu0 %v12955_v39  ;;  %3700 = vmatpush.msrb.mxu3 %v16287_v9  ;;  %16296 = vst [vmem:[#allocation13_spill] sm:$0xff] %v13017_v0  ;;  %v13059_v9 = vld [vmem:[%s14463_s3 + $0x518] sm:$0xff] }
 0x5d1   :  { %3683 = vmatpush.msrb.mxu2 %v12962_v57  ;;  %3661 = vmatpush.msrb.mxu1 %v12975_v43  ;;  %16297 = vst [vmem:[#allocation11_spill] sm:$0xff] %v13023_v25  ;;  %v16316_v43 = vld [vmem:[#allocation154_spill] sm:$0xff] }
 0x5d2   :  { %3644 = vmatpush.msrb.mxu0 %v12969_v6  ;;  %3701 = vmatpush.msrb.mxu3 %v12987_v13  ;;  %16298 = vst [vmem:[#allocation50_spill] sm:$0xff] %v13029_v52  ;;  %v16317_v6 = vld [vmem:[#allocation22_spill] sm:$0xff] }
 0x5d3   :  { %3684 = vmatpush.msrb.mxu2 %v12981_v8  ;;  %3662 = vmatpush.msrb.mxu1 %v12999_v18  ;;  %16299 = vst [vmem:[#allocation51_spill] sm:$0xff] %v13035_v58  ;;  %v16315_v18 = vld [vmem:[#allocation24_spill] sm:$0xff]  ;;  %v133_v57 = vadd.f32 %v16317_v6, %v16316_v43  ;;  %v16322_v6 = vld [vmem:[#allocation157_spill] sm:$0xff] }
 0x5d4   :  { %3645 = vmatpush.msrb.mxu0 %v12993_v54  ;;  %3702 = vmatpush.msrb.mxu3 %v13011_v12  ;;  %16300 = vst [vmem:[#allocation66_spill] sm:$0xff] %v13041_v19 }
 0x5d5   :  { %3685 = vmatpush.msrb.mxu2 %v13005_v50  ;;  %3663 = vmatpush.msrb.mxu1 %v13023_v25  ;;  %16301 = vst [vmem:[#allocation67_spill] sm:$0xff] %v13047_v20  ;;  %v3145_v25 = vpop.f32.mrf.mxu2  ;;  %v16314_v50 = vld [vmem:[#allocation153_spill] sm:$0xff] }
 0x5d6   :  { %3646 = vmatpush.msrb.mxu0 %v13017_v0  ;;  %3703 = vmatpush.msrb.mxu3 %v13035_v58  ;;  %16302 = vst [vmem:[#allocation71_spill] sm:$0xff] %v13053_v31  ;;  %v3105_v58 = vpop.f32.mrf.mxu0  ;;  %v215_v54 = vadd.f32 %v16315_v18, %v16314_v50 }
 0x5d7   :  { %3686 = vmatpush.msrb.mxu2 %v13029_v52  ;;  %3664 = vmatpush.msrb.mxu1 %v13047_v20  ;;  %16303 = vst [vmem:[#allocation82_spill] sm:$0xff] %v13059_v9  ;;  %v13071_v20 = vld [vmem:[%s14463_s3 + $0x4d0] sm:$0xff]  ;;  %v3165_v52 = vpop.f32.mrf.mxu3 }
 0x5d8   :  { %3647 = vmatpush.msrb.mxu0 %v13041_v19  ;;  %3704 = vmatpush.msrb.mxu3 %v13059_v9  ;;  %v13065_v19 = vld [vmem:[%s14463_s3 + $0x10] sm:$0xff]  ;;  %16305 = vst [vmem:[#allocation76_spill] sm:$0xff] %v13071_v20  ;;  %v13083_v9 = vld [vmem:[%s14463_s3 + $0x4d8] sm:$0xff]  ;;  %v3166_v15 = vadd.f32 %v3165_v52, %v3145_v25 }
 0x5d9   :  { %3687 = vmatpush.msrb.mxu2 %v13053_v31  ;;  %16304 = vst [vmem:[#allocation83_spill] sm:$0xff] %v13065_v19  ;;  %3665 = vmatpush.msrb.mxu1 %v13071_v20  ;;  %v13077_v31 = vld [vmem:[%s14463_s3 + $0x18] sm:$0xff] }
 0x5da   :  { %3648 = vmatpush.msrb.mxu0 %v13065_v19  ;;  %16306 = vst [vmem:[#allocation77_spill] sm:$0xff] %v13077_v31  ;;  %3705 = vmatpush.msrb.mxu3 %v13083_v9  ;;  %v13089_v19 = vld [vmem:[%s14463_s3 + $0x490] sm:$0xff]  ;;  %v13095_v20 = vld [vmem:[%s14463_s3 + $0x498] sm:$0xff] }
 0x5db   :  { %3688 = vmatpush.msrb.mxu2 %v13077_v31  ;;  %16307 = vst [vmem:[#allocation86_spill] sm:$0xff] %v13083_v9  ;;  %3666 = vmatpush.msrb.mxu1 %v13089_v19  ;;  %v13101_v31 = vld [vmem:[%s14463_s3 + $0x450] sm:$0xff]  ;;  %v13107_v9 = vld [vmem:[%s14463_s3 + $0x458] sm:$0xff] }
 0x5dc   :  { %16308 = vst [vmem:[#allocation87_spill] sm:$0xff] %v13089_v19  ;;  %3706 = vmatpush.msrb.mxu3 %v13095_v20  ;;  %v13113_v19 = vld [vmem:[%s14463_s3 + $0x410] sm:$0xff] }
 0x5dd   :  { %16309 = vst [vmem:[#allocation80_spill] sm:$0xff] %v13095_v20  ;;  %3667 = vmatpush.msrb.mxu1 %v13101_v31  ;;  %v13119_v20 = vld [vmem:[%s14463_s3 + $0x418] sm:$0xff]  ;;  %v3225_v39 = vpop.f32.mrf.mxu2 }
 0x5de   :  { %16310 = vst [vmem:[#allocation81_spill] sm:$0xff] %v13101_v31  ;;  %3707 = vmatpush.msrb.mxu3 %v13107_v9  ;;  %v3125_v31 = vpop.f32.mrf.mxu1 }
 0x5df   :  { %16311 = vst [vmem:[#allocation92_spill] sm:$0xff] %v13107_v9  ;;  %3668 = vmatpush.msrb.mxu1 %v13113_v19  ;;  %v3185_v9 = vpop.f32.mrf.mxu0  ;;  %v3126_v13 = vadd.f32 %v3125_v31, %v3105_v58  ;;  %v3245_v8 = vpop.f32.mrf.mxu3 }
 0x5e0   :  { %16312 = vst [vmem:[#allocation20_spill] sm:$0xff] %v13113_v19  ;;  %3708 = vmatpush.msrb.mxu3 %v13119_v20  ;;  %v3246_v36 = vadd.f32 %v3245_v8, %v3225_v39  ;;  %v16323_v39 = vld [vmem:[#allocation122_spill] sm:$0xff] }
 0x5e1   :  { %16313 = vst [vmem:[#allocation18_spill] sm:$0xff] %v13119_v20  ;;  %v3408_v23 = vadd.f32 %v3126_v13, %v133_v57  ;;  %v16318_v20 = vld [vmem:[#allocation155_spill] sm:$0xff]  ;;  %v297_v57 = vadd.f32 %v16323_v39, %v16322_v6  ;;  %v16327_v6 = vld [vmem:[#allocation138_spill] sm:$0xff] }
 0x5e2   :  { %v256_v53 = vadd.f32 %v16319_v55, %v16318_v20 }
 0x5e3   :  { %v4602_v5 = vmul.f32 -1.442695, %v3408_v23 }
 0x5e4   :  { %v3411_v3 = vadd.f32 %v3246_v36, %v256_v53 }
 0x5e6   :  { %v3205_v0 = vpop.f32.mrf.mxu1 }
 0x5e7   :  { %v3206_v12 = vadd.f32 %v3205_v0, %v3185_v9  ;;  %v16321_v0 = vld [vmem:[#allocation23_spill] sm:$0xff] }
 0x5e8   :  { %v174_v9 = vadd.f32 %v16321_v0, %v16320_v45 }
 0x5e9   :  { %v3410_v19 = vadd.f32 %v3206_v12, %v215_v54  ;;  %v3265_v54 = vpop.f32.mrf.mxu0  ;;  %v4605_v12 = vmul.f32 -1.442695, %v3411_v3  ;;  %v3305_v53 = vpop.f32.mrf.mxu2 }
 0x5ea   :  { %v3409_v58 = vadd.f32 %v3166_v15, %v174_v9  ;;  %v16325_v15 = vld [vmem:[#allocation123_spill] sm:$0xff] }
 0x5eb   :  { %v4604_v2 = vmul.f32 -1.442695, %v3410_v19 }
 0x5ec   :  { %v4603_v8 = vmul.f32 -1.442695, %v3409_v58 }
 0x5ed   :  { %4782 = vpow2.f32 %v4604_v2  ;;  %v16324_v2 = vld [vmem:[#allocation158_spill] sm:$0xff] }
 0x5ee   :  { %4784 = vpow2.f32 %v4602_v5  ;;  %v338_v19 = vadd.f32 %v16325_v15, %v16324_v2 }
 0x5ef   :  { %v3285_v18 = vpop.f32.mrf.mxu1  ;;  %4786 = vpow2.f32 %v4605_v12 }
 0x5f0   :  { %v3286_v31 = vadd.f32 %v3285_v18, %v3265_v54  ;;  %4788 = vpow2.f32 %v4603_v8 }
 0x5f2   :  { %v3412_v55 = vadd.f32 %v3286_v31, %v297_v57 }
 0x5f3   :  { %v4783_v13 = vpop.eup %4782 }
 0x5f4   :  { %v4785_v52 = vpop.eup %4784  ;;  %v13132_v23 = vadd.f32 1.0, %v4783_v13  ;;  %v4606_v3 = vmul.f32 -1.442695, %v3412_v55 }
 0x5f5   :  { %v4787_v0 = vpop.eup %4786  ;;  %v3434_v5 = vadd.f32 1.0, %v4785_v52 }
 0x5f6   :  { %v3325_v25 = vpop.f32.mrf.mxu3  ;;  %4790 = vrcp.f32 %v13132_v23  ;;  %v4789_v18 = vpop.eup %4788  ;;  %v13137_v58 = vadd.f32 1.0, %v4787_v0  ;;  %v3481_v34 = vand.u32 2147483648, %v13132_v23  ;;  %vm3475_vm11 = vweird.f32 %v13132_v23 }
 0x5f7   :  { %v3326_v36 = vadd.f32 %v3325_v25, %v3305_v53  ;;  %4792 = vpow2.f32 %v4606_v3  ;;  %v13139_v12 = vadd.f32 1.0, %v4789_v18  ;;  %v3451_v50 = vand.u32 2147483648, %v3434_v5 }
 0x5f8   :  { %4794 = vrcp.f32 %v3434_v5  ;;  %vm3445_vm13 = vweird.f32 %v3434_v5  ;;  %vm3490_vm3 = vweird.f32 %v13137_v58 }
 0x5f9   :  { %v3413_v9 = vadd.f32 %v3326_v36, %v338_v19  ;;  %4796 = vrcp.f32 %v13137_v58  ;;  %vm3460_vm0 = vweird.f32 %v13139_v12 }
 0x5fb   :  { %v4607_v54 = vmul.f32 -1.442695, %v3413_v9 }
 0x5fc   :  { %v13141_v31 = vpop.eup %4790 }
 0x5fd   :  { %v4793_v39 = vpop.eup %4792  ;;  %4798 = vpow2.f32 %v4607_v54  ;;  %v3471_v8 = vmul.f32 %v13141_v31, %v13132_v23  ;;  %vm3476_vm9 = vweird.f32 %v13141_v31 }
 0x5fe   :  { %v13144_v57 = vpop.eup %4794  ;;  %4800 = vrcp.f32 %v13139_v12  ;;  %v13149_v13 = vadd.f32 1.0, %v4793_v39  ;;  %vm13182_vm12 = vmor %vm3475_vm11, %vm3476_vm9 }
 0x5ff   :  { %v13151_v55 = vpop.eup %4796  ;;  %v3441_v25 = vmul.f32 %v13144_v57, %v3434_v5  ;;  %v3472_v36 = vsub.f32 1.0, %v3471_v8  ;;  %vm3446_vm10 = vweird.f32 %v13144_v57 }
 0x600   :  { %4802 = vrcp.f32 %v13149_v13  ;;  %v3486_v19 = vmul.f32 %v13151_v55, %v13137_v58  ;;  %vm13198_vm15 = vmor %vm3445_vm13, %vm3446_vm10  ;;  %vm3491_vm1 = vweird.f32 %v13151_v55  ;;  %vm3505_vm10 = vweird.f32 %v13149_v13 }
 0x601   :  { %v3442_v15 = vsub.f32 1.0, %v3441_v25  ;;  %v3473_v9 = vmul.f32 %v13141_v31, %v3472_v36  ;;  %v16326_v25 = vld [vmem:[#allocation159_spill] sm:$0xff]  ;;  %vm13215_vm5 = vmor %vm3490_vm3, %vm3491_vm1 }
 0x602   :  { %v3487_v54 = vsub.f32 1.0, %v3486_v19  ;;  %v379_v45 = vadd.f32 %v16327_v6, %v16326_v25 }
 0x603   :  { %v4799_v53 = vpop.eup %4798  ;;  %v3443_v2 = vmul.f32 %v13144_v57, %v3442_v15  ;;  %v3474_v36 = vadd.f32 %v13141_v31, %v3473_v9 }
 0x604   :  { %v13155_v52 = vpop.eup %4800  ;;  %v13159_v3 = vadd.f32 1.0, %v4799_v53  ;;  %v3449_v53 = vand.u32 2147483647, %v3434_v5  ;;  %v3488_v6 = vmul.f32 %v13151_v55, %v3487_v54  ;;  %v3452_v54 = vor.u32 1.1754944e-38, %v3451_v50 }
 0x605   :  { %v3456_v0 = vmul.f32 %v13155_v52, %v13139_v12  ;;  %v3444_v15 = vadd.f32 %v13144_v57, %v3443_v2  ;;  %vm3461_vm4 = vweird.f32 %v13155_v52 }
 0x606   :  { %v13164_v18 = vpop.eup %4802  ;;  %4804 = vrcp.f32 %v13159_v3  ;;  %vm13188_vm14 = vcmp.eq.f32.partialorder %v3449_v53, 8.507059e+37  ;;  %vm13230_vm6 = vmor %vm3460_vm0, %vm3461_vm4 }
 0x607   :  { %v3457_v43 = vsub.f32 1.0, %v3456_v0  ;;  %v3501_v19 = vmul.f32 %v13164_v18, %v13149_v13  ;;  %v3479_v0 = vand.u32 2147483647, %v13132_v23  ;;  %v3478_v23 = vsel %vm13182_vm12, %v13141_v31, %v3474_v36 }
 0x608   :  { %v3448_v50 = vsel %vm13198_vm15, %v13144_v57, %v3444_v15  ;;  %vm3506_vm8 = vweird.f32 %v13164_v18 }
 0x609   :  { %v3502_v41 = vsub.f32 1.0, %v3501_v19  ;;  %vm3480_vm2 = vcmp.eq.f32.partialorder %v3479_v0, 8.507059e+37  ;;  %v3494_v19 = vand.u32 2147483647, %v13137_v58  ;;  %v3453_v15 = vsel %vm13188_vm14, %v3452_v54, %v3448_v50  ;;  %vm3507_vm11 = vmor %vm3505_vm10, %vm3506_vm8 }
 0x60a   :  { %v3509_v50 = vand.u32 2147483647, %v13149_v13  ;;  %vm3520_vm14 = vweird.f32 %v13159_v3 }
 0x60b   :  { %vm3495_vm7 = vcmp.eq.f32.partialorder %v3494_v19, 8.507059e+37 }
 0x60c   :  { %vm3510_vm12 = vcmp.eq.f32.partialorder %v3509_v50, 8.507059e+37  ;;  %v16378_v50 = vld [vmem:[#allocation219_spill] sm:$0xff] }
 0x616   :  { %v3345_v39 = vpop.f32.mrf.mxu0 }
 0x61c   :  { %v3365_v8 = vpop.f32.mrf.mxu1 }
 0x61d   :  { %v3366_v20 = vadd.f32 %v3365_v8, %v3345_v39  ;;  %v16328_v39 = vld [vmem:[#allocation160_spill] sm:$0xff]  ;;  %v16329_v8 = vld [vmem:[#allocation139_spill] sm:$0xff]  ;;  %v3385_v2 = vpop.f32.mrf.mxu2 }
 0x61e   :  { %v420_v25 = vadd.f32 %v16329_v8, %v16328_v39  ;;  %v3458_v8 = vmul.f32 %v13155_v52, %v3457_v43  ;;  %v3482_v39 = vor.u32 1.1754944e-38, %v3481_v34  ;;  %v3489_v43 = vadd.f32 %v13151_v55, %v3488_v6 }
 0x61f   :  { %v3414_v24 = vadd.f32 %v3366_v20, %v379_v45  ;;  %v13186_v45 = vpop.eup %4804  ;;  %v3496_v34 = vand.u32 2147483648, %v13137_v58  ;;  %v3503_v6 = vmul.f32 %v13164_v18, %v3502_v41  ;;  %v16371_v41 = vld [vmem:[#allocation212_spill] sm:$0xff] }
 0x620   :  { %v3516_v31 = vmul.f32 %v13186_v45, %v13159_v3  ;;  %v3483_v53 = vsel %vm3480_vm2, %v3482_v39, %v3478_v23  ;;  %v3464_v23 = vand.u32 2147483647, %v13139_v12  ;;  %v3493_v58 = vsel %vm13215_vm5, %v13151_v55, %v3489_v43 }
 0x621   :  { %4806 = vtanh.f32 %v3414_v24  ;;  %v3532_v0 = vmul.f32 %v3483_v53, %v12118_v28  ;;  %v3504_v54 = vadd.f32 %v13164_v18, %v3503_v6  ;;  %vm3521_vm13 = vweird.f32 %v13186_v45 }
 0x622   :  { %vm3465_vm9 = vcmp.eq.f32.partialorder %v3464_v23, 8.507059e+37  ;;  %vm3522_vm15 = vmor %vm3520_vm14, %vm3521_vm13  ;;  %v16367_v23 = vld [vmem:[#allocation208_spill] sm:$0xff] }
 0x623   :  { %v3405_v27 = vpop.f32.mrf.mxu3  ;;  %v3508_v53 = vsel %vm3507_vm11, %v13164_v18, %v3504_v54  ;;  %v16373_v54 = vld [vmem:[#allocation214_spill] sm:$0xff] }
 0x624   :  { %v3406_v5 = vadd.f32 %v3405_v27, %v3385_v2  ;;  %v3459_v27 = vadd.f32 %v13155_v52, %v3458_v8  ;;  %v3497_v2 = vor.u32 1.1754944e-38, %v3496_v34  ;;  %v3517_v8 = vsub.f32 1.0, %v3516_v31 }
 0x626   :  { %v3415_v36 = vadd.f32 %v3406_v5, %v420_v25  ;;  %v3466_v25 = vand.u32 2147483648, %v13139_v12  ;;  %v3463_v28 = vsel %vm13230_vm6, %v13155_v52, %v3459_v27  ;;  %v3498_v24 = vsel %vm3495_vm7, %v3497_v2, %v3493_v58  ;;  %v16368_v58 = vld [vmem:[#allocation209_spill] sm:$0xff]  ;;  %v16369_v2 = vld [vmem:[#allocation210_spill] sm:$0xff] }
 0x627   :  { %v4807_v9 = vpop.eup %4806  ;;  %v3511_v5 = vand.u32 2147483648, %v13149_v13  ;;  %v3518_v43 = vmul.f32 %v13186_v45, %v3517_v8  ;;  %v3533_v34 = vmul.f32 %v3498_v24, %v12132_v32  ;;  %v3526_v13 = vand.u32 2147483648, %v13159_v3  ;;  %v16370_v8 = vld [vmem:[#allocation211_spill] sm:$0xff]  ;;  %v16375_v24 = vld [vmem:[#allocation216_spill] sm:$0xff] }
 0x628   :  { %4808 = vtanh.f32 %v3415_v36  ;;  %v3534_v39 = vmul.f32 %v4807_v9, %v3453_v15  ;;  %v3467_v55 = vor.u32 1.1754944e-38, %v3466_v25  ;;  %v3524_v32 = vand.u32 2147483647, %v13159_v3 }
 0x629   :  { %v3512_v36 = vor.u32 1.1754944e-38, %v3511_v5  ;;  %v3519_v19 = vadd.f32 %v13186_v45, %v3518_v43  ;;  %v3527_v15 = vor.u32 1.1754944e-38, %v3526_v13  ;;  %v16376_v5 = vld [vmem:[#allocation217_spill] sm:$0xff]  ;;  %v16379_v43 = vld [vmem:[#allocation220_spill] sm:$0xff] }
 0x62a   :  { %v13234_v20 = vadd.f32 %v3534_v39, %v3532_v0  ;;  %v3468_v52 = vsel %vm3465_vm9, %v3467_v55, %v3463_v28  ;;  %vm3525_vm0 = vcmp.eq.f32.partialorder %v3524_v32, 8.507059e+37  ;;  %v16366_v39 = vld [vmem:[#allocation207_spill] sm:$0xff]  ;;  %v16372_v28 = vld [vmem:[#allocation213_spill] sm:$0xff]  ;;  %v16389_v32 = vld [vmem:[#allocation230_spill] sm:$0xff] }
 0x62b   :  { %v3513_v57 = vsel %vm3510_vm12, %v3512_v36, %v3508_v53  ;;  %v3523_v18 = vsel %vm3522_vm15, %v13186_v45, %v3519_v19  ;;  %v16365_v45 = vld [vmem:[#allocation206_spill] sm:$0xff]  ;;  %v16374_v55 = vld [vmem:[#allocation215_spill] sm:$0xff]  ;;  %v16383_v53 = vld [vmem:[#allocation224_spill] sm:$0xff] }
 0x62c   :  { %4810 = vtanh.f32 %v13234_v20  ;;  %v3528_v0 = vsel %vm3525_vm0, %v3527_v15, %v3523_v18  ;;  %v16384_v36 = vld [vmem:[#allocation225_spill] sm:$0xff]  ;;  %v16385_v19 = vld [vmem:[#allocation226_spill] sm:$0xff]  ;;  %v16390_v18 = vld [vmem:[#allocation231_spill] sm:$0xff] }
 0x62d   :  { %v16388_v13 = vld [vmem:[#allocation229_spill] sm:$0xff]  ;;  %v16391_v15 = vld [vmem:[#allocation232_spill] sm:$0xff] }
 0x62e   :  { %v4809_v12 = vpop.eup %4808 }
 0x62f   :  { %v3535_v31 = vmul.f32 %v4809_v12, %v3468_v52  ;;  %v16377_v12 = vld [vmem:[#allocation218_spill] sm:$0xff]  ;;  %v16380_v52 = vld [vmem:[#allocation221_spill] sm:$0xff] }
 0x631   :  { %v13248_v27 = vadd.f32 %v3535_v31, %v3533_v34  ;;  %v16381_v34 = vld [vmem:[#allocation222_spill] sm:$0xff]  ;;  %v16382_v31 = vld [vmem:[#allocation223_spill] sm:$0xff] }
 0x632   :  { %v4811_v9 = vpop.eup %4810 }
 0x633   :  { %4812 = vtanh.f32 %v13248_v27  ;;  %v13256_v6 = vmul.f32 %v4811_v9, %v3513_v57  ;;  %v16386_v9 = vld [vmem:[#allocation227_spill] sm:$0xff]  ;;  %v16387_v57 = vld [vmem:[#allocation228_spill] sm:$0xff] }
 0x635   :  { %3569 = vmatmul.f32.vlgmr.msra.gmra.mxu0 %v13256_v6  ;;  %3609 = vmatmul.f32.vlgmr.msra.gmra.mxu2 %v13256_v6 }
 0x636   :  { %3713 = vmatpush.msra.mxu0 %v12148_v49  ;;  %3753 = vmatpush.msra.mxu2 %v12154_v10  ;;  %v16340_v49 = vld [vmem:[#allocation181_spill] sm:$0xff]  ;;  %v16341_v10 = vld [vmem:[#allocation182_spill] sm:$0xff] }
 0x638   :  { %3714 = vmatpush.msra.mxu0 %v12160_v30  ;;  %3754 = vmatpush.msra.mxu2 %v12166_v60  ;;  %v16342_v30 = vld [vmem:[#allocation183_spill] sm:$0xff]  ;;  %v16343_v60 = vld [vmem:[#allocation184_spill] sm:$0xff] }
 0x639   :  { %v4813_v25 = vpop.eup %4812 }
 0x63a   :  { %v13265_v3 = vmul.f32 %v4813_v25, %v3528_v0  ;;  %3715 = vmatpush.msra.mxu0 %v12174_v7  ;;  %3755 = vmatpush.msra.mxu2 %v12180_v47  ;;  %v16344_v7 = vld [vmem:[#allocation185_spill] sm:$0xff]  ;;  %v16345_v47 = vld [vmem:[#allocation186_spill] sm:$0xff] }
 0x63b   :  { %v16392_v25 = vld [vmem:[#allocation233_spill] sm:$0xff]  ;;  %v16393_v0 = vld [vmem:[#allocation234_spill] sm:$0xff] }
 0x63c   :  { %3589 = vmatmul.f32.vlgmr.msra.gmra.mxu1 %v13265_v3  ;;  %3629 = vmatmul.f32.vlgmr.msra.gmra.mxu3 %v13265_v3 }
 0x63d   :  { %3716 = vmatpush.msra.mxu0 %v12188_v46  ;;  %3733 = vmatpush.msra.mxu1 %v12194_v51  ;;  %v16346_v46 = vld [vmem:[#allocation187_spill] sm:$0xff]  ;;  %v16347_v51 = vld [vmem:[#allocation188_spill] sm:$0xff] }
 0x63e   :  { %3756 = vmatpush.msra.mxu2 %v12200_v62  ;;  %3773 = vmatpush.msra.mxu3 %v12206_v33  ;;  %v16348_v62 = vld [vmem:[#allocation189_spill] sm:$0xff]  ;;  %v16349_v33 = vld [vmem:[#allocation190_spill] sm:$0xff] }
 0x63f   :  { %3649 = vmatmul.f32.vlgmr.msrb.gmra.mxu0 %v13256_v6  ;;  %3689 = vmatmul.f32.vlgmr.msrb.gmra.mxu2 %v13256_v6 }
 0x640   :  { %3717 = vmatpush.msra.mxu0 %v12214_v59  ;;  %3734 = vmatpush.msra.mxu1 %v12220_v26  ;;  %v16350_v59 = vld [vmem:[#allocation191_spill] sm:$0xff]  ;;  %v16351_v26 = vld [vmem:[#allocation192_spill] sm:$0xff] }
 0x641   :  { %3757 = vmatpush.msra.mxu2 %v12226_v4  ;;  %3774 = vmatpush.msra.mxu3 %v12232_v14  ;;  %v16352_v4 = vld [vmem:[#allocation193_spill] sm:$0xff]  ;;  %v16353_v14 = vld [vmem:[#allocation194_spill] sm:$0xff] }
 0x642   :  { %3718 = vmatpush.msra.mxu0 %v12238_v37  ;;  %3735 = vmatpush.msra.mxu1 %v12244_v40  ;;  %v16354_v37 = vld [vmem:[#allocation195_spill] sm:$0xff]  ;;  %v16355_v40 = vld [vmem:[#allocation196_spill] sm:$0xff] }
 0x643   :  { %3758 = vmatpush.msra.mxu2 %v12250_v21  ;;  %3775 = vmatpush.msra.mxu3 %v12256_v17  ;;  %v16356_v21 = vld [vmem:[#allocation197_spill] sm:$0xff]  ;;  %v16357_v17 = vld [vmem:[#allocation198_spill] sm:$0xff] }
 0x644   :  { %3719 = vmatpush.msra.mxu0 %v12262_v48  ;;  %3736 = vmatpush.msra.mxu1 %v12268_v11  ;;  %v16358_v48 = vld [vmem:[#allocation199_spill] sm:$0xff]  ;;  %v16359_v11 = vld [vmem:[#allocation200_spill] sm:$0xff] }
 0x645   :  { %3759 = vmatpush.msra.mxu2 %v12274_v22  ;;  %3776 = vmatpush.msra.mxu3 %v12280_v63  ;;  %v16360_v22 = vld [vmem:[#allocation201_spill] sm:$0xff]  ;;  %v16361_v63 = vld [vmem:[#allocation202_spill] sm:$0xff] }
 0x646   :  { %3669 = vmatmul.f32.vlgmr.msrb.gmra.mxu1 %v13265_v3  ;;  %3709 = vmatmul.f32.vlgmr.msrb.gmra.mxu3 %v13265_v3 }
 0x647   :  { %3720 = vmatpush.msra.mxu0 %v12288_v35  ;;  %3737 = vmatpush.msra.mxu1 %v12294_v29  ;;  %v16362_v35 = vld [vmem:[#allocation203_spill] sm:$0xff]  ;;  %v16363_v29 = vld [vmem:[#allocation204_spill] sm:$0xff] }
 0x648   :  { %3760 = vmatpush.msra.mxu2 %v12300_v61  ;;  %3777 = vmatpush.msra.mxu3 %v16340_v49  ;;  %v16364_v61 = vld [vmem:[#allocation205_spill] sm:$0xff]  ;;  %v16394_v49 = vld [vmem:[#allocation235_spill] sm:$0xff] }
 0x649   :  { %3721 = vmatpush.msra.mxu0 %v16341_v10  ;;  %3738 = vmatpush.msra.mxu1 %v16342_v30  ;;  %v16395_v10 = vld [vmem:[#allocation236_spill] sm:$0xff]  ;;  %v16396_v30 = vld [vmem:[#allocation237_spill] sm:$0xff] }
 0x64a   :  { %3761 = vmatpush.msra.mxu2 %v16343_v60  ;;  %3778 = vmatpush.msra.mxu3 %v16344_v7  ;;  %v16397_v60 = vld [vmem:[#allocation40_spill] sm:$0xff]  ;;  %v16398_v7 = vld [vmem:[#allocation34_spill] sm:$0xff] }
 0x64b   :  { %3722 = vmatpush.msra.mxu0 %v16345_v47  ;;  %3739 = vmatpush.msra.mxu1 %v16346_v46  ;;  %v16399_v47 = vld [vmem:[#allocation35_spill] sm:$0xff] }
 0x64c   :  { %3762 = vmatpush.msra.mxu2 %v16347_v51  ;;  %3779 = vmatpush.msra.mxu3 %v16348_v62  ;;  %v16400_v46 = vld [vmem:[#allocation43_spill] sm:$0xff]  ;;  %v16401_v51 = vld [vmem:[#allocation44_spill] sm:$0xff] }
 0x64d   :  { %3723 = vmatpush.msra.mxu0 %v16349_v33  ;;  %3740 = vmatpush.msra.mxu1 %v16350_v59  ;;  %v16402_v62 = vld [vmem:[#allocation36_spill] sm:$0xff]  ;;  %v16403_v33 = vld [vmem:[#allocation37_spill] sm:$0xff] }
 0x64e   :  { %3763 = vmatpush.msra.mxu2 %v16351_v26  ;;  %3780 = vmatpush.msra.mxu3 %v16352_v4  ;;  %v16404_v59 = vld [vmem:[#allocation49_spill] sm:$0xff]  ;;  %v16406_v4 = vld [vmem:[#allocation42_spill] sm:$0xff] }
 0x64f   :  { %3724 = vmatpush.msra.mxu0 %v16353_v14  ;;  %3741 = vmatpush.msra.mxu1 %v16354_v37  ;;  %v16405_v26 = vld [vmem:[#allocation41_spill] sm:$0xff]  ;;  %v16407_v14 = vld [vmem:[#allocation54_spill] sm:$0xff]  ;;  %v16408_v37 = vld [vmem:[#allocation55_spill] sm:$0xff] }
 0x650   :  { %3764 = vmatpush.msra.mxu2 %v16355_v40  ;;  %3781 = vmatpush.msra.mxu3 %v16356_v21  ;;  %v13372_v40 = vld [vmem:[%s14463_s3 + $0x1b8] sm:$0xff]  ;;  %v13379_v21 = vld [vmem:[%s14463_s3 + $0x170] sm:$0xff] }
 0x651   :  { %3725 = vmatpush.msra.mxu0 %v16357_v17  ;;  %3742 = vmatpush.msra.mxu1 %v16358_v48  ;;  %v16410_v17 = vld [vmem:[#allocation46_spill] sm:$0xff] }
 0x652   :  { %3765 = vmatpush.msra.mxu2 %v16359_v11  ;;  %3782 = vmatpush.msra.mxu3 %v16360_v22  ;;  %v16411_v48 = vld [vmem:[#allocation58_spill] sm:$0xff]  ;;  %v13421_v11 = vld [vmem:[%s14463_s3 + $0xb0] sm:$0xff] }
 0x653   :  { %3726 = vmatpush.msra.mxu0 %v16361_v63  ;;  %3743 = vmatpush.msra.mxu1 %v16362_v35  ;;  %v16412_v22 = vld [vmem:[#allocation59_spill] sm:$0xff]  ;;  %v13428_v63 = vld [vmem:[%s14463_s3 + $0xb8] sm:$0xff] }
 0x654   :  { %3766 = vmatpush.msra.mxu2 %v16363_v29  ;;  %3783 = vmatpush.msra.mxu3 %v16364_v61  ;;  %v16413_v35 = vld [vmem:[#allocation52_spill] sm:$0xff]  ;;  %v16414_v61 = vld [vmem:[#allocation53_spill] sm:$0xff] }
 0x655   :  { %3727 = vmatpush.msra.mxu0 %v16365_v45  ;;  %3744 = vmatpush.msra.mxu1 %v16366_v39  ;;  %v13435_v29 = vld [vmem:[%s14463_s3 + $0x70] sm:$0xff]  ;;  %v13442_v45 = vld [vmem:[%s14463_s3 + $0x78] sm:$0xff]  ;;  %v16415_v39 = vld [vmem:[#allocation62_spill] sm:$0xff] }
 0x656   :  { %3767 = vmatpush.msra.mxu2 %v16367_v23  ;;  %3784 = vmatpush.msra.mxu3 %v16368_v58  ;;  %v13449_v23 = vld [vmem:[%s14463_s3 + $0x30] sm:$0xff] }
 0x657   :  { %3728 = vmatpush.msra.mxu0 %v16369_v2  ;;  %3745 = vmatpush.msra.mxu1 %v16370_v8  ;;  %v16416_v58 = vld [vmem:[#allocation63_spill] sm:$0xff]  ;;  %v13456_v2 = vld [vmem:[%s14463_s3 + $0x38] sm:$0xff] }
 0x658   :  { %3768 = vmatpush.msra.mxu2 %v16371_v41  ;;  %3785 = vmatpush.msra.mxu3 %v16372_v28  ;;  %v13462_v8 = vld [vmem:[%s14463_s3 + $0x4f8] sm:$0xff]  ;;  %v13470_v41 = vld [vmem:[%s14463_s3 + $0x4b0] sm:$0xff] }
 0x659   :  { %3729 = vmatmul.f32.vlgmr.msra.gmra.mxu0 %v13256_v6  ;;  %3769 = vmatmul.f32.vlgmr.msra.gmra.mxu2 %v13256_v6  ;;  %v13476_v28 = vld [vmem:[%s14463_s3 + $0x4b8] sm:$0xff] }
 0x65a   :  { %3793 = vmatpush.msrb.mxu0 %v16373_v54  ;;  %3833 = vmatpush.msrb.mxu2 %v16374_v55  ;;  %v5642_v54 = vld [vmem:[%s14463_s3 + $0x3c0] sm:$0xff]  ;;  %v13488_v55 = vld [vmem:[%s14463_s3 + $0x470] sm:$0xff] }
 0x65b   :  { %3746 = vmatpush.msra.mxu1 %v16375_v24  ;;  %3786 = vmatpush.msra.mxu3 %v16376_v5  ;;  %v13494_v24 = vld [vmem:[%s14463_s3 + $0x478] sm:$0xff]  ;;  %v5646_v5 = vld [vmem:[%s14463_s3 + $0x380] sm:$0xff] }
 0x65c   :  { %3794 = vmatpush.msrb.mxu0 %v16377_v12  ;;  %3834 = vmatpush.msrb.mxu2 %v16378_v50  ;;  %v5647_v12 = vld [vmem:[%s14463_s3 + $0x388] sm:$0xff]  ;;  %v13506_v50 = vld [vmem:[%s14463_s3 + $0x430] sm:$0xff] }
 0x65d   :  { %3747 = vmatpush.msra.mxu1 %v16379_v43  ;;  %3787 = vmatpush.msra.mxu3 %v16380_v52  ;;  %v13512_v43 = vld [vmem:[%s14463_s3 + $0x438] sm:$0xff]  ;;  %v5650_v52 = vld [vmem:[%s14463_s3 + $0x340] sm:$0xff] }
 0x65e   :  { %3795 = vmatpush.msrb.mxu0 %v16381_v34  ;;  %3835 = vmatpush.msrb.mxu2 %v16382_v31  ;;  %v5651_v34 = vld [vmem:[%s14463_s3 + $0x348] sm:$0xff]  ;;  %v5652_v31 = vld [vmem:[%s14463_s3 + $0x7c0] sm:$0xff] }
 0x65f   :  { %3748 = vmatpush.msra.mxu1 %v16383_v53  ;;  %3788 = vmatpush.msra.mxu3 %v16384_v36  ;;  %v5653_v53 = vld [vmem:[%s14463_s3 + $0x7c8] sm:$0xff] }
 0x660   :  { %3749 = vmatmul.f32.vlgmr.msra.gmra.mxu1 %v13265_v3  ;;  %3789 = vmatmul.f32.vlgmr.msra.gmra.mxu3 %v13265_v3  ;;  %v5655_v36 = vld [vmem:[%s14463_s3 + $0x308] sm:$0xff] }
 0x661   :  { %3796 = vmatpush.msrb.mxu0 %v16385_v19  ;;  %3813 = vmatpush.msrb.mxu1 %v16386_v9  ;;  %v5656_v19 = vld [vmem:[%s14463_s3 + $0x780] sm:$0xff]  ;;  %v5657_v9 = vld [vmem:[%s14463_s3 + $0x788] sm:$0xff] }
 0x662   :  { %3836 = vmatpush.msrb.mxu2 %v16387_v57  ;;  %3853 = vmatpush.msrb.mxu3 %v16388_v13  ;;  %v5658_v57 = vld [vmem:[%s14463_s3 + $0x2c0] sm:$0xff]  ;;  %v5659_v13 = vld [vmem:[%s14463_s3 + $0x2c8] sm:$0xff] }
 0x663   :  { %3797 = vmatpush.msrb.mxu0 %v16389_v32  ;;  %3814 = vmatpush.msrb.mxu1 %v16390_v18  ;;  %v5660_v32 = vld [vmem:[%s14463_s3 + $0x740] sm:$0xff]  ;;  %v5661_v18 = vld [vmem:[%s14463_s3 + $0x748] sm:$0xff] }
 0x664   :  { %3837 = vmatpush.msrb.mxu2 %v16391_v15  ;;  %3854 = vmatpush.msrb.mxu3 %v16392_v25  ;;  %v5662_v15 = vld [vmem:[%s14463_s3 + $0x280] sm:$0xff]  ;;  %v5663_v25 = vld [vmem:[%s14463_s3 + $0x288] sm:$0xff] }
 0x665   :  { %3798 = vmatpush.msrb.mxu0 %v16393_v0  ;;  %3815 = vmatpush.msrb.mxu1 %v16394_v49  ;;  %v5664_v0 = vld [vmem:[%s14463_s3 + $0x700] sm:$0xff]  ;;  %v5665_v49 = vld [vmem:[%s14463_s3 + $0x708] sm:$0xff] }
 0x666   :  { %3838 = vmatpush.msrb.mxu2 %v16395_v10  ;;  %3855 = vmatpush.msrb.mxu3 %v16396_v30  ;;  %v5666_v10 = vld [vmem:[%s14463_s3 + $0x240] sm:$0xff]  ;;  %v5667_v30 = vld [vmem:[%s14463_s3 + $0x248] sm:$0xff] }
 0x667   :  { %3799 = vmatpush.msrb.mxu0 %v16397_v60  ;;  %3816 = vmatpush.msrb.mxu1 %v16398_v7  ;;  %v5668_v60 = vld [vmem:[%s14463_s3 + $0x6c0] sm:$0xff]  ;;  %v5669_v7 = vld [vmem:[%s14463_s3 + $0x6c8] sm:$0xff] }
 0x668   :  { %3839 = vmatpush.msrb.mxu2 %v16399_v47  ;;  %3856 = vmatpush.msrb.mxu3 %v16400_v46  ;;  %v5670_v47 = vld [vmem:[%s14463_s3 + $0x200] sm:$0xff]  ;;  %v5671_v46 = vld [vmem:[%s14463_s3 + $0x208] sm:$0xff] }
 0x669   :  { %3800 = vmatpush.msrb.mxu0 %v16401_v51  ;;  %3817 = vmatpush.msrb.mxu1 %v16402_v62  ;;  %v5672_v51 = vld [vmem:[%s14463_s3 + $0x680] sm:$0xff]  ;;  %v5673_v62 = vld [vmem:[%s14463_s3 + $0x688] sm:$0xff] }
 0x66a   :  { %3840 = vmatpush.msrb.mxu2 %v16403_v33  ;;  %3857 = vmatpush.msrb.mxu3 %v16404_v59  ;;  %v5674_v33 = vld [vmem:[%s14463_s3 + $0x1c0] sm:$0xff]  ;;  %v5675_v59 = vld [vmem:[%s14463_s3 + $0x1c8] sm:$0xff] }
 0x66b   :  { %3801 = vmatpush.msrb.mxu0 %v16405_v26  ;;  %3818 = vmatpush.msrb.mxu1 %v16406_v4  ;;  %v5676_v26 = vld [vmem:[%s14463_s3 + $0x640] sm:$0xff]  ;;  %v5677_v4 = vld [vmem:[%s14463_s3 + $0x648] sm:$0xff] }
 0x66c   :  { %3841 = vmatpush.msrb.mxu2 %v12712_v44  ;;  %3858 = vmatpush.msrb.mxu3 %v16407_v14  ;;  %v13393_v44 = vld [vmem:[%s14463_s3 + $0x130] sm:$0xff]  ;;  %v5678_v14 = vld [vmem:[%s14463_s3 + $0x180] sm:$0xff] }
 0x66d   :  { %3802 = vmatpush.msrb.mxu0 %v16408_v37  ;;  %3819 = vmatpush.msrb.mxu1 %v12730_v1  ;;  %v13386_v1 = vld [vmem:[%s14463_s3 + $0x178] sm:$0xff]  ;;  %v5679_v37 = vld [vmem:[%s14463_s3 + $0x188] sm:$0xff] }
 0x66e   :  { %3842 = vmatpush.msrb.mxu2 %v13372_v40  ;;  %3859 = vmatpush.msrb.mxu3 %v12737_v16  ;;  %v13400_v16 = vld [vmem:[%s14463_s3 + $0x138] sm:$0xff] }
 0x66f   :  { %3803 = vmatpush.msrb.mxu0 %v13379_v21  ;;  %3820 = vmatpush.msrb.mxu1 %v12744_v42  ;;  %v16409_v42 = vld [vmem:[#allocation45_spill] sm:$0xff] }
 0x670   :  { %3843 = vmatpush.msrb.mxu2 %v13386_v1  ;;  %3860 = vmatpush.msrb.mxu3 %v12751_v56  ;;  %v13407_v56 = vld [vmem:[%s14463_s3 + $0xf0] sm:$0xff] }
 0x671   :  { %3804 = vmatpush.msrb.mxu0 %v13393_v44  ;;  %3821 = vmatpush.msrb.mxu1 %v12758_v38  ;;  %v13414_v38 = vld [vmem:[%s14463_s3 + $0xf8] sm:$0xff] }
 0x672   :  { %3844 = vmatpush.msrb.mxu2 %v13400_v16  ;;  %3861 = vmatpush.msrb.mxu3 %v16409_v42  ;;  %v5680_v42 = vld [vmem:[%s14463_s3 + $0x600] sm:$0xff] }
 0x673   :  { %3805 = vmatpush.msrb.mxu0 %v13407_v56  ;;  %3822 = vmatpush.msrb.mxu1 %v16410_v17  ;;  %v5681_v17 = vld [vmem:[%s14463_s3 + $0x608] sm:$0xff] }
 0x674   :  { %3845 = vmatpush.msrb.mxu2 %v13414_v38  ;;  %3862 = vmatpush.msrb.mxu3 %v16411_v48  ;;  %v5682_v48 = vld [vmem:[%s14463_s3 + $0x140] sm:$0xff] }
 0x675   :  { %3806 = vmatpush.msrb.mxu0 %v13421_v11  ;;  %3823 = vmatpush.msrb.mxu1 %v16412_v22  ;;  %v5683_v22 = vld [vmem:[%s14463_s3 + $0x148] sm:$0xff] }
 0x676   :  { %3846 = vmatpush.msrb.mxu2 %v13428_v63  ;;  %3863 = vmatpush.msrb.mxu3 %v16413_v35  ;;  %v5684_v35 = vld [vmem:[%s14463_s3 + $0x5c0] sm:$0xff] }
 0x677   :  { %3807 = vmatpush.msrb.mxu0 %v13435_v29  ;;  %3824 = vmatpush.msrb.mxu1 %v16414_v61  ;;  %v5685_v61 = vld [vmem:[%s14463_s3 + $0x5c8] sm:$0xff] }
 0x678   :  { %3847 = vmatpush.msrb.mxu2 %v13442_v45  ;;  %3864 = vmatpush.msrb.mxu3 %v16415_v39  ;;  %v5686_v39 = vld [vmem:[%s14463_s3 + $0x100] sm:$0xff] }
 0x679   :  { %3808 = vmatpush.msrb.mxu0 %v13449_v23  ;;  %3825 = vmatpush.msrb.mxu1 %v16416_v58  ;;  %v5687_v58 = vld [vmem:[%s14463_s3 + $0x108] sm:$0xff] }
 0x67a   :  { %3848 = vmatpush.msrb.mxu2 %v13456_v2  ;;  %3865 = vmatpush.msrb.mxu3 %v13462_v8 }
 0x67b   :  { %3809 = vmatmul.f32.vlgmr.msrb.gmra.mxu0 %v13256_v6  ;;  %3849 = vmatmul.f32.vlgmr.msrb.gmra.mxu2 %v13256_v6  ;;  %v5643_v6 = vld [vmem:[%s14463_s3 + $0x3c8] sm:$0xff] }
 0x67c   :  { %3826 = vmatpush.msrb.mxu1 %v13470_v41  ;;  %3866 = vmatpush.msrb.mxu3 %v13476_v28 }
 0x67d   :  { %4018 = vmatpush.msra.mxu0 %v5642_v54  ;;  %4058 = vmatpush.msra.mxu2 %v5643_v6  ;;  %v5688_v54 = vld [vmem:[%s14463_s3 + $0x580] sm:$0xff]  ;;  %v5689_v6 = vld [vmem:[%s14463_s3 + $0x588] sm:$0xff] }
 0x67e   :  { %3827 = vmatpush.msrb.mxu1 %v13488_v55  ;;  %3867 = vmatpush.msrb.mxu3 %v13494_v24 }
 0x67f   :  { %4019 = vmatpush.msra.mxu0 %v5646_v5  ;;  %4059 = vmatpush.msra.mxu2 %v5647_v12  ;;  %v5690_v5 = vld [vmem:[%s14463_s3 + $0xc0] sm:$0xff]  ;;  %v5691_v12 = vld [vmem:[%s14463_s3 + $0xc8] sm:$0xff] }
 0x680   :  { %3828 = vmatpush.msrb.mxu1 %v13506_v50  ;;  %3868 = vmatpush.msrb.mxu3 %v13512_v43 }
 0x681   :  { %3829 = vmatmul.f32.vlgmr.msrb.gmra.mxu1 %v13265_v3  ;;  %3869 = vmatmul.f32.vlgmr.msrb.gmra.mxu3 %v13265_v3  ;;  %v5654_v3 = vld [vmem:[%s14463_s3 + $0x300] sm:$0xff] }
 0x682   :  { %4020 = vmatpush.msra.mxu0 %v5650_v52  ;;  %4060 = vmatpush.msra.mxu2 %v5651_v34  ;;  %v5692_v52 = vld [vmem:[%s14463_s3 + $0x540] sm:$0xff]  ;;  %v5693_v34 = vld [vmem:[%s14463_s3 + $0x548] sm:$0xff] }
 0x683   :  { %4038 = vmatpush.msra.mxu1 %v5652_v31  ;;  %4078 = vmatpush.msra.mxu3 %v5653_v53  ;;  %v5694_v31 = vld [vmem:[%s14463_s3 + $0x80] sm:$0xff]  ;;  %v5695_v53 = vld [vmem:[%s14463_s3 + $0x88] sm:$0xff] }
 0x684   :  { %4021 = vmatpush.msra.mxu0 %v5654_v3  ;;  %4061 = vmatpush.msra.mxu2 %v5655_v36  ;;  %v5696_v3 = vld [vmem:[%s14463_s3 + $0x500] sm:$0xff]  ;;  %v5697_v36 = vld [vmem:[%s14463_s3 + $0x508] sm:$0xff] }
 0x685   :  { %4039 = vmatpush.msra.mxu1 %v5656_v19  ;;  %4079 = vmatpush.msra.mxu3 %v5657_v9  ;;  %v5698_v19 = vld [vmem:[%s14463_s3 + $0x40] sm:$0xff]  ;;  %v5699_v9 = vld [vmem:[%s14463_s3 + $0x48] sm:$0xff] }
 0x686   :  { %4022 = vmatpush.msra.mxu0 %v5658_v57  ;;  %4062 = vmatpush.msra.mxu2 %v5659_v13  ;;  %v5700_v57 = vld [vmem:[%s14463_s3 + $0x4c0] sm:$0xff]  ;;  %v5701_v13 = vld [vmem:[%s14463_s3 + $0x4c8] sm:$0xff] }
 0x687   :  { %4040 = vmatpush.msra.mxu1 %v5660_v32  ;;  %4080 = vmatpush.msra.mxu3 %v5661_v18  ;;  %v5702_v32 = vld [vmem:[%s14463_s3] sm:$0xff]  ;;  %v5703_v18 = vld [vmem:[%s14463_s3 + $0x8] sm:$0xff] }
 0x688   :  { %4023 = vmatpush.msra.mxu0 %v5662_v15  ;;  %4063 = vmatpush.msra.mxu2 %v5663_v25  ;;  %v5704_v15 = vld [vmem:[%s14463_s3 + $0x3d0] sm:$0xff]  ;;  %v5705_v25 = vld [vmem:[%s14463_s3 + $0x3d8] sm:$0xff] }
 0x689   :  { %4041 = vmatpush.msra.mxu1 %v5664_v0  ;;  %4081 = vmatpush.msra.mxu3 %v5665_v49  ;;  %v5706_v0 = vld [vmem:[%s14463_s3 + $0x480] sm:$0xff]  ;;  %v5707_v49 = vld [vmem:[%s14463_s3 + $0x488] sm:$0xff] }
 0x68a   :  { %4024 = vmatpush.msra.mxu0 %v5666_v10  ;;  %4064 = vmatpush.msra.mxu2 %v5667_v30  ;;  %v5708_v10 = vld [vmem:[%s14463_s3 + $0x390] sm:$0xff]  ;;  %v5709_v30 = vld [vmem:[%s14463_s3 + $0x398] sm:$0xff] }
 0x68b   :  { %4042 = vmatpush.msra.mxu1 %v5668_v60  ;;  %4082 = vmatpush.msra.mxu3 %v5669_v7  ;;  %v5710_v60 = vld [vmem:[%s14463_s3 + $0x440] sm:$0xff]  ;;  %v5711_v7 = vld [vmem:[%s14463_s3 + $0x448] sm:$0xff] }
 0x68c   :  { %4025 = vmatpush.msra.mxu0 %v5670_v47  ;;  %4065 = vmatpush.msra.mxu2 %v5671_v46  ;;  %v5712_v47 = vld [vmem:[%s14463_s3 + $0x350] sm:$0xff]  ;;  %v5713_v46 = vld [vmem:[%s14463_s3 + $0x358] sm:$0xff] }
 0x68d   :  { %4043 = vmatpush.msra.mxu1 %v5672_v51  ;;  %4083 = vmatpush.msra.mxu3 %v5673_v62  ;;  %v5714_v51 = vld [vmem:[%s14463_s3 + $0x400] sm:$0xff]  ;;  %v5715_v62 = vld [vmem:[%s14463_s3 + $0x408] sm:$0xff] }
 0x68e   :  { %4026 = vmatpush.msra.mxu0 %v5674_v33  ;;  %4066 = vmatpush.msra.mxu2 %v5675_v59  ;;  %v5716_v33 = vld [vmem:[%s14463_s3 + $0x310] sm:$0xff] }
 0x68f   :  { %4044 = vmatpush.msra.mxu1 %v5676_v26  ;;  %4084 = vmatpush.msra.mxu3 %v5677_v4  ;;  %v5717_v59 = vld [vmem:[%s14463_s3 + $0x7d0] sm:$0xff]  ;;  %v5718_v26 = vld [vmem:[%s14463_s3 + $0x318] sm:$0xff] }
 0x690   :  { %4027 = vmatpush.msra.mxu0 %v5678_v14  ;;  %4067 = vmatpush.msra.mxu2 %v5679_v37  ;;  %v5719_v4 = vld [vmem:[%s14463_s3 + $0x7d8] sm:$0xff]  ;;  %v5720_v14 = vld [vmem:[%s14463_s3 + $0x2d0] sm:$0xff] }
 0x691   :  { %4045 = vmatpush.msra.mxu1 %v5680_v42  ;;  %4085 = vmatpush.msra.mxu3 %v5681_v17  ;;  %v5721_v37 = vld [vmem:[%s14463_s3 + $0x790] sm:$0xff]  ;;  %v5722_v42 = vld [vmem:[%s14463_s3 + $0x2d8] sm:$0xff] }
 0x692   :  { %4028 = vmatpush.msra.mxu0 %v5682_v48  ;;  %4068 = vmatpush.msra.mxu2 %v5683_v22  ;;  %v5723_v17 = vld [vmem:[%s14463_s3 + $0x798] sm:$0xff]  ;;  %v5724_v48 = vld [vmem:[%s14463_s3 + $0x290] sm:$0xff] }
 0x693   :  { %4046 = vmatpush.msra.mxu1 %v5684_v35  ;;  %4086 = vmatpush.msra.mxu3 %v5685_v61  ;;  %v5725_v22 = vld [vmem:[%s14463_s3 + $0x750] sm:$0xff]  ;;  %v5726_v35 = vld [vmem:[%s14463_s3 + $0x298] sm:$0xff] }
 0x694   :  { %4029 = vmatpush.msra.mxu0 %v5686_v39  ;;  %4069 = vmatpush.msra.mxu2 %v5687_v58  ;;  %v5727_v61 = vld [vmem:[%s14463_s3 + $0x758] sm:$0xff]  ;;  %v5728_v39 = vld [vmem:[%s14463_s3 + $0x250] sm:$0xff] }
 0x695   :  { %4047 = vmatpush.msra.mxu1 %v5688_v54  ;;  %4087 = vmatpush.msra.mxu3 %v5689_v6  ;;  %v5729_v58 = vld [vmem:[%s14463_s3 + $0x710] sm:$0xff]  ;;  %v5730_v54 = vld [vmem:[%s14463_s3 + $0x258] sm:$0xff] }
 0x696   :  { %4030 = vmatpush.msra.mxu0 %v5690_v5  ;;  %4070 = vmatpush.msra.mxu2 %v5691_v12  ;;  %v5731_v6 = vld [vmem:[%s14463_s3 + $0x718] sm:$0xff]  ;;  %v5732_v5 = vld [vmem:[%s14463_s3 + $0x210] sm:$0xff] }
 0x697   :  { %4048 = vmatpush.msra.mxu1 %v5692_v52  ;;  %4088 = vmatpush.msra.mxu3 %v5693_v34  ;;  %v5733_v12 = vld [vmem:[%s14463_s3 + $0x6d0] sm:$0xff]  ;;  %v5734_v34 = vld [vmem:[%s14463_s3 + $0x6d8] sm:$0xff] }
 0x698   :  { %4031 = vmatpush.msra.mxu0 %v5694_v31  ;;  %4071 = vmatpush.msra.mxu2 %v5695_v53  ;;  %v16417_v52 = vld [vmem:[#allocation56_spill] sm:$0xff]  ;;  %v16418_v31 = vld [vmem:[#allocation57_spill] sm:$0xff] }
 0x699   :  { %4049 = vmatpush.msra.mxu1 %v5696_v3  ;;  %4089 = vmatpush.msra.mxu3 %v5697_v36  ;;  %v5735_v53 = vld [vmem:[%s14463_s3 + $0x690] sm:$0xff]  ;;  %v5736_v36 = vld [vmem:[%s14463_s3 + $0x698] sm:$0xff] }
 0x69a   :  { %4032 = vmatpush.msra.mxu0 %v5698_v19  ;;  %4072 = vmatpush.msra.mxu2 %v5699_v9  ;;  %v16419_v3 = vld [vmem:[#allocation68_spill] sm:$0xff]  ;;  %v16420_v19 = vld [vmem:[#allocation69_spill] sm:$0xff] }
 0x69b   :  { %4050 = vmatpush.msra.mxu1 %v5700_v57  ;;  %4090 = vmatpush.msra.mxu3 %v5701_v13  ;;  %v5737_v9 = vld [vmem:[%s14463_s3 + $0x650] sm:$0xff]  ;;  %v5738_v13 = vld [vmem:[%s14463_s3 + $0x658] sm:$0xff] }
 0x69c   :  { %4033 = vmatpush.msra.mxu0 %v5702_v32  ;;  %4073 = vmatpush.msra.mxu2 %v5703_v18  ;;  %v16421_v57 = vld [vmem:[#allocation60_spill] sm:$0xff]  ;;  %v16422_v32 = vld [vmem:[#allocation61_spill] sm:$0xff] }
 0x69d   :  { %4051 = vmatpush.msra.mxu1 %v5706_v0  ;;  %4091 = vmatpush.msra.mxu3 %v5707_v49  ;;  %v5739_v18 = vld [vmem:[%s14463_s3 + $0x610] sm:$0xff]  ;;  %v16424_v0 = vld [vmem:[#allocation73_spill] sm:$0xff] }
 0x69e   :  { %4098 = vmatpush.msrb.mxu0 %v5704_v15  ;;  %4138 = vmatpush.msrb.mxu2 %v5705_v25  ;;  %v16423_v15 = vld [vmem:[#allocation72_spill] sm:$0xff] }
 0x69f   :  { %4052 = vmatpush.msra.mxu1 %v5710_v60  ;;  %4092 = vmatpush.msra.mxu3 %v5711_v7  ;;  %v5740_v25 = vld [vmem:[%s14463_s3 + $0x618] sm:$0xff]  ;;  %v16428_v60 = vld [vmem:[#allocation79_spill] sm:$0xff]  ;;  %v16429_v7 = vld [vmem:[#allocation70_spill] sm:$0xff] }
 0x6a0   :  { %4099 = vmatpush.msrb.mxu0 %v5708_v10  ;;  %4139 = vmatpush.msrb.mxu2 %v5709_v30  ;;  %v16425_v49 = vld [vmem:[#allocation64_spill] sm:$0xff]  ;;  %v16426_v10 = vld [vmem:[#allocation65_spill] sm:$0xff]  ;;  %v16427_v30 = vld [vmem:[#allocation78_spill] sm:$0xff] }
 0x6a1   :  { %4053 = vmatpush.msra.mxu1 %v5714_v51  ;;  %4093 = vmatpush.msra.mxu3 %v5715_v62  ;;  %v16432_v51 = vld [vmem:[#allocation13_spill] sm:$0xff]  ;;  %v16433_v62 = vld [vmem:[#allocation11_spill] sm:$0xff] }
 0x6a2   :  { %4100 = vmatpush.msrb.mxu0 %v5712_v47  ;;  %4140 = vmatpush.msrb.mxu2 %v5713_v46  ;;  %v16430_v47 = vld [vmem:[#allocation12_spill] sm:$0xff]  ;;  %v16431_v46 = vld [vmem:[#allocation10_spill] sm:$0xff] }
 0x6a3   :  { %4118 = vmatpush.msrb.mxu1 %v5717_v59  ;;  %4158 = vmatpush.msrb.mxu3 %v5719_v4  ;;  %v16435_v59 = vld [vmem:[#allocation51_spill] sm:$0xff] }
 0x6a4   :  { %4101 = vmatpush.msrb.mxu0 %v5716_v33  ;;  %4141 = vmatpush.msrb.mxu2 %v5718_v26  ;;  %v16434_v33 = vld [vmem:[#allocation50_spill] sm:$0xff]  ;;  %v16437_v4 = vld [vmem:[#allocation67_spill] sm:$0xff] }
 0x6a5   :  { %4119 = vmatpush.msrb.mxu1 %v5721_v37  ;;  %4159 = vmatpush.msrb.mxu3 %v5723_v17  ;;  %v16436_v26 = vld [vmem:[#allocation66_spill] sm:$0xff]  ;;  %v16441_v17 = vld [vmem:[#allocation76_spill] sm:$0xff] }
 0x6a6   :  { %4102 = vmatpush.msrb.mxu0 %v5720_v14  ;;  %4142 = vmatpush.msrb.mxu2 %v5722_v42  ;;  %v16438_v14 = vld [vmem:[#allocation71_spill] sm:$0xff]  ;;  %v16439_v37 = vld [vmem:[#allocation82_spill] sm:$0xff] }
 0x6a7   :  { %4120 = vmatpush.msrb.mxu1 %v5725_v22  ;;  %4160 = vmatpush.msrb.mxu3 %v5727_v61  ;;  %v16440_v42 = vld [vmem:[#allocation83_spill] sm:$0xff]  ;;  %v16443_v22 = vld [vmem:[#allocation86_spill] sm:$0xff]  ;;  %v16445_v61 = vld [vmem:[#allocation80_spill] sm:$0xff] }
 0x6a8   :  { %4103 = vmatpush.msrb.mxu0 %v5724_v48  ;;  %4143 = vmatpush.msrb.mxu2 %v5726_v35  ;;  %v16442_v48 = vld [vmem:[#allocation77_spill] sm:$0xff]  ;;  %v16444_v35 = vld [vmem:[#allocation87_spill] sm:$0xff] }
 0x6a9   :  { %4121 = vmatpush.msrb.mxu1 %v5729_v58  ;;  %4161 = vmatpush.msrb.mxu3 %v5731_v6  ;;  %v16447_v58 = vld [vmem:[#allocation92_spill] sm:$0xff]  ;;  %v16449_v6 = vld [vmem:[#allocation18_spill] sm:$0xff] }
 0x6aa   :  { %4104 = vmatpush.msrb.mxu0 %v5728_v39  ;;  %4144 = vmatpush.msrb.mxu2 %v5730_v54  ;;  %v16446_v39 = vld [vmem:[#allocation81_spill] sm:$0xff]  ;;  %v16448_v54 = vld [vmem:[#allocation20_spill] sm:$0xff] }
 0x6ab   :  { %4122 = vmatpush.msrb.mxu1 %v5733_v12  ;;  %4162 = vmatpush.msrb.mxu3 %v5734_v34 }
 0x6ac   :  { %4105 = vmatpush.msrb.mxu0 %v5732_v5  ;;  %4145 = vmatpush.msrb.mxu2 %v16417_v52 }
 0x6ad   :  { %4123 = vmatpush.msrb.mxu1 %v5735_v53  ;;  %4163 = vmatpush.msrb.mxu3 %v5736_v36  ;;  %v16450_v36 = vld [vmem:[#allocation153_spill] sm:$0xff] }
 0x6ae   :  { %4106 = vmatpush.msrb.mxu0 %v16418_v31  ;;  %4146 = vmatpush.msrb.mxu2 %v16419_v3 }
 0x6af   :  { %4124 = vmatpush.msrb.mxu1 %v5737_v9  ;;  %4164 = vmatpush.msrb.mxu3 %v5738_v13 }
 0x6b0   :  { %4107 = vmatpush.msrb.mxu0 %v16420_v19  ;;  %4147 = vmatpush.msrb.mxu2 %v16421_v57  ;;  %v16451_v19 = vld [vmem:[#allocation28_spill] sm:$0xff] }
 0x6b1   :  { %4125 = vmatpush.msrb.mxu1 %v5739_v18  ;;  %4165 = vmatpush.msrb.mxu3 %v5740_v25  ;;  %v218_v9 = vadd.f32 %v16451_v19, %v16450_v36  ;;  %v16452_v18 = vld [vmem:[#allocation154_spill] sm:$0xff] }
 0x6b2   :  { %4108 = vmatpush.msrb.mxu0 %v16422_v32  ;;  %4148 = vmatpush.msrb.mxu2 %v16423_v15  ;;  %v3570_v12 = vpop.f32.mrf.mxu0  ;;  %v16453_v15 = vld [vmem:[#allocation26_spill] sm:$0xff] }
 0x6b3   :  { %4126 = vmatpush.msrb.mxu1 %v16425_v49  ;;  %4166 = vmatpush.msrb.mxu3 %v16427_v30  ;;  %v136_v25 = vadd.f32 %v16453_v15, %v16452_v18  ;;  %v16454_v30 = vld [vmem:[#allocation155_spill] sm:$0xff] }
 0x6b4   :  { %4109 = vmatpush.msrb.mxu0 %v16424_v0  ;;  %4149 = vmatpush.msrb.mxu2 %v16426_v10 }
 0x6b5   :  { %4127 = vmatpush.msrb.mxu1 %v16429_v7  ;;  %4167 = vmatpush.msrb.mxu3 %v16431_v46 }
 0x6b6   :  { %4110 = vmatpush.msrb.mxu0 %v16428_v60  ;;  %4150 = vmatpush.msrb.mxu2 %v16430_v47  ;;  %v16455_v60 = vld [vmem:[#allocation29_spill] sm:$0xff] }
 0x6b7   :  { %4128 = vmatpush.msrb.mxu1 %v16433_v62  ;;  %4168 = vmatpush.msrb.mxu3 %v16435_v59  ;;  %v259_v7 = vadd.f32 %v16455_v60, %v16454_v30  ;;  %v16456_v62 = vld [vmem:[#allocation156_spill] sm:$0xff] }
 0x6b8   :  { %4111 = vmatpush.msrb.mxu0 %v16432_v51  ;;  %4151 = vmatpush.msrb.mxu2 %v16434_v33  ;;  %v3610_v34 = vpop.f32.mrf.mxu2  ;;  %v16457_v33 = vld [vmem:[#allocation27_spill] sm:$0xff] }
 0x6b9   :  { %4129 = vmatpush.msrb.mxu1 %v16437_v4  ;;  %4169 = vmatpush.msrb.mxu3 %v16439_v37  ;;  %v3590_v5 = vpop.f32.mrf.mxu1  ;;  %v177_v59 = vadd.f32 %v16457_v33, %v16456_v62 }
 0x6ba   :  { %4112 = vmatpush.msrb.mxu0 %v16436_v26  ;;  %4152 = vmatpush.msrb.mxu2 %v16438_v14  ;;  %v3591_v57 = vadd.f32 %v3590_v5, %v3570_v12 }
 0x6bb   :  { %4130 = vmatpush.msrb.mxu1 %v16441_v17  ;;  %4170 = vmatpush.msrb.mxu3 %v16443_v22  ;;  %v16459_v22 = vld [vmem:[#allocation145_spill] sm:$0xff] }
 0x6bc   :  { %4113 = vmatpush.msrb.mxu0 %v16440_v42  ;;  %4153 = vmatpush.msrb.mxu2 %v16442_v48  ;;  %v3650_v53 = vpop.f32.mrf.mxu0  ;;  %v3873_v10 = vadd.f32 %v3591_v57, %v136_v25  ;;  %v16458_v48 = vld [vmem:[#allocation157_spill] sm:$0xff] }
 0x6bd   :  { %4131 = vmatpush.msrb.mxu1 %v16444_v35  ;;  %4171 = vmatpush.msrb.mxu3 %v16445_v61  ;;  %v300_v35 = vadd.f32 %v16459_v22, %v16458_v48 }
 0x6be   :  { %v4608_v26 = vmul.f32 -1.442695, %v3873_v10 }
 0x6bf   :  { %4132 = vmatpush.msrb.mxu1 %v16446_v39  ;;  %4172 = vmatpush.msrb.mxu3 %v16447_v58  ;;  %v3630_v52 = vpop.f32.mrf.mxu3 }
 0x6c0   :  { %v3631_v46 = vadd.f32 %v3630_v52, %v3610_v34  ;;  %v16460_v34 = vld [vmem:[#allocation158_spill] sm:$0xff] }
 0x6c1   :  { %4133 = vmatpush.msrb.mxu1 %v16448_v54  ;;  %4173 = vmatpush.msrb.mxu3 %v16449_v6 }
 0x6c2   :  { %v3690_v0 = vpop.f32.mrf.mxu2  ;;  %v3874_v14 = vadd.f32 %v3631_v46, %v177_v59 }
 0x6c3   :  { %v3670_v31 = vpop.f32.mrf.mxu1 }
 0x6c4   :  { %v3671_v3 = vadd.f32 %v3670_v31, %v3650_v53  ;;  %v4609_v61 = vmul.f32 -1.442695, %v3874_v14  ;;  %v16461_v31 = vld [vmem:[#allocation146_spill] sm:$0xff] }
 0x6c5   :  { %v341_v53 = vadd.f32 %v16461_v31, %v16460_v34 }
 0x6c6   :  { %v3875_v32 = vadd.f32 %v3671_v3, %v218_v9 }
 0x6c8   :  { %v4610_v47 = vmul.f32 -1.442695, %v3875_v32 }
 0x6c9   :  { %v3710_v13 = vpop.f32.mrf.mxu3 }
 0x6ca   :  { %v3711_v49 = vadd.f32 %v3710_v13, %v3690_v0  ;;  %4814 = vpow2.f32 %v4610_v47 }
 0x6cb   :  { %4816 = vpow2.f32 %v4608_v26 }
 0x6cc   :  { %v3876_v51 = vadd.f32 %v3711_v49, %v259_v7 }
 0x6ce   :  { %v4611_v42 = vmul.f32 -1.442695, %v3876_v51 }
 0x6d0   :  { %v4815_v39 = vpop.eup %4814  ;;  %4818 = vpow2.f32 %v4611_v42 }
 0x6d1   :  { %v4817_v12 = vpop.eup %4816  ;;  %4820 = vpow2.f32 %v4609_v61  ;;  %v13833_v52 = vadd.f32 1.0, %v4815_v39 }
 0x6d2   :  { %v3899_v9 = vadd.f32 1.0, %v4817_v12 }
 0x6d3   :  { %4822 = vrcp.f32 %v13833_v52  ;;  %vm3940_vm3 = vweird.f32 %v13833_v52 }
 0x6d4   :  { %v3914_v12 = vand.u32 2147483647, %v3899_v9  ;;  %vm3910_vm5 = vweird.f32 %v3899_v9 }
 0x6d6   :  { %v3730_v37 = vpop.f32.mrf.mxu0  ;;  %v4819_v19 = vpop.eup %4818  ;;  %vm13889_vm6 = vcmp.eq.f32.partialorder %v3914_v12, 8.507059e+37 }
 0x6d7   :  { %v4821_v13 = vpop.eup %4820  ;;  %v13838_v32 = vadd.f32 1.0, %v4819_v19  ;;  %v3946_v19 = vand.u32 2147483648, %v13833_v52 }
 0x6d8   :  { %v13840_v25 = vadd.f32 1.0, %v4821_v13 }
 0x6d9   :  { %v13842_v0 = vpop.eup %4822  ;;  %v3961_v12 = vand.u32 2147483648, %v13838_v32  ;;  %vm3955_vm11 = vweird.f32 %v13838_v32 }
 0x6da   :  { %v3936_v60 = vmul.f32 %v13842_v0, %v13833_v52  ;;  %vm3941_vm1 = vweird.f32 %v13842_v0  ;;  %vm3925_vm8 = vweird.f32 %v13840_v25 }
 0x6db   :  { %vm13883_vm4 = vmor %vm3940_vm3, %vm3941_vm1 }
 0x6dc   :  { %v3770_v6 = vpop.f32.mrf.mxu2  ;;  %v3937_v33 = vsub.f32 1.0, %v3936_v60  ;;  %v3944_v60 = vand.u32 2147483647, %v13833_v52 }
 0x6dd   :  { %v3750_v4 = vpop.f32.mrf.mxu1 }
 0x6de   :  { %v3751_v17 = vadd.f32 %v3750_v4, %v3730_v37  ;;  %v3938_v42 = vmul.f32 %v13842_v0, %v3937_v33  ;;  %vm3945_vm10 = vcmp.eq.f32.partialorder %v3944_v60, 8.507059e+37  ;;  %v3931_v60 = vand.u32 2147483648, %v13840_v25 }
 0x6e0   :  { %v3877_v58 = vadd.f32 %v3751_v17, %v300_v35 }
 0x6e2   :  { %v4612_v3 = vmul.f32 -1.442695, %v3877_v58  ;;  %v16462_v58 = vld [vmem:[#allocation159_spill] sm:$0xff] }
 0x6e3   :  { %v3790_v54 = vpop.f32.mrf.mxu3 }
 0x6e4   :  { %v3791_v5 = vadd.f32 %v3790_v54, %v3770_v6  ;;  %4824 = vpow2.f32 %v4612_v3  ;;  %v16463_v54 = vld [vmem:[#allocation147_spill] sm:$0xff]  ;;  %v3939_v3 = vadd.f32 %v13842_v0, %v3938_v42 }
 0x6e5   :  { %4826 = vrcp.f32 %v3899_v9  ;;  %v382_v6 = vadd.f32 %v16463_v54, %v16462_v58 }
 0x6e6   :  { %v3878_v57 = vadd.f32 %v3791_v5, %v341_v53  ;;  %4828 = vrcp.f32 %v13838_v32  ;;  %v3916_v53 = vand.u32 2147483648, %v3899_v9  ;;  %v3943_v52 = vsel %vm13883_vm4, %v13842_v0, %v3939_v3 }
 0x6e8   :  { %v4613_v15 = vmul.f32 -1.442695, %v3878_v57  ;;  %v3917_v42 = vor.u32 1.1754944e-38, %v3916_v53 }
 0x6ea   :  { %v4825_v49 = vpop.eup %4824  ;;  %4830 = vpow2.f32 %v4613_v15 }
 0x6eb   :  { %v13845_v10 = vpop.eup %4826  ;;  %4832 = vrcp.f32 %v13840_v25  ;;  %v13850_v7 = vadd.f32 1.0, %v4825_v49 }
 0x6ec   :  { %v13852_v47 = vpop.eup %4828  ;;  %v3906_v46 = vmul.f32 %v13845_v10, %v3899_v9  ;;  %vm3911_vm2 = vweird.f32 %v13845_v10 }
 0x6ed   :  { %4834 = vrcp.f32 %v13850_v7  ;;  %v3951_v4 = vmul.f32 %v13852_v47, %v13838_v32  ;;  %vm13899_vm7 = vmor %vm3910_vm5, %vm3911_vm2  ;;  %vm3956_vm9 = vweird.f32 %v13852_v47  ;;  %vm3970_vm2 = vweird.f32 %v13850_v7 }
 0x6ee   :  { %v3907_v26 = vsub.f32 1.0, %v3906_v46  ;;  %v16464_v46 = vld [vmem:[#allocation160_spill] sm:$0xff]  ;;  %vm13916_vm13 = vmor %vm3955_vm11, %vm3956_vm9 }
 0x6ef   :  { %v3952_v22 = vsub.f32 1.0, %v3951_v4 }
 0x6f0   :  { %v4831_v51 = vpop.eup %4830  ;;  %v3908_v39 = vmul.f32 %v13845_v10, %v3907_v26  ;;  %v3929_v26 = vand.u32 2147483647, %v13840_v25 }
 0x6f1   :  { %v13856_v59 = vpop.eup %4832  ;;  %v13860_v14 = vadd.f32 1.0, %v4831_v51  ;;  %v3953_v15 = vmul.f32 %v13852_v47, %v3952_v22  ;;  %v16465_v51 = vld [vmem:[#allocation148_spill] sm:$0xff] }
 0x6f2   :  { %v3921_v37 = vmul.f32 %v13856_v59, %v13840_v25  ;;  %v3909_v49 = vadd.f32 %v13845_v10, %v3908_v39  ;;  %v423_v33 = vadd.f32 %v16465_v51, %v16464_v46  ;;  %v3947_v39 = vor.u32 1.1754944e-38, %v3946_v19 }
 0x6f3   :  { %v13865_v17 = vpop.eup %4834  ;;  %4836 = vrcp.f32 %v13860_v14  ;;  %vm3926_vm12 = vweird.f32 %v13856_v59  ;;  %vm3930_vm1 = vcmp.eq.f32.partialorder %v3929_v26, 8.507059e+37  ;;  %v5746_v26 = vld [vmem:[%s14463_s3 + $0x368] sm:$0xff] }
 0x6f4   :  { %v3922_v31 = vsub.f32 1.0, %v3921_v37  ;;  %v3966_v57 = vmul.f32 %v13865_v17, %v13850_v7  ;;  %v3913_v0 = vsel %vm13899_vm7, %v13845_v10, %v3909_v49  ;;  %v3948_v53 = vsel %vm3945_vm10, %v3947_v39, %v3943_v52  ;;  %vm13931_vm14 = vmor %vm3925_vm8, %vm3926_vm12  ;;  %v5741_v10 = vld [vmem:[%s14463_s3 + $0x3e0] sm:$0xff] }
 0x6f5   :  { %v3918_v49 = vsel %vm13889_vm6, %v3917_v42, %v3913_v0  ;;  %v3997_v51 = vmul.f32 %v3948_v53, %v13234_v20  ;;  %v3962_v52 = vor.u32 1.1754944e-38, %v3961_v12  ;;  %vm3971_vm0 = vweird.f32 %v13865_v17 }
 0x6f6   :  { %v3967_v54 = vsub.f32 1.0, %v3966_v57  ;;  %v3959_v57 = vand.u32 2147483647, %v13838_v32  ;;  %v3976_v39 = vand.u32 2147483648, %v13850_v7  ;;  %vm3972_vm3 = vmor %vm3970_vm2, %vm3971_vm0  ;;  %vm3985_vm6 = vweird.f32 %v13860_v14 }
 0x6f8   :  { %v3810_v35 = vpop.f32.mrf.mxu0  ;;  %vm3960_vm15 = vcmp.eq.f32.partialorder %v3959_v57, 8.507059e+37  ;;  %v3977_v12 = vor.u32 1.1754944e-38, %v3976_v39  ;;  %v5755_v39 = vld [vmem:[%s14463_s3 + $0x2a0] sm:$0xff] }
 0x6f9   :  { %v13887_v4 = vpop.eup %4836 }
 0x6fa   :  { %vm3986_vm5 = vweird.f32 %v13887_v4 }
 0x6fb   :  { %vm3987_vm7 = vmor %vm3985_vm6, %vm3986_vm5 }
 0x6fe   :  { %v3830_v61 = vpop.f32.mrf.mxu1  ;;  %v3850_v22 = vpop.f32.mrf.mxu2 }
 0x6ff   :  { %v3831_v5 = vadd.f32 %v3830_v61, %v3810_v35  ;;  %v3923_v61 = vmul.f32 %v13856_v59, %v3922_v31  ;;  %v3981_v31 = vmul.f32 %v13887_v4, %v13860_v14 }
 0x701   :  { %v3879_v13 = vadd.f32 %v3831_v5, %v382_v6  ;;  %v3954_v5 = vadd.f32 %v13852_v47, %v3953_v15  ;;  %v3924_v19 = vadd.f32 %v13856_v59, %v3923_v61  ;;  %v3968_v15 = vmul.f32 %v13865_v17, %v3967_v54 }
 0x702   :  { %v3974_v54 = vand.u32 2147483647, %v13850_v7  ;;  %v3991_v7 = vand.u32 2147483648, %v13860_v14 }
 0x703   :  { %4838 = vtanh.f32 %v3879_v13  ;;  %v3958_v32 = vsel %vm13916_vm13, %v13852_v47, %v3954_v5  ;;  %v3928_v20 = vsel %vm13931_vm14, %v13856_v59, %v3924_v19  ;;  %v3969_v42 = vadd.f32 %v13865_v17, %v3968_v15  ;;  %v5742_v15 = vld [vmem:[%s14463_s3 + $0x3e8] sm:$0xff] }
 0x704   :  { %v3870_v35 = vpop.f32.mrf.mxu3  ;;  %v3932_v47 = vor.u32 1.1754944e-38, %v3931_v60  ;;  %v3963_v61 = vsel %vm3960_vm15, %v3962_v52, %v3958_v32  ;;  %vm3975_vm4 = vcmp.eq.f32.partialorder %v3974_v54, 8.507059e+37  ;;  %v5744_v60 = vld [vmem:[%s14463_s3 + $0x3a8] sm:$0xff]  ;;  %v5747_v32 = vld [vmem:[%s14463_s3 + $0x320] sm:$0xff] }
 0x705   :  { %v3871_v6 = vadd.f32 %v3870_v35, %v3850_v22  ;;  %v3982_v22 = vsub.f32 1.0, %v3981_v31  ;;  %v3973_v5 = vsel %vm3972_vm3, %v13865_v17, %v3969_v42  ;;  %v5748_v52 = vld [vmem:[%s14463_s3 + $0x7e0] sm:$0xff]  ;;  %v5750_v35 = vld [vmem:[%s14463_s3 + $0x7e8] sm:$0xff] }
 0x706   :  { %v3933_v59 = vsel %vm3930_vm1, %v3932_v47, %v3928_v20  ;;  %v3978_v19 = vsel %vm3975_vm4, %v3977_v12, %v3973_v5  ;;  %v5751_v20 = vld [vmem:[%s14463_s3 + $0x2e0] sm:$0xff]  ;;  %v5753_v47 = vld [vmem:[%s14463_s3 + $0x2e8] sm:$0xff] }
 0x707   :  { %v3880_v3 = vadd.f32 %v3871_v6, %v423_v33  ;;  %v3983_v9 = vmul.f32 %v13887_v4, %v3982_v22  ;;  %v3998_v6 = vmul.f32 %v3963_v61, %v13248_v27  ;;  %v3989_v27 = vand.u32 2147483647, %v13860_v14  ;;  %v5749_v22 = vld [vmem:[%s14463_s3 + $0x328] sm:$0xff]  ;;  %v5752_v42 = vld [vmem:[%s14463_s3 + $0x7a0] sm:$0xff] }
 0x708   :  { %v5754_v61 = vld [vmem:[%s14463_s3 + $0x7a8] sm:$0xff]  ;;  %v5763_v12 = vld [vmem:[%s14463_s3 + $0x220] sm:$0xff] }
 0x709   :  { %v4839_v13 = vpop.eup %4838  ;;  %4840 = vtanh.f32 %v3880_v3  ;;  %v3984_v53 = vadd.f32 %v13887_v4, %v3983_v9  ;;  %vm3990_vm8 = vcmp.eq.f32.partialorder %v3989_v27, 8.507059e+37  ;;  %v5757_v54 = vld [vmem:[%s14463_s3 + $0x2a8] sm:$0xff]  ;;  %v5768_v27 = vld [vmem:[%s14463_s3 + $0x6a0] sm:$0xff] }
 0x70a   :  { %v3999_v33 = vmul.f32 %v4839_v13, %v3918_v49  ;;  %v3992_v13 = vor.u32 1.1754944e-38, %v3991_v7  ;;  %v5758_v9 = vld [vmem:[%s14463_s3 + $0x768] sm:$0xff]  ;;  %v5767_v7 = vld [vmem:[%s14463_s3 + $0x1e0] sm:$0xff] }
 0x70b   :  { %v3988_v17 = vsel %vm3987_vm7, %v13887_v4, %v3984_v53  ;;  %v5743_v4 = vld [vmem:[%s14463_s3 + $0x3a0] sm:$0xff]  ;;  %v5762_v5 = vld [vmem:[%s14463_s3 + $0x728] sm:$0xff] }
 0x70c   :  { %v13935_v37 = vadd.f32 %v3999_v33, %v3997_v51  ;;  %v3993_v49 = vsel %vm3990_vm8, %v3992_v13, %v3988_v17  ;;  %v5745_v33 = vld [vmem:[%s14463_s3 + $0x360] sm:$0xff]  ;;  %v5769_v17 = vld [vmem:[%s14463_s3 + $0x1e8] sm:$0xff] }
 0x70d   :  { %v5764_v53 = vld [vmem:[%s14463_s3 + $0x6e0] sm:$0xff]  ;;  %v5770_v13 = vld [vmem:[%s14463_s3 + $0x6a8] sm:$0xff] }
 0x70e   :  { %4842 = vtanh.f32 %v13935_v37 }
 0x70f   :  { %v4841_v25 = vpop.eup %4840 }
 0x710   :  { %v4000_v0 = vmul.f32 %v4841_v25, %v3933_v59  ;;  %v5756_v25 = vld [vmem:[%s14463_s3 + $0x760] sm:$0xff] }
 0x711   :  { %v5759_v59 = vld [vmem:[%s14463_s3 + $0x260] sm:$0xff] }
 0x712   :  { %v13949_v31 = vadd.f32 %v4000_v0, %v3998_v6  ;;  %v5760_v6 = vld [vmem:[%s14463_s3 + $0x720] sm:$0xff]  ;;  %v5761_v0 = vld [vmem:[%s14463_s3 + $0x268] sm:$0xff] }
 0x714   :  { %v4843_v3 = vpop.eup %4842  ;;  %4844 = vtanh.f32 %v13949_v31 }
 0x715   :  { %v13957_v57 = vmul.f32 %v4843_v3, %v3978_v19  ;;  %v5765_v3 = vld [vmem:[%s14463_s3 + $0x228] sm:$0xff] }
 0x716   :  { %v5766_v19 = vld [vmem:[%s14463_s3 + $0x6e8] sm:$0xff] }
 0x717   :  { %4034 = vmatmul.f32.vlgmr.msra.gmra.mxu0 %v13957_v57  ;;  %4074 = vmatmul.f32.vlgmr.msra.gmra.mxu2 %v13957_v57 }
 0x718   :  { %4178 = vmatpush.msra.mxu0 %v5741_v10  ;;  %4218 = vmatpush.msra.mxu2 %v5742_v15  ;;  %v5771_v10 = vld [vmem:[%s14463_s3 + $0x1a0] sm:$0xff] }
 0x719   :  { %v5772_v15 = vld [vmem:[%s14463_s3 + $0x660] sm:$0xff] }
 0x71a   :  { %v4845_v14 = vpop.eup %4844  ;;  %4179 = vmatpush.msra.mxu0 %v5743_v4  ;;  %4219 = vmatpush.msra.mxu2 %v5744_v60  ;;  %v5775_v4 = vld [vmem:[%s14463_s3 + $0x160] sm:$0xff] }
 0x71b   :  { %v13974_v51 = vmul.f32 %v4845_v14, %v3993_v49  ;;  %v5773_v14 = vld [vmem:[%s14463_s3 + $0x1a8] sm:$0xff]  ;;  %v5776_v60 = vld [vmem:[%s14463_s3 + $0x620] sm:$0xff] }
 0x71c   :  { %4180 = vmatpush.msra.mxu0 %v5745_v33  ;;  %4220 = vmatpush.msra.mxu2 %v5746_v26  ;;  %v5774_v49 = vld [vmem:[%s14463_s3 + $0x668] sm:$0xff] }
 0x71d   :  { %4054 = vmatmul.f32.vlgmr.msra.gmra.mxu1 %v13974_v51  ;;  %4094 = vmatmul.f32.vlgmr.msra.gmra.mxu3 %v13974_v51  ;;  %v5777_v33 = vld [vmem:[%s14463_s3 + $0x168] sm:$0xff] }
 0x71e   :  { %4181 = vmatpush.msra.mxu0 %v5747_v32  ;;  %4198 = vmatpush.msra.mxu1 %v5748_v52  ;;  %v5778_v26 = vld [vmem:[%s14463_s3 + $0x628] sm:$0xff]  ;;  %v5779_v32 = vld [vmem:[%s14463_s3 + $0x120] sm:$0xff] }
 0x71f   :  { %4221 = vmatpush.msra.mxu2 %v5749_v22  ;;  %4238 = vmatpush.msra.mxu3 %v5750_v35  ;;  %v5780_v52 = vld [vmem:[%s14463_s3 + $0x5e0] sm:$0xff]  ;;  %v5781_v22 = vld [vmem:[%s14463_s3 + $0x128] sm:$0xff] }
 0x720   :  { %4114 = vmatmul.f32.vlgmr.msrb.gmra.mxu0 %v13957_v57  ;;  %4154 = vmatmul.f32.vlgmr.msrb.gmra.mxu2 %v13957_v57  ;;  %v5782_v35 = vld [vmem:[%s14463_s3 + $0x5e8] sm:$0xff] }
 0x721   :  { %4182 = vmatpush.msra.mxu0 %v5751_v20  ;;  %4199 = vmatpush.msra.mxu1 %v5752_v42  ;;  %v5783_v20 = vld [vmem:[%s14463_s3 + $0xe0] sm:$0xff] }
 0x722   :  { %4222 = vmatpush.msra.mxu2 %v5753_v47  ;;  %4239 = vmatpush.msra.mxu3 %v5754_v61  ;;  %v5784_v42 = vld [vmem:[%s14463_s3 + $0x5a0] sm:$0xff]  ;;  %v5785_v47 = vld [vmem:[%s14463_s3 + $0xe8] sm:$0xff] }
 0x723   :  { %4183 = vmatpush.msra.mxu0 %v5755_v39  ;;  %4200 = vmatpush.msra.mxu1 %v5756_v25  ;;  %v5786_v61 = vld [vmem:[%s14463_s3 + $0x5a8] sm:$0xff]  ;;  %v5787_v39 = vld [vmem:[%s14463_s3 + $0xa0] sm:$0xff] }
 0x724   :  { %4223 = vmatpush.msra.mxu2 %v5757_v54  ;;  %4240 = vmatpush.msra.mxu3 %v5758_v9  ;;  %v5788_v25 = vld [vmem:[%s14463_s3 + $0x560] sm:$0xff]  ;;  %v5789_v54 = vld [vmem:[%s14463_s3 + $0xa8] sm:$0xff] }
 0x725   :  { %4184 = vmatpush.msra.mxu0 %v5759_v59  ;;  %4201 = vmatpush.msra.mxu1 %v5760_v6  ;;  %v5790_v9 = vld [vmem:[%s14463_s3 + $0x568] sm:$0xff]  ;;  %v5791_v59 = vld [vmem:[%s14463_s3 + $0x60] sm:$0xff] }
 0x726   :  { %4224 = vmatpush.msra.mxu2 %v5761_v0  ;;  %4241 = vmatpush.msra.mxu3 %v5762_v5  ;;  %v5792_v6 = vld [vmem:[%s14463_s3 + $0x520] sm:$0xff]  ;;  %v5793_v0 = vld [vmem:[%s14463_s3 + $0x68] sm:$0xff] }
 0x727   :  { %4134 = vmatmul.f32.vlgmr.msrb.gmra.mxu1 %v13974_v51  ;;  %4174 = vmatmul.f32.vlgmr.msrb.gmra.mxu3 %v13974_v51  ;;  %v5794_v5 = vld [vmem:[%s14463_s3 + $0x528] sm:$0xff] }
 0x728   :  { %4185 = vmatpush.msra.mxu0 %v5763_v12  ;;  %4202 = vmatpush.msra.mxu1 %v5764_v53  ;;  %v5795_v12 = vld [vmem:[%s14463_s3 + $0x20] sm:$0xff] }
 0x729   :  { %4225 = vmatpush.msra.mxu2 %v5765_v3  ;;  %4242 = vmatpush.msra.mxu3 %v5766_v19  ;;  %v5796_v53 = vld [vmem:[%s14463_s3 + $0x4e0] sm:$0xff]  ;;  %v5797_v3 = vld [vmem:[%s14463_s3 + $0x28] sm:$0xff] }
 0x72a   :  { %4186 = vmatpush.msra.mxu0 %v5767_v7  ;;  %4203 = vmatpush.msra.mxu1 %v5768_v27  ;;  %v5798_v19 = vld [vmem:[%s14463_s3 + $0x4e8] sm:$0xff]  ;;  %v5799_v7 = vld [vmem:[%s14463_s3 + $0x3f0] sm:$0xff]  ;;  %v5800_v27 = vld [vmem:[%s14463_s3 + $0x3f8] sm:$0xff] }
 0x72b   :  { %4226 = vmatpush.msra.mxu2 %v5769_v17  ;;  %4243 = vmatpush.msra.mxu3 %v5770_v13  ;;  %v5801_v17 = vld [vmem:[%s14463_s3 + $0x4a0] sm:$0xff]  ;;  %v5802_v13 = vld [vmem:[%s14463_s3 + $0x4a8] sm:$0xff] }
 0x72c   :  { %4187 = vmatpush.msra.mxu0 %v5771_v10  ;;  %4204 = vmatpush.msra.mxu1 %v5772_v15  ;;  %v5803_v10 = vld [vmem:[%s14463_s3 + $0x3b0] sm:$0xff]  ;;  %v5804_v15 = vld [vmem:[%s14463_s3 + $0x3b8] sm:$0xff] }
 0x72d   :  { %4227 = vmatpush.msra.mxu2 %v5773_v14  ;;  %4244 = vmatpush.msra.mxu3 %v5774_v49  ;;  %v5805_v14 = vld [vmem:[%s14463_s3 + $0x460] sm:$0xff]  ;;  %v5806_v49 = vld [vmem:[%s14463_s3 + $0x468] sm:$0xff] }
 0x72e   :  { %4188 = vmatpush.msra.mxu0 %v5775_v4  ;;  %4205 = vmatpush.msra.mxu1 %v5776_v60  ;;  %v5807_v4 = vld [vmem:[%s14463_s3 + $0x370] sm:$0xff]  ;;  %v5808_v60 = vld [vmem:[%s14463_s3 + $0x378] sm:$0xff] }
 0x72f   :  { %4228 = vmatpush.msra.mxu2 %v5777_v33  ;;  %4245 = vmatpush.msra.mxu3 %v5778_v26  ;;  %v5809_v33 = vld [vmem:[%s14463_s3 + $0x420] sm:$0xff]  ;;  %v5810_v26 = vld [vmem:[%s14463_s3 + $0x428] sm:$0xff] }
 0x730   :  { %4189 = vmatpush.msra.mxu0 %v5779_v32  ;;  %4206 = vmatpush.msra.mxu1 %v5780_v52  ;;  %v5811_v32 = vld [vmem:[%s14463_s3 + $0x330] sm:$0xff] }
 0x731   :  { %4229 = vmatpush.msra.mxu2 %v5781_v22  ;;  %4246 = vmatpush.msra.mxu3 %v5782_v35  ;;  %v5812_v52 = vld [vmem:[%s14463_s3 + $0x7f0] sm:$0xff]  ;;  %v5813_v22 = vld [vmem:[%s14463_s3 + $0x338] sm:$0xff] }
 0x732   :  { %4190 = vmatpush.msra.mxu0 %v5783_v20  ;;  %4207 = vmatpush.msra.mxu1 %v5784_v42  ;;  %v5814_v35 = vld [vmem:[%s14463_s3 + $0x7f8] sm:$0xff]  ;;  %v5815_v20 = vld [vmem:[%s14463_s3 + $0x2f0] sm:$0xff] }
 0x733   :  { %4230 = vmatpush.msra.mxu2 %v5785_v47  ;;  %4247 = vmatpush.msra.mxu3 %v5786_v61  ;;  %v5816_v42 = vld [vmem:[%s14463_s3 + $0x7b0] sm:$0xff]  ;;  %v5817_v47 = vld [vmem:[%s14463_s3 + $0x2f8] sm:$0xff] }
 0x734   :  { %4191 = vmatpush.msra.mxu0 %v5787_v39  ;;  %4208 = vmatpush.msra.mxu1 %v5788_v25  ;;  %v5818_v61 = vld [vmem:[%s14463_s3 + $0x7b8] sm:$0xff]  ;;  %v5819_v39 = vld [vmem:[%s14463_s3 + $0x2b0] sm:$0xff] }
 0x735   :  { %4231 = vmatpush.msra.mxu2 %v5789_v54  ;;  %4248 = vmatpush.msra.mxu3 %v5790_v9  ;;  %v5820_v25 = vld [vmem:[%s14463_s3 + $0x770] sm:$0xff]  ;;  %v5821_v54 = vld [vmem:[%s14463_s3 + $0x2b8] sm:$0xff] }
 0x736   :  { %4192 = vmatpush.msra.mxu0 %v5791_v59  ;;  %4209 = vmatpush.msra.mxu1 %v5792_v6  ;;  %v5822_v9 = vld [vmem:[%s14463_s3 + $0x778] sm:$0xff]  ;;  %v5823_v59 = vld [vmem:[%s14463_s3 + $0x270] sm:$0xff] }
 0x737   :  { %4232 = vmatpush.msra.mxu2 %v5793_v0  ;;  %4249 = vmatpush.msra.mxu3 %v5794_v5  ;;  %v5824_v6 = vld [vmem:[%s14463_s3 + $0x730] sm:$0xff]  ;;  %v5825_v0 = vld [vmem:[%s14463_s3 + $0x278] sm:$0xff] }
 0x738   :  { %4193 = vmatpush.msra.mxu0 %v5795_v12  ;;  %4210 = vmatpush.msra.mxu1 %v5796_v53  ;;  %v5826_v5 = vld [vmem:[%s14463_s3 + $0x738] sm:$0xff]  ;;  %v5827_v12 = vld [vmem:[%s14463_s3 + $0x230] sm:$0xff] }
 0x739   :  { %4233 = vmatpush.msra.mxu2 %v5797_v3  ;;  %4250 = vmatpush.msra.mxu3 %v5798_v19  ;;  %v5828_v53 = vld [vmem:[%s14463_s3 + $0x6f0] sm:$0xff]  ;;  %v5829_v3 = vld [vmem:[%s14463_s3 + $0x238] sm:$0xff] }
 0x73a   :  { %4194 = vmatmul.f32.vlgmr.msra.gmra.mxu0 %v13957_v57  ;;  %4234 = vmatmul.f32.vlgmr.msra.gmra.mxu2 %v13957_v57  ;;  %v5830_v19 = vld [vmem:[%s14463_s3 + $0x6f8] sm:$0xff] }
 0x73b   :  { %4258 = vmatpush.msrb.mxu0 %v5799_v7  ;;  %4298 = vmatpush.msrb.mxu2 %v5800_v27  ;;  %v5831_v7 = vld [vmem:[%s14463_s3 + $0x1f0] sm:$0xff] }
 0x73c   :  { %4211 = vmatpush.msra.mxu1 %v5801_v17  ;;  %4251 = vmatpush.msra.mxu3 %v5802_v13  ;;  %v5832_v27 = vld [vmem:[%s14463_s3 + $0x6b0] sm:$0xff]  ;;  %v5833_v17 = vld [vmem:[%s14463_s3 + $0x1f8] sm:$0xff] }
 0x73d   :  { %4259 = vmatpush.msrb.mxu0 %v5803_v10  ;;  %4299 = vmatpush.msrb.mxu2 %v5804_v15  ;;  %v5834_v13 = vld [vmem:[%s14463_s3 + $0x6b8] sm:$0xff]  ;;  %v5835_v10 = vld [vmem:[%s14463_s3 + $0x1b0] sm:$0xff] }
 0x73e   :  { %4212 = vmatpush.msra.mxu1 %v5805_v14  ;;  %4252 = vmatpush.msra.mxu3 %v5806_v49  ;;  %v5836_v15 = vld [vmem:[%s14463_s3 + $0x670] sm:$0xff]  ;;  %v5837_v14 = vld [vmem:[%s14463_s3 + $0x678] sm:$0xff] }
 0x73f   :  { %4260 = vmatpush.msrb.mxu0 %v5807_v4  ;;  %4300 = vmatpush.msrb.mxu2 %v5808_v60  ;;  %v5838_v49 = vld [vmem:[%s14463_s3 + $0x630] sm:$0xff]  ;;  %v5839_v4 = vld [vmem:[%s14463_s3 + $0x638] sm:$0xff] }
 0x740   :  { %4213 = vmatpush.msra.mxu1 %v5809_v33  ;;  %4253 = vmatpush.msra.mxu3 %v5810_v26 }
 0x741   :  { %4214 = vmatmul.f32.vlgmr.msra.gmra.mxu1 %v13974_v51  ;;  %4254 = vmatmul.f32.vlgmr.msra.gmra.mxu3 %v13974_v51 }
 0x742   :  { %4261 = vmatpush.msrb.mxu0 %v5811_v32  ;;  %4278 = vmatpush.msrb.mxu1 %v5812_v52 }
 0x743   :  { %4301 = vmatpush.msrb.mxu2 %v5813_v22  ;;  %4318 = vmatpush.msrb.mxu3 %v5814_v35 }
 0x744   :  { %4262 = vmatpush.msrb.mxu0 %v5815_v20  ;;  %4279 = vmatpush.msrb.mxu1 %v5816_v42 }
 0x745   :  { %4302 = vmatpush.msrb.mxu2 %v5817_v47  ;;  %4319 = vmatpush.msrb.mxu3 %v5818_v61  ;;  %v16479_v47 = vld [vmem:[#allocation31_spill] sm:$0xff] }
 0x746   :  { %4263 = vmatpush.msrb.mxu0 %v5819_v39  ;;  %4280 = vmatpush.msrb.mxu1 %v5820_v25  ;;  %v180_v61 = vadd.f32 %v16479_v47, %v16456_v62 }
 0x747   :  { %4303 = vmatpush.msrb.mxu2 %v5821_v54  ;;  %4320 = vmatpush.msrb.mxu3 %v5822_v9 }
 0x748   :  { %4264 = vmatpush.msrb.mxu0 %v5823_v59  ;;  %4281 = vmatpush.msrb.mxu1 %v5824_v6 }
 0x749   :  { %4304 = vmatpush.msrb.mxu2 %v5825_v0  ;;  %4321 = vmatpush.msrb.mxu3 %v5826_v5 }
 0x74a   :  { %4265 = vmatpush.msrb.mxu0 %v5827_v12  ;;  %4282 = vmatpush.msrb.mxu1 %v5828_v53 }
 0x74b   :  { %4305 = vmatpush.msrb.mxu2 %v5829_v3  ;;  %4322 = vmatpush.msrb.mxu3 %v5830_v19 }
 0x74c   :  { %4266 = vmatpush.msrb.mxu0 %v5831_v7  ;;  %4283 = vmatpush.msrb.mxu1 %v5832_v27  ;;  %v16481_v7 = vld [vmem:[#allocation150_spill] sm:$0xff] }
 0x74d   :  { %4306 = vmatpush.msrb.mxu2 %v5833_v17  ;;  %4323 = vmatpush.msrb.mxu3 %v5834_v13  ;;  %v344_v27 = vadd.f32 %v16481_v7, %v16460_v34 }
 0x74e   :  { %4267 = vmatpush.msrb.mxu0 %v5835_v10  ;;  %4284 = vmatpush.msrb.mxu1 %v5836_v15 }
 0x74f   :  { %4307 = vmatpush.msrb.mxu2 %v13372_v40  ;;  %4324 = vmatpush.msrb.mxu3 %v5837_v14  ;;  %v5840_v40 = vld [vmem:[%s14463_s3 + $0x5f0] sm:$0xff] }
 0x750   :  { %4268 = vmatpush.msrb.mxu0 %v13379_v21  ;;  %4285 = vmatpush.msrb.mxu1 %v5838_v49  ;;  %v5841_v21 = vld [vmem:[%s14463_s3 + $0x5f8] sm:$0xff] }
 0x751   :  { %4308 = vmatpush.msrb.mxu2 %v13386_v1  ;;  %4325 = vmatpush.msrb.mxu3 %v5839_v4  ;;  %v5842_v1 = vld [vmem:[%s14463_s3 + $0x5b0] sm:$0xff] }
 0x752   :  { %4269 = vmatpush.msrb.mxu0 %v13393_v44  ;;  %4286 = vmatpush.msrb.mxu1 %v5840_v40  ;;  %v5843_v44 = vld [vmem:[%s14463_s3 + $0x5b8] sm:$0xff] }
 0x753   :  { %4309 = vmatpush.msrb.mxu2 %v13400_v16  ;;  %4326 = vmatpush.msrb.mxu3 %v5841_v21  ;;  %v5844_v16 = vld [vmem:[%s14463_s3 + $0x570] sm:$0xff] }
 0x754   :  { %4270 = vmatpush.msrb.mxu0 %v13407_v56  ;;  %4287 = vmatpush.msrb.mxu1 %v5842_v1  ;;  %v5845_v56 = vld [vmem:[%s14463_s3 + $0x578] sm:$0xff] }
 0x755   :  { %4310 = vmatpush.msrb.mxu2 %v13414_v38  ;;  %4327 = vmatpush.msrb.mxu3 %v5843_v44  ;;  %v5846_v38 = vld [vmem:[%s14463_s3 + $0x530] sm:$0xff] }
 0x756   :  { %4271 = vmatpush.msrb.mxu0 %v13421_v11  ;;  %4288 = vmatpush.msrb.mxu1 %v5844_v16  ;;  %v5847_v11 = vld [vmem:[%s14463_s3 + $0x538] sm:$0xff] }
 0x757   :  { %4311 = vmatpush.msrb.mxu2 %v13428_v63  ;;  %4328 = vmatpush.msrb.mxu3 %v5845_v56  ;;  %v5848_v63 = vld [vmem:[%s14463_s3 + $0x4f0] sm:$0xff] }
 0x758   :  { %4272 = vmatpush.msrb.mxu0 %v13435_v29  ;;  %4289 = vmatpush.msrb.mxu1 %v5846_v38 }
 0x759   :  { %4312 = vmatpush.msrb.mxu2 %v13442_v45  ;;  %4329 = vmatpush.msrb.mxu3 %v5847_v11 }
 0x75a   :  { %4273 = vmatpush.msrb.mxu0 %v13449_v23  ;;  %4290 = vmatpush.msrb.mxu1 %v5848_v63 }
 0x75b   :  { %4313 = vmatpush.msrb.mxu2 %v13456_v2  ;;  %4330 = vmatpush.msrb.mxu3 %v13462_v8 }
 0x75c   :  { %4274 = vmatmul.f32.vlgmr.msrb.gmra.mxu0 %v13957_v57  ;;  %4314 = vmatmul.f32.vlgmr.msrb.gmra.mxu2 %v13957_v57 }
 0x75d   :  { %4291 = vmatpush.msrb.mxu1 %v13470_v41  ;;  %4331 = vmatpush.msrb.mxu3 %v13476_v28  ;;  %v16476_v28 = vld [vmem:[#allocation32_spill] sm:$0xff] }
 0x75f   :  { %4292 = vmatpush.msrb.mxu1 %v13488_v55  ;;  %4332 = vmatpush.msrb.mxu3 %v13494_v24  ;;  %v221_v55 = vadd.f32 %v16476_v28, %v16450_v36 }
 0x761   :  { %4293 = vmatpush.msrb.mxu1 %v13506_v50  ;;  %4333 = vmatpush.msrb.mxu3 %v13512_v43  ;;  %v16477_v50 = vld [vmem:[#allocation30_spill] sm:$0xff] }
 0x762   :  { %4294 = vmatmul.f32.vlgmr.msrb.gmra.mxu1 %v13974_v51  ;;  %4334 = vmatmul.f32.vlgmr.msrb.gmra.mxu3 %v13974_v51  ;;  %v139_v43 = vadd.f32 %v16477_v50, %v16452_v18  ;;  %v16478_v51 = vld [vmem:[#allocation33_spill] sm:$0xff] }
 0x763   :  { %v262_v22 = vadd.f32 %v16478_v51, %v16454_v30  ;;  %v16480_v18 = vld [vmem:[#allocation149_spill] sm:$0xff] }
 0x764   :  { %v303_v6 = vadd.f32 %v16480_v18, %v16458_v48 }
 0x794   :  { %v4035_v45 = vpop.f32.mrf.mxu0 }
 0x79a   :  { %v4055_v29 = vpop.f32.mrf.mxu1  ;;  %v4075_v2 = vpop.f32.mrf.mxu2 }
 0x79b   :  { %v4056_v60 = vadd.f32 %v4055_v29, %v4035_v45 }
 0x79d   :  { %v4115_v41 = vpop.f32.mrf.mxu0  ;;  %v4338_v52 = vadd.f32 %v4056_v60, %v139_v43 }
 0x79f   :  { %v4614_v39 = vmul.f32 -1.442695, %v4338_v52 }
 0x7a0   :  { %v4095_v23 = vpop.f32.mrf.mxu3 }
 0x7a1   :  { %v4096_v20 = vadd.f32 %v4095_v23, %v4075_v2 }
 0x7a3   :  { %v4155_v26 = vpop.f32.mrf.mxu2  ;;  %v4339_v25 = vadd.f32 %v4096_v20, %v180_v61  ;;  %v16483_v61 = vld [vmem:[#allocation152_spill] sm:$0xff] }
 0x7a4   :  { %v4135_v8 = vpop.f32.mrf.mxu1 }
 0x7a5   :  { %v4136_v57 = vadd.f32 %v4135_v8, %v4115_v41  ;;  %v4615_v0 = vmul.f32 -1.442695, %v4339_v25 }
 0x7a7   :  { %v4340_v33 = vadd.f32 %v4136_v57, %v221_v55 }
 0x7a9   :  { %v4616_v35 = vmul.f32 -1.442695, %v4340_v33 }
 0x7aa   :  { %v4175_v24 = vpop.f32.mrf.mxu3 }
 0x7ab   :  { %v4176_v32 = vadd.f32 %v4175_v24, %v4155_v26  ;;  %4846 = vpow2.f32 %v4616_v35  ;;  %v16482_v24 = vld [vmem:[#allocation151_spill] sm:$0xff] }
 0x7ac   :  { %4848 = vpow2.f32 %v4614_v39  ;;  %v385_v33 = vadd.f32 %v16482_v24, %v16462_v58  ;;  %v11_v58 = vstv %s14465_s5  ;;  %v426_v39 = vadd.f32 %v16483_v61, %v16464_v46 }
 0x7ad   :  { %v4341_v42 = vadd.f32 %v4176_v32, %v262_v22  ;;  %12 = vst [vmem:[#allocation5] sm:$0x1] %v11_v58 }
 0x7af   :  { %v4617_v9 = vmul.f32 -1.442695, %v4341_v42 }
 0x7b1   :  { %v4847_v5 = vpop.eup %4846  ;;  %4850 = vpow2.f32 %v4617_v9 }
 0x7b2   :  { %v4849_v19 = vpop.eup %4848  ;;  %4852 = vpow2.f32 %v4615_v0  ;;  %v14332_v62 = vadd.f32 1.0, %v4847_v5 }
 0x7b3   :  { %v14336_v10 = vadd.f32 1.0, %v4849_v19 }
 0x7b4   :  { %4854 = vrcp.f32 %v14332_v62  ;;  %v4411_v51 = vand.u32 2147483648, %v14332_v62  ;;  %vm4405_vm11 = vweird.f32 %v14332_v62  ;;  %v4409_v47 = vand.u32 2147483647, %v14332_v62 }
 0x7b5   :  { %v4379_v43 = vand.u32 2147483647, %v14336_v10  ;;  %v4381_v26 = vand.u32 2147483648, %v14336_v10  ;;  %vm4375_vm13 = vweird.f32 %v14336_v10 }
 0x7b6   :  { %v4412_v0 = vor.u32 1.1754944e-38, %v4411_v51  ;;  %vm4410_vm2 = vcmp.eq.f32.partialorder %v4409_v47, 8.507059e+37 }
 0x7b7   :  { %v4195_v54 = vpop.f32.mrf.mxu0  ;;  %v4851_v13 = vpop.eup %4850  ;;  %vm14398_vm14 = vcmp.eq.f32.partialorder %v4379_v43, 8.507059e+37  ;;  %v4382_v9 = vor.u32 1.1754944e-38, %v4381_v26 }
 0x7b8   :  { %v4853_v48 = vpop.eup %4852  ;;  %v14339_v14 = vadd.f32 1.0, %v4851_v13 }
 0x7b9   :  { %v14342_v4 = vadd.f32 1.0, %v4853_v48 }
 0x7ba   :  { %v14344_v40 = vpop.eup %4854  ;;  %v4426_v19 = vand.u32 2147483648, %v14339_v14  ;;  %vm4420_vm3 = vweird.f32 %v14339_v14  ;;  %v4424_v13 = vand.u32 2147483647, %v14339_v14 }
 0x7bb   :  { %v4401_v1 = vmul.f32 %v14344_v40, %v14332_v62  ;;  %vm4406_vm9 = vweird.f32 %v14344_v40  ;;  %vm4390_vm0 = vweird.f32 %v14342_v4 }
 0x7bc   :  { %vm14391_vm12 = vmor %vm4405_vm11, %vm4406_vm9  ;;  %vm4425_vm7 = vcmp.eq.f32.partialorder %v4424_v13, 8.507059e+37 }
 0x7bd   :  { %v4235_v53 = vpop.f32.mrf.mxu2  ;;  %v4402_v11 = vsub.f32 1.0, %v4401_v1 }
 0x7be   :  { %v4215_v36 = vpop.f32.mrf.mxu1 }
 0x7bf   :  { %v4216_v59 = vadd.f32 %v4215_v36, %v4195_v54  ;;  %v4403_v8 = vmul.f32 %v14344_v40, %v4402_v11 }
 0x7c1   :  { %v4342_v30 = vadd.f32 %v4216_v59, %v303_v6  ;;  %v4404_v52 = vadd.f32 %v14344_v40, %v4403_v8 }
 0x7c3   :  { %v4618_v17 = vmul.f32 -1.442695, %v4342_v30  ;;  %v4408_v46 = vsel %vm14391_vm12, %v14344_v40, %v4404_v52 }
 0x7c4   :  { %v4255_v12 = vpop.f32.mrf.mxu3  ;;  %v4413_v7 = vsel %vm4410_vm2, %v4412_v0, %v4408_v46 }
 0x7c5   :  { %v4256_v3 = vadd.f32 %v4255_v12, %v4235_v53  ;;  %4856 = vpow2.f32 %v4618_v17  ;;  %v4462_v1 = vmul.f32 %v4413_v7, %v13935_v37 }
 0x7c6   :  { %4858 = vrcp.f32 %v14336_v10 }
 0x7c7   :  { %v4343_v15 = vadd.f32 %v4256_v3, %v344_v27  ;;  %4860 = vrcp.f32 %v14339_v14 }
 0x7c9   :  { %v4619_v49 = vmul.f32 -1.442695, %v4343_v15 }
 0x7cb   :  { %v4857_v34 = vpop.eup %4856  ;;  %4862 = vpow2.f32 %v4619_v49  ;;  %v4396_v49 = vand.u32 2147483648, %v14342_v4 }
 0x7cc   :  { %v14347_v21 = vpop.eup %4858  ;;  %4864 = vrcp.f32 %v14342_v4  ;;  %v14352_v44 = vadd.f32 1.0, %v4857_v34 }
 0x7cd   :  { %v14354_v16 = vpop.eup %4860  ;;  %v4371_v56 = vmul.f32 %v14347_v21, %v14336_v10  ;;  %vm4376_vm10 = vweird.f32 %v14347_v21 }
 0x7ce   :  { %4866 = vrcp.f32 %v14352_v44  ;;  %v4416_v45 = vmul.f32 %v14354_v16, %v14339_v14  ;;  %vm14408_vm15 = vmor %vm4375_vm13, %vm4376_vm10  ;;  %vm4421_vm1 = vweird.f32 %v14354_v16  ;;  %vm4435_vm10 = vweird.f32 %v14352_v44 }
 0x7cf   :  { %v4372_v29 = vsub.f32 1.0, %v4371_v56  ;;  %vm14425_vm5 = vmor %vm4420_vm3, %vm4421_vm1  ;;  %v4427_v56 = vor.u32 1.1754944e-38, %v4426_v19  ;;  %vm4495_vm1 = vcmask 7168  }
 0x7d0   :  { %v4417_v57 = vsub.f32 1.0, %v4416_v45  ;;  %v4397_v45 = vor.u32 1.1754944e-38, %v4396_v49 }
 0x7d1   :  { %v4863_v38 = vpop.eup %4862  ;;  %v4373_v60 = vmul.f32 %v14347_v21, %v4372_v29 }
 0x7d2   :  { %v14359_v63 = vpop.eup %4864  ;;  %v14363_v23 = vadd.f32 1.0, %v4863_v38  ;;  %v4418_v20 = vmul.f32 %v14354_v16, %v4417_v57 }
 0x7d3   :  { %v4386_v2 = vmul.f32 %v14359_v63, %v14342_v4  ;;  %v4374_v42 = vadd.f32 %v14347_v21, %v4373_v60  ;;  %vm4391_vm4 = vweird.f32 %v14359_v63 }
 0x7d4   :  { %v14368_v41 = vpop.eup %4866  ;;  %4868 = vrcp.f32 %v14363_v23  ;;  %v4419_v3 = vadd.f32 %v14354_v16, %v4418_v20  ;;  %vm4392_vm6 = vmor %vm4390_vm0, %vm4391_vm4 }
 0x7d5   :  { %v4387_v32 = vsub.f32 1.0, %v4386_v2  ;;  %v4431_v35 = vmul.f32 %v14368_v41, %v14352_v44  ;;  %v4378_v53 = vsel %vm14408_vm15, %v14347_v21, %v4374_v42  ;;  %v4394_v21 = vand.u32 2147483647, %v14342_v4 }
 0x7d6   :  { %v4383_v48 = vsel %vm14398_vm14, %v4382_v9, %v4378_v53  ;;  %v4423_v14 = vsel %vm14425_vm5, %v14354_v16, %v4419_v3  ;;  %vm4436_vm8 = vweird.f32 %v14368_v41  ;;  %v4441_v16 = vand.u32 2147483648, %v14352_v44 }
 0x7d7   :  { %v4388_v6 = vmul.f32 %v14359_v63, %v4387_v32  ;;  %v4432_v12 = vsub.f32 1.0, %v4431_v35  ;;  %v4428_v2 = vsel %vm4425_vm7, %v4427_v56, %v4423_v14  ;;  %vm4395_vm9 = vcmp.eq.f32.partialorder %v4394_v21, 8.507059e+37  ;;  %vm4437_vm11 = vmor %vm4435_vm10, %vm4436_vm8 }
 0x7d8   :  { %v4439_v4 = vand.u32 2147483647, %v14352_v44  ;;  %v4442_v24 = vor.u32 1.1754944e-38, %v4441_v16  ;;  %v4456_v32 = vand.u32 2147483648, %v14363_v23  ;;  %vm4450_vm14 = vweird.f32 %v14363_v23 }
 0x7d9   :  { %v4275_v28 = vpop.f32.mrf.mxu0  ;;  %v4389_v17 = vadd.f32 %v14359_v63, %v4388_v6  ;;  %v4433_v40 = vmul.f32 %v14368_v41, %v4432_v12  ;;  %v4454_v44 = vand.u32 2147483647, %v14363_v23 }
 0x7da   :  { %v14396_v25 = vpop.eup %4868  ;;  %vm4440_vm12 = vcmp.eq.f32.partialorder %v4439_v4, 8.507059e+37  ;;  %v4457_v51 = vor.u32 1.1754944e-38, %v4456_v32 }
 0x7db   :  { %v4446_v27 = vmul.f32 %v14396_v25, %v14363_v23  ;;  %v4393_v11 = vsel %vm4392_vm6, %v14359_v63, %v4389_v17  ;;  %v4434_v8 = vadd.f32 %v14368_v41, %v4433_v40  ;;  %vm4451_vm13 = vweird.f32 %v14396_v25  ;;  %v4621_v23 = vld [vmem:[#allocation5] ss:$0 sm:$0xff] }
 0x7dc   :  { %v4398_v57 = vsel %vm4395_vm9, %v4397_v45, %v4393_v11  ;;  %vm4452_vm15 = vmor %vm4450_vm14, %vm4451_vm13  ;;  %vm4455_vm0 = vcmp.eq.f32.partialorder %v4454_v44, 8.507059e+37 }
 0x7dd   :  { %v4447_v38 = vsub.f32 1.0, %v4446_v27  ;;  %v4438_v60 = vsel %vm4437_vm11, %v14368_v41, %v4434_v8 }
 0x7de   :  { %v4443_v26 = vsel %vm4440_vm12, %v4442_v24, %v4438_v60 }
 0x7df   :  { %v4295_v55 = vpop.f32.mrf.mxu1  ;;  %v4315_v59 = vpop.f32.mrf.mxu2  ;;  %v4448_v63 = vmul.f32 %v14396_v25, %v4447_v38 }
 0x7e0   :  { %v4296_v50 = vadd.f32 %v4295_v55, %v4275_v28  ;;  %v4463_v55 = vmul.f32 %v4428_v2, %v13949_v31  ;;  %v4479_v31 = vld [vmem:[%s14466_s4] sm:$0x3] }
 0x7e1   :  { %v4482_v35 = vperm.slane %v4479_v31, 1 }
 0x7e2   :  { %v4344_v22 = vadd.f32 %v4296_v50, %v385_v33  ;;  %v4449_v50 = vadd.f32 %v14396_v25, %v4448_v63 }
 0x7e4   :  { %4870 = vtanh.f32 %v4344_v22  ;;  %v4453_v41 = vsel %vm4452_vm15, %v14396_v25, %v4449_v50  ;;  %v4481_v22 = vperm.slane %v4479_v31, 0 }
 0x7e5   :  { %v4335_v18 = vpop.f32.mrf.mxu3  ;;  %v4458_v20 = vsel %vm4455_vm0, %v4457_v51, %v4453_v41 }
 0x7e6   :  { %v4336_v30 = vadd.f32 %v4335_v18, %v4315_v59 }
 0x7e8   :  { %v4345_v62 = vadd.f32 %v4336_v30, %v426_v39 }
 0x7ea   :  { %v4871_v10 = vpop.eup %4870  ;;  %4872 = vtanh.f32 %v4345_v62 }
 0x7eb   :  { %v4464_v34 = vmul.f32 %v4871_v10, %v4383_v48 }
 0x7ed   :  { %v4466_v29 = vadd.f32 %v4464_v34, %v4462_v1 }
 0x7ef   :  { %4874 = vtanh.f32 %v4466_v29 }
 0x7f0   :  { %v4873_v37 = vpop.eup %4872 }
 0x7f1   :  { %v4465_v28 = vmul.f32 %v4873_v37, %v4398_v57 }
 0x7f3   :  { %v4467_v33 = vadd.f32 %v4465_v28, %v4463_v55 }
 0x7f5   :  { %v4875_v43 = vpop.eup %4874  ;;  %4876 = vtanh.f32 %v4467_v33 }
 0x7f6   :  { %v4470_v52 = vmul.f32 %v4875_v43, %v4443_v26 }
 0x7f8   :  { %v4485_v47 = vmul.f32 %v4481_v22, %v4470_v52 }
 0x7fb   :  { %v4877_v58 = vpop.eup %4876 }
 0x7fc   :  { %v4471_v42 = vmul.f32 %v4877_v58, %v4458_v20 }
 0x7fe   :  { %v4486_v61 = vmul.f32 %v4482_v35, %v4471_v42 }
 0x800   :  { %v4487_v39 = vadd.f32 %v4486_v61, %v4485_v47 }
 0x802   :  { %4488 = vadd.xlane.f32.xlu0 %v4487_v39 }
 0x875   :  { %v4489_v36 = vpop.xlane.xlu0 %4488 }
 0x876   :  { %v4494_v54 = vadd.f32 %v4621_v23, %v4489_v36 }
 0x878   :  { %4496 = vst.msk [vmem:[%s14467_s6] sm:$0xff] %vm4495_vm1, %v4494_v54 }

</bundles_post_ra>
